<compile_context>
chip_gen: v6e
topology: v6e:2x2x1
jax: 0.10.0
libtpu: 0.0.40
codegen_flags: <defaults>
</compile_context>

<pallas_src>
import jax
import jax.numpy as jnp
from jax.experimental import pallas as pl
from jax.experimental.pallas import tpu as pltpu

_LANE = 128


def _round_up(x, m):
    return (x + m - 1) // m * m


def _rnn_seq_kernel(xs_ref, h0_ref, wix_ref, wih_ref, bi_ref, wo_ref, bo_ref,
                    outs_ref, hT_ref, hs_ref):
    # xs:   (T, B, obs_dim)   all observations (read once)
    # h0:   (B, Hp)           padded initial hidden state
    # wix:  (obs_dim, Hp)     x-part of i2h weight (pre-transposed, padded)
    # wih:  (Hp, Hp)          h-part of i2h weight (pre-transposed, padded)
    # bi:   (1, Hp)           i2h bias (padded)
    # wo:   (Hp, Op)          h2o weight (pre-transposed, padded)
    # bo:   (1, Op)           h2o bias (padded)
    # outs: (T, B, Op)        all per-step outputs (one lane-dense slab store)
    # hT:   (B, Hp)           final hidden state
    # hs:   (T, B, Hp)        VMEM scratch: holds xb[t] = x_t@Wx + b_i2h,
    #                         then overwritten in place with h_t per step.
    T, B, obs_dim = xs_ref.shape
    HP = hs_ref.shape[-1]
    hi = jax.lax.Precision.HIGHEST

    # ---- pre-pass (off the serial chain): xb[t] = x_t @ Wx + b_i2h -------
    x = xs_ref[...]                                       # (T, B, obs_dim)
    xb = jnp.zeros((T, B, HP), jnp.float32) + bi_ref[...]
    for i in range(obs_dim):                              # obs_dim=2: 2 VPU FMAs
        xb = xb + x[:, :, i:i + 1] * wix_ref[i, :]
    hs_ref[...] = xb

    # ---- serial recurrence: one MXU push + one tanh + one add per step ---
    wih = wih_ref[...]                                    # resident for the loop
    h = h0_ref[...]
    for t in range(T):                                    # static -> fully unrolled
        pre = hs_ref[t] + jnp.dot(h, wih,
                                  preferred_element_type=jnp.float32,
                                  precision=hi)
        h = jnp.tanh(pre)
        hs_ref[t] = h                                     # stash for batched h2o

    # ---- post-pass: single batched h2o projection over all T steps -------
    hs = hs_ref[...].reshape(T * B, HP)                   # (128, 128) at defaults
    out = jnp.dot(hs, wo_ref[...],
                  preferred_element_type=jnp.float32, precision=hi) + bo_ref[...]
    outs_ref[...] = out.reshape(T, B, -1).astype(outs_ref.dtype)
    hT_ref[...] = h


def prepare_recognition_rnn_params(w_i2h, b_i2h, w_h2o, b_h2o, obs_dim):
    """One-time glue: transpose / split / lane-pad the PyTorch-layout params.

    w_i2h: (nhidden, obs_dim + nhidden), b_i2h: (nhidden,)
    w_h2o: (2*latent_dim, nhidden),      b_h2o: (2*latent_dim,)
    """
    nhidden = w_i2h.shape[0]
    out_dim = w_h2o.shape[0]
    hp = _round_up(nhidden, _LANE)
    op = _round_up(out_dim, _LANE)
    f32 = jnp.float32

    w_t = jnp.transpose(w_i2h).astype(f32)            # (obs_dim+nhidden, nhidden)
    wix = jnp.zeros((obs_dim, hp), f32).at[:, :nhidden].set(w_t[:obs_dim])
    wih = jnp.zeros((hp, hp), f32).at[:nhidden, :nhidden].set(w_t[obs_dim:])
    bi = jnp.zeros((1, hp), f32).at[0, :nhidden].set(b_i2h.astype(f32))
    wo = jnp.zeros((hp, op), f32).at[:nhidden, :out_dim].set(
        jnp.transpose(w_h2o).astype(f32))
    bo = jnp.zeros((1, op), f32).at[0, :out_dim].set(b_h2o.astype(f32))
    return {
        "wix": wix, "wih": wih, "bi": bi, "wo": wo, "bo": bo,
        "obs_dim": obs_dim, "nhidden": nhidden, "out_dim": out_dim,
        "hp": hp, "op": op,
    }


def recognition_rnn_sequence(xs, h0, params):
    """Run T repeated RecognitionRNN.forward steps fused in one kernel launch.

    xs: (T, B, obs_dim), h0: (B, nhidden).
    Returns (outs (T, B, 2*latent_dim), h_T (B, nhidden)).

    Note (v7x): one call = one serial recurrence = one TensorCore.  For many
    independent sequences, jax.vmap this function (or batch sequences along B)
    so the second core / bigger MXU pushes are used.
    """
    T, B, obs_dim = xs.shape
    nhidden, out_dim = params["nhidden"], params["out_dim"]
    hp, op = params["hp"], params["op"]
    assert obs_dim == params["obs_dim"]

    h0p = jnp.zeros((B, hp), jnp.float32).at[:, :nhidden].set(
        h0.astype(jnp.float32))

    vmem = pl.BlockSpec(memory_space=pltpu.MemorySpace.VMEM)
    outs_p, hT_p = pl.pallas_call(
        _rnn_seq_kernel,
        out_shape=(
            jax.ShapeDtypeStruct((T, B, op), jnp.float32),
            jax.ShapeDtypeStruct((B, hp), jnp.float32),
        ),
        in_specs=[vmem] * 7,
        out_specs=(vmem, vmem),
        scratch_shapes=[pltpu.VMEM((T, B, hp), jnp.float32)],
    )(xs.astype(jnp.float32), h0p, params["wix"], params["wih"],
      params["bi"], params["wo"], params["bo"])

    return outs_p[:, :, :out_dim], hT_p[:, :nhidden]


def recognition_rnn_step(x, h, params):
    """Exact single-step RecognitionRNN.forward(x, h) -> (out, h_new)."""
    outs, h_new = recognition_rnn_sequence(x[None], h, params)
    return outs[0], h_new


def _reference_step(x, h, w_i2h, b_i2h, w_h2o, b_h2o):
    hi = jax.lax.Precision.HIGHEST
    combined = jnp.concatenate([x, h], axis=1)
    h_new = jnp.tanh(jnp.dot(combined, w_i2h.T, precision=hi) + b_i2h)
    out = jnp.dot(h_new, w_h2o.T, precision=hi) + b_h2o
    return out, h_new


if __name__ == "__main__":
    # Module hyper-parameters (defaults from the PyTorch __init__).
    latent_dim = 4
    obs_dim = 2
    nhidden = 25
    nbatch = 8
    T = 16

    key = jax.random.PRNGKey(0)
    k1, k2, k3, k4, k5, k6 = jax.random.split(key, 6)

    bound1 = 1.0 / jnp.sqrt(obs_dim + nhidden)
    w_i2h = jax.random.uniform(k1, (nhidden, obs_dim + nhidden),
                               minval=-bound1, maxval=bound1, dtype=jnp.float32)
    b_i2h = jax.random.uniform(k2, (nhidden,),
                               minval=-bound1, maxval=bound1, dtype=jnp.float32)
    bound2 = 1.0 / jnp.sqrt(nhidden)
    w_h2o = jax.random.uniform(k3, (latent_dim * 2, nhidden),
                               minval=-bound2, maxval=bound2, dtype=jnp.float32)
    b_h2o = jax.random.uniform(k4, (latent_dim * 2,),
                               minval=-bound2, maxval=bound2, dtype=jnp.float32)

    xs = jax.random.normal(k5, (T, nbatch, obs_dim), dtype=jnp.float32)
    h0 = jnp.zeros((nbatch, nhidden), jnp.float32)        # initHidden()
    h_rand = jax.random.normal(k6, (nbatch, nhidden), dtype=jnp.float32)

    # One-time parameter glue (hoisted out of the forward path).
    params = prepare_recognition_rnn_params(w_i2h, b_i2h, w_h2o, b_h2o, obs_dim)

    # Fused sequence: T repeated module.forward calls in one kernel launch.
    outs, hT = recognition_rnn_sequence(xs, h0, params)
    outs = jax.block_until_ready(outs)
    hT = jax.block_until_ready(hT)

    # Single-step path (exact module.forward semantics) with a nonzero hidden.
    out1, h1 = recognition_rnn_step(xs[0], h_rand, params)
    out1 = jax.block_until_ready(out1)
    h1 = jax.block_until_ready(h1)

    # Pure-JAX references.
    outs_ref = []
    h_ref = h0
    for t in range(T):
        o, h_ref = _reference_step(xs[t], h_ref, w_i2h, b_i2h, w_h2o, b_h2o)
        outs_ref.append(o)
    outs_ref = jnp.stack(outs_ref)
    out1_ref, h1_ref = _reference_step(xs[0], h_rand, w_i2h, b_i2h, w_h2o, b_h2o)

    assert outs.shape == (T, nbatch, latent_dim * 2)
    assert hT.shape == (nbatch, nhidden)
    assert jnp.allclose(outs, outs_ref, atol=1e-4, rtol=1e-4)
    assert jnp.allclose(hT, h_ref, atol=1e-4, rtol=1e-4)
    assert jnp.allclose(out1, out1_ref, atol=1e-4, rtol=1e-4)
    assert jnp.allclose(h1, h1_ref, atol=1e-4, rtol=1e-4)

    print("KERNEL_OK")
</pallas_src>

<mosaic_0001>
module attributes {stable_mosaic.version = 11 : i64} {
  func.func @_rnn_seq_kernel(%arg0: memref<16x8x2xf32, #tpu.memory_space<vmem>>, %arg1: memref<8x128xf32, #tpu.memory_space<vmem>>, %arg2: memref<2x128xf32, #tpu.memory_space<vmem>>, %arg3: memref<128x128xf32, #tpu.memory_space<vmem>>, %arg4: memref<1x128xf32, #tpu.memory_space<vmem>>, %arg5: memref<128x128xf32, #tpu.memory_space<vmem>>, %arg6: memref<1x128xf32, #tpu.memory_space<vmem>>, %arg7: memref<16x8x128xf32, #tpu.memory_space<vmem>>, %arg8: memref<8x128xf32, #tpu.memory_space<vmem>>, %arg9: memref<16x8x128xf32, #tpu.memory_space<vmem>>) attributes {dimension_semantics = [], scalar_prefetch = 0 : i64, scratch_operands = 1 : i64, tpu.core_type = #tpu.core_type<tc>} {
    %c0 = arith.constant 0 : index
    %c0_0 = arith.constant 0 : index
    %c0_1 = arith.constant 0 : index
    %0 = vector.load %arg0[%c0, %c0_0, %c0_1] : memref<16x8x2xf32, #tpu.memory_space<vmem>>, vector<16x8x2xf32>
    %cst = arith.constant 0.000000e+00 : f32
    %1 = vector.broadcast %cst : f32 to vector<16x8x128xf32>
    %c0_2 = arith.constant 0 : index
    %c0_3 = arith.constant 0 : index
    %2 = vector.load %arg4[%c0_2, %c0_3] : memref<1x128xf32, #tpu.memory_space<vmem>>, vector<1x128xf32>
    %3 = vector.shape_cast %2 : vector<1x128xf32> to vector<1x1x128xf32>
    %4 = vector.broadcast %3 : vector<1x1x128xf32> to vector<16x8x128xf32>
    %5 = arith.addf %1, %4 : vector<16x8x128xf32>
    %6 = vector.extract_strided_slice %0 {offsets = [0, 0, 0], sizes = [16, 8, 1], strides = [1, 1, 1]} : vector<16x8x2xf32> to vector<16x8x1xf32>
    %c0_4 = arith.constant 0 : index
    %c0_5 = arith.constant 0 : index
    %7 = vector.load %arg2[%c0_4, %c0_5] : memref<2x128xf32, #tpu.memory_space<vmem>>, vector<1x128xf32>
    %8 = vector.shape_cast %7 : vector<1x128xf32> to vector<128xf32>
    %9 = vector.shape_cast %8 : vector<128xf32> to vector<1x1x128xf32>
    %10 = vector.broadcast %6 : vector<16x8x1xf32> to vector<16x8x128xf32>
    %11 = vector.broadcast %9 : vector<1x1x128xf32> to vector<16x8x128xf32>
    %12 = arith.mulf %10, %11 : vector<16x8x128xf32>
    %13 = arith.addf %5, %12 : vector<16x8x128xf32>
    %14 = vector.extract_strided_slice %0 {offsets = [0, 0, 1], sizes = [16, 8, 1], strides = [1, 1, 1]} : vector<16x8x2xf32> to vector<16x8x1xf32>
    %c1 = arith.constant 1 : index
    %c0_6 = arith.constant 0 : index
    %15 = vector.load %arg2[%c1, %c0_6] : memref<2x128xf32, #tpu.memory_space<vmem>>, vector<1x128xf32>
    %16 = vector.shape_cast %15 : vector<1x128xf32> to vector<128xf32>
    %17 = vector.shape_cast %16 : vector<128xf32> to vector<1x1x128xf32>
    %18 = vector.broadcast %14 : vector<16x8x1xf32> to vector<16x8x128xf32>
    %19 = vector.broadcast %17 : vector<1x1x128xf32> to vector<16x8x128xf32>
    %20 = arith.mulf %18, %19 : vector<16x8x128xf32>
    %21 = arith.addf %13, %20 : vector<16x8x128xf32>
    %c0_7 = arith.constant 0 : index
    %c0_8 = arith.constant 0 : index
    %c0_9 = arith.constant 0 : index
    %22 = vector.load %arg9[%c0_7, %c0_8, %c0_9] : memref<16x8x128xf32, #tpu.memory_space<vmem>>, vector<16x8x128xf32>
    tpu.vector_store %arg9[%c0_7, %c0_8, %c0_9], %21 {strides = array<i32>} : memref<16x8x128xf32, #tpu.memory_space<vmem>>, vector<16x8x128xf32>,
    %c0_10 = arith.constant 0 : index
    %c0_11 = arith.constant 0 : index
    %23 = vector.load %arg3[%c0_10, %c0_11] : memref<128x128xf32, #tpu.memory_space<vmem>>, vector<128x128xf32>
    %c0_12 = arith.constant 0 : index
    %c0_13 = arith.constant 0 : index
    %24 = vector.load %arg1[%c0_12, %c0_13] : memref<8x128xf32, #tpu.memory_space<vmem>>, vector<8x128xf32>
    %c0_14 = arith.constant 0 : index
    %c0_15 = arith.constant 0 : index
    %c0_16 = arith.constant 0 : index
    %25 = vector.load %arg9[%c0_14, %c0_15, %c0_16] : memref<16x8x128xf32, #tpu.memory_space<vmem>>, vector<1x8x128xf32>
    %26 = vector.shape_cast %25 : vector<1x8x128xf32> to vector<8x128xf32>
    %cst_17 = arith.constant dense<0.000000e+00> : vector<8x128xf32>
    %27 = tpu.matmul %24, %23, %cst_17 {dimension_numbers = #tpu.dot_dimension_numbers<[1], [0], [0], [1], [0, 0, 1, 1], [], []>, precision = #tpu.contract_precision<fp32>} : vector<8x128xf32>, vector<128x128xf32>, vector<8x128xf32> -> vector<8x128xf32>
    %28 = arith.addf %26, %27 : vector<8x128xf32>
    %29 = math.tanh %28 : vector<8x128xf32>
    %c0_18 = arith.constant 0 : index
    %c0_19 = arith.constant 0 : index
    %c0_20 = arith.constant 0 : index
    %30 = vector.load %arg9[%c0_18, %c0_19, %c0_20] : memref<16x8x128xf32, #tpu.memory_space<vmem>>, vector<1x8x128xf32>
    %31 = vector.shape_cast %30 : vector<1x8x128xf32> to vector<8x128xf32>
    %32 = vector.shape_cast %29 : vector<8x128xf32> to vector<1x8x128xf32>
    tpu.vector_store %arg9[%c0_18, %c0_19, %c0_20], %32 {strides = array<i32>} : memref<16x8x128xf32, #tpu.memory_space<vmem>>, vector<1x8x128xf32>,
    %c1_21 = arith.constant 1 : index
    %c0_22 = arith.constant 0 : index
    %c0_23 = arith.constant 0 : index
    %33 = vector.load %arg9[%c1_21, %c0_22, %c0_23] : memref<16x8x128xf32, #tpu.memory_space<vmem>>, vector<1x8x128xf32>
    %34 = vector.shape_cast %33 : vector<1x8x128xf32> to vector<8x128xf32>
    %cst_24 = arith.constant dense<0.000000e+00> : vector<8x128xf32>
    %35 = tpu.matmul %29, %23, %cst_24 {dimension_numbers = #tpu.dot_dimension_numbers<[1], [0], [0], [1], [0, 0, 1, 1], [], []>, precision = #tpu.contract_precision<fp32>} : vector<8x128xf32>, vector<128x128xf32>, vector<8x128xf32> -> vector<8x128xf32>
    %36 = arith.addf %34, %35 : vector<8x128xf32>
    %37 = math.tanh %36 : vector<8x128xf32>
    %c1_25 = arith.constant 1 : index
    %c0_26 = arith.constant 0 : index
    %c0_27 = arith.constant 0 : index
    %38 = vector.load %arg9[%c1_25, %c0_26, %c0_27] : memref<16x8x128xf32, #tpu.memory_space<vmem>>, vector<1x8x128xf32>
    %39 = vector.shape_cast %38 : vector<1x8x128xf32> to vector<8x128xf32>
    %40 = vector.shape_cast %37 : vector<8x128xf32> to vector<1x8x128xf32>
    tpu.vector_store %arg9[%c1_25, %c0_26, %c0_27], %40 {strides = array<i32>} : memref<16x8x128xf32, #tpu.memory_space<vmem>>, vector<1x8x128xf32>,
    %c2 = arith.constant 2 : index
    %c0_28 = arith.constant 0 : index
    %c0_29 = arith.constant 0 : index
    %41 = vector.load %arg9[%c2, %c0_28, %c0_29] : memref<16x8x128xf32, #tpu.memory_space<vmem>>, vector<1x8x128xf32>
    %42 = vector.shape_cast %41 : vector<1x8x128xf32> to vector<8x128xf32>
    %cst_30 = arith.constant dense<0.000000e+00> : vector<8x128xf32>
    %43 = tpu.matmul %37, %23, %cst_30 {dimension_numbers = #tpu.dot_dimension_numbers<[1], [0], [0], [1], [0, 0, 1, 1], [], []>, precision = #tpu.contract_precision<fp32>} : vector<8x128xf32>, vector<128x128xf32>, vector<8x128xf32> -> vector<8x128xf32>
    %44 = arith.addf %42, %43 : vector<8x128xf32>
    %45 = math.tanh %44 : vector<8x128xf32>
    %c2_31 = arith.constant 2 : index
    %c0_32 = arith.constant 0 : index
    %c0_33 = arith.constant 0 : index
    %46 = vector.load %arg9[%c2_31, %c0_32, %c0_33] : memref<16x8x128xf32, #tpu.memory_space<vmem>>, vector<1x8x128xf32>
    %47 = vector.shape_cast %46 : vector<1x8x128xf32> to vector<8x128xf32>
    %48 = vector.shape_cast %45 : vector<8x128xf32> to vector<1x8x128xf32>
    tpu.vector_store %arg9[%c2_31, %c0_32, %c0_33], %48 {strides = array<i32>} : memref<16x8x128xf32, #tpu.memory_space<vmem>>, vector<1x8x128xf32>,
    %c3 = arith.constant 3 : index
    %c0_34 = arith.constant 0 : index
    %c0_35 = arith.constant 0 : index
    %49 = vector.load %arg9[%c3, %c0_34, %c0_35] : memref<16x8x128xf32, #tpu.memory_space<vmem>>, vector<1x8x128xf32>
    %50 = vector.shape_cast %49 : vector<1x8x128xf32> to vector<8x128xf32>
    %cst_36 = arith.constant dense<0.000000e+00> : vector<8x128xf32>
    %51 = tpu.matmul %45, %23, %cst_36 {dimension_numbers = #tpu.dot_dimension_numbers<[1], [0], [0], [1], [0, 0, 1, 1], [], []>, precision = #tpu.contract_precision<fp32>} : vector<8x128xf32>, vector<128x128xf32>, vector<8x128xf32> -> vector<8x128xf32>
    %52 = arith.addf %50, %51 : vector<8x128xf32>
    %53 = math.tanh %52 : vector<8x128xf32>
    %c3_37 = arith.constant 3 : index
    %c0_38 = arith.constant 0 : index
    %c0_39 = arith.constant 0 : index
    %54 = vector.load %arg9[%c3_37, %c0_38, %c0_39] : memref<16x8x128xf32, #tpu.memory_space<vmem>>, vector<1x8x128xf32>
    %55 = vector.shape_cast %54 : vector<1x8x128xf32> to vector<8x128xf32>
    %56 = vector.shape_cast %53 : vector<8x128xf32> to vector<1x8x128xf32>
    tpu.vector_store %arg9[%c3_37, %c0_38, %c0_39], %56 {strides = array<i32>} : memref<16x8x128xf32, #tpu.memory_space<vmem>>, vector<1x8x128xf32>,
    %c4 = arith.constant 4 : index
    %c0_40 = arith.constant 0 : index
    %c0_41 = arith.constant 0 : index
    %57 = vector.load %arg9[%c4, %c0_40, %c0_41] : memref<16x8x128xf32, #tpu.memory_space<vmem>>, vector<1x8x128xf32>
    %58 = vector.shape_cast %57 : vector<1x8x128xf32> to vector<8x128xf32>
    %cst_42 = arith.constant dense<0.000000e+00> : vector<8x128xf32>
    %59 = tpu.matmul %53, %23, %cst_42 {dimension_numbers = #tpu.dot_dimension_numbers<[1], [0], [0], [1], [0, 0, 1, 1], [], []>, precision = #tpu.contract_precision<fp32>} : vector<8x128xf32>, vector<128x128xf32>, vector<8x128xf32> -> vector<8x128xf32>
    %60 = arith.addf %58, %59 : vector<8x128xf32>
    %61 = math.tanh %60 : vector<8x128xf32>
    %c4_43 = arith.constant 4 : index
    %c0_44 = arith.constant 0 : index
    %c0_45 = arith.constant 0 : index
    %62 = vector.load %arg9[%c4_43, %c0_44, %c0_45] : memref<16x8x128xf32, #tpu.memory_space<vmem>>, vector<1x8x128xf32>
    %63 = vector.shape_cast %62 : vector<1x8x128xf32> to vector<8x128xf32>
    %64 = vector.shape_cast %61 : vector<8x128xf32> to vector<1x8x128xf32>
    tpu.vector_store %arg9[%c4_43, %c0_44, %c0_45], %64 {strides = array<i32>} : memref<16x8x128xf32, #tpu.memory_space<vmem>>, vector<1x8x128xf32>,
    %c5 = arith.constant 5 : index
    %c0_46 = arith.constant 0 : index
    %c0_47 = arith.constant 0 : index
    %65 = vector.load %arg9[%c5, %c0_46, %c0_47] : memref<16x8x128xf32, #tpu.memory_space<vmem>>, vector<1x8x128xf32>
    %66 = vector.shape_cast %65 : vector<1x8x128xf32> to vector<8x128xf32>
    %cst_48 = arith.constant dense<0.000000e+00> : vector<8x128xf32>
    %67 = tpu.matmul %61, %23, %cst_48 {dimension_numbers = #tpu.dot_dimension_numbers<[1], [0], [0], [1], [0, 0, 1, 1], [], []>, precision = #tpu.contract_precision<fp32>} : vector<8x128xf32>, vector<128x128xf32>, vector<8x128xf32> -> vector<8x128xf32>
    %68 = arith.addf %66, %67 : vector<8x128xf32>
    %69 = math.tanh %68 : vector<8x128xf32>
    %c5_49 = arith.constant 5 : index
    %c0_50 = arith.constant 0 : index
    %c0_51 = arith.constant 0 : index
    %70 = vector.load %arg9[%c5_49, %c0_50, %c0_51] : memref<16x8x128xf32, #tpu.memory_space<vmem>>, vector<1x8x128xf32>
    %71 = vector.shape_cast %70 : vector<1x8x128xf32> to vector<8x128xf32>
    %72 = vector.shape_cast %69 : vector<8x128xf32> to vector<1x8x128xf32>
    tpu.vector_store %arg9[%c5_49, %c0_50, %c0_51], %72 {strides = array<i32>} : memref<16x8x128xf32, #tpu.memory_space<vmem>>, vector<1x8x128xf32>,
    %c6 = arith.constant 6 : index
    %c0_52 = arith.constant 0 : index
    %c0_53 = arith.constant 0 : index
    %73 = vector.load %arg9[%c6, %c0_52, %c0_53] : memref<16x8x128xf32, #tpu.memory_space<vmem>>, vector<1x8x128xf32>
    %74 = vector.shape_cast %73 : vector<1x8x128xf32> to vector<8x128xf32>
    %cst_54 = arith.constant dense<0.000000e+00> : vector<8x128xf32>
    %75 = tpu.matmul %69, %23, %cst_54 {dimension_numbers = #tpu.dot_dimension_numbers<[1], [0], [0], [1], [0, 0, 1, 1], [], []>, precision = #tpu.contract_precision<fp32>} : vector<8x128xf32>, vector<128x128xf32>, vector<8x128xf32> -> vector<8x128xf32>
    %76 = arith.addf %74, %75 : vector<8x128xf32>
    %77 = math.tanh %76 : vector<8x128xf32>
    %c6_55 = arith.constant 6 : index
    %c0_56 = arith.constant 0 : index
    %c0_57 = arith.constant 0 : index
    %78 = vector.load %arg9[%c6_55, %c0_56, %c0_57] : memref<16x8x128xf32, #tpu.memory_space<vmem>>, vector<1x8x128xf32>
    %79 = vector.shape_cast %78 : vector<1x8x128xf32> to vector<8x128xf32>
    %80 = vector.shape_cast %77 : vector<8x128xf32> to vector<1x8x128xf32>
    tpu.vector_store %arg9[%c6_55, %c0_56, %c0_57], %80 {strides = array<i32>} : memref<16x8x128xf32, #tpu.memory_space<vmem>>, vector<1x8x128xf32>,
    %c7 = arith.constant 7 : index
    %c0_58 = arith.constant 0 : index
    %c0_59 = arith.constant 0 : index
    %81 = vector.load %arg9[%c7, %c0_58, %c0_59] : memref<16x8x128xf32, #tpu.memory_space<vmem>>, vector<1x8x128xf32>
    %82 = vector.shape_cast %81 : vector<1x8x128xf32> to vector<8x128xf32>
    %cst_60 = arith.constant dense<0.000000e+00> : vector<8x128xf32>
    %83 = tpu.matmul %77, %23, %cst_60 {dimension_numbers = #tpu.dot_dimension_numbers<[1], [0], [0], [1], [0, 0, 1, 1], [], []>, precision = #tpu.contract_precision<fp32>} : vector<8x128xf32>, vector<128x128xf32>, vector<8x128xf32> -> vector<8x128xf32>
    %84 = arith.addf %82, %83 : vector<8x128xf32>
    %85 = math.tanh %84 : vector<8x128xf32>
    %c7_61 = arith.constant 7 : index
    %c0_62 = arith.constant 0 : index
    %c0_63 = arith.constant 0 : index
    %86 = vector.load %arg9[%c7_61, %c0_62, %c0_63] : memref<16x8x128xf32, #tpu.memory_space<vmem>>, vector<1x8x128xf32>
    %87 = vector.shape_cast %86 : vector<1x8x128xf32> to vector<8x128xf32>
    %88 = vector.shape_cast %85 : vector<8x128xf32> to vector<1x8x128xf32>
    tpu.vector_store %arg9[%c7_61, %c0_62, %c0_63], %88 {strides = array<i32>} : memref<16x8x128xf32, #tpu.memory_space<vmem>>, vector<1x8x128xf32>,
    %c8 = arith.constant 8 : index
    %c0_64 = arith.constant 0 : index
    %c0_65 = arith.constant 0 : index
    %89 = vector.load %arg9[%c8, %c0_64, %c0_65] : memref<16x8x128xf32, #tpu.memory_space<vmem>>, vector<1x8x128xf32>
    %90 = vector.shape_cast %89 : vector<1x8x128xf32> to vector<8x128xf32>
    %cst_66 = arith.constant dense<0.000000e+00> : vector<8x128xf32>
    %91 = tpu.matmul %85, %23, %cst_66 {dimension_numbers = #tpu.dot_dimension_numbers<[1], [0], [0], [1], [0, 0, 1, 1], [], []>, precision = #tpu.contract_precision<fp32>} : vector<8x128xf32>, vector<128x128xf32>, vector<8x128xf32> -> vector<8x128xf32>
    %92 = arith.addf %90, %91 : vector<8x128xf32>
    %93 = math.tanh %92 : vector<8x128xf32>
    %c8_67 = arith.constant 8 : index
    %c0_68 = arith.constant 0 : index
    %c0_69 = arith.constant 0 : index
    %94 = vector.load %arg9[%c8_67, %c0_68, %c0_69] : memref<16x8x128xf32, #tpu.memory_space<vmem>>, vector<1x8x128xf32>
    %95 = vector.shape_cast %94 : vector<1x8x128xf32> to vector<8x128xf32>
    %96 = vector.shape_cast %93 : vector<8x128xf32> to vector<1x8x128xf32>
    tpu.vector_store %arg9[%c8_67, %c0_68, %c0_69], %96 {strides = array<i32>} : memref<16x8x128xf32, #tpu.memory_space<vmem>>, vector<1x8x128xf32>,
    %c9 = arith.constant 9 : index
    %c0_70 = arith.constant 0 : index
    %c0_71 = arith.constant 0 : index
    %97 = vector.load %arg9[%c9, %c0_70, %c0_71] : memref<16x8x128xf32, #tpu.memory_space<vmem>>, vector<1x8x128xf32>
    %98 = vector.shape_cast %97 : vector<1x8x128xf32> to vector<8x128xf32>
    %cst_72 = arith.constant dense<0.000000e+00> : vector<8x128xf32>
    %99 = tpu.matmul %93, %23, %cst_72 {dimension_numbers = #tpu.dot_dimension_numbers<[1], [0], [0], [1], [0, 0, 1, 1], [], []>, precision = #tpu.contract_precision<fp32>} : vector<8x128xf32>, vector<128x128xf32>, vector<8x128xf32> -> vector<8x128xf32>
    %100 = arith.addf %98, %99 : vector<8x128xf32>
    %101 = math.tanh %100 : vector<8x128xf32>
    %c9_73 = arith.constant 9 : index
    %c0_74 = arith.constant 0 : index
    %c0_75 = arith.constant 0 : index
    %102 = vector.load %arg9[%c9_73, %c0_74, %c0_75] : memref<16x8x128xf32, #tpu.memory_space<vmem>>, vector<1x8x128xf32>
    %103 = vector.shape_cast %102 : vector<1x8x128xf32> to vector<8x128xf32>
    %104 = vector.shape_cast %101 : vector<8x128xf32> to vector<1x8x128xf32>
    tpu.vector_store %arg9[%c9_73, %c0_74, %c0_75], %104 {strides = array<i32>} : memref<16x8x128xf32, #tpu.memory_space<vmem>>, vector<1x8x128xf32>,
    %c10 = arith.constant 10 : index
    %c0_76 = arith.constant 0 : index
    %c0_77 = arith.constant 0 : index
    %105 = vector.load %arg9[%c10, %c0_76, %c0_77] : memref<16x8x128xf32, #tpu.memory_space<vmem>>, vector<1x8x128xf32>
    %106 = vector.shape_cast %105 : vector<1x8x128xf32> to vector<8x128xf32>
    %cst_78 = arith.constant dense<0.000000e+00> : vector<8x128xf32>
    %107 = tpu.matmul %101, %23, %cst_78 {dimension_numbers = #tpu.dot_dimension_numbers<[1], [0], [0], [1], [0, 0, 1, 1], [], []>, precision = #tpu.contract_precision<fp32>} : vector<8x128xf32>, vector<128x128xf32>, vector<8x128xf32> -> vector<8x128xf32>
    %108 = arith.addf %106, %107 : vector<8x128xf32>
    %109 = math.tanh %108 : vector<8x128xf32>
    %c10_79 = arith.constant 10 : index
    %c0_80 = arith.constant 0 : index
    %c0_81 = arith.constant 0 : index
    %110 = vector.load %arg9[%c10_79, %c0_80, %c0_81] : memref<16x8x128xf32, #tpu.memory_space<vmem>>, vector<1x8x128xf32>
    %111 = vector.shape_cast %110 : vector<1x8x128xf32> to vector<8x128xf32>
    %112 = vector.shape_cast %109 : vector<8x128xf32> to vector<1x8x128xf32>
    tpu.vector_store %arg9[%c10_79, %c0_80, %c0_81], %112 {strides = array<i32>} : memref<16x8x128xf32, #tpu.memory_space<vmem>>, vector<1x8x128xf32>,
    %c11 = arith.constant 11 : index
    %c0_82 = arith.constant 0 : index
    %c0_83 = arith.constant 0 : index
    %113 = vector.load %arg9[%c11, %c0_82, %c0_83] : memref<16x8x128xf32, #tpu.memory_space<vmem>>, vector<1x8x128xf32>
    %114 = vector.shape_cast %113 : vector<1x8x128xf32> to vector<8x128xf32>
    %cst_84 = arith.constant dense<0.000000e+00> : vector<8x128xf32>
    %115 = tpu.matmul %109, %23, %cst_84 {dimension_numbers = #tpu.dot_dimension_numbers<[1], [0], [0], [1], [0, 0, 1, 1], [], []>, precision = #tpu.contract_precision<fp32>} : vector<8x128xf32>, vector<128x128xf32>, vector<8x128xf32> -> vector<8x128xf32>
    %116 = arith.addf %114, %115 : vector<8x128xf32>
    %117 = math.tanh %116 : vector<8x128xf32>
    %c11_85 = arith.constant 11 : index
    %c0_86 = arith.constant 0 : index
    %c0_87 = arith.constant 0 : index
    %118 = vector.load %arg9[%c11_85, %c0_86, %c0_87] : memref<16x8x128xf32, #tpu.memory_space<vmem>>, vector<1x8x128xf32>
    %119 = vector.shape_cast %118 : vector<1x8x128xf32> to vector<8x128xf32>
    %120 = vector.shape_cast %117 : vector<8x128xf32> to vector<1x8x128xf32>
    tpu.vector_store %arg9[%c11_85, %c0_86, %c0_87], %120 {strides = array<i32>} : memref<16x8x128xf32, #tpu.memory_space<vmem>>, vector<1x8x128xf32>,
    %c12 = arith.constant 12 : index
    %c0_88 = arith.constant 0 : index
    %c0_89 = arith.constant 0 : index
    %121 = vector.load %arg9[%c12, %c0_88, %c0_89] : memref<16x8x128xf32, #tpu.memory_space<vmem>>, vector<1x8x128xf32>
    %122 = vector.shape_cast %121 : vector<1x8x128xf32> to vector<8x128xf32>
    %cst_90 = arith.constant dense<0.000000e+00> : vector<8x128xf32>
    %123 = tpu.matmul %117, %23, %cst_90 {dimension_numbers = #tpu.dot_dimension_numbers<[1], [0], [0], [1], [0, 0, 1, 1], [], []>, precision = #tpu.contract_precision<fp32>} : vector<8x128xf32>, vector<128x128xf32>, vector<8x128xf32> -> vector<8x128xf32>
    %124 = arith.addf %122, %123 : vector<8x128xf32>
    %125 = math.tanh %124 : vector<8x128xf32>
    %c12_91 = arith.constant 12 : index
    %c0_92 = arith.constant 0 : index
    %c0_93 = arith.constant 0 : index
    %126 = vector.load %arg9[%c12_91, %c0_92, %c0_93] : memref<16x8x128xf32, #tpu.memory_space<vmem>>, vector<1x8x128xf32>
    %127 = vector.shape_cast %126 : vector<1x8x128xf32> to vector<8x128xf32>
    %128 = vector.shape_cast %125 : vector<8x128xf32> to vector<1x8x128xf32>
    tpu.vector_store %arg9[%c12_91, %c0_92, %c0_93], %128 {strides = array<i32>} : memref<16x8x128xf32, #tpu.memory_space<vmem>>, vector<1x8x128xf32>,
    %c13 = arith.constant 13 : index
    %c0_94 = arith.constant 0 : index
    %c0_95 = arith.constant 0 : index
    %129 = vector.load %arg9[%c13, %c0_94, %c0_95] : memref<16x8x128xf32, #tpu.memory_space<vmem>>, vector<1x8x128xf32>
    %130 = vector.shape_cast %129 : vector<1x8x128xf32> to vector<8x128xf32>
    %cst_96 = arith.constant dense<0.000000e+00> : vector<8x128xf32>
    %131 = tpu.matmul %125, %23, %cst_96 {dimension_numbers = #tpu.dot_dimension_numbers<[1], [0], [0], [1], [0, 0, 1, 1], [], []>, precision = #tpu.contract_precision<fp32>} : vector<8x128xf32>, vector<128x128xf32>, vector<8x128xf32> -> vector<8x128xf32>
    %132 = arith.addf %130, %131 : vector<8x128xf32>
    %133 = math.tanh %132 : vector<8x128xf32>
    %c13_97 = arith.constant 13 : index
    %c0_98 = arith.constant 0 : index
    %c0_99 = arith.constant 0 : index
    %134 = vector.load %arg9[%c13_97, %c0_98, %c0_99] : memref<16x8x128xf32, #tpu.memory_space<vmem>>, vector<1x8x128xf32>
    %135 = vector.shape_cast %134 : vector<1x8x128xf32> to vector<8x128xf32>
    %136 = vector.shape_cast %133 : vector<8x128xf32> to vector<1x8x128xf32>
    tpu.vector_store %arg9[%c13_97, %c0_98, %c0_99], %136 {strides = array<i32>} : memref<16x8x128xf32, #tpu.memory_space<vmem>>, vector<1x8x128xf32>,
    %c14 = arith.constant 14 : index
    %c0_100 = arith.constant 0 : index
    %c0_101 = arith.constant 0 : index
    %137 = vector.load %arg9[%c14, %c0_100, %c0_101] : memref<16x8x128xf32, #tpu.memory_space<vmem>>, vector<1x8x128xf32>
    %138 = vector.shape_cast %137 : vector<1x8x128xf32> to vector<8x128xf32>
    %cst_102 = arith.constant dense<0.000000e+00> : vector<8x128xf32>
    %139 = tpu.matmul %133, %23, %cst_102 {dimension_numbers = #tpu.dot_dimension_numbers<[1], [0], [0], [1], [0, 0, 1, 1], [], []>, precision = #tpu.contract_precision<fp32>} : vector<8x128xf32>, vector<128x128xf32>, vector<8x128xf32> -> vector<8x128xf32>
    %140 = arith.addf %138, %139 : vector<8x128xf32>
    %141 = math.tanh %140 : vector<8x128xf32>
    %c14_103 = arith.constant 14 : index
    %c0_104 = arith.constant 0 : index
    %c0_105 = arith.constant 0 : index
    %142 = vector.load %arg9[%c14_103, %c0_104, %c0_105] : memref<16x8x128xf32, #tpu.memory_space<vmem>>, vector<1x8x128xf32>
    %143 = vector.shape_cast %142 : vector<1x8x128xf32> to vector<8x128xf32>
    %144 = vector.shape_cast %141 : vector<8x128xf32> to vector<1x8x128xf32>
    tpu.vector_store %arg9[%c14_103, %c0_104, %c0_105], %144 {strides = array<i32>} : memref<16x8x128xf32, #tpu.memory_space<vmem>>, vector<1x8x128xf32>,
    %c15 = arith.constant 15 : index
    %c0_106 = arith.constant 0 : index
    %c0_107 = arith.constant 0 : index
    %145 = vector.load %arg9[%c15, %c0_106, %c0_107] : memref<16x8x128xf32, #tpu.memory_space<vmem>>, vector<1x8x128xf32>
    %146 = vector.shape_cast %145 : vector<1x8x128xf32> to vector<8x128xf32>
    %cst_108 = arith.constant dense<0.000000e+00> : vector<8x128xf32>
    %147 = tpu.matmul %141, %23, %cst_108 {dimension_numbers = #tpu.dot_dimension_numbers<[1], [0], [0], [1], [0, 0, 1, 1], [], []>, precision = #tpu.contract_precision<fp32>} : vector<8x128xf32>, vector<128x128xf32>, vector<8x128xf32> -> vector<8x128xf32>
    %148 = arith.addf %146, %147 : vector<8x128xf32>
    %149 = math.tanh %148 : vector<8x128xf32>
    %c15_109 = arith.constant 15 : index
    %c0_110 = arith.constant 0 : index
    %c0_111 = arith.constant 0 : index
    %150 = vector.load %arg9[%c15_109, %c0_110, %c0_111] : memref<16x8x128xf32, #tpu.memory_space<vmem>>, vector<1x8x128xf32>
    %151 = vector.shape_cast %150 : vector<1x8x128xf32> to vector<8x128xf32>
    %152 = vector.shape_cast %149 : vector<8x128xf32> to vector<1x8x128xf32>
    tpu.vector_store %arg9[%c15_109, %c0_110, %c0_111], %152 {strides = array<i32>} : memref<16x8x128xf32, #tpu.memory_space<vmem>>, vector<1x8x128xf32>,
    %c0_112 = arith.constant 0 : index
    %c0_113 = arith.constant 0 : index
    %c0_114 = arith.constant 0 : index
    %153 = vector.load %arg9[%c0_112, %c0_113, %c0_114] : memref<16x8x128xf32, #tpu.memory_space<vmem>>, vector<16x8x128xf32>
    %154 = vector.shape_cast %153 : vector<16x8x128xf32> to vector<128x128xf32>
    %c0_115 = arith.constant 0 : index
    %c0_116 = arith.constant 0 : index
    %155 = vector.load %arg5[%c0_115, %c0_116] : memref<128x128xf32, #tpu.memory_space<vmem>>, vector<128x128xf32>
    %cst_117 = arith.constant dense<0.000000e+00> : vector<128x128xf32>
    %156 = tpu.matmul %154, %155, %cst_117 {dimension_numbers = #tpu.dot_dimension_numbers<[1], [0], [0], [1], [0, 0, 1, 1], [], []>, precision = #tpu.contract_precision<fp32>} : vector<128x128xf32>, vector<128x128xf32>, vector<128x128xf32> -> vector<128x128xf32>
    %c0_118 = arith.constant 0 : index
    %c0_119 = arith.constant 0 : index
    %157 = vector.load %arg6[%c0_118, %c0_119] : memref<1x128xf32, #tpu.memory_space<vmem>>, vector<1x128xf32>
    %158 = vector.broadcast %157 : vector<1x128xf32> to vector<128x128xf32>
    %159 = arith.addf %156, %158 : vector<128x128xf32>
    %160 = vector.shape_cast %159 : vector<128x128xf32> to vector<16x8x128xf32>
    %c0_120 = arith.constant 0 : index
    %c0_121 = arith.constant 0 : index
    %c0_122 = arith.constant 0 : index
    %161 = vector.load %arg7[%c0_120, %c0_121, %c0_122] : memref<16x8x128xf32, #tpu.memory_space<vmem>>, vector<16x8x128xf32>
    tpu.vector_store %arg7[%c0_120, %c0_121, %c0_122], %160 {strides = array<i32>} : memref<16x8x128xf32, #tpu.memory_space<vmem>>, vector<16x8x128xf32>,
    %c0_123 = arith.constant 0 : index
    %c0_124 = arith.constant 0 : index
    %162 = vector.load %arg8[%c0_123, %c0_124] : memref<8x128xf32, #tpu.memory_space<vmem>>, vector<8x128xf32>
    tpu.vector_store %arg8[%c0_123, %c0_124], %149 {strides = array<i32>} : memref<8x128xf32, #tpu.memory_space<vmem>>, vector<8x128xf32>,
    return
  }
}

</mosaic_0001>

<bundles_post_ra>
// kernel: tpu_custom_call.1
= control target key start
LH: loop header
LB: loop body
LE: loop exit
PB: predicated region body
PF: predicated region fallthrough
CT: control target
= control target key end

     0   :  { %14 = vsyncpa [#allocation4], 0  ;;  %s22335_s0 = inlined_call_operand.vmem [shape: f32[16,8,2], index: 0, kind: input, shape index: {}]   ;;  %s22336_s1 = inlined_call_operand.vmem [shape: f32[8,128], index: 1, kind: input, shape index: {}]   ;;  %s22337_s2 = inlined_call_operand.vmem [shape: f32[2,128], index: 2, kind: input, shape index: {}]   ;;  %s22338_s3 = inlined_call_operand.vmem [shape: f32[128,128], index: 3, kind: input, shape index: {}]   ;;  %s22339_s4 = inlined_call_operand.vmem [shape: f32[1,128], index: 4, kind: input, shape index: {}]   ;;  %s22340_s5 = inlined_call_operand.hbm [shape: f32[128,128], index: 5, kind: input, shape index: {}]   ;;  %s22341_s6 = inlined_call_operand.vmem [shape: f32[1,128], index: 6, kind: input, shape index: {}]   ;;  %s22342_s7 = inlined_call_operand.hbm [shape: f32[16,8,128], index: 7, kind: output, shape index: {0}]   ;;  %s22343_s8 = inlined_call_operand.hbm [shape: f32[8,128], index: 8, kind: output, shape index: {1}]  }
   0x1   :  { %15 = vsyncpa [#allocation5], 0 }
   0x2   :  { %16 = vsyncpa [#allocation8], 0  ;;  %s17678_s27 = smov [#allocation3]  }
   0x3   :  { %s32_s28 = sshll.u32 %s17678_s27, 4  ;;  %s33_s28 = int_to_ptr.vmem [resolvable:$true] %s32_s28 }
   0x4   :  { %s17620_s29 = scalar_lea.vmem %s33_s28, 2048  ;;  %p17625_p1 = scmp.lt.s32.totalorder %s33_s28, %s33_s28 }
   0x5   :  { %p17621_p0 = scmp.ne.s32.totalorder %s33_s28, %s17620_s29  ;;  %p17626_p2 = scmp.lt.s32.totalorder %s17620_s29, %s17620_s29 }
   0x7   :  { %p17627_p3 = por %p17626_p2, %p17625_p1 }
   0x9   :  { %p17628_p4 = pnand %p17627_p3, %p17621_p0 }
   0xb   :  { %17631 = shalt.err (!%p17628_p4)
}
   0xc   :  { %s17679_s30 = smov 128   ;;  %s17680_s9 = smov 8  }
   0xd   :  { %38 = dma.hbm_to_vmem [thread:$0]  %s22340_s5, 2048, %s33_s28, [#allocation4], %s17679_s30, %s17679_s30, %s17680_s9  }
   0xe   :  { %17672 = dma.done.wait [#allocation4], 2048  }
   0xf   :  { %17673 = vsyncadd [#allocation4], 4294965248  ;;  %v22375_v0 = vmov 0.0   ;;  %vm17682_vm0 = vmmov 0   ;;  %v22344_v1 = vmov 0   ;;  %v317_v2 = vld [vmem:[%s22338_s3 + $0x78] sm:$0xff] }
  0x10   :  { %13855 = vmatprep.subr.mxu0 %v22375_v0  ;;  %13890 = vmatprep.subr.mxu1 %v22375_v0  ;;  %v316_v3 = vld [vmem:[%s22338_s3 + $0x70] sm:$0xff]  ;;  %v315_v4 = vld [vmem:[%s22338_s3 + $0x68] sm:$0xff]  ;;  %v17755_v5 = vand.u32 4294901760, %v317_v2  ;;  %v314_v8 = vld [vmem:[%s22338_s3 + $0x60] sm:$0xff] }
  0x11   :  { %13887 = vmatprep.mubr.msk.f32.mxu0 %vm17682_vm0, %v22375_v0  ;;  %13922 = vmatprep.mubr.msk.f32.mxu1 %vm17682_vm0, %v22375_v0  ;;  %v17757_v6 = vand.u32 4294901760, %v316_v3  ;;  %v17759_v7 = vand.u32 4294901760, %v315_v4  ;;  %v313_v9 = vld [vmem:[%s22338_s3 + $0x58] sm:$0xff]  ;;  %v312_v10 = vld [vmem:[%s22338_s3 + $0x50] sm:$0xff]  ;;  %v17770_v11 = vand.u32 4294901760, %v314_v8  ;;  %v311_v14 = vld [vmem:[%s22338_s3 + $0x48] sm:$0xff] }
  0x12   :  { %17562 = vset.pattern.permute.xlu1 %v22344_v1  ;;  %17560 = vset.pattern.permute.xlu0 %v22344_v1  ;;  %v17772_v12 = vand.u32 4294901760, %v313_v9  ;;  %v17774_v13 = vand.u32 4294901760, %v312_v10  ;;  %v310_v15 = vld [vmem:[%s22338_s3 + $0x40] sm:$0xff]  ;;  %v17784_v16 = vsub.f32 %v317_v2, %v17755_v5  ;;  %v17789_v18 = vand.u32 4294901760, %v311_v14  ;;  %v309_v20 = vld [vmem:[%s22338_s3 + $0x38] sm:$0xff]  ;;  %v308_v27 = vld [vmem:[%s22338_s3 + $0x30] sm:$0xff] }
  0x13   :  { %13856 = vmatpush3.msra.mxu0 %v17755_v5  ;;  %v17787_v17 = vsub.f32 %v316_v3, %v17757_v6  ;;  %v17792_v19 = vsub.f32 %v315_v4, %v17759_v7  ;;  %v17799_v21 = vsub.f32 %v314_v8, %v17770_v11  ;;  %v17814_v26 = vand.u32 4294901760, %v310_v15  ;;  %v17834_v32 = vld [vmem:[%s22335_s0 + $0x8] sm:$0xff]  ;;  %v17839_v33 = vld [vmem:[%s22335_s0] sm:$0xff]  ;;  %v305_v52 = vld [vmem:[%s22338_s3 + $0x18] sm:$0xff] }
  0x14   :  { %13857 = vmatprep.subr.mxu0 %v22375_v0  ;;  %v17802_v22 = vsub.f32 %v313_v9, %v17772_v12  ;;  %v17806_v23 = vand.u32 4294901760, %v17784_v16  ;;  %v17823_v29 = vand.u32 4294901760, %v309_v20  ;;  %v17829_v31 = vsub.f32 %v312_v10, %v17774_v13  ;;  %v307_v39 = vld [vmem:[%s22338_s3 + $0x28] sm:$0xff]  ;;  %76 = vperm.xlu1 %17562, %v17834_v32   ;;  %v306_v44 = vld [vmem:[%s22338_s3 + $0x20] sm:$0xff]  ;;  %v304_v57 = vld [vmem:[%s22338_s3 + $0x10] sm:$0xff] }
  0x15   :  { %13858 = vmatpush3.msra.mxu0 %v17757_v6  ;;  %v17809_v24 = vand.u32 4294901760, %v17787_v17  ;;  %v17812_v25 = vand.u32 4294901760, %v17792_v19  ;;  %v17821_v28 = vand.u32 4294901760, %v17799_v21  ;;  %v17849_v37 = vsub.f32 %v311_v14, %v17789_v18  ;;  %71 = vperm.xlu0 %17560, %v17839_v33   ;;  %v318_v53 = vld [vmem:[%s22336_s1] sm:$0xff]  ;;  %v303_v63 = vld [vmem:[%s22338_s3 + $0x8] sm:$0xff] }
  0x16   :  { %13859 = vmatprep.subr.mxu0 %v22375_v0  ;;  %v17826_v30 = vand.u32 4294901760, %v17802_v22  ;;  %v415_v34 = vsub.f32 %v17784_v16, %v17806_v23  ;;  %v17852_v38 = vand.u32 4294901760, %v308_v27  ;;  %v17866_v43 = vand.u32 4294901760, %v17829_v31  ;;  %v302_v14 = vld [vmem:[%s22338_s3] sm:$0xff] }
  0x17   :  { %13860 = vmatpush3.msra.mxu0 %v17759_v7  ;;  %v422_v35 = vsub.f32 %v17787_v17, %v17809_v24  ;;  %v429_v36 = vsub.f32 %v17792_v19, %v17812_v25  ;;  %v436_v42 = vsub.f32 %v17799_v21, %v17821_v28  ;;  %v17876_v46 = vsub.f32 %v310_v15, %v17814_v26 }
  0x18   :  { %13861 = vmatprep.subr.mxu0 %v22375_v0  ;;  %v17859_v40 = vand.u32 4294901760, %v415_v34  ;;  %v443_v45 = vsub.f32 %v17802_v22, %v17826_v30  ;;  %v17882_v48 = vand.u32 4294901760, %v307_v39  ;;  %v17885_v49 = vand.u32 4294901760, %v17849_v37 }
  0x19   :  { %13862 = vmatpush3.msra.mxu0 %v17770_v11  ;;  %v17861_v41 = vand.u32 4294901760, %v422_v35  ;;  %v17880_v47 = vand.u32 4294901760, %v429_v36  ;;  %v17888_v50 = vsub.f32 %v309_v20, %v17823_v29  ;;  %v17892_v51 = vand.u32 4294901760, %v306_v44 }
  0x1a   :  { %22505 = vst [vmem:[#allocation12_spill] sm:$0xff] %v17859_v40  ;;  %13863 = vmatprep.subr.mxu0 %v22375_v0  ;;  %13891 = vmatpush3.msra.mxu1 %v17859_v40  ;;  %22508 = vst [vmem:[#allocation15_spill] sm:$0xff] %v17885_v49  ;;  %v17902_v54 = vand.u32 4294901760, %v436_v42  ;;  %v450_v55 = vsub.f32 %v17829_v31, %v17866_v43  ;;  %v17907_v56 = vand.u32 4294901760, %v17876_v46  ;;  %v17917_v59 = vand.u32 4294901760, %v443_v45 }
  0x1b   :  { %22506 = vst [vmem:[#allocation13_spill] sm:$0xff] %v17861_v41  ;;  %13864 = vmatpush3.msra.mxu0 %v17772_v12  ;;  %22507 = vst [vmem:[#allocation14_spill] sm:$0xff] %v17880_v47  ;;  %13892 = vmatprep.subr.mxu1 %v22375_v0  ;;  %v17913_v58 = vsub.f32 %v308_v27, %v17852_v38  ;;  %v17920_v60 = vand.u32 4294901760, %v17888_v50  ;;  %v457_v61 = vsub.f32 %v17849_v37, %v17885_v49 }
  0x1c   :  { %13865 = vmatprep.subr.mxu0 %v22375_v0  ;;  %13893 = vmatpush3.msra.mxu1 %v17861_v41  ;;  %22509 = vst [vmem:[#allocation16_spill] sm:$0xff] %v17902_v54  ;;  %22510 = vst [vmem:[#allocation17_spill] sm:$0xff] %v17907_v56  ;;  %v17926_v62 = vand.u32 4294901760, %v305_v52  ;;  %v17932_v2 = vsub.f32 %v307_v39, %v17882_v48  ;;  %v17934_v3 = vand.u32 4294901760, %v318_v53  ;;  %v17938_v4 = vand.u32 4294901760, %v304_v57 }
  0x1d   :  { %13866 = vmatpush3.msra.mxu0 %v17774_v13  ;;  %13894 = vmatprep.subr.mxu1 %v22375_v0  ;;  %22511 = vst [vmem:[#allocation18_spill] sm:$0xff] %v17917_v59  ;;  %22512 = vst [vmem:[#allocation19_spill] sm:$0xff] %v17920_v60  ;;  %v17942_v8 = vand.u32 4294901760, %v450_v55  ;;  %v464_v9 = vsub.f32 %v17876_v46, %v17907_v56  ;;  %v17947_v10 = vand.u32 4294901760, %v17913_v58  ;;  %v17959_v27 = vand.u32 4294901760, %v303_v63 }
  0x1e   :  { %13867 = vmatprep.subr.mxu0 %v22375_v0  ;;  %13895 = vmatpush3.msra.mxu1 %v17880_v47  ;;  %v17953_v15 = vsub.f32 %v306_v44, %v17892_v51  ;;  %v471_v20 = vsub.f32 %v17888_v50, %v17920_v60  ;;  %v17963_v34 = vand.u32 4294901760, %v457_v61  ;;  %v17966_v35 = vand.u32 4294901760, %v17932_v2 }
  0x1f   :  { %13868 = vmatpush3.msra.mxu0 %v17789_v18  ;;  %13896 = vmatprep.subr.mxu1 %v22375_v0  ;;  %22513 = vst [vmem:[#allocation20_spill] sm:$0xff] %v17942_v8  ;;  %22514 = vst [vmem:[#allocation21_spill] sm:$0xff] %v17947_v10  ;;  %v17969_v36 = vsub.f32 %v318_v53, %v17934_v3  ;;  %v17972_v39 = vsub.f32 %v305_v52, %v17926_v62  ;;  %v17976_v42 = vand.u32 4294901760, %v302_v14 }
  0x20   :  { %13869 = vmatprep.subr.mxu0 %v22375_v0  ;;  %13897 = vmatpush3.msra.mxu1 %v17902_v54  ;;  %22515 = vst [vmem:[#allocation22_spill] sm:$0xff] %v17963_v34  ;;  %22516 = vst [vmem:[#allocation23_spill] sm:$0xff] %v17966_v35  ;;  %v17980_v44 = vand.u32 4294901760, %v464_v9  ;;  %v478_v45 = vsub.f32 %v17913_v58, %v17947_v10  ;;  %v17985_v53 = vand.u32 4294901760, %v17953_v15  ;;  %v17992_v55 = vand.u32 4294901760, %v471_v20 }
  0x21   :  { %13870 = vmatpush3.msra.mxu0 %v17814_v26  ;;  %13898 = vmatprep.subr.mxu1 %v22375_v0  ;;  %v17988_v52 = vsub.f32 %v304_v57, %v17938_v4  ;;  %v485_v61 = vsub.f32 %v17932_v2, %v17966_v35  ;;  %v18000_v1 = vand.u32 4294901760, %v17972_v39  ;;  %v18003_v57 = vsub.f32 %v303_v63, %v17959_v27 }
  0x22   :  { %13871 = vmatprep.subr.mxu0 %v22375_v0  ;;  %13899 = vmatpush3.msra.mxu1 %v17917_v59  ;;  %22517 = vst [vmem:[#allocation24_spill] sm:$0xff] %v17980_v44  ;;  %22518 = vst [vmem:[#allocation25_spill] sm:$0xff] %v17985_v53  ;;  %v18009_v20 = vand.u32 4294901760, %v478_v45  ;;  %v22524_v45 = vand.u32 4294901760, %v17969_v36 }
  0x23   :  { %13872 = vmatpush3.msra.mxu0 %v17823_v29  ;;  %13900 = vmatprep.subr.mxu1 %v22375_v0  ;;  %22519 = vst [vmem:[#allocation26_spill] sm:$0xff] %v17992_v55  ;;  %22520 = vst [vmem:[#allocation27_spill] sm:$0xff] %v18000_v1  ;;  %v18014_v9 = vand.u32 4294901760, %v17988_v52  ;;  %v18023_v63 = vand.u32 4294901760, %v485_v61  ;;  %v499_v59 = vsub.f32 %v17972_v39, %v18000_v1 }
  0x24   :  { %13873 = vmatprep.subr.mxu0 %v22375_v0  ;;  %13901 = vmatpush3.msra.mxu1 %v17942_v8  ;;  %22521 = vst [vmem:[#allocation28_spill] sm:$0xff] %v18009_v20  ;;  %v18017_v8 = vsub.f32 %v302_v14, %v17976_v42  ;;  %v18031_v14 = vand.u32 4294901760, %v18003_v57 }
  0x25   :  { %13874 = vmatpush3.msra.mxu0 %v17852_v38  ;;  %13902 = vmatprep.subr.mxu1 %v22375_v0  ;;  %22522 = vst [vmem:[#allocation29_spill] sm:$0xff] %v18014_v9  ;;  %22523 = vst [vmem:[#allocation30_spill] sm:$0xff] %v18023_v63  ;;  %v18048_v47 = vand.u32 4294901760, %v499_v59 }
  0x26   :  { %13875 = vmatprep.subr.mxu0 %v22375_v0  ;;  %13903 = vmatpush3.msra.mxu1 %v17963_v34  ;;  %v492_v34 = vsub.f32 %v17953_v15, %v17985_v53  ;;  %22525 = vst [vmem:[#allocation31_spill] sm:$0xff] %v18031_v14 }
  0x27   :  { %13876 = vmatpush3.msra.mxu0 %v17882_v48  ;;  %13904 = vmatprep.subr.mxu1 %v22375_v0  ;;  %22528 = vst [vmem:[#allocation34_spill] sm:$0xff] %v18048_v47 }
  0x28   :  { %13877 = vmatprep.subr.mxu0 %v22375_v0  ;;  %13905 = vmatpush3.msra.mxu1 %v17980_v44  ;;  %v404_v44 = vsub.f32 %v17969_v36, %v22524_v45  ;;  %v18037_v61 = vand.u32 4294901760, %v492_v34  ;;  %v18042_v45 = vand.u32 4294901760, %v18017_v8  ;;  %v513_v34 = vsub.f32 %v18003_v57, %v18031_v14 }
  0x29   :  { %13878 = vmatpush3.msra.mxu0 %v17892_v51  ;;  %13906 = vmatprep.subr.mxu1 %v22375_v0 }
  0x2a   :  { %13879 = vmatprep.subr.mxu0 %v22375_v0  ;;  %13907 = vmatpush3.msra.mxu1 %v17992_v55  ;;  %22526 = vst [vmem:[#allocation32_spill] sm:$0xff] %v18037_v61  ;;  %v506_v55 = vsub.f32 %v17988_v52, %v18014_v9  ;;  %22527 = vst [vmem:[#allocation33_spill] sm:$0xff] %v18042_v45  ;;  %v405_v54 = vand.u32 4294901760, %v404_v44  ;;  %v520_v41 = vsub.f32 %v18017_v8, %v18042_v45 }
  0x2b   :  { %13880 = vmatpush3.msra.mxu0 %v17926_v62  ;;  %13908 = vmatprep.subr.mxu1 %v22375_v0  ;;  %v18063_v59 = vand.u32 4294901760, %v513_v34  ;;  %v22535_v34 = vld [vmem:[#allocation14_spill] sm:$0xff] }
  0x2c   :  { %13881 = vmatprep.subr.mxu0 %v22375_v0  ;;  %13909 = vmatpush3.msra.mxu1 %v18009_v20  ;;  %v18056_v20 = vand.u32 4294901760, %v506_v55  ;;  %v18069_v44 = vand.u32 4294901760, %v520_v41  ;;  %v22532_v41 = vand.u32 4294901760, %v17969_v36  ;;  %v22533_v55 = vmov 0  }
  0x2d   :  { %13882 = vmatpush3.msra.mxu0 %v17938_v4  ;;  %13910 = vmatprep.subr.mxu1 %v22375_v0  ;;  %22530 = vst [vmem:[#allocation36_spill] sm:$0xff] %v18063_v59 }
  0x2e   :  { %13883 = vmatprep.subr.mxu0 %v22375_v0  ;;  %13911 = vmatpush3.msra.mxu1 %v18023_v63  ;;  %22529 = vst [vmem:[#allocation35_spill] sm:$0xff] %v18056_v20  ;;  %22531 = vst [vmem:[#allocation37_spill] sm:$0xff] %v18069_v44 }
  0x2f   :  { %13884 = vmatpush3.msra.mxu0 %v17959_v27  ;;  %13912 = vmatprep.subr.mxu1 %v22375_v0 }
  0x30   :  { %13885 = vmatprep.subr.mxu0 %v22375_v0  ;;  %13913 = vmatpush3.msra.mxu1 %v18037_v61 }
  0x31   :  { %13886 = vmatpush3.msra.mxu0 %v17976_v42  ;;  %13914 = vmatprep.subr.mxu1 %v22375_v0 }
  0x32   :  { %13925 = vmatprep.subr.mxu0 %v22375_v0  ;;  %13888 = vmatmul.mubr.f32.vlgmr.msra.gmra.mxu0 %v405_v54  ;;  %v17684_v54 = vmov 1  }
  0x33   :  { %13915 = vmatpush3.msra.mxu1 %v18048_v47  ;;  %13926 = vmatpush3.msra.mxu0 %v17784_v16 }
  0x34   :  { %13916 = vmatprep.subr.mxu1 %v22375_v0  ;;  %13927 = vmatprep.subr.mxu0 %v22375_v0 }
  0x35   :  { %13917 = vmatpush3.msra.mxu1 %v18056_v20  ;;  %13928 = vmatpush3.msra.mxu0 %v17787_v17 }
  0x36   :  { %13918 = vmatprep.subr.mxu1 %v22375_v0  ;;  %13929 = vmatprep.subr.mxu0 %v22375_v0 }
  0x37   :  { %13919 = vmatpush3.msra.mxu1 %v18063_v59  ;;  %13930 = vmatpush3.msra.mxu0 %v17792_v19 }
  0x38   :  { %13920 = vmatprep.subr.mxu1 %v22375_v0  ;;  %13931 = vmatprep.subr.mxu0 %v22375_v0 }
  0x39   :  { %13921 = vmatpush3.msra.mxu1 %v18069_v44  ;;  %13932 = vmatpush3.msra.mxu0 %v17799_v21 }
  0x3a   :  { %13923 = vmatmul.mubr.f32.vlgmr.msra.gmra.mxu1 %v17934_v3  ;;  %13933 = vmatprep.subr.mxu0 %v22375_v0 }
  0x3b   :  { %13960 = vmatprep.subr.mxu1 %v22375_v0  ;;  %13934 = vmatpush3.msra.mxu0 %v17802_v22 }
  0x3c   :  { %13961 = vmatpush3.msra.mxu1 %v17755_v5  ;;  %13935 = vmatprep.subr.mxu0 %v22375_v0 }
  0x3d   :  { %13962 = vmatprep.subr.mxu1 %v22375_v0  ;;  %13936 = vmatpush3.msra.mxu0 %v17829_v31 }
  0x3e   :  { %13963 = vmatpush3.msra.mxu1 %v17757_v6  ;;  %13937 = vmatprep.subr.mxu0 %v22375_v0 }
  0x3f   :  { %13964 = vmatprep.subr.mxu1 %v22375_v0  ;;  %13938 = vmatpush3.msra.mxu0 %v17849_v37 }
  0x40   :  { %13965 = vmatpush3.msra.mxu1 %v17759_v7  ;;  %13939 = vmatprep.subr.mxu0 %v22375_v0 }
  0x41   :  { %13966 = vmatprep.subr.mxu1 %v22375_v0  ;;  %13940 = vmatpush3.msra.mxu0 %v17876_v46 }
  0x42   :  { %13967 = vmatpush3.msra.mxu1 %v17770_v11  ;;  %13941 = vmatprep.subr.mxu0 %v22375_v0 }
  0x43   :  { %13968 = vmatprep.subr.mxu1 %v22375_v0  ;;  %13942 = vmatpush3.msra.mxu0 %v17888_v50 }
  0x44   :  { %13969 = vmatpush3.msra.mxu1 %v17772_v12  ;;  %13943 = vmatprep.subr.mxu0 %v22375_v0 }
  0x45   :  { %13970 = vmatprep.subr.mxu1 %v22375_v0  ;;  %13944 = vmatpush3.msra.mxu0 %v17913_v58 }
  0x46   :  { %13971 = vmatpush3.msra.mxu1 %v17774_v13  ;;  %13945 = vmatprep.subr.mxu0 %v22375_v0 }
  0x47   :  { %13972 = vmatprep.subr.mxu1 %v22375_v0  ;;  %13946 = vmatpush3.msra.mxu0 %v17932_v2 }
  0x48   :  { %13973 = vmatpush3.msra.mxu1 %v17789_v18  ;;  %13947 = vmatprep.subr.mxu0 %v22375_v0 }
  0x49   :  { %13974 = vmatprep.subr.mxu1 %v22375_v0  ;;  %13948 = vmatpush3.msra.mxu0 %v17953_v15 }
  0x4a   :  { %13975 = vmatpush3.msra.mxu1 %v17814_v26  ;;  %13949 = vmatprep.subr.mxu0 %v22375_v0 }
  0x4b   :  { %13976 = vmatprep.subr.mxu1 %v22375_v0  ;;  %13950 = vmatpush3.msra.mxu0 %v17972_v39 }
  0x4c   :  { %13977 = vmatpush3.msra.mxu1 %v17823_v29  ;;  %13951 = vmatprep.subr.mxu0 %v22375_v0 }
  0x4d   :  { %13978 = vmatprep.subr.mxu1 %v22375_v0  ;;  %13952 = vmatpush3.msra.mxu0 %v17988_v52 }
  0x4e   :  { %13979 = vmatpush3.msra.mxu1 %v17852_v38  ;;  %13953 = vmatprep.subr.mxu0 %v22375_v0 }
  0x4f   :  { %13980 = vmatprep.subr.mxu1 %v22375_v0  ;;  %13954 = vmatpush3.msra.mxu0 %v18003_v57 }
  0x50   :  { %13981 = vmatpush3.msra.mxu1 %v17882_v48  ;;  %13955 = vmatprep.subr.mxu0 %v22375_v0 }
  0x51   :  { %13982 = vmatprep.subr.mxu1 %v22375_v0  ;;  %13956 = vmatpush3.msra.mxu0 %v18017_v8 }
  0x52   :  { %13957 = vmatprep.mubr.msk.f32.mxu0 %vm17682_vm0, %v22375_v0  ;;  %13983 = vmatpush3.msra.mxu1 %v17892_v51 }
  0x53   :  { %13958 = vmatmul.mubr.f32.vlgmr.msra.gmra.mxu0 %v17969_v36  ;;  %13984 = vmatprep.subr.mxu1 %v22375_v0  ;;  %v46_v36 = vld [vmem:[%s22335_s0 + $0x10] sm:$0xff] }
  0x54   :  { %13995 = vmatprep.subr.mxu0 %v22375_v0  ;;  %13985 = vmatpush3.msra.mxu1 %v17926_v62 }
  0x55   :  { %13996 = vmatpush3.msra.mxu0 %v17806_v23  ;;  %13986 = vmatprep.subr.mxu1 %v22375_v0 }
  0x56   :  { %13997 = vmatprep.subr.mxu0 %v22375_v0  ;;  %13987 = vmatpush3.msra.mxu1 %v17938_v4 }
  0x57   :  { %13998 = vmatpush3.msra.mxu0 %v17809_v24  ;;  %13988 = vmatprep.subr.mxu1 %v22375_v0 }
  0x58   :  { %13999 = vmatprep.subr.mxu0 %v22375_v0  ;;  %13989 = vmatpush3.msra.mxu1 %v17959_v27 }
  0x59   :  { %14000 = vmatpush3.msra.mxu0 %v17812_v25  ;;  %13990 = vmatprep.subr.mxu1 %v22375_v0 }
  0x5a   :  { %14001 = vmatprep.subr.mxu0 %v22375_v0  ;;  %13991 = vmatpush3.msra.mxu1 %v17976_v42 }
  0x5b   :  { %13992 = vmatprep.mubr.msk.f32.mxu1 %vm17682_vm0, %v22375_v0  ;;  %14002 = vmatpush3.msra.mxu0 %v17821_v28 }
  0x5c   :  { %13993 = vmatmul.mubr.f32.vlgmr.msra.gmra.mxu1 %v22532_v41  ;;  %14003 = vmatprep.subr.mxu0 %v22375_v0  ;;  %v49_v41 = vld [vmem:[%s22335_s0 + $0x28] sm:$0xff] }
  0x5d   :  { %14030 = vmatprep.subr.mxu1 %v22375_v0  ;;  %14004 = vmatpush3.msra.mxu0 %v17826_v30 }
  0x5e   :  { %14031 = vmatpush3.msra.mxu1 %v17755_v5  ;;  %14005 = vmatprep.subr.mxu0 %v22375_v0 }
  0x5f   :  { %14032 = vmatprep.subr.mxu1 %v22375_v0  ;;  %14006 = vmatpush3.msra.mxu0 %v17866_v43 }
  0x60   :  { %14033 = vmatpush3.msra.mxu1 %v17757_v6  ;;  %14007 = vmatprep.subr.mxu0 %v22375_v0 }
  0x61   :  { %14034 = vmatprep.subr.mxu1 %v22375_v0  ;;  %14008 = vmatpush3.msra.mxu0 %v17885_v49 }
  0x62   :  { %14035 = vmatpush3.msra.mxu1 %v17759_v7  ;;  %14009 = vmatprep.subr.mxu0 %v22375_v0 }
  0x63   :  { %14036 = vmatprep.subr.mxu1 %v22375_v0  ;;  %14010 = vmatpush3.msra.mxu0 %v17907_v56 }
  0x64   :  { %14037 = vmatpush3.msra.mxu1 %v17770_v11  ;;  %14011 = vmatprep.subr.mxu0 %v22375_v0 }
  0x65   :  { %14038 = vmatprep.subr.mxu1 %v22375_v0  ;;  %14012 = vmatpush3.msra.mxu0 %v17920_v60 }
  0x66   :  { %14039 = vmatpush3.msra.mxu1 %v17772_v12  ;;  %14013 = vmatprep.subr.mxu0 %v22375_v0 }
  0x67   :  { %14040 = vmatprep.subr.mxu1 %v22375_v0  ;;  %14014 = vmatpush3.msra.mxu0 %v17947_v10 }
  0x68   :  { %14041 = vmatpush3.msra.mxu1 %v17774_v13  ;;  %14015 = vmatprep.subr.mxu0 %v22375_v0 }
  0x69   :  { %14042 = vmatprep.subr.mxu1 %v22375_v0  ;;  %14016 = vmatpush3.msra.mxu0 %v17966_v35 }
  0x6a   :  { %14043 = vmatpush3.msra.mxu1 %v17789_v18  ;;  %14017 = vmatprep.subr.mxu0 %v22375_v0 }
  0x6b   :  { %14044 = vmatprep.subr.mxu1 %v22375_v0  ;;  %14018 = vmatpush3.msra.mxu0 %v17985_v53 }
  0x6c   :  { %14045 = vmatpush3.msra.mxu1 %v17814_v26  ;;  %14019 = vmatprep.subr.mxu0 %v22375_v0 }
  0x6d   :  { %14046 = vmatprep.subr.mxu1 %v22375_v0  ;;  %14020 = vmatpush3.msra.mxu0 %v18000_v1 }
  0x6e   :  { %14047 = vmatpush3.msra.mxu1 %v17823_v29  ;;  %14021 = vmatprep.subr.mxu0 %v22375_v0 }
  0x6f   :  { %14048 = vmatprep.subr.mxu1 %v22375_v0  ;;  %14022 = vmatpush3.msra.mxu0 %v18014_v9 }
  0x70   :  { %14049 = vmatpush3.msra.mxu1 %v17852_v38  ;;  %14023 = vmatprep.subr.mxu0 %v22375_v0 }
  0x71   :  { %14050 = vmatprep.subr.mxu1 %v22375_v0  ;;  %14024 = vmatpush3.msra.mxu0 %v18031_v14 }
  0x72   :  { %14051 = vmatpush3.msra.mxu1 %v17882_v48  ;;  %14025 = vmatprep.subr.mxu0 %v22375_v0 }
  0x73   :  { %14052 = vmatprep.subr.mxu1 %v22375_v0  ;;  %14026 = vmatpush3.msra.mxu0 %v18042_v45 }
  0x74   :  { %14027 = vmatprep.mubr.msk.f32.mxu0 %vm17682_vm0, %v22375_v0  ;;  %14053 = vmatpush3.msra.mxu1 %v17892_v51 }
  0x75   :  { %14028 = vmatmul.mubr.f32.vlgmr.msra.gmra.mxu0 %v17934_v3  ;;  %14054 = vmatprep.subr.mxu1 %v22375_v0 }
  0x76   :  { %14062 = vmatprep.mubr.msk.f32.mxu1 %vm17682_vm0, %v22375_v0  ;;  %14055 = vmatpush3.msra.mxu1 %v17926_v62 }
  0x77   :  { %17563 = vset.pattern.permute.xlu1 %v17684_v54  ;;  %14056 = vmatprep.subr.mxu1 %v22375_v0 }
  0x78   :  { %191 = vperm.xlu1 %17563, %v17834_v32   ;;  %14057 = vmatpush3.msra.mxu1 %v17938_v4  ;;  %v47_v32 = vld [vmem:[%s22335_s0 + $0x18] sm:$0xff] }
  0x79   :  { %17561 = vset.pattern.permute.xlu0 %v17684_v54  ;;  %14058 = vmatprep.subr.mxu1 %v22375_v0  ;;  %v22536_v54 = vld [vmem:[#allocation16_spill] sm:$0xff] }
  0x7a   :  { %187 = vperm.xlu0 %17561, %v17839_v33   ;;  %14059 = vmatpush3.msra.mxu1 %v17959_v27  ;;  %v48_v33 = vld [vmem:[%s22335_s0 + $0x20] sm:$0xff] }
  0x7b   :  { %14065 = vmatprep.subr.mxu0 %v22375_v0  ;;  %14060 = vmatprep.subr.mxu1 %v22375_v0 }
  0x7c   :  { %17564 = vset.pattern.permute.xlu1 %v22533_v55  ;;  %14061 = vmatpush3.msra.mxu1 %v17976_v42  ;;  %v50_v55 = vld [vmem:[%s22335_s0 + $0x30] sm:$0xff] }
  0x7d   :  { %81 = vperm.xlu1 %17564, %v46_v36   ;;  %14063 = vmatmul.mubr.f32.vlgmr.msra.gmra.mxu1 %v17934_v3  ;;  %v22534_v3 = vld [vmem:[#allocation13_spill] sm:$0xff] }
  0x7e   :  { %195 = vperm.xlu0 %17561, %v46_v36   ;;  %14100 = vmatprep.subr.mxu1 %v22375_v0  ;;  %v22537_v36 = vld [vmem:[#allocation18_spill] sm:$0xff] }
  0x7f   :  { %14066 = vmatpush3.msra.mxu0 %v17755_v5  ;;  %14101 = vmatpush3.msra.mxu1 %v17859_v40 }
  0x80   :  { %14067 = vmatprep.subr.mxu0 %v22375_v0  ;;  %14102 = vmatprep.subr.mxu1 %v22375_v0 }
  0x81   :  { %86 = vperm.xlu1 %17564, %v47_v32   ;;  %14103 = vmatpush3.msra.mxu1 %v22534_v3 }
  0x82   :  { %199 = vperm.xlu0 %17561, %v47_v32   ;;  %14104 = vmatprep.subr.mxu1 %v22375_v0  ;;  %v22538_v32 = vld [vmem:[#allocation20_spill] sm:$0xff] }
  0x83   :  { %14068 = vmatpush3.msra.mxu0 %v17757_v6  ;;  %14105 = vmatpush3.msra.mxu1 %v22535_v34 }
  0x84   :  { %14069 = vmatprep.subr.mxu0 %v22375_v0  ;;  %14106 = vmatprep.subr.mxu1 %v22375_v0 }
  0x85   :  { %91 = vperm.xlu1 %17564, %v48_v33   ;;  %14107 = vmatpush3.msra.mxu1 %v22536_v54 }
  0x86   :  { %203 = vperm.xlu0 %17561, %v48_v33   ;;  %14108 = vmatprep.subr.mxu1 %v22375_v0  ;;  %v22539_v33 = vld [vmem:[#allocation22_spill] sm:$0xff] }
  0x87   :  { %14070 = vmatpush3.msra.mxu0 %v17759_v7  ;;  %14109 = vmatpush3.msra.mxu1 %v22537_v36  ;;  %v22540_v36 = vld [vmem:[#allocation24_spill] sm:$0xff] }
  0x88   :  { %14071 = vmatprep.subr.mxu0 %v22375_v0  ;;  %14110 = vmatprep.subr.mxu1 %v22375_v0 }
  0x89   :  { %96 = vperm.xlu1 %17564, %v49_v41   ;;  %14111 = vmatpush3.msra.mxu1 %v22538_v32  ;;  %v22541_v32 = vld [vmem:[#allocation26_spill] sm:$0xff] }
  0x8a   :  { %207 = vperm.xlu0 %17561, %v49_v41   ;;  %14112 = vmatprep.subr.mxu1 %v22375_v0  ;;  %v51_v41 = vld [vmem:[%s22335_s0 + $0x38] sm:$0xff] }
  0x8b   :  { %14072 = vmatpush3.msra.mxu0 %v17770_v11  ;;  %14113 = vmatpush3.msra.mxu1 %v22539_v33  ;;  %v22542_v33 = vld [vmem:[#allocation28_spill] sm:$0xff] }
  0x8c   :  { %14073 = vmatprep.subr.mxu0 %v22375_v0  ;;  %14114 = vmatprep.subr.mxu1 %v22375_v0 }
  0x8d   :  { %101 = vperm.xlu1 %17564, %v50_v55   ;;  %14115 = vmatpush3.msra.mxu1 %v22540_v36 }
  0x8e   :  { %211 = vperm.xlu0 %17561, %v50_v55   ;;  %14116 = vmatprep.subr.mxu1 %v22375_v0  ;;  %v52_v55 = vld [vmem:[%s22335_s0 + $0x40] sm:$0xff] }
  0x8f   :  { %14074 = vmatpush3.msra.mxu0 %v17772_v12  ;;  %14117 = vmatpush3.msra.mxu1 %v22541_v32 }
  0x90   :  { %14075 = vmatprep.subr.mxu0 %v22375_v0  ;;  %14118 = vmatprep.subr.mxu1 %v22375_v0 }
  0x91   :  { %106 = vperm.xlu1 %17564, %v51_v41   ;;  %14076 = vmatpush3.msra.mxu0 %v17774_v13 }
  0x92   :  { %215 = vperm.xlu0 %17561, %v51_v41   ;;  %14119 = vmatpush3.msra.mxu1 %v22542_v33  ;;  %v53_v41 = vld [vmem:[%s22335_s0 + $0x48] sm:$0xff] }
  0x93   :  { %14077 = vmatprep.subr.mxu0 %v22375_v0  ;;  %14120 = vmatprep.subr.mxu1 %v22375_v0 }
  0x94   :  { %14078 = vmatpush3.msra.mxu0 %v17789_v18  ;;  %14121 = vmatpush3.msra.mxu1 %v18023_v63 }
  0x95   :  { %111 = vperm.xlu1 %17564, %v52_v55   ;;  %14079 = vmatprep.subr.mxu0 %v22375_v0 }
  0x96   :  { %219 = vperm.xlu0 %17561, %v52_v55   ;;  %14122 = vmatprep.subr.mxu1 %v22375_v0  ;;  %v54_v55 = vld [vmem:[%s22335_s0 + $0x50] sm:$0xff] }
  0x97   :  { %14080 = vmatpush3.msra.mxu0 %v17814_v26  ;;  %14123 = vmatpush3.msra.mxu1 %v18037_v61 }
  0x98   :  { %14081 = vmatprep.subr.mxu0 %v22375_v0  ;;  %14124 = vmatprep.subr.mxu1 %v22375_v0 }
  0x99   :  { %116 = vperm.xlu1 %17564, %v53_v41   ;;  %14082 = vmatpush3.msra.mxu0 %v17823_v29 }
  0x9a   :  { %223 = vperm.xlu0 %17561, %v53_v41   ;;  %14125 = vmatpush3.msra.mxu1 %v18048_v47  ;;  %v55_v41 = vld [vmem:[%s22335_s0 + $0x58] sm:$0xff] }
  0x9b   :  { %14083 = vmatprep.subr.mxu0 %v22375_v0  ;;  %14126 = vmatprep.subr.mxu1 %v22375_v0 }
  0x9c   :  { %14084 = vmatpush3.msra.mxu0 %v17852_v38  ;;  %14127 = vmatpush3.msra.mxu1 %v18056_v20 }
  0x9d   :  { %121 = vperm.xlu1 %17564, %v54_v55   ;;  %14085 = vmatprep.subr.mxu0 %v22375_v0 }
  0x9e   :  { %227 = vperm.xlu0 %17561, %v54_v55   ;;  %14128 = vmatprep.subr.mxu1 %v22375_v0  ;;  %v56_v55 = vld [vmem:[%s22335_s0 + $0x60] sm:$0xff] }
  0x9f   :  { %14086 = vmatpush3.msra.mxu0 %v17882_v48  ;;  %14129 = vmatpush3.msra.mxu1 %v18063_v59 }
  0xa0   :  { %14087 = vmatprep.subr.mxu0 %v22375_v0  ;;  %14130 = vmatprep.subr.mxu1 %v22375_v0 }
  0xa1   :  { %126 = vperm.xlu1 %17564, %v55_v41   ;;  %14088 = vmatpush3.msra.mxu0 %v17892_v51 }
  0xa2   :  { %231 = vperm.xlu0 %17561, %v55_v41   ;;  %14131 = vmatpush3.msra.mxu1 %v18069_v44  ;;  %v57_v41 = vld [vmem:[%s22335_s0 + $0x68] sm:$0xff]  ;;  %v59_v44 = vld [vmem:[%s22335_s0 + $0x78] sm:$0xff] }
  0xa3   :  { %14089 = vmatprep.subr.mxu0 %v22375_v0  ;;  %14132 = vmatprep.mubr.msk.f32.mxu1 %vm17682_vm0, %v22375_v0 }
  0xa4   :  { %14170 = vmatprep.subr.mxu1 %v22375_v0  ;;  %14090 = vmatpush3.msra.mxu0 %v17926_v62 }
  0xa5   :  { %131 = vperm.xlu1 %17564, %v56_v55   ;;  %14091 = vmatprep.subr.mxu0 %v22375_v0 }
  0xa6   :  { %235 = vperm.xlu0 %17561, %v56_v55   ;;  %14092 = vmatpush3.msra.mxu0 %v17938_v4  ;;  %v58_v55 = vld [vmem:[%s22335_s0 + $0x70] sm:$0xff] }
  0xa7   :  { %14097 = vmatprep.mubr.msk.f32.mxu0 %vm17682_vm0, %v22375_v0  ;;  %14093 = vmatprep.subr.mxu0 %v22375_v0 }
  0xa8   :  { %14094 = vmatpush3.msra.mxu0 %v17959_v27 }
  0xa9   :  { %136 = vperm.xlu1 %17564, %v57_v41   ;;  %14095 = vmatprep.subr.mxu0 %v22375_v0 }
  0xaa   :  { %239 = vperm.xlu0 %17561, %v57_v41   ;;  %14096 = vmatpush3.msra.mxu0 %v17976_v42 }
  0xab   :  { %14135 = vmatprep.subr.mxu0 %v22375_v0  ;;  %v18332_v0 = vld [vmem:[%s22337_s2] ss:$0 sm:$0xff] }
  0xac   :  { %22543 = vst [vmem:[#allocation38_spill] sm:$0xff] %v18332_v0 }
  0xad   :  { %141 = vperm.xlu1 %17564, %v58_v55  }
  0xae   :  { %243 = vperm.xlu0 %17561, %v58_v55   ;;  %v72_v55 = vpop.permute.xlu0 %71 }
  0xaf   :  { %v153_v34 = vmul.f32 %v18332_v0, %v72_v55 }
  0xb1   :  { %146 = vperm.xlu1 %17564, %v59_v44  }
  0xb2   :  { %247 = vperm.xlu0 %17561, %v59_v44   ;;  %v18338_v44 = vld [vmem:[%s22339_s4] ss:$0 sm:$0xff] }
  0xf2   :  { %v407_v59 = vpop.f32.mrf.mxu0 }
  0xf4   :  { %v13889_v41 = vpop.f32.mrf.mxu0 }
  0xf5   :  { %v169_v41 = vadd.f32 %v18338_v44, %v153_v34  ;;  %v22546_v34 = vmov 0.0  }
  0xfa   :  { %v558_v20 = vpop.f32.mrf.mxu1 }
  0xfb   :  { %v559_v54 = vadd.f32 %v558_v20, %v407_v59 }
  0xfc   :  { %v13924_v47 = vpop.f32.mrf.mxu1 }
  0xfd   :  { %v18343_v47 = vld [vmem:[%s22337_s2 + $0x1] ss:$0 sm:$0xff] }
 0x113   :  { %v662_v61 = vpop.f32.mrf.mxu0 }
 0x115   :  { %v13959_v63 = vpop.f32.mrf.mxu0 }
 0x116   :  { %v663_v63 = vadd.f32 %v662_v61, %v559_v54  ;;  %v22551_v54 = vld [vmem:[#allocation12_spill] sm:$0xff] }
 0x11c   :  { %v751_v33 = vpop.f32.mrf.mxu1 }
 0x11d   :  { %v752_v20 = vadd.f32 %v751_v33, %v663_v63  ;;  %v22553_v33 = vld [vmem:[#allocation13_spill] sm:$0xff] }
 0x11e   :  { %v13994_v32 = vpop.f32.mrf.mxu1  ;;  %v22554_v63 = vld [vmem:[#allocation33_spill] sm:$0xff] }
 0x11f   :  { %v188_v32 = vpop.permute.xlu0 %187 }
 0x120   :  { %v254_v3 = vmul.f32 %v18343_v47, %v188_v32  ;;  %v22555_v32 = vld [vmem:[#allocation14_spill] sm:$0xff] }
 0x135   :  { %v870_v36 = vpop.f32.mrf.mxu0 }
 0x136   :  { %v871_v59 = vadd.f32 %v870_v36, %v752_v20  ;;  %v22552_v36 = vld [vmem:[#allocation31_spill] sm:$0xff]  ;;  %v22557_v20 = vld [vmem:[#allocation18_spill] sm:$0xff] }
 0x137   :  { %v14029_v45 = vpop.f32.mrf.mxu0 }
 0x138   :  { %v270_v45 = vadd.f32 %v254_v3, %v169_v41  ;;  %v22556_v41 = vld [vmem:[#allocation16_spill] sm:$0xff] }
 0x13d   :  { %v957_v55 = vpop.f32.mrf.mxu1 }
 0x13e   :  { %v958_v0 = vadd.f32 %v957_v55, %v871_v59  ;;  %v22558_v59 = vld [vmem:[#allocation20_spill] sm:$0xff]  ;;  %v22559_v55 = vld [vmem:[#allocation22_spill] sm:$0xff] }
 0x13f   :  { %v14064_v14 = vpop.f32.mrf.mxu1 }
 0x140   :  { %v961_v40 = vadd.f32 %v958_v0, %v270_v45  ;;  %v22550_v14 = vld [vmem:[#allocation29_spill] sm:$0xff]  ;;  %v22560_v45 = vld [vmem:[#allocation24_spill] sm:$0xff] }
 0x142   :  { %17565 = vtanh.f32 %v961_v40 }
 0x14f   :  { %v17566_v9 = vpop.eup %17565 }
 0x150   :  { %v18347_v1 = vand.u32 4294901760, %v17566_v9 }
 0x152   :  { %22544 = vst [vmem:[#allocation39_spill] sm:$0xff] %v18347_v1  ;;  %14133 = vmatmul.mubr.f32.vlgmr.msra.gmra.mxu1 %v18347_v1  ;;  %v18351_v61 = vsub.f32 %v17566_v9, %v18347_v1  ;;  %v22549_v9 = vld [vmem:[#allocation27_spill] sm:$0xff] }
 0x153   :  { %14171 = vmatpush3.msra.mxu1 %v17755_v5  ;;  %14202 = vmatprep.mubr.msk.f32.mxu1 %vm17682_vm0, %v22546_v34 }
 0x154   :  { %22545 = vst [vmem:[#allocation40_spill] sm:$0xff] %v18351_v61  ;;  %14172 = vmatprep.subr.mxu1 %v22546_v34  ;;  %v18358_v3 = vand.u32 4294901760, %v18351_v61 }
 0x155   :  { %14173 = vmatpush3.msra.mxu1 %v17757_v6 }
 0x156   :  { %22547 = vst [vmem:[#allocation41_spill] sm:$0xff] %v18358_v3  ;;  %14174 = vmatprep.subr.mxu1 %v22546_v34  ;;  %v1050_v0 = vsub.f32 %v18351_v61, %v18358_v3 }
 0x157   :  { %14175 = vmatpush3.msra.mxu1 %v17759_v7 }
 0x158   :  { %14176 = vmatprep.subr.mxu1 %v22546_v34  ;;  %v18366_v40 = vand.u32 4294901760, %v1050_v0  ;;  %v22561_v0 = vld [vmem:[#allocation26_spill] sm:$0xff] }
 0x159   :  { %14177 = vmatpush3.msra.mxu1 %v17770_v11 }
 0x15a   :  { %22548 = vst [vmem:[#allocation42_spill] sm:$0xff] %v18366_v40  ;;  %14178 = vmatprep.subr.mxu1 %v22546_v34  ;;  %14098 = vmatmul.mubr.f32.vlgmr.msra.gmra.mxu0 %v18366_v40  ;;  %v22564_v40 = vld [vmem:[#allocation32_spill] sm:$0xff] }
 0x15b   :  { %14136 = vmatpush3.msra.mxu0 %v17784_v16  ;;  %14179 = vmatpush3.msra.mxu1 %v17772_v12 }
 0x15c   :  { %14137 = vmatprep.subr.mxu0 %v22546_v34  ;;  %14180 = vmatprep.subr.mxu1 %v22546_v34 }
 0x15d   :  { %14138 = vmatpush3.msra.mxu0 %v17787_v17  ;;  %14181 = vmatpush3.msra.mxu1 %v17774_v13 }
 0x15e   :  { %14139 = vmatprep.subr.mxu0 %v22546_v34  ;;  %14182 = vmatprep.subr.mxu1 %v22546_v34 }
 0x15f   :  { %14140 = vmatpush3.msra.mxu0 %v17792_v19  ;;  %14183 = vmatpush3.msra.mxu1 %v17789_v18 }
 0x160   :  { %14141 = vmatprep.subr.mxu0 %v22546_v34  ;;  %14184 = vmatprep.subr.mxu1 %v22546_v34 }
 0x161   :  { %14142 = vmatpush3.msra.mxu0 %v17799_v21  ;;  %14185 = vmatpush3.msra.mxu1 %v17814_v26 }
 0x162   :  { %14143 = vmatprep.subr.mxu0 %v22546_v34  ;;  %14186 = vmatprep.subr.mxu1 %v22546_v34 }
 0x163   :  { %14144 = vmatpush3.msra.mxu0 %v17802_v22  ;;  %14187 = vmatpush3.msra.mxu1 %v17823_v29 }
 0x164   :  { %14145 = vmatprep.subr.mxu0 %v22546_v34  ;;  %14188 = vmatprep.subr.mxu1 %v22546_v34 }
 0x165   :  { %14146 = vmatpush3.msra.mxu0 %v17829_v31  ;;  %14189 = vmatpush3.msra.mxu1 %v17852_v38 }
 0x166   :  { %14147 = vmatprep.subr.mxu0 %v22546_v34  ;;  %14190 = vmatprep.subr.mxu1 %v22546_v34 }
 0x167   :  { %14148 = vmatpush3.msra.mxu0 %v17849_v37  ;;  %14191 = vmatpush3.msra.mxu1 %v17882_v48 }
 0x168   :  { %14149 = vmatprep.subr.mxu0 %v22546_v34  ;;  %14192 = vmatprep.subr.mxu1 %v22546_v34 }
 0x169   :  { %14150 = vmatpush3.msra.mxu0 %v17876_v46  ;;  %14193 = vmatpush3.msra.mxu1 %v17892_v51 }
 0x16a   :  { %14151 = vmatprep.subr.mxu0 %v22546_v34  ;;  %14194 = vmatprep.subr.mxu1 %v22546_v34 }
 0x16b   :  { %14152 = vmatpush3.msra.mxu0 %v17888_v50  ;;  %14195 = vmatpush3.msra.mxu1 %v17926_v62 }
 0x16c   :  { %14153 = vmatprep.subr.mxu0 %v22546_v34  ;;  %14196 = vmatprep.subr.mxu1 %v22546_v34 }
 0x16d   :  { %14154 = vmatpush3.msra.mxu0 %v17913_v58  ;;  %14197 = vmatpush3.msra.mxu1 %v17938_v4 }
 0x16e   :  { %14155 = vmatprep.subr.mxu0 %v22546_v34  ;;  %14198 = vmatprep.subr.mxu1 %v22546_v34 }
 0x16f   :  { %14156 = vmatpush3.msra.mxu0 %v17932_v2  ;;  %14199 = vmatpush3.msra.mxu1 %v17959_v27 }
 0x170   :  { %14157 = vmatprep.subr.mxu0 %v22546_v34  ;;  %14200 = vmatprep.subr.mxu1 %v22546_v34 }
 0x171   :  { %14158 = vmatpush3.msra.mxu0 %v17953_v15  ;;  %14201 = vmatpush3.msra.mxu1 %v17976_v42 }
 0x172   :  { %14159 = vmatprep.subr.mxu0 %v22546_v34  ;;  %14203 = vmatmul.mubr.f32.vlgmr.msra.gmra.mxu1 %v18358_v3  ;;  %v22563_v3 = vld [vmem:[#allocation30_spill] sm:$0xff] }
 0x173   :  { %14240 = vmatprep.subr.mxu1 %v22546_v34  ;;  %14160 = vmatpush3.msra.mxu0 %v17972_v39 }
 0x174   :  { %14241 = vmatpush3.msra.mxu1 %v17755_v5  ;;  %14161 = vmatprep.subr.mxu0 %v22546_v34 }
 0x175   :  { %14242 = vmatprep.subr.mxu1 %v22546_v34  ;;  %14162 = vmatpush3.msra.mxu0 %v17988_v52 }
 0x176   :  { %14243 = vmatpush3.msra.mxu1 %v17757_v6  ;;  %14163 = vmatprep.subr.mxu0 %v22546_v34 }
 0x177   :  { %14244 = vmatprep.subr.mxu1 %v22546_v34  ;;  %14164 = vmatpush3.msra.mxu0 %v18003_v57 }
 0x178   :  { %14245 = vmatpush3.msra.mxu1 %v17759_v7  ;;  %14165 = vmatprep.subr.mxu0 %v22546_v34 }
 0x179   :  { %14246 = vmatprep.subr.mxu1 %v22546_v34  ;;  %14166 = vmatpush3.msra.mxu0 %v18017_v8 }
 0x17a   :  { %14167 = vmatprep.mubr.msk.f32.mxu0 %vm17682_vm0, %v22546_v34  ;;  %14247 = vmatpush3.msra.mxu1 %v17770_v11 }
 0x17b   :  { %14168 = vmatmul.mubr.f32.vlgmr.msra.gmra.mxu0 %v18351_v61  ;;  %14205 = vmatprep.subr.mxu0 %v22546_v34  ;;  %v22562_v61 = vld [vmem:[#allocation28_spill] sm:$0xff] }
 0x17c   :  { %14248 = vmatprep.subr.mxu1 %v22546_v34  ;;  %14206 = vmatpush3.msra.mxu0 %v17806_v23 }
 0x17d   :  { %14249 = vmatpush3.msra.mxu1 %v17772_v12  ;;  %14207 = vmatprep.subr.mxu0 %v22546_v34 }
 0x17e   :  { %14250 = vmatprep.subr.mxu1 %v22546_v34  ;;  %14208 = vmatpush3.msra.mxu0 %v17809_v24 }
 0x17f   :  { %14251 = vmatpush3.msra.mxu1 %v17774_v13  ;;  %14209 = vmatprep.subr.mxu0 %v22546_v34 }
 0x180   :  { %14252 = vmatprep.subr.mxu1 %v22546_v34  ;;  %14210 = vmatpush3.msra.mxu0 %v17812_v25 }
 0x181   :  { %14253 = vmatpush3.msra.mxu1 %v17789_v18  ;;  %14211 = vmatprep.subr.mxu0 %v22546_v34 }
 0x182   :  { %14254 = vmatprep.subr.mxu1 %v22546_v34  ;;  %14212 = vmatpush3.msra.mxu0 %v17821_v28 }
 0x183   :  { %14255 = vmatpush3.msra.mxu1 %v17814_v26  ;;  %14213 = vmatprep.subr.mxu0 %v22546_v34 }
 0x184   :  { %14256 = vmatprep.subr.mxu1 %v22546_v34  ;;  %14214 = vmatpush3.msra.mxu0 %v17826_v30 }
 0x185   :  { %14257 = vmatpush3.msra.mxu1 %v17823_v29  ;;  %14215 = vmatprep.subr.mxu0 %v22546_v34 }
 0x186   :  { %14258 = vmatprep.subr.mxu1 %v22546_v34  ;;  %14216 = vmatpush3.msra.mxu0 %v17866_v43 }
 0x187   :  { %14259 = vmatpush3.msra.mxu1 %v17852_v38  ;;  %14217 = vmatprep.subr.mxu0 %v22546_v34 }
 0x188   :  { %14260 = vmatprep.subr.mxu1 %v22546_v34  ;;  %14218 = vmatpush3.msra.mxu0 %v17885_v49 }
 0x189   :  { %14261 = vmatpush3.msra.mxu1 %v17882_v48  ;;  %14219 = vmatprep.subr.mxu0 %v22546_v34 }
 0x18a   :  { %14262 = vmatprep.subr.mxu1 %v22546_v34  ;;  %14220 = vmatpush3.msra.mxu0 %v17907_v56 }
 0x18b   :  { %14263 = vmatpush3.msra.mxu1 %v17892_v51  ;;  %14221 = vmatprep.subr.mxu0 %v22546_v34 }
 0x18c   :  { %14264 = vmatprep.subr.mxu1 %v22546_v34  ;;  %14222 = vmatpush3.msra.mxu0 %v17920_v60 }
 0x18d   :  { %14265 = vmatpush3.msra.mxu1 %v17926_v62  ;;  %14223 = vmatprep.subr.mxu0 %v22546_v34 }
 0x18e   :  { %14266 = vmatprep.subr.mxu1 %v22546_v34  ;;  %14224 = vmatpush3.msra.mxu0 %v17947_v10 }
 0x18f   :  { %14267 = vmatpush3.msra.mxu1 %v17938_v4  ;;  %14225 = vmatprep.subr.mxu0 %v22546_v34 }
 0x190   :  { %14268 = vmatprep.subr.mxu1 %v22546_v34  ;;  %14226 = vmatpush3.msra.mxu0 %v17966_v35 }
 0x191   :  { %14269 = vmatpush3.msra.mxu1 %v17959_v27  ;;  %14227 = vmatprep.subr.mxu0 %v22546_v34 }
 0x192   :  { %14270 = vmatprep.subr.mxu1 %v22546_v34  ;;  %14228 = vmatpush3.msra.mxu0 %v17985_v53 }
 0x193   :  { %14271 = vmatpush3.msra.mxu1 %v17976_v42  ;;  %14272 = vmatprep.mubr.msk.f32.mxu1 %vm17682_vm0, %v22546_v34 }
 0x194   :  { %14229 = vmatprep.subr.mxu0 %v22546_v34  ;;  %14273 = vmatmul.mubr.f32.vlgmr.msra.gmra.mxu1 %v18347_v1 }
 0x195   :  { %14230 = vmatpush3.msra.mxu0 %v22549_v9  ;;  %14237 = vmatprep.mubr.msk.f32.mxu0 %vm17682_vm0, %v22546_v34 }
 0x196   :  { %14231 = vmatprep.subr.mxu0 %v22546_v34  ;;  %14310 = vmatprep.subr.mxu1 %v22546_v34 }
 0x197   :  { %14232 = vmatpush3.msra.mxu0 %v22550_v14  ;;  %14311 = vmatpush3.msra.mxu1 %v22551_v54 }
 0x198   :  { %14233 = vmatprep.subr.mxu0 %v22546_v34  ;;  %14312 = vmatprep.subr.mxu1 %v22546_v34 }
 0x199   :  { %14234 = vmatpush3.msra.mxu0 %v22552_v36  ;;  %14313 = vmatpush3.msra.mxu1 %v22553_v33  ;;  %v22569_v33 = vld [vmem:[#allocation38_spill] sm:$0xff] }
 0x19a   :  { %14235 = vmatprep.subr.mxu0 %v22546_v34  ;;  %14314 = vmatprep.subr.mxu1 %v22546_v34 }
 0x19b   :  { %14236 = vmatpush3.msra.mxu0 %v22554_v63  ;;  %14315 = vmatpush3.msra.mxu1 %v22555_v32 }
 0x19c   :  { %14238 = vmatmul.mubr.f32.vlgmr.msra.gmra.mxu0 %v18347_v1  ;;  %14316 = vmatprep.subr.mxu1 %v22546_v34  ;;  %v22565_v1 = vld [vmem:[#allocation34_spill] sm:$0xff] }
 0x19d   :  { %14317 = vmatpush3.msra.mxu1 %v22556_v41  ;;  %14275 = vmatprep.subr.mxu0 %v22546_v34 }
 0x19e   :  { %14318 = vmatprep.subr.mxu1 %v22546_v34  ;;  %14276 = vmatpush3.msra.mxu0 %v17755_v5 }
 0x19f   :  { %14319 = vmatpush3.msra.mxu1 %v22557_v20  ;;  %14277 = vmatprep.subr.mxu0 %v22546_v34  ;;  %v77_v20 = vpop.permute.xlu1 %76 }
 0x1a0   :  { %14320 = vmatprep.subr.mxu1 %v22546_v34  ;;  %14278 = vmatpush3.msra.mxu0 %v17757_v6  ;;  %v154_v36 = vmul.f32 %v22569_v33, %v77_v20  ;;  %v22584_v20 = vld [vmem:[#allocation13_spill] sm:$0xff] }
 0x1a1   :  { %14321 = vmatpush3.msra.mxu1 %v22558_v59  ;;  %14279 = vmatprep.subr.mxu0 %v22546_v34 }
 0x1a2   :  { %14322 = vmatprep.subr.mxu1 %v22546_v34  ;;  %14280 = vmatpush3.msra.mxu0 %v17759_v7  ;;  %v170_v9 = vadd.f32 %v18338_v44, %v154_v36  ;;  %v22580_v36 = vld [vmem:[#allocation27_spill] sm:$0xff] }
 0x1a3   :  { %14323 = vmatpush3.msra.mxu1 %v22559_v55  ;;  %14281 = vmatprep.subr.mxu0 %v22546_v34  ;;  %v192_v14 = vpop.permute.xlu1 %191 }
 0x1a4   :  { %14324 = vmatprep.subr.mxu1 %v22546_v34  ;;  %14282 = vmatpush3.msra.mxu0 %v17770_v11  ;;  %v255_v53 = vmul.f32 %v18343_v47, %v192_v14  ;;  %v22578_v14 = vld [vmem:[#allocation23_spill] sm:$0xff] }
 0x1a5   :  { %14325 = vmatpush3.msra.mxu1 %v22560_v45  ;;  %14283 = vmatprep.subr.mxu0 %v22546_v34 }
 0x1a6   :  { %14326 = vmatprep.subr.mxu1 %v22546_v34  ;;  %14284 = vmatpush3.msra.mxu0 %v17772_v12  ;;  %v271_v60 = vadd.f32 %v255_v53, %v170_v9  ;;  %v22575_v53 = vld [vmem:[#allocation17_spill] sm:$0xff] }
 0x1a7   :  { %14327 = vmatpush3.msra.mxu1 %v22561_v0  ;;  %14285 = vmatprep.subr.mxu0 %v22546_v34  ;;  %v22577_v9 = vld [vmem:[#allocation21_spill] sm:$0xff] }
 0x1a8   :  { %14328 = vmatprep.subr.mxu1 %v22546_v34  ;;  %14286 = vmatpush3.msra.mxu0 %v17774_v13 }
 0x1a9   :  { %14329 = vmatpush3.msra.mxu1 %v22562_v61  ;;  %14287 = vmatprep.subr.mxu0 %v22546_v34 }
 0x1aa   :  { %14330 = vmatprep.subr.mxu1 %v22546_v34  ;;  %14288 = vmatpush3.msra.mxu0 %v17789_v18 }
 0x1ab   :  { %14331 = vmatpush3.msra.mxu1 %v22563_v3  ;;  %14289 = vmatprep.subr.mxu0 %v22546_v34  ;;  %v22566_v3 = vld [vmem:[#allocation35_spill] sm:$0xff] }
 0x1ac   :  { %14332 = vmatprep.subr.mxu1 %v22546_v34  ;;  %14290 = vmatpush3.msra.mxu0 %v17814_v26 }
 0x1ad   :  { %14333 = vmatpush3.msra.mxu1 %v22564_v40  ;;  %14291 = vmatprep.subr.mxu0 %v22546_v34  ;;  %v22567_v40 = vld [vmem:[#allocation36_spill] sm:$0xff] }
 0x1ae   :  { %14334 = vmatprep.subr.mxu1 %v22546_v34  ;;  %14292 = vmatpush3.msra.mxu0 %v17823_v29 }
 0x1af   :  { %14335 = vmatpush3.msra.mxu1 %v22565_v1  ;;  %14293 = vmatprep.subr.mxu0 %v22546_v34  ;;  %v22568_v1 = vld [vmem:[#allocation37_spill] sm:$0xff] }
 0x1b0   :  { %14336 = vmatprep.subr.mxu1 %v22546_v34  ;;  %14294 = vmatpush3.msra.mxu0 %v17852_v38 }
 0x1b1   :  { %14337 = vmatpush3.msra.mxu1 %v22566_v3  ;;  %14295 = vmatprep.subr.mxu0 %v22546_v34 }
 0x1b2   :  { %14338 = vmatprep.subr.mxu1 %v22546_v34  ;;  %14296 = vmatpush3.msra.mxu0 %v17882_v48 }
 0x1b3   :  { %14339 = vmatpush3.msra.mxu1 %v22567_v40  ;;  %14297 = vmatprep.subr.mxu0 %v22546_v34 }
 0x1b4   :  { %14340 = vmatprep.subr.mxu1 %v22546_v34  ;;  %14298 = vmatpush3.msra.mxu0 %v17892_v51 }
 0x1b5   :  { %14341 = vmatpush3.msra.mxu1 %v22568_v1  ;;  %14299 = vmatprep.subr.mxu0 %v22546_v34 }
 0x1b6   :  { %14342 = vmatprep.mubr.msk.f32.mxu1 %vm17682_vm0, %v22546_v34  ;;  %14380 = vmatprep.subr.mxu1 %v22546_v34 }
 0x1b7   :  { %14300 = vmatpush3.msra.mxu0 %v17926_v62  ;;  %14307 = vmatprep.mubr.msk.f32.mxu0 %vm17682_vm0, %v22546_v34 }
 0x1b8   :  { %14301 = vmatprep.subr.mxu0 %v22546_v34 }
 0x1b9   :  { %14302 = vmatpush3.msra.mxu0 %v17938_v4 }
 0x1ba   :  { %14303 = vmatprep.subr.mxu0 %v22546_v34 }
 0x1bb   :  { %14304 = vmatpush3.msra.mxu0 %v17959_v27 }
 0x1bc   :  { %14305 = vmatprep.subr.mxu0 %v22546_v34 }
 0x1bd   :  { %14306 = vmatpush3.msra.mxu0 %v17976_v42 }
 0x1be   :  { %14345 = vmatprep.subr.mxu0 %v22546_v34 }
 0x212   :  { %v1204_v1 = vpop.f32.mrf.mxu1 }
 0x214   :  { %v14134_v40 = vpop.f32.mrf.mxu1 }
 0x21a   :  { %v1053_v3 = vpop.f32.mrf.mxu0 }
 0x21b   :  { %v1205_v32 = vadd.f32 %v1204_v1, %v1053_v3  ;;  %v22576_v3 = vld [vmem:[#allocation19_spill] sm:$0xff] }
 0x21c   :  { %v14099_v61 = vpop.f32.mrf.mxu0 }
 0x232   :  { %v1397_v0 = vpop.f32.mrf.mxu1 }
 0x234   :  { %v14204_v45 = vpop.f32.mrf.mxu1 }
 0x23b   :  { %v1308_v55 = vpop.f32.mrf.mxu0 }
 0x23c   :  { %v1309_v54 = vadd.f32 %v1308_v55, %v1205_v32  ;;  %v22582_v32 = vld [vmem:[#allocation12_spill] sm:$0xff]  ;;  %v22585_v55 = vld [vmem:[#allocation33_spill] sm:$0xff] }
 0x23d   :  { %v14169_v59 = vpop.f32.mrf.mxu0 }
 0x23e   :  { %v1398_v35 = vadd.f32 %v1397_v0, %v1309_v54  ;;  %v22579_v54 = vld [vmem:[#allocation25_spill] sm:$0xff]  ;;  %v22586_v0 = vld [vmem:[#allocation14_spill] sm:$0xff] }
 0x254   :  { %v1603_v41 = vpop.f32.mrf.mxu1 }
 0x256   :  { %v14274_v63 = vpop.f32.mrf.mxu1 }
 0x257   :  { %v22581_v63 = vld [vmem:[#allocation29_spill] sm:$0xff] }
 0x25c   :  { %v1516_v40 = vpop.f32.mrf.mxu0 }
 0x25d   :  { %v1517_v10 = vadd.f32 %v1516_v40, %v1398_v35  ;;  %v22587_v40 = vld [vmem:[#allocation16_spill] sm:$0xff] }
 0x25e   :  { %v14239_v61 = vpop.f32.mrf.mxu0 }
 0x25f   :  { %v1604_v45 = vadd.f32 %v1603_v41, %v1517_v10  ;;  %v22574_v10 = vld [vmem:[#allocation15_spill] sm:$0xff]  ;;  %v22588_v61 = vld [vmem:[#allocation18_spill] sm:$0xff] }
 0x260   :  { %v22583_v41 = vld [vmem:[#allocation31_spill] sm:$0xff] }
 0x261   :  { %v1607_v56 = vadd.f32 %v1604_v45, %v271_v60  ;;  %v22589_v45 = vld [vmem:[#allocation20_spill] sm:$0xff] }
 0x263   :  { %17567 = vtanh.f32 %v1607_v56 }
 0x270   :  { %v17568_v59 = vpop.eup %17567 }
 0x271   :  { %v18572_v49 = vand.u32 4294901760, %v17568_v59 }
 0x273   :  { %22570 = vst [vmem:[#allocation38_spill] sm:$0xff] %v18572_v49  ;;  %14343 = vmatmul.mubr.f32.vlgmr.msra.gmra.mxu1 %v18572_v49  ;;  %v18576_v1 = vsub.f32 %v17568_v59, %v18572_v49  ;;  %v22590_v59 = vld [vmem:[#allocation22_spill] sm:$0xff] }
 0x274   :  { %14381 = vmatpush3.msra.mxu1 %v17755_v5  ;;  %14412 = vmatprep.mubr.msk.f32.mxu1 %vm17682_vm0, %v22546_v34 }
 0x275   :  { %22571 = vst [vmem:[#allocation43_spill] sm:$0xff] %v18576_v1  ;;  %14382 = vmatprep.subr.mxu1 %v22546_v34  ;;  %v18583_v35 = vand.u32 4294901760, %v18576_v1 }
 0x276   :  { %14383 = vmatpush3.msra.mxu1 %v17757_v6 }
 0x277   :  { %22572 = vst [vmem:[#allocation44_spill] sm:$0xff] %v18583_v35  ;;  %14384 = vmatprep.subr.mxu1 %v22546_v34  ;;  %v1696_v56 = vsub.f32 %v18576_v1, %v18583_v35 }
 0x278   :  { %14385 = vmatpush3.msra.mxu1 %v17759_v7 }
 0x279   :  { %14386 = vmatprep.subr.mxu1 %v22546_v34  ;;  %v18591_v60 = vand.u32 4294901760, %v1696_v56  ;;  %v22591_v56 = vld [vmem:[#allocation24_spill] sm:$0xff] }
 0x27a   :  { %14387 = vmatpush3.msra.mxu1 %v17770_v11 }
 0x27b   :  { %22573 = vst [vmem:[#allocation45_spill] sm:$0xff] %v18591_v60  ;;  %14388 = vmatprep.subr.mxu1 %v22546_v34  ;;  %14308 = vmatmul.mubr.f32.vlgmr.msra.gmra.mxu0 %v18591_v60  ;;  %v22594_v60 = vld [vmem:[#allocation30_spill] sm:$0xff] }
 0x27c   :  { %14346 = vmatpush3.msra.mxu0 %v17784_v16  ;;  %14389 = vmatpush3.msra.mxu1 %v17772_v12 }
 0x27d   :  { %14347 = vmatprep.subr.mxu0 %v22546_v34  ;;  %14390 = vmatprep.subr.mxu1 %v22546_v34 }
 0x27e   :  { %14348 = vmatpush3.msra.mxu0 %v17787_v17  ;;  %14391 = vmatpush3.msra.mxu1 %v17774_v13 }
 0x27f   :  { %14349 = vmatprep.subr.mxu0 %v22546_v34  ;;  %14392 = vmatprep.subr.mxu1 %v22546_v34 }
 0x280   :  { %14350 = vmatpush3.msra.mxu0 %v17792_v19  ;;  %14393 = vmatpush3.msra.mxu1 %v17789_v18 }
 0x281   :  { %14351 = vmatprep.subr.mxu0 %v22546_v34  ;;  %14394 = vmatprep.subr.mxu1 %v22546_v34 }
 0x282   :  { %14352 = vmatpush3.msra.mxu0 %v17799_v21  ;;  %14395 = vmatpush3.msra.mxu1 %v17814_v26 }
 0x283   :  { %14353 = vmatprep.subr.mxu0 %v22546_v34  ;;  %14396 = vmatprep.subr.mxu1 %v22546_v34 }
 0x284   :  { %14354 = vmatpush3.msra.mxu0 %v17802_v22  ;;  %14397 = vmatpush3.msra.mxu1 %v17823_v29 }
 0x285   :  { %14355 = vmatprep.subr.mxu0 %v22546_v34  ;;  %14398 = vmatprep.subr.mxu1 %v22546_v34 }
 0x286   :  { %14356 = vmatpush3.msra.mxu0 %v17829_v31  ;;  %14399 = vmatpush3.msra.mxu1 %v17852_v38 }
 0x287   :  { %14357 = vmatprep.subr.mxu0 %v22546_v34  ;;  %14400 = vmatprep.subr.mxu1 %v22546_v34 }
 0x288   :  { %14358 = vmatpush3.msra.mxu0 %v17849_v37  ;;  %14401 = vmatpush3.msra.mxu1 %v17882_v48 }
 0x289   :  { %14359 = vmatprep.subr.mxu0 %v22546_v34  ;;  %14402 = vmatprep.subr.mxu1 %v22546_v34 }
 0x28a   :  { %14360 = vmatpush3.msra.mxu0 %v17876_v46  ;;  %14403 = vmatpush3.msra.mxu1 %v17892_v51 }
 0x28b   :  { %14361 = vmatprep.subr.mxu0 %v22546_v34  ;;  %14404 = vmatprep.subr.mxu1 %v22546_v34 }
 0x28c   :  { %14362 = vmatpush3.msra.mxu0 %v17888_v50  ;;  %14405 = vmatpush3.msra.mxu1 %v17926_v62 }
 0x28d   :  { %14363 = vmatprep.subr.mxu0 %v22546_v34  ;;  %14406 = vmatprep.subr.mxu1 %v22546_v34 }
 0x28e   :  { %14364 = vmatpush3.msra.mxu0 %v17913_v58  ;;  %14407 = vmatpush3.msra.mxu1 %v17938_v4 }
 0x28f   :  { %14365 = vmatprep.subr.mxu0 %v22546_v34  ;;  %14408 = vmatprep.subr.mxu1 %v22546_v34 }
 0x290   :  { %14366 = vmatpush3.msra.mxu0 %v17932_v2  ;;  %14409 = vmatpush3.msra.mxu1 %v17959_v27 }
 0x291   :  { %14367 = vmatprep.subr.mxu0 %v22546_v34  ;;  %14410 = vmatprep.subr.mxu1 %v22546_v34 }
 0x292   :  { %14368 = vmatpush3.msra.mxu0 %v17953_v15  ;;  %14411 = vmatpush3.msra.mxu1 %v17976_v42 }
 0x293   :  { %14369 = vmatprep.subr.mxu0 %v22546_v34  ;;  %14413 = vmatmul.mubr.f32.vlgmr.msra.gmra.mxu1 %v18583_v35  ;;  %v22593_v35 = vld [vmem:[#allocation28_spill] sm:$0xff] }
 0x294   :  { %14450 = vmatprep.subr.mxu1 %v22546_v34  ;;  %14370 = vmatpush3.msra.mxu0 %v17972_v39 }
 0x295   :  { %14451 = vmatpush3.msra.mxu1 %v17755_v5  ;;  %14371 = vmatprep.subr.mxu0 %v22546_v34 }
 0x296   :  { %14452 = vmatprep.subr.mxu1 %v22546_v34  ;;  %14372 = vmatpush3.msra.mxu0 %v17988_v52 }
 0x297   :  { %14453 = vmatpush3.msra.mxu1 %v17757_v6  ;;  %14373 = vmatprep.subr.mxu0 %v22546_v34 }
 0x298   :  { %14454 = vmatprep.subr.mxu1 %v22546_v34  ;;  %14374 = vmatpush3.msra.mxu0 %v18003_v57 }
 0x299   :  { %14455 = vmatpush3.msra.mxu1 %v17759_v7  ;;  %14375 = vmatprep.subr.mxu0 %v22546_v34 }
 0x29a   :  { %14456 = vmatprep.subr.mxu1 %v22546_v34  ;;  %14376 = vmatpush3.msra.mxu0 %v18017_v8 }
 0x29b   :  { %14377 = vmatprep.mubr.msk.f32.mxu0 %vm17682_vm0, %v22546_v34  ;;  %14457 = vmatpush3.msra.mxu1 %v17770_v11 }
 0x29c   :  { %14378 = vmatmul.mubr.f32.vlgmr.msra.gmra.mxu0 %v18576_v1  ;;  %14415 = vmatprep.subr.mxu0 %v22546_v34  ;;  %v22592_v1 = vld [vmem:[#allocation26_spill] sm:$0xff] }
 0x29d   :  { %14458 = vmatprep.subr.mxu1 %v22546_v34  ;;  %14416 = vmatpush3.msra.mxu0 %v17806_v23 }
 0x29e   :  { %14459 = vmatpush3.msra.mxu1 %v17772_v12  ;;  %14417 = vmatprep.subr.mxu0 %v22546_v34 }
 0x29f   :  { %14460 = vmatprep.subr.mxu1 %v22546_v34  ;;  %14418 = vmatpush3.msra.mxu0 %v17809_v24 }
 0x2a0   :  { %14461 = vmatpush3.msra.mxu1 %v17774_v13  ;;  %14419 = vmatprep.subr.mxu0 %v22546_v34 }
 0x2a1   :  { %14462 = vmatprep.subr.mxu1 %v22546_v34  ;;  %14420 = vmatpush3.msra.mxu0 %v17812_v25 }
 0x2a2   :  { %14463 = vmatpush3.msra.mxu1 %v17789_v18  ;;  %14421 = vmatprep.subr.mxu0 %v22546_v34 }
 0x2a3   :  { %14464 = vmatprep.subr.mxu1 %v22546_v34  ;;  %14422 = vmatpush3.msra.mxu0 %v17821_v28 }
 0x2a4   :  { %14465 = vmatpush3.msra.mxu1 %v17814_v26  ;;  %14423 = vmatprep.subr.mxu0 %v22546_v34 }
 0x2a5   :  { %14466 = vmatprep.subr.mxu1 %v22546_v34  ;;  %14424 = vmatpush3.msra.mxu0 %v17826_v30 }
 0x2a6   :  { %14467 = vmatpush3.msra.mxu1 %v17823_v29  ;;  %14425 = vmatprep.subr.mxu0 %v22546_v34 }
 0x2a7   :  { %14468 = vmatprep.subr.mxu1 %v22546_v34  ;;  %14426 = vmatpush3.msra.mxu0 %v17866_v43 }
 0x2a8   :  { %14469 = vmatpush3.msra.mxu1 %v17852_v38  ;;  %14427 = vmatprep.subr.mxu0 %v22546_v34 }
 0x2a9   :  { %14470 = vmatprep.subr.mxu1 %v22546_v34  ;;  %14428 = vmatpush3.msra.mxu0 %v22574_v10 }
 0x2aa   :  { %14471 = vmatpush3.msra.mxu1 %v17882_v48  ;;  %14429 = vmatprep.subr.mxu0 %v22546_v34 }
 0x2ab   :  { %14472 = vmatprep.subr.mxu1 %v22546_v34  ;;  %14430 = vmatpush3.msra.mxu0 %v22575_v53 }
 0x2ac   :  { %14473 = vmatpush3.msra.mxu1 %v17892_v51  ;;  %14431 = vmatprep.subr.mxu0 %v22546_v34 }
 0x2ad   :  { %14474 = vmatprep.subr.mxu1 %v22546_v34  ;;  %14432 = vmatpush3.msra.mxu0 %v22576_v3 }
 0x2ae   :  { %14475 = vmatpush3.msra.mxu1 %v17926_v62  ;;  %14433 = vmatprep.subr.mxu0 %v22546_v34 }
 0x2af   :  { %14476 = vmatprep.subr.mxu1 %v22546_v34  ;;  %14434 = vmatpush3.msra.mxu0 %v22577_v9 }
 0x2b0   :  { %14477 = vmatpush3.msra.mxu1 %v17938_v4  ;;  %14435 = vmatprep.subr.mxu0 %v22546_v34 }
 0x2b1   :  { %14478 = vmatprep.subr.mxu1 %v22546_v34  ;;  %14436 = vmatpush3.msra.mxu0 %v22578_v14 }
 0x2b2   :  { %14479 = vmatpush3.msra.mxu1 %v17959_v27  ;;  %14437 = vmatprep.subr.mxu0 %v22546_v34 }
 0x2b3   :  { %14480 = vmatprep.subr.mxu1 %v22546_v34  ;;  %14438 = vmatpush3.msra.mxu0 %v22579_v54 }
 0x2b4   :  { %14481 = vmatpush3.msra.mxu1 %v17976_v42  ;;  %14482 = vmatprep.mubr.msk.f32.mxu1 %vm17682_vm0, %v22546_v34 }
 0x2b5   :  { %14439 = vmatprep.subr.mxu0 %v22546_v34  ;;  %14483 = vmatmul.mubr.f32.vlgmr.msra.gmra.mxu1 %v18572_v49 }
 0x2b6   :  { %14440 = vmatpush3.msra.mxu0 %v22580_v36  ;;  %14447 = vmatprep.mubr.msk.f32.mxu0 %vm17682_vm0, %v22546_v34 }
 0x2b7   :  { %14441 = vmatprep.subr.mxu0 %v22546_v34  ;;  %14520 = vmatprep.subr.mxu1 %v22546_v34 }
 0x2b8   :  { %14442 = vmatpush3.msra.mxu0 %v22581_v63  ;;  %14521 = vmatpush3.msra.mxu1 %v22582_v32  ;;  %v196_v63 = vpop.permute.xlu0 %195 }
 0x2b9   :  { %14443 = vmatprep.subr.mxu0 %v22546_v34  ;;  %14522 = vmatprep.subr.mxu1 %v22546_v34  ;;  %v256_v54 = vmul.f32 %v18343_v47, %v196_v63  ;;  %v22610_v63 = vld [vmem:[#allocation29_spill] sm:$0xff] }
 0x2ba   :  { %14444 = vmatpush3.msra.mxu0 %v22583_v41  ;;  %14523 = vmatpush3.msra.mxu1 %v22584_v20 }
 0x2bb   :  { %14445 = vmatprep.subr.mxu0 %v22546_v34  ;;  %14524 = vmatprep.subr.mxu1 %v22546_v34 }
 0x2bc   :  { %14446 = vmatpush3.msra.mxu0 %v22585_v55  ;;  %14525 = vmatpush3.msra.mxu1 %v22586_v0  ;;  %v82_v55 = vpop.permute.xlu1 %81 }
 0x2bd   :  { %14448 = vmatmul.mubr.f32.vlgmr.msra.gmra.mxu0 %v18572_v49  ;;  %14526 = vmatprep.subr.mxu1 %v22546_v34  ;;  %v22595_v49 = vld [vmem:[#allocation32_spill] sm:$0xff]  ;;  %v155_v41 = vmul.f32 %v22569_v33, %v82_v55  ;;  %v22614_v55 = vld [vmem:[#allocation33_spill] sm:$0xff] }
 0x2be   :  { %14527 = vmatpush3.msra.mxu1 %v22587_v40  ;;  %14485 = vmatprep.subr.mxu0 %v22546_v34 }
 0x2bf   :  { %14528 = vmatprep.subr.mxu1 %v22546_v34  ;;  %14486 = vmatpush3.msra.mxu0 %v17755_v5  ;;  %v171_v36 = vadd.f32 %v18338_v44, %v155_v41  ;;  %v22612_v41 = vld [vmem:[#allocation31_spill] sm:$0xff] }
 0x2c0   :  { %14529 = vmatpush3.msra.mxu1 %v22588_v61  ;;  %14487 = vmatprep.subr.mxu0 %v22546_v34 }
 0x2c1   :  { %14530 = vmatprep.subr.mxu1 %v22546_v34  ;;  %14488 = vmatpush3.msra.mxu0 %v17757_v6  ;;  %v272_v3 = vadd.f32 %v256_v54, %v171_v36  ;;  %v22608_v54 = vld [vmem:[#allocation25_spill] sm:$0xff]  ;;  %v22609_v36 = vld [vmem:[#allocation27_spill] sm:$0xff] }
 0x2c2   :  { %14531 = vmatpush3.msra.mxu1 %v22589_v45  ;;  %14489 = vmatprep.subr.mxu0 %v22546_v34 }
 0x2c3   :  { %14532 = vmatprep.subr.mxu1 %v22546_v34  ;;  %14490 = vmatpush3.msra.mxu0 %v17759_v7 }
 0x2c4   :  { %14533 = vmatpush3.msra.mxu1 %v22590_v59  ;;  %14491 = vmatprep.subr.mxu0 %v22546_v34 }
 0x2c5   :  { %14534 = vmatprep.subr.mxu1 %v22546_v34  ;;  %14492 = vmatpush3.msra.mxu0 %v17770_v11 }
 0x2c6   :  { %14535 = vmatpush3.msra.mxu1 %v22591_v56  ;;  %14493 = vmatprep.subr.mxu0 %v22546_v34 }
 0x2c7   :  { %14536 = vmatprep.subr.mxu1 %v22546_v34  ;;  %14494 = vmatpush3.msra.mxu0 %v17772_v12 }
 0x2c8   :  { %14537 = vmatpush3.msra.mxu1 %v22592_v1  ;;  %14495 = vmatprep.subr.mxu0 %v22546_v34 }
 0x2c9   :  { %14538 = vmatprep.subr.mxu1 %v22546_v34  ;;  %14496 = vmatpush3.msra.mxu0 %v17774_v13 }
 0x2ca   :  { %14539 = vmatpush3.msra.mxu1 %v22593_v35  ;;  %14497 = vmatprep.subr.mxu0 %v22546_v34  ;;  %v22596_v35 = vld [vmem:[#allocation34_spill] sm:$0xff] }
 0x2cb   :  { %14540 = vmatprep.subr.mxu1 %v22546_v34  ;;  %14498 = vmatpush3.msra.mxu0 %v17789_v18 }
 0x2cc   :  { %14541 = vmatpush3.msra.mxu1 %v22594_v60  ;;  %14499 = vmatprep.subr.mxu0 %v22546_v34  ;;  %v22597_v60 = vld [vmem:[#allocation35_spill] sm:$0xff] }
 0x2cd   :  { %14542 = vmatprep.subr.mxu1 %v22546_v34  ;;  %14500 = vmatpush3.msra.mxu0 %v17814_v26 }
 0x2ce   :  { %14543 = vmatpush3.msra.mxu1 %v22595_v49  ;;  %14501 = vmatprep.subr.mxu0 %v22546_v34  ;;  %v22598_v49 = vld [vmem:[#allocation36_spill] sm:$0xff] }
 0x2cf   :  { %14544 = vmatprep.subr.mxu1 %v22546_v34  ;;  %14502 = vmatpush3.msra.mxu0 %v17823_v29 }
 0x2d0   :  { %14545 = vmatpush3.msra.mxu1 %v22596_v35  ;;  %14503 = vmatprep.subr.mxu0 %v22546_v34  ;;  %v22599_v35 = vld [vmem:[#allocation37_spill] sm:$0xff] }
 0x2d1   :  { %14546 = vmatprep.subr.mxu1 %v22546_v34  ;;  %14504 = vmatpush3.msra.mxu0 %v17852_v38 }
 0x2d2   :  { %14547 = vmatpush3.msra.mxu1 %v22597_v60  ;;  %14505 = vmatprep.subr.mxu0 %v22546_v34 }
 0x2d3   :  { %14548 = vmatprep.subr.mxu1 %v22546_v34  ;;  %14506 = vmatpush3.msra.mxu0 %v17882_v48 }
 0x2d4   :  { %14549 = vmatpush3.msra.mxu1 %v22598_v49  ;;  %14507 = vmatprep.subr.mxu0 %v22546_v34 }
 0x2d5   :  { %14550 = vmatprep.subr.mxu1 %v22546_v34  ;;  %14508 = vmatpush3.msra.mxu0 %v17892_v51 }
 0x2d6   :  { %14551 = vmatpush3.msra.mxu1 %v22599_v35  ;;  %14509 = vmatprep.subr.mxu0 %v22546_v34 }
 0x2d7   :  { %14552 = vmatprep.mubr.msk.f32.mxu1 %vm17682_vm0, %v22546_v34  ;;  %14590 = vmatprep.subr.mxu1 %v22546_v34 }
 0x2d8   :  { %14510 = vmatpush3.msra.mxu0 %v17926_v62  ;;  %14517 = vmatprep.mubr.msk.f32.mxu0 %vm17682_vm0, %v22546_v34 }
 0x2d9   :  { %14511 = vmatprep.subr.mxu0 %v22546_v34 }
 0x2da   :  { %14512 = vmatpush3.msra.mxu0 %v17938_v4 }
 0x2db   :  { %14513 = vmatprep.subr.mxu0 %v22546_v34 }
 0x2dc   :  { %14514 = vmatpush3.msra.mxu0 %v17959_v27 }
 0x2dd   :  { %14515 = vmatprep.subr.mxu0 %v22546_v34 }
 0x2de   :  { %14516 = vmatpush3.msra.mxu0 %v17976_v42 }
 0x2df   :  { %14555 = vmatprep.subr.mxu0 %v22546_v34 }
 0x333   :  { %v1850_v35 = vpop.f32.mrf.mxu1 }
 0x335   :  { %v14344_v49 = vpop.f32.mrf.mxu1 }
 0x33b   :  { %v1699_v60 = vpop.f32.mrf.mxu0 }
 0x33c   :  { %v1851_v0 = vadd.f32 %v1850_v35, %v1699_v60 }
 0x33d   :  { %v14309_v1 = vpop.f32.mrf.mxu0 }
 0x353   :  { %v2043_v56 = vpop.f32.mrf.mxu1 }
 0x355   :  { %v14414_v59 = vpop.f32.mrf.mxu1 }
 0x35c   :  { %v1954_v45 = vpop.f32.mrf.mxu0 }
 0x35d   :  { %v1955_v32 = vadd.f32 %v1954_v45, %v1851_v0  ;;  %v22615_v0 = vld [vmem:[#allocation14_spill] sm:$0xff] }
 0x35e   :  { %v14379_v61 = vpop.f32.mrf.mxu0  ;;  %v22617_v45 = vld [vmem:[#allocation18_spill] sm:$0xff] }
 0x35f   :  { %v2044_v14 = vadd.f32 %v2043_v56, %v1955_v32  ;;  %v22611_v32 = vld [vmem:[#allocation12_spill] sm:$0xff] }
 0x360   :  { %v22618_v56 = vld [vmem:[#allocation20_spill] sm:$0xff] }
 0x375   :  { %v2249_v40 = vpop.f32.mrf.mxu1 }
 0x377   :  { %v14484_v20 = vpop.f32.mrf.mxu1 }
 0x378   :  { %v22613_v20 = vld [vmem:[#allocation13_spill] sm:$0xff] }
 0x37d   :  { %v2162_v49 = vpop.f32.mrf.mxu0 }
 0x37e   :  { %v2163_v9 = vadd.f32 %v2162_v49, %v2044_v14  ;;  %v22607_v14 = vld [vmem:[#allocation23_spill] sm:$0xff]  ;;  %v22619_v49 = vld [vmem:[#allocation22_spill] sm:$0xff] }
 0x37f   :  { %v14449_v1 = vpop.f32.mrf.mxu0 }
 0x380   :  { %v2250_v59 = vadd.f32 %v2249_v40, %v2163_v9  ;;  %v22606_v9 = vld [vmem:[#allocation21_spill] sm:$0xff]  ;;  %v22616_v40 = vld [vmem:[#allocation16_spill] sm:$0xff] }
 0x381   :  { %v22620_v1 = vld [vmem:[#allocation24_spill] sm:$0xff] }
 0x382   :  { %v2253_v53 = vadd.f32 %v2250_v59, %v272_v3  ;;  %v22605_v3 = vld [vmem:[#allocation19_spill] sm:$0xff]  ;;  %v22621_v59 = vld [vmem:[#allocation26_spill] sm:$0xff] }
 0x384   :  { %17569 = vtanh.f32 %v2253_v53  ;;  %v22604_v53 = vld [vmem:[#allocation17_spill] sm:$0xff] }
 0x391   :  { %v17570_v61 = vpop.eup %17569 }
 0x392   :  { %v18797_v35 = vand.u32 4294901760, %v17570_v61 }
 0x394   :  { %22600 = vst [vmem:[#allocation15_spill] sm:$0xff] %v18797_v35  ;;  %14553 = vmatmul.mubr.f32.vlgmr.msra.gmra.mxu1 %v18797_v35  ;;  %v18801_v33 = vsub.f32 %v17570_v61, %v18797_v35  ;;  %v22622_v61 = vld [vmem:[#allocation28_spill] sm:$0xff] }
 0x395   :  { %14591 = vmatpush3.msra.mxu1 %v17755_v5  ;;  %14622 = vmatprep.mubr.msk.f32.mxu1 %vm17682_vm0, %v22546_v34 }
 0x396   :  { %22601 = vst [vmem:[#allocation46_spill] sm:$0xff] %v18801_v33  ;;  %14592 = vmatprep.subr.mxu1 %v22546_v34  ;;  %v18808_v44 = vand.u32 4294901760, %v18801_v33 }
 0x397   :  { %14593 = vmatpush3.msra.mxu1 %v17757_v6 }
 0x398   :  { %22602 = vst [vmem:[#allocation47_spill] sm:$0xff] %v18808_v44  ;;  %14594 = vmatprep.subr.mxu1 %v22546_v34  ;;  %v2342_v47 = vsub.f32 %v18801_v33, %v18808_v44 }
 0x399   :  { %14595 = vmatpush3.msra.mxu1 %v17759_v7 }
 0x39a   :  { %14596 = vmatprep.subr.mxu1 %v22546_v34  ;;  %v18816_v60 = vand.u32 4294901760, %v2342_v47  ;;  %v22623_v47 = vld [vmem:[#allocation30_spill] sm:$0xff] }
 0x39b   :  { %14597 = vmatpush3.msra.mxu1 %v17770_v11 }
 0x39c   :  { %22603 = vst [vmem:[#allocation48_spill] sm:$0xff] %v18816_v60  ;;  %14598 = vmatprep.subr.mxu1 %v22546_v34  ;;  %14518 = vmatmul.mubr.f32.vlgmr.msra.gmra.mxu0 %v18816_v60  ;;  %v22626_v60 = vld [vmem:[#allocation35_spill] sm:$0xff] }
 0x39d   :  { %14556 = vmatpush3.msra.mxu0 %v17784_v16  ;;  %14599 = vmatpush3.msra.mxu1 %v17772_v12 }
 0x39e   :  { %14557 = vmatprep.subr.mxu0 %v22546_v34  ;;  %14600 = vmatprep.subr.mxu1 %v22546_v34 }
 0x39f   :  { %14558 = vmatpush3.msra.mxu0 %v17787_v17  ;;  %14601 = vmatpush3.msra.mxu1 %v17774_v13 }
 0x3a0   :  { %14559 = vmatprep.subr.mxu0 %v22546_v34  ;;  %14602 = vmatprep.subr.mxu1 %v22546_v34 }
 0x3a1   :  { %14560 = vmatpush3.msra.mxu0 %v17792_v19  ;;  %14603 = vmatpush3.msra.mxu1 %v17789_v18 }
 0x3a2   :  { %14561 = vmatprep.subr.mxu0 %v22546_v34  ;;  %14604 = vmatprep.subr.mxu1 %v22546_v34 }
 0x3a3   :  { %14562 = vmatpush3.msra.mxu0 %v17799_v21  ;;  %14605 = vmatpush3.msra.mxu1 %v17814_v26 }
 0x3a4   :  { %14563 = vmatprep.subr.mxu0 %v22546_v34  ;;  %14606 = vmatprep.subr.mxu1 %v22546_v34 }
 0x3a5   :  { %14564 = vmatpush3.msra.mxu0 %v17802_v22  ;;  %14607 = vmatpush3.msra.mxu1 %v17823_v29 }
 0x3a6   :  { %14565 = vmatprep.subr.mxu0 %v22546_v34  ;;  %14608 = vmatprep.subr.mxu1 %v22546_v34 }
 0x3a7   :  { %14566 = vmatpush3.msra.mxu0 %v17829_v31  ;;  %14609 = vmatpush3.msra.mxu1 %v17852_v38 }
 0x3a8   :  { %14567 = vmatprep.subr.mxu0 %v22546_v34  ;;  %14610 = vmatprep.subr.mxu1 %v22546_v34 }
 0x3a9   :  { %14568 = vmatpush3.msra.mxu0 %v17849_v37  ;;  %14611 = vmatpush3.msra.mxu1 %v17882_v48 }
 0x3aa   :  { %14569 = vmatprep.subr.mxu0 %v22546_v34  ;;  %14612 = vmatprep.subr.mxu1 %v22546_v34 }
 0x3ab   :  { %14570 = vmatpush3.msra.mxu0 %v17876_v46  ;;  %14613 = vmatpush3.msra.mxu1 %v17892_v51 }
 0x3ac   :  { %14571 = vmatprep.subr.mxu0 %v22546_v34  ;;  %14614 = vmatprep.subr.mxu1 %v22546_v34 }
 0x3ad   :  { %14572 = vmatpush3.msra.mxu0 %v17888_v50  ;;  %14615 = vmatpush3.msra.mxu1 %v17926_v62 }
 0x3ae   :  { %14573 = vmatprep.subr.mxu0 %v22546_v34  ;;  %14616 = vmatprep.subr.mxu1 %v22546_v34 }
 0x3af   :  { %14574 = vmatpush3.msra.mxu0 %v17913_v58  ;;  %14617 = vmatpush3.msra.mxu1 %v17938_v4 }
 0x3b0   :  { %14575 = vmatprep.subr.mxu0 %v22546_v34  ;;  %14618 = vmatprep.subr.mxu1 %v22546_v34 }
 0x3b1   :  { %14576 = vmatpush3.msra.mxu0 %v17932_v2  ;;  %14619 = vmatpush3.msra.mxu1 %v17959_v27 }
 0x3b2   :  { %14577 = vmatprep.subr.mxu0 %v22546_v34  ;;  %14620 = vmatprep.subr.mxu1 %v22546_v34 }
 0x3b3   :  { %14578 = vmatpush3.msra.mxu0 %v17953_v15  ;;  %14621 = vmatpush3.msra.mxu1 %v17976_v42 }
 0x3b4   :  { %14579 = vmatprep.subr.mxu0 %v22546_v34  ;;  %14623 = vmatmul.mubr.f32.vlgmr.msra.gmra.mxu1 %v18808_v44  ;;  %v22625_v44 = vld [vmem:[#allocation34_spill] sm:$0xff] }
 0x3b5   :  { %14660 = vmatprep.subr.mxu1 %v22546_v34  ;;  %14580 = vmatpush3.msra.mxu0 %v17972_v39 }
 0x3b6   :  { %14661 = vmatpush3.msra.mxu1 %v17755_v5  ;;  %14581 = vmatprep.subr.mxu0 %v22546_v34 }
 0x3b7   :  { %14662 = vmatprep.subr.mxu1 %v22546_v34  ;;  %14582 = vmatpush3.msra.mxu0 %v17988_v52 }
 0x3b8   :  { %14663 = vmatpush3.msra.mxu1 %v17757_v6  ;;  %14583 = vmatprep.subr.mxu0 %v22546_v34 }
 0x3b9   :  { %14664 = vmatprep.subr.mxu1 %v22546_v34  ;;  %14584 = vmatpush3.msra.mxu0 %v18003_v57 }
 0x3ba   :  { %14665 = vmatpush3.msra.mxu1 %v17759_v7  ;;  %14585 = vmatprep.subr.mxu0 %v22546_v34 }
 0x3bb   :  { %14666 = vmatprep.subr.mxu1 %v22546_v34  ;;  %14586 = vmatpush3.msra.mxu0 %v18017_v8 }
 0x3bc   :  { %14587 = vmatprep.mubr.msk.f32.mxu0 %vm17682_vm0, %v22546_v34  ;;  %14667 = vmatpush3.msra.mxu1 %v17770_v11 }
 0x3bd   :  { %14588 = vmatmul.mubr.f32.vlgmr.msra.gmra.mxu0 %v18801_v33  ;;  %14625 = vmatprep.subr.mxu0 %v22546_v34  ;;  %v22624_v33 = vld [vmem:[#allocation32_spill] sm:$0xff] }
 0x3be   :  { %14668 = vmatprep.subr.mxu1 %v22546_v34  ;;  %14626 = vmatpush3.msra.mxu0 %v17806_v23 }
 0x3bf   :  { %14669 = vmatpush3.msra.mxu1 %v17772_v12  ;;  %14627 = vmatprep.subr.mxu0 %v22546_v34 }
 0x3c0   :  { %14670 = vmatprep.subr.mxu1 %v22546_v34  ;;  %14628 = vmatpush3.msra.mxu0 %v17809_v24 }
 0x3c1   :  { %14671 = vmatpush3.msra.mxu1 %v17774_v13  ;;  %14629 = vmatprep.subr.mxu0 %v22546_v34 }
 0x3c2   :  { %14672 = vmatprep.subr.mxu1 %v22546_v34  ;;  %14630 = vmatpush3.msra.mxu0 %v17812_v25 }
 0x3c3   :  { %14673 = vmatpush3.msra.mxu1 %v17789_v18  ;;  %14631 = vmatprep.subr.mxu0 %v22546_v34 }
 0x3c4   :  { %14674 = vmatprep.subr.mxu1 %v22546_v34  ;;  %14632 = vmatpush3.msra.mxu0 %v17821_v28 }
 0x3c5   :  { %14675 = vmatpush3.msra.mxu1 %v17814_v26  ;;  %14633 = vmatprep.subr.mxu0 %v22546_v34 }
 0x3c6   :  { %14676 = vmatprep.subr.mxu1 %v22546_v34  ;;  %14634 = vmatpush3.msra.mxu0 %v17826_v30 }
 0x3c7   :  { %14677 = vmatpush3.msra.mxu1 %v17823_v29  ;;  %14635 = vmatprep.subr.mxu0 %v22546_v34 }
 0x3c8   :  { %14678 = vmatprep.subr.mxu1 %v22546_v34  ;;  %14636 = vmatpush3.msra.mxu0 %v17866_v43 }
 0x3c9   :  { %14679 = vmatpush3.msra.mxu1 %v17852_v38  ;;  %14637 = vmatprep.subr.mxu0 %v22546_v34 }
 0x3ca   :  { %14680 = vmatprep.subr.mxu1 %v22546_v34  ;;  %14638 = vmatpush3.msra.mxu0 %v22574_v10 }
 0x3cb   :  { %14681 = vmatpush3.msra.mxu1 %v17882_v48  ;;  %14639 = vmatprep.subr.mxu0 %v22546_v34 }
 0x3cc   :  { %14682 = vmatprep.subr.mxu1 %v22546_v34  ;;  %14640 = vmatpush3.msra.mxu0 %v22604_v53 }
 0x3cd   :  { %14683 = vmatpush3.msra.mxu1 %v17892_v51  ;;  %14641 = vmatprep.subr.mxu0 %v22546_v34 }
 0x3ce   :  { %14684 = vmatprep.subr.mxu1 %v22546_v34  ;;  %14642 = vmatpush3.msra.mxu0 %v22605_v3 }
 0x3cf   :  { %14685 = vmatpush3.msra.mxu1 %v17926_v62  ;;  %14643 = vmatprep.subr.mxu0 %v22546_v34 }
 0x3d0   :  { %14686 = vmatprep.subr.mxu1 %v22546_v34  ;;  %14644 = vmatpush3.msra.mxu0 %v22606_v9 }
 0x3d1   :  { %14687 = vmatpush3.msra.mxu1 %v17938_v4  ;;  %14645 = vmatprep.subr.mxu0 %v22546_v34 }
 0x3d2   :  { %14688 = vmatprep.subr.mxu1 %v22546_v34  ;;  %14646 = vmatpush3.msra.mxu0 %v22607_v14 }
 0x3d3   :  { %14689 = vmatpush3.msra.mxu1 %v17959_v27  ;;  %14647 = vmatprep.subr.mxu0 %v22546_v34 }
 0x3d4   :  { %14690 = vmatprep.subr.mxu1 %v22546_v34  ;;  %14648 = vmatpush3.msra.mxu0 %v22608_v54 }
 0x3d5   :  { %14691 = vmatpush3.msra.mxu1 %v17976_v42  ;;  %14692 = vmatprep.mubr.msk.f32.mxu1 %vm17682_vm0, %v22546_v34 }
 0x3d6   :  { %14649 = vmatprep.subr.mxu0 %v22546_v34  ;;  %14693 = vmatmul.mubr.f32.vlgmr.msra.gmra.mxu1 %v18797_v35 }
 0x3d7   :  { %14650 = vmatpush3.msra.mxu0 %v22609_v36  ;;  %14657 = vmatprep.mubr.msk.f32.mxu0 %vm17682_vm0, %v22546_v34 }
 0x3d8   :  { %14651 = vmatprep.subr.mxu0 %v22546_v34  ;;  %14730 = vmatprep.subr.mxu1 %v22546_v34 }
 0x3d9   :  { %14652 = vmatpush3.msra.mxu0 %v22610_v63  ;;  %14731 = vmatpush3.msra.mxu1 %v22611_v32 }
 0x3da   :  { %14653 = vmatprep.subr.mxu0 %v22546_v34  ;;  %14732 = vmatprep.subr.mxu1 %v22546_v34 }
 0x3db   :  { %14654 = vmatpush3.msra.mxu0 %v22612_v41  ;;  %14733 = vmatpush3.msra.mxu1 %v22613_v20  ;;  %v200_v41 = vpop.permute.xlu0 %199 }
 0x3dc   :  { %14655 = vmatprep.subr.mxu0 %v22546_v34  ;;  %14734 = vmatprep.subr.mxu1 %v22546_v34 }
 0x3dd   :  { %14656 = vmatpush3.msra.mxu0 %v22614_v55  ;;  %14735 = vmatpush3.msra.mxu1 %v22615_v0  ;;  %v19022_v0 = vld [vmem:[%s22337_s2] ss:$0 sm:$0xff] }
 0x3de   :  { %14658 = vmatmul.mubr.f32.vlgmr.msra.gmra.mxu0 %v18797_v35  ;;  %14736 = vmatprep.subr.mxu1 %v22546_v34  ;;  %v22627_v35 = vld [vmem:[#allocation36_spill] sm:$0xff]  ;;  %22629 = vst [vmem:[#allocation49_spill] sm:$0xff] %v19022_v0 }
 0x3df   :  { %14737 = vmatpush3.msra.mxu1 %v22616_v40  ;;  %14695 = vmatprep.subr.mxu0 %v22546_v34 }
 0x3e0   :  { %14738 = vmatprep.subr.mxu1 %v22546_v34  ;;  %14696 = vmatpush3.msra.mxu0 %v17755_v5 }
 0x3e1   :  { %14739 = vmatpush3.msra.mxu1 %v22617_v45  ;;  %14697 = vmatprep.subr.mxu0 %v22546_v34  ;;  %v87_v45 = vpop.permute.xlu1 %86 }
 0x3e2   :  { %14740 = vmatprep.subr.mxu1 %v22546_v34  ;;  %14698 = vmatpush3.msra.mxu0 %v17757_v6  ;;  %v156_v55 = vmul.f32 %v19022_v0, %v87_v45 }
 0x3e3   :  { %14741 = vmatpush3.msra.mxu1 %v22618_v56  ;;  %14699 = vmatprep.subr.mxu0 %v22546_v34 }
 0x3e4   :  { %14742 = vmatprep.subr.mxu1 %v22546_v34  ;;  %14700 = vmatpush3.msra.mxu0 %v17759_v7 }
 0x3e5   :  { %14743 = vmatpush3.msra.mxu1 %v22619_v49  ;;  %14701 = vmatprep.subr.mxu0 %v22546_v34 }
 0x3e6   :  { %14744 = vmatprep.subr.mxu1 %v22546_v34  ;;  %14702 = vmatpush3.msra.mxu0 %v17770_v11 }
 0x3e7   :  { %14745 = vmatpush3.msra.mxu1 %v22620_v1  ;;  %14703 = vmatprep.subr.mxu0 %v22546_v34 }
 0x3e8   :  { %14746 = vmatprep.subr.mxu1 %v22546_v34  ;;  %14704 = vmatpush3.msra.mxu0 %v17772_v12 }
 0x3e9   :  { %14747 = vmatpush3.msra.mxu1 %v22621_v59  ;;  %14705 = vmatprep.subr.mxu0 %v22546_v34 }
 0x3ea   :  { %14748 = vmatprep.subr.mxu1 %v22546_v34  ;;  %14706 = vmatpush3.msra.mxu0 %v17774_v13 }
 0x3eb   :  { %14749 = vmatpush3.msra.mxu1 %v22622_v61  ;;  %14707 = vmatprep.subr.mxu0 %v22546_v34 }
 0x3ec   :  { %14750 = vmatprep.subr.mxu1 %v22546_v34  ;;  %14708 = vmatpush3.msra.mxu0 %v17789_v18 }
 0x3ed   :  { %14751 = vmatpush3.msra.mxu1 %v22623_v47  ;;  %14709 = vmatprep.subr.mxu0 %v22546_v34 }
 0x3ee   :  { %14752 = vmatprep.subr.mxu1 %v22546_v34  ;;  %14710 = vmatpush3.msra.mxu0 %v17814_v26 }
 0x3ef   :  { %14753 = vmatpush3.msra.mxu1 %v22624_v33  ;;  %14711 = vmatprep.subr.mxu0 %v22546_v34 }
 0x3f0   :  { %14754 = vmatprep.subr.mxu1 %v22546_v34  ;;  %14712 = vmatpush3.msra.mxu0 %v17823_v29 }
 0x3f1   :  { %14755 = vmatpush3.msra.mxu1 %v22625_v44  ;;  %14713 = vmatprep.subr.mxu0 %v22546_v34  ;;  %v22628_v44 = vld [vmem:[#allocation37_spill] sm:$0xff] }
 0x3f2   :  { %14756 = vmatprep.subr.mxu1 %v22546_v34  ;;  %14714 = vmatpush3.msra.mxu0 %v17852_v38 }
 0x3f3   :  { %14757 = vmatpush3.msra.mxu1 %v22626_v60  ;;  %14715 = vmatprep.subr.mxu0 %v22546_v34 }
 0x3f4   :  { %14758 = vmatprep.subr.mxu1 %v22546_v34  ;;  %14716 = vmatpush3.msra.mxu0 %v17882_v48 }
 0x3f5   :  { %14759 = vmatpush3.msra.mxu1 %v22627_v35  ;;  %14717 = vmatprep.subr.mxu0 %v22546_v34 }
 0x3f6   :  { %14760 = vmatprep.subr.mxu1 %v22546_v34  ;;  %14718 = vmatpush3.msra.mxu0 %v17892_v51 }
 0x3f7   :  { %14761 = vmatpush3.msra.mxu1 %v22628_v44  ;;  %14719 = vmatprep.subr.mxu0 %v22546_v34 }
 0x3f8   :  { %14762 = vmatprep.mubr.msk.f32.mxu1 %vm17682_vm0, %v22546_v34  ;;  %14800 = vmatprep.subr.mxu1 %v22546_v34 }
 0x3f9   :  { %14720 = vmatpush3.msra.mxu0 %v17926_v62  ;;  %14727 = vmatprep.mubr.msk.f32.mxu0 %vm17682_vm0, %v22546_v34 }
 0x3fa   :  { %14721 = vmatprep.subr.mxu0 %v22546_v34 }
 0x3fb   :  { %14722 = vmatpush3.msra.mxu0 %v17938_v4 }
 0x3fc   :  { %14723 = vmatprep.subr.mxu0 %v22546_v34 }
 0x3fd   :  { %14724 = vmatpush3.msra.mxu0 %v17959_v27 }
 0x3fe   :  { %14725 = vmatprep.subr.mxu0 %v22546_v34 }
 0x3ff   :  { %14726 = vmatpush3.msra.mxu0 %v17976_v42 }
 0x400   :  { %14765 = vmatprep.subr.mxu0 %v22546_v34 }
 0x454   :  { %v2496_v44 = vpop.f32.mrf.mxu1 }
 0x456   :  { %v14554_v35 = vpop.f32.mrf.mxu1 }
 0x457   :  { %v19028_v35 = vld [vmem:[%s22339_s4] ss:$0 sm:$0xff] }
 0x45c   :  { %v2345_v60 = vpop.f32.mrf.mxu0 }
 0x45d   :  { %v2497_v56 = vadd.f32 %v2496_v44, %v2345_v60  ;;  %v19034_v44 = vld [vmem:[%s22337_s2 + $0x1] ss:$0 sm:$0xff] }
 0x45e   :  { %v14519_v33 = vpop.f32.mrf.mxu0  ;;  %v257_v60 = vmul.f32 %v19034_v44, %v200_v41 }
 0x45f   :  { %v172_v33 = vadd.f32 %v19028_v35, %v156_v55 }
 0x474   :  { %v2689_v47 = vpop.f32.mrf.mxu1 }
 0x476   :  { %v14624_v61 = vpop.f32.mrf.mxu1 }
 0x47d   :  { %v2600_v59 = vpop.f32.mrf.mxu0 }
 0x47e   :  { %v2601_v20 = vadd.f32 %v2600_v59, %v2497_v56  ;;  %v273_v56 = vadd.f32 %v257_v60, %v172_v33  ;;  %v22637_v33 = vld [vmem:[#allocation13_spill] sm:$0xff] }
 0x47f   :  { %v14589_v1 = vpop.f32.mrf.mxu0  ;;  %v22638_v60 = vld [vmem:[#allocation33_spill] sm:$0xff] }
 0x496   :  { %v2895_v49 = vpop.f32.mrf.mxu1 }
 0x498   :  { %v14694_v40 = vpop.f32.mrf.mxu1 }
 0x499   :  { %v2690_v40 = vadd.f32 %v2689_v47, %v2601_v20  ;;  %v22636_v47 = vld [vmem:[#allocation31_spill] sm:$0xff] }
 0x49e   :  { %v2808_v1 = vpop.f32.mrf.mxu0 }
 0x49f   :  { %v2809_v61 = vadd.f32 %v2808_v1, %v2690_v40  ;;  %v22639_v40 = vld [vmem:[#allocation14_spill] sm:$0xff]  ;;  %v22640_v1 = vld [vmem:[#allocation16_spill] sm:$0xff] }
 0x4a0   :  { %v14659_v45 = vpop.f32.mrf.mxu0 }
 0x4a1   :  { %v2896_v59 = vadd.f32 %v2895_v49, %v2809_v61  ;;  %v22635_v49 = vld [vmem:[#allocation12_spill] sm:$0xff]  ;;  %v22641_v61 = vld [vmem:[#allocation18_spill] sm:$0xff] }
 0x4a2   :  { %v22642_v45 = vld [vmem:[#allocation20_spill] sm:$0xff] }
 0x4a3   :  { %v2899_v0 = vadd.f32 %v2896_v59, %v273_v56  ;;  %v22643_v56 = vld [vmem:[#allocation22_spill] sm:$0xff]  ;;  %v22644_v59 = vld [vmem:[#allocation24_spill] sm:$0xff] }
 0x4a5   :  { %17571 = vtanh.f32 %v2899_v0  ;;  %v22634_v0 = vld [vmem:[#allocation29_spill] sm:$0xff] }
 0x4b2   :  { %v17572_v32 = vpop.eup %17571 }
 0x4b3   :  { %v19037_v63 = vand.u32 4294901760, %v17572_v32 }
 0x4b5   :  { %22630 = vst [vmem:[#allocation50_spill] sm:$0xff] %v19037_v63  ;;  %14763 = vmatmul.mubr.f32.vlgmr.msra.gmra.mxu1 %v19037_v63  ;;  %v19041_v55 = vsub.f32 %v17572_v32, %v19037_v63 }
 0x4b6   :  { %14801 = vmatpush3.msra.mxu1 %v17755_v5  ;;  %14832 = vmatprep.mubr.msk.f32.mxu1 %vm17682_vm0, %v22546_v34 }
 0x4b7   :  { %22631 = vst [vmem:[#allocation51_spill] sm:$0xff] %v19041_v55  ;;  %14802 = vmatprep.subr.mxu1 %v22546_v34  ;;  %v19048_v41 = vand.u32 4294901760, %v19041_v55 }
 0x4b8   :  { %14803 = vmatpush3.msra.mxu1 %v17757_v6 }
 0x4b9   :  { %22632 = vst [vmem:[#allocation52_spill] sm:$0xff] %v19048_v41  ;;  %14804 = vmatprep.subr.mxu1 %v22546_v34  ;;  %v2988_v20 = vsub.f32 %v19041_v55, %v19048_v41 }
 0x4ba   :  { %14805 = vmatpush3.msra.mxu1 %v17759_v7 }
 0x4bb   :  { %14806 = vmatprep.subr.mxu1 %v22546_v34  ;;  %v19056_v32 = vand.u32 4294901760, %v2988_v20  ;;  %v22645_v20 = vld [vmem:[#allocation26_spill] sm:$0xff] }
 0x4bc   :  { %14807 = vmatpush3.msra.mxu1 %v17770_v11 }
 0x4bd   :  { %22633 = vst [vmem:[#allocation53_spill] sm:$0xff] %v19056_v32  ;;  %14808 = vmatprep.subr.mxu1 %v22546_v34  ;;  %14728 = vmatmul.mubr.f32.vlgmr.msra.gmra.mxu0 %v19056_v32  ;;  %v22648_v32 = vld [vmem:[#allocation32_spill] sm:$0xff] }
 0x4be   :  { %14766 = vmatpush3.msra.mxu0 %v17784_v16  ;;  %14809 = vmatpush3.msra.mxu1 %v17772_v12 }
 0x4bf   :  { %14767 = vmatprep.subr.mxu0 %v22546_v34  ;;  %14810 = vmatprep.subr.mxu1 %v22546_v34 }
 0x4c0   :  { %14768 = vmatpush3.msra.mxu0 %v17787_v17  ;;  %14811 = vmatpush3.msra.mxu1 %v17774_v13 }
 0x4c1   :  { %14769 = vmatprep.subr.mxu0 %v22546_v34  ;;  %14812 = vmatprep.subr.mxu1 %v22546_v34 }
 0x4c2   :  { %14770 = vmatpush3.msra.mxu0 %v17792_v19  ;;  %14813 = vmatpush3.msra.mxu1 %v17789_v18 }
 0x4c3   :  { %14771 = vmatprep.subr.mxu0 %v22546_v34  ;;  %14814 = vmatprep.subr.mxu1 %v22546_v34 }
 0x4c4   :  { %14772 = vmatpush3.msra.mxu0 %v17799_v21  ;;  %14815 = vmatpush3.msra.mxu1 %v17814_v26 }
 0x4c5   :  { %14773 = vmatprep.subr.mxu0 %v22546_v34  ;;  %14816 = vmatprep.subr.mxu1 %v22546_v34 }
 0x4c6   :  { %14774 = vmatpush3.msra.mxu0 %v17802_v22  ;;  %14817 = vmatpush3.msra.mxu1 %v17823_v29 }
 0x4c7   :  { %14775 = vmatprep.subr.mxu0 %v22546_v34  ;;  %14818 = vmatprep.subr.mxu1 %v22546_v34 }
 0x4c8   :  { %14776 = vmatpush3.msra.mxu0 %v17829_v31  ;;  %14819 = vmatpush3.msra.mxu1 %v17852_v38 }
 0x4c9   :  { %14777 = vmatprep.subr.mxu0 %v22546_v34  ;;  %14820 = vmatprep.subr.mxu1 %v22546_v34 }
 0x4ca   :  { %14778 = vmatpush3.msra.mxu0 %v17849_v37  ;;  %14821 = vmatpush3.msra.mxu1 %v17882_v48 }
 0x4cb   :  { %14779 = vmatprep.subr.mxu0 %v22546_v34  ;;  %14822 = vmatprep.subr.mxu1 %v22546_v34 }
 0x4cc   :  { %14780 = vmatpush3.msra.mxu0 %v17876_v46  ;;  %14823 = vmatpush3.msra.mxu1 %v17892_v51 }
 0x4cd   :  { %14781 = vmatprep.subr.mxu0 %v22546_v34  ;;  %14824 = vmatprep.subr.mxu1 %v22546_v34 }
 0x4ce   :  { %14782 = vmatpush3.msra.mxu0 %v17888_v50  ;;  %14825 = vmatpush3.msra.mxu1 %v17926_v62 }
 0x4cf   :  { %14783 = vmatprep.subr.mxu0 %v22546_v34  ;;  %14826 = vmatprep.subr.mxu1 %v22546_v34 }
 0x4d0   :  { %14784 = vmatpush3.msra.mxu0 %v17913_v58  ;;  %14827 = vmatpush3.msra.mxu1 %v17938_v4 }
 0x4d1   :  { %14785 = vmatprep.subr.mxu0 %v22546_v34  ;;  %14828 = vmatprep.subr.mxu1 %v22546_v34 }
 0x4d2   :  { %14786 = vmatpush3.msra.mxu0 %v17932_v2  ;;  %14829 = vmatpush3.msra.mxu1 %v17959_v27 }
 0x4d3   :  { %14787 = vmatprep.subr.mxu0 %v22546_v34  ;;  %14830 = vmatprep.subr.mxu1 %v22546_v34 }
 0x4d4   :  { %14788 = vmatpush3.msra.mxu0 %v17953_v15  ;;  %14831 = vmatpush3.msra.mxu1 %v17976_v42 }
 0x4d5   :  { %14789 = vmatprep.subr.mxu0 %v22546_v34  ;;  %14833 = vmatmul.mubr.f32.vlgmr.msra.gmra.mxu1 %v19048_v41  ;;  %v22647_v41 = vld [vmem:[#allocation30_spill] sm:$0xff] }
 0x4d6   :  { %14870 = vmatprep.subr.mxu1 %v22546_v34  ;;  %14790 = vmatpush3.msra.mxu0 %v17972_v39 }
 0x4d7   :  { %14871 = vmatpush3.msra.mxu1 %v17755_v5  ;;  %14791 = vmatprep.subr.mxu0 %v22546_v34 }
 0x4d8   :  { %14872 = vmatprep.subr.mxu1 %v22546_v34  ;;  %14792 = vmatpush3.msra.mxu0 %v17988_v52 }
 0x4d9   :  { %14873 = vmatpush3.msra.mxu1 %v17757_v6  ;;  %14793 = vmatprep.subr.mxu0 %v22546_v34 }
 0x4da   :  { %14874 = vmatprep.subr.mxu1 %v22546_v34  ;;  %14794 = vmatpush3.msra.mxu0 %v18003_v57 }
 0x4db   :  { %14875 = vmatpush3.msra.mxu1 %v17759_v7  ;;  %14795 = vmatprep.subr.mxu0 %v22546_v34 }
 0x4dc   :  { %14876 = vmatprep.subr.mxu1 %v22546_v34  ;;  %14796 = vmatpush3.msra.mxu0 %v18017_v8 }
 0x4dd   :  { %14797 = vmatprep.mubr.msk.f32.mxu0 %vm17682_vm0, %v22546_v34  ;;  %14877 = vmatpush3.msra.mxu1 %v17770_v11 }
 0x4de   :  { %14798 = vmatmul.mubr.f32.vlgmr.msra.gmra.mxu0 %v19041_v55  ;;  %14835 = vmatprep.subr.mxu0 %v22546_v34  ;;  %v22646_v55 = vld [vmem:[#allocation28_spill] sm:$0xff] }
 0x4df   :  { %14878 = vmatprep.subr.mxu1 %v22546_v34  ;;  %14836 = vmatpush3.msra.mxu0 %v17806_v23 }
 0x4e0   :  { %14879 = vmatpush3.msra.mxu1 %v17772_v12  ;;  %14837 = vmatprep.subr.mxu0 %v22546_v34 }
 0x4e1   :  { %14880 = vmatprep.subr.mxu1 %v22546_v34  ;;  %14838 = vmatpush3.msra.mxu0 %v17809_v24 }
 0x4e2   :  { %14881 = vmatpush3.msra.mxu1 %v17774_v13  ;;  %14839 = vmatprep.subr.mxu0 %v22546_v34 }
 0x4e3   :  { %14882 = vmatprep.subr.mxu1 %v22546_v34  ;;  %14840 = vmatpush3.msra.mxu0 %v17812_v25 }
 0x4e4   :  { %14883 = vmatpush3.msra.mxu1 %v17789_v18  ;;  %14841 = vmatprep.subr.mxu0 %v22546_v34 }
 0x4e5   :  { %14884 = vmatprep.subr.mxu1 %v22546_v34  ;;  %14842 = vmatpush3.msra.mxu0 %v17821_v28 }
 0x4e6   :  { %14885 = vmatpush3.msra.mxu1 %v17814_v26  ;;  %14843 = vmatprep.subr.mxu0 %v22546_v34 }
 0x4e7   :  { %14886 = vmatprep.subr.mxu1 %v22546_v34  ;;  %14844 = vmatpush3.msra.mxu0 %v17826_v30 }
 0x4e8   :  { %14887 = vmatpush3.msra.mxu1 %v17823_v29  ;;  %14845 = vmatprep.subr.mxu0 %v22546_v34 }
 0x4e9   :  { %14888 = vmatprep.subr.mxu1 %v22546_v34  ;;  %14846 = vmatpush3.msra.mxu0 %v17866_v43 }
 0x4ea   :  { %14889 = vmatpush3.msra.mxu1 %v17852_v38  ;;  %14847 = vmatprep.subr.mxu0 %v22546_v34 }
 0x4eb   :  { %14890 = vmatprep.subr.mxu1 %v22546_v34  ;;  %14848 = vmatpush3.msra.mxu0 %v22574_v10 }
 0x4ec   :  { %14891 = vmatpush3.msra.mxu1 %v17882_v48  ;;  %14849 = vmatprep.subr.mxu0 %v22546_v34 }
 0x4ed   :  { %14892 = vmatprep.subr.mxu1 %v22546_v34  ;;  %14850 = vmatpush3.msra.mxu0 %v22604_v53 }
 0x4ee   :  { %14893 = vmatpush3.msra.mxu1 %v17892_v51  ;;  %14851 = vmatprep.subr.mxu0 %v22546_v34 }
 0x4ef   :  { %14894 = vmatprep.subr.mxu1 %v22546_v34  ;;  %14852 = vmatpush3.msra.mxu0 %v22605_v3 }
 0x4f0   :  { %14895 = vmatpush3.msra.mxu1 %v17926_v62  ;;  %14853 = vmatprep.subr.mxu0 %v22546_v34 }
 0x4f1   :  { %14896 = vmatprep.subr.mxu1 %v22546_v34  ;;  %14854 = vmatpush3.msra.mxu0 %v22606_v9 }
 0x4f2   :  { %14897 = vmatpush3.msra.mxu1 %v17938_v4  ;;  %14855 = vmatprep.subr.mxu0 %v22546_v34 }
 0x4f3   :  { %14898 = vmatprep.subr.mxu1 %v22546_v34  ;;  %14856 = vmatpush3.msra.mxu0 %v22607_v14 }
 0x4f4   :  { %14899 = vmatpush3.msra.mxu1 %v17959_v27  ;;  %14857 = vmatprep.subr.mxu0 %v22546_v34 }
 0x4f5   :  { %14900 = vmatprep.subr.mxu1 %v22546_v34  ;;  %14858 = vmatpush3.msra.mxu0 %v22608_v54 }
 0x4f6   :  { %14901 = vmatpush3.msra.mxu1 %v17976_v42  ;;  %14902 = vmatprep.mubr.msk.f32.mxu1 %vm17682_vm0, %v22546_v34 }
 0x4f7   :  { %14859 = vmatprep.subr.mxu0 %v22546_v34  ;;  %14903 = vmatmul.mubr.f32.vlgmr.msra.gmra.mxu1 %v19037_v63 }
 0x4f8   :  { %14860 = vmatpush3.msra.mxu0 %v22609_v36  ;;  %14867 = vmatprep.mubr.msk.f32.mxu0 %vm17682_vm0, %v22546_v34 }
 0x4f9   :  { %14861 = vmatprep.subr.mxu0 %v22546_v34  ;;  %14940 = vmatprep.subr.mxu1 %v22546_v34 }
 0x4fa   :  { %14862 = vmatpush3.msra.mxu0 %v22634_v0  ;;  %14941 = vmatpush3.msra.mxu1 %v22635_v49  ;;  %v204_v0 = vpop.permute.xlu0 %203 }
 0x4fb   :  { %14863 = vmatprep.subr.mxu0 %v22546_v34  ;;  %14942 = vmatprep.subr.mxu1 %v22546_v34  ;;  %v258_v54 = vmul.f32 %v19034_v44, %v204_v0  ;;  %v22661_v0 = vld [vmem:[#allocation23_spill] sm:$0xff] }
 0x4fc   :  { %14864 = vmatpush3.msra.mxu0 %v22636_v47  ;;  %14943 = vmatpush3.msra.mxu1 %v22637_v33  ;;  %v22653_v33 = vld [vmem:[#allocation49_spill] sm:$0xff] }
 0x4fd   :  { %14865 = vmatprep.subr.mxu0 %v22546_v34  ;;  %14944 = vmatprep.subr.mxu1 %v22546_v34 }
 0x4fe   :  { %14866 = vmatpush3.msra.mxu0 %v22638_v60  ;;  %14945 = vmatpush3.msra.mxu1 %v22639_v40  ;;  %v92_v40 = vpop.permute.xlu1 %91 }
 0x4ff   :  { %14868 = vmatmul.mubr.f32.vlgmr.msra.gmra.mxu0 %v19037_v63  ;;  %14946 = vmatprep.subr.mxu1 %v22546_v34  ;;  %v22649_v63 = vld [vmem:[#allocation34_spill] sm:$0xff]  ;;  %v157_v47 = vmul.f32 %v22653_v33, %v92_v40  ;;  %v22665_v40 = vld [vmem:[#allocation12_spill] sm:$0xff] }
 0x500   :  { %14947 = vmatpush3.msra.mxu1 %v22640_v1  ;;  %14905 = vmatprep.subr.mxu0 %v22546_v34 }
 0x501   :  { %14948 = vmatprep.subr.mxu1 %v22546_v34  ;;  %14906 = vmatpush3.msra.mxu0 %v17755_v5  ;;  %v173_v36 = vadd.f32 %v19028_v35, %v157_v47  ;;  %v22663_v47 = vld [vmem:[#allocation27_spill] sm:$0xff] }
 0x502   :  { %14949 = vmatpush3.msra.mxu1 %v22641_v61  ;;  %14907 = vmatprep.subr.mxu0 %v22546_v34 }
 0x503   :  { %14950 = vmatprep.subr.mxu1 %v22546_v34  ;;  %14908 = vmatpush3.msra.mxu0 %v17757_v6  ;;  %v274_v3 = vadd.f32 %v258_v54, %v173_v36  ;;  %v22659_v54 = vld [vmem:[#allocation19_spill] sm:$0xff]  ;;  %v22660_v36 = vld [vmem:[#allocation21_spill] sm:$0xff] }
 0x504   :  { %14951 = vmatpush3.msra.mxu1 %v22642_v45  ;;  %14909 = vmatprep.subr.mxu0 %v22546_v34 }
 0x505   :  { %14952 = vmatprep.subr.mxu1 %v22546_v34  ;;  %14910 = vmatpush3.msra.mxu0 %v17759_v7 }
 0x506   :  { %14953 = vmatpush3.msra.mxu1 %v22643_v56  ;;  %14911 = vmatprep.subr.mxu0 %v22546_v34 }
 0x507   :  { %14954 = vmatprep.subr.mxu1 %v22546_v34  ;;  %14912 = vmatpush3.msra.mxu0 %v17770_v11 }
 0x508   :  { %14955 = vmatpush3.msra.mxu1 %v22644_v59  ;;  %14913 = vmatprep.subr.mxu0 %v22546_v34 }
 0x509   :  { %14956 = vmatprep.subr.mxu1 %v22546_v34  ;;  %14914 = vmatpush3.msra.mxu0 %v17772_v12 }
 0x50a   :  { %14957 = vmatpush3.msra.mxu1 %v22645_v20  ;;  %14915 = vmatprep.subr.mxu0 %v22546_v34 }
 0x50b   :  { %14958 = vmatprep.subr.mxu1 %v22546_v34  ;;  %14916 = vmatpush3.msra.mxu0 %v17774_v13 }
 0x50c   :  { %14959 = vmatpush3.msra.mxu1 %v22646_v55  ;;  %14917 = vmatprep.subr.mxu0 %v22546_v34 }
 0x50d   :  { %14960 = vmatprep.subr.mxu1 %v22546_v34  ;;  %14918 = vmatpush3.msra.mxu0 %v17789_v18 }
 0x50e   :  { %14961 = vmatpush3.msra.mxu1 %v22647_v41  ;;  %14919 = vmatprep.subr.mxu0 %v22546_v34  ;;  %v22650_v41 = vld [vmem:[#allocation35_spill] sm:$0xff] }
 0x50f   :  { %14962 = vmatprep.subr.mxu1 %v22546_v34  ;;  %14920 = vmatpush3.msra.mxu0 %v17814_v26 }
 0x510   :  { %14963 = vmatpush3.msra.mxu1 %v22648_v32  ;;  %14921 = vmatprep.subr.mxu0 %v22546_v34  ;;  %v22651_v32 = vld [vmem:[#allocation36_spill] sm:$0xff] }
 0x511   :  { %14964 = vmatprep.subr.mxu1 %v22546_v34  ;;  %14922 = vmatpush3.msra.mxu0 %v17823_v29 }
 0x512   :  { %14965 = vmatpush3.msra.mxu1 %v22649_v63  ;;  %14923 = vmatprep.subr.mxu0 %v22546_v34  ;;  %v22652_v63 = vld [vmem:[#allocation37_spill] sm:$0xff] }
 0x513   :  { %14966 = vmatprep.subr.mxu1 %v22546_v34  ;;  %14924 = vmatpush3.msra.mxu0 %v17852_v38 }
 0x514   :  { %14967 = vmatpush3.msra.mxu1 %v22650_v41  ;;  %14925 = vmatprep.subr.mxu0 %v22546_v34 }
 0x515   :  { %14968 = vmatprep.subr.mxu1 %v22546_v34  ;;  %14926 = vmatpush3.msra.mxu0 %v17882_v48 }
 0x516   :  { %14969 = vmatpush3.msra.mxu1 %v22651_v32  ;;  %14927 = vmatprep.subr.mxu0 %v22546_v34 }
 0x517   :  { %14970 = vmatprep.subr.mxu1 %v22546_v34  ;;  %14928 = vmatpush3.msra.mxu0 %v17892_v51 }
 0x518   :  { %14971 = vmatpush3.msra.mxu1 %v22652_v63  ;;  %14929 = vmatprep.subr.mxu0 %v22546_v34 }
 0x519   :  { %14972 = vmatprep.mubr.msk.f32.mxu1 %vm17682_vm0, %v22546_v34  ;;  %15010 = vmatprep.subr.mxu1 %v22546_v34 }
 0x51a   :  { %14930 = vmatpush3.msra.mxu0 %v17926_v62  ;;  %14937 = vmatprep.mubr.msk.f32.mxu0 %vm17682_vm0, %v22546_v34 }
 0x51b   :  { %14931 = vmatprep.subr.mxu0 %v22546_v34 }
 0x51c   :  { %14932 = vmatpush3.msra.mxu0 %v17938_v4 }
 0x51d   :  { %14933 = vmatprep.subr.mxu0 %v22546_v34 }
 0x51e   :  { %14934 = vmatpush3.msra.mxu0 %v17959_v27 }
 0x51f   :  { %14935 = vmatprep.subr.mxu0 %v22546_v34 }
 0x520   :  { %14936 = vmatpush3.msra.mxu0 %v17976_v42 }
 0x521   :  { %14975 = vmatprep.subr.mxu0 %v22546_v34 }
 0x575   :  { %v3142_v63 = vpop.f32.mrf.mxu1 }
 0x577   :  { %v14764_v32 = vpop.f32.mrf.mxu1 }
 0x57d   :  { %v2991_v41 = vpop.f32.mrf.mxu0 }
 0x57e   :  { %v3143_v1 = vadd.f32 %v3142_v63, %v2991_v41 }
 0x57f   :  { %v14729_v55 = vpop.f32.mrf.mxu0 }
 0x595   :  { %v3335_v20 = vpop.f32.mrf.mxu1 }
 0x597   :  { %v14834_v59 = vpop.f32.mrf.mxu1 }
 0x59e   :  { %v3246_v56 = vpop.f32.mrf.mxu0 }
 0x59f   :  { %v3247_v49 = vadd.f32 %v3246_v56, %v3143_v1  ;;  %v22666_v1 = vld [vmem:[#allocation31_spill] sm:$0xff]  ;;  %v22668_v56 = vld [vmem:[#allocation33_spill] sm:$0xff] }
 0x5a0   :  { %v14799_v45 = vpop.f32.mrf.mxu0 }
 0x5a1   :  { %v3336_v14 = vadd.f32 %v3335_v20, %v3247_v49  ;;  %v22662_v49 = vld [vmem:[#allocation25_spill] sm:$0xff]  ;;  %v22669_v20 = vld [vmem:[#allocation14_spill] sm:$0xff] }
 0x5b7   :  { %v3541_v61 = vpop.f32.mrf.mxu1 }
 0x5b9   :  { %v14904_v60 = vpop.f32.mrf.mxu1 }
 0x5ba   :  { %v22664_v60 = vld [vmem:[#allocation29_spill] sm:$0xff] }
 0x5bf   :  { %v3454_v32 = vpop.f32.mrf.mxu0 }
 0x5c0   :  { %v3455_v9 = vadd.f32 %v3454_v32, %v3336_v14  ;;  %v22670_v32 = vld [vmem:[#allocation16_spill] sm:$0xff] }
 0x5c1   :  { %v14869_v55 = vpop.f32.mrf.mxu0 }
 0x5c2   :  { %v3542_v59 = vadd.f32 %v3541_v61, %v3455_v9  ;;  %v22658_v9 = vld [vmem:[#allocation17_spill] sm:$0xff]  ;;  %v22671_v55 = vld [vmem:[#allocation18_spill] sm:$0xff] }
 0x5c3   :  { %v22667_v61 = vld [vmem:[#allocation13_spill] sm:$0xff] }
 0x5c4   :  { %v3545_v53 = vadd.f32 %v3542_v59, %v274_v3  ;;  %v22672_v59 = vld [vmem:[#allocation20_spill] sm:$0xff] }
 0x5c6   :  { %17573 = vtanh.f32 %v3545_v53 }
 0x5d3   :  { %v17574_v45 = vpop.eup %17573 }
 0x5d4   :  { %v19262_v63 = vand.u32 4294901760, %v17574_v45 }
 0x5d6   :  { %22654 = vst [vmem:[#allocation49_spill] sm:$0xff] %v19262_v63  ;;  %14973 = vmatmul.mubr.f32.vlgmr.msra.gmra.mxu1 %v19262_v63  ;;  %v19266_v41 = vsub.f32 %v17574_v45, %v19262_v63  ;;  %v22673_v45 = vld [vmem:[#allocation22_spill] sm:$0xff] }
 0x5d7   :  { %15011 = vmatpush3.msra.mxu1 %v17755_v5  ;;  %15042 = vmatprep.mubr.msk.f32.mxu1 %vm17682_vm0, %v22546_v34 }
 0x5d8   :  { %22655 = vst [vmem:[#allocation54_spill] sm:$0xff] %v19266_v41  ;;  %15012 = vmatprep.subr.mxu1 %v22546_v34  ;;  %v19273_v14 = vand.u32 4294901760, %v19266_v41 }
 0x5d9   :  { %15013 = vmatpush3.msra.mxu1 %v17757_v6 }
 0x5da   :  { %22656 = vst [vmem:[#allocation55_spill] sm:$0xff] %v19273_v14  ;;  %15014 = vmatprep.subr.mxu1 %v22546_v34  ;;  %v3634_v53 = vsub.f32 %v19266_v41, %v19273_v14 }
 0x5db   :  { %15015 = vmatpush3.msra.mxu1 %v17759_v7 }
 0x5dc   :  { %15016 = vmatprep.subr.mxu1 %v22546_v34  ;;  %v19281_v3 = vand.u32 4294901760, %v3634_v53  ;;  %v22674_v53 = vld [vmem:[#allocation24_spill] sm:$0xff] }
 0x5dd   :  { %15017 = vmatpush3.msra.mxu1 %v17770_v11 }
 0x5de   :  { %22657 = vst [vmem:[#allocation56_spill] sm:$0xff] %v19281_v3  ;;  %15018 = vmatprep.subr.mxu1 %v22546_v34  ;;  %14938 = vmatmul.mubr.f32.vlgmr.msra.gmra.mxu0 %v19281_v3  ;;  %v22677_v3 = vld [vmem:[#allocation30_spill] sm:$0xff] }
 0x5df   :  { %14976 = vmatpush3.msra.mxu0 %v17784_v16  ;;  %15019 = vmatpush3.msra.mxu1 %v17772_v12 }
 0x5e0   :  { %14977 = vmatprep.subr.mxu0 %v22546_v34  ;;  %15020 = vmatprep.subr.mxu1 %v22546_v34 }
 0x5e1   :  { %14978 = vmatpush3.msra.mxu0 %v17787_v17  ;;  %15021 = vmatpush3.msra.mxu1 %v17774_v13 }
 0x5e2   :  { %14979 = vmatprep.subr.mxu0 %v22546_v34  ;;  %15022 = vmatprep.subr.mxu1 %v22546_v34 }
 0x5e3   :  { %14980 = vmatpush3.msra.mxu0 %v17792_v19  ;;  %15023 = vmatpush3.msra.mxu1 %v17789_v18 }
 0x5e4   :  { %14981 = vmatprep.subr.mxu0 %v22546_v34  ;;  %15024 = vmatprep.subr.mxu1 %v22546_v34 }
 0x5e5   :  { %14982 = vmatpush3.msra.mxu0 %v17799_v21  ;;  %15025 = vmatpush3.msra.mxu1 %v17814_v26 }
 0x5e6   :  { %14983 = vmatprep.subr.mxu0 %v22546_v34  ;;  %15026 = vmatprep.subr.mxu1 %v22546_v34 }
 0x5e7   :  { %14984 = vmatpush3.msra.mxu0 %v17802_v22  ;;  %15027 = vmatpush3.msra.mxu1 %v17823_v29 }
 0x5e8   :  { %14985 = vmatprep.subr.mxu0 %v22546_v34  ;;  %15028 = vmatprep.subr.mxu1 %v22546_v34 }
 0x5e9   :  { %14986 = vmatpush3.msra.mxu0 %v17829_v31  ;;  %15029 = vmatpush3.msra.mxu1 %v17852_v38 }
 0x5ea   :  { %14987 = vmatprep.subr.mxu0 %v22546_v34  ;;  %15030 = vmatprep.subr.mxu1 %v22546_v34 }
 0x5eb   :  { %14988 = vmatpush3.msra.mxu0 %v17849_v37  ;;  %15031 = vmatpush3.msra.mxu1 %v17882_v48 }
 0x5ec   :  { %14989 = vmatprep.subr.mxu0 %v22546_v34  ;;  %15032 = vmatprep.subr.mxu1 %v22546_v34 }
 0x5ed   :  { %14990 = vmatpush3.msra.mxu0 %v17876_v46  ;;  %15033 = vmatpush3.msra.mxu1 %v17892_v51 }
 0x5ee   :  { %14991 = vmatprep.subr.mxu0 %v22546_v34  ;;  %15034 = vmatprep.subr.mxu1 %v22546_v34 }
 0x5ef   :  { %14992 = vmatpush3.msra.mxu0 %v17888_v50  ;;  %15035 = vmatpush3.msra.mxu1 %v17926_v62 }
 0x5f0   :  { %14993 = vmatprep.subr.mxu0 %v22546_v34  ;;  %15036 = vmatprep.subr.mxu1 %v22546_v34 }
 0x5f1   :  { %14994 = vmatpush3.msra.mxu0 %v17913_v58  ;;  %15037 = vmatpush3.msra.mxu1 %v17938_v4 }
 0x5f2   :  { %14995 = vmatprep.subr.mxu0 %v22546_v34  ;;  %15038 = vmatprep.subr.mxu1 %v22546_v34 }
 0x5f3   :  { %14996 = vmatpush3.msra.mxu0 %v17932_v2  ;;  %15039 = vmatpush3.msra.mxu1 %v17959_v27 }
 0x5f4   :  { %14997 = vmatprep.subr.mxu0 %v22546_v34  ;;  %15040 = vmatprep.subr.mxu1 %v22546_v34 }
 0x5f5   :  { %14998 = vmatpush3.msra.mxu0 %v17953_v15  ;;  %15041 = vmatpush3.msra.mxu1 %v17976_v42 }
 0x5f6   :  { %14999 = vmatprep.subr.mxu0 %v22546_v34  ;;  %15043 = vmatmul.mubr.f32.vlgmr.msra.gmra.mxu1 %v19273_v14  ;;  %v22676_v14 = vld [vmem:[#allocation28_spill] sm:$0xff] }
 0x5f7   :  { %15080 = vmatprep.subr.mxu1 %v22546_v34  ;;  %15000 = vmatpush3.msra.mxu0 %v17972_v39 }
 0x5f8   :  { %15081 = vmatpush3.msra.mxu1 %v17755_v5  ;;  %15001 = vmatprep.subr.mxu0 %v22546_v34 }
 0x5f9   :  { %15082 = vmatprep.subr.mxu1 %v22546_v34  ;;  %15002 = vmatpush3.msra.mxu0 %v17988_v52 }
 0x5fa   :  { %15083 = vmatpush3.msra.mxu1 %v17757_v6  ;;  %15003 = vmatprep.subr.mxu0 %v22546_v34 }
 0x5fb   :  { %15084 = vmatprep.subr.mxu1 %v22546_v34  ;;  %15004 = vmatpush3.msra.mxu0 %v18003_v57 }
 0x5fc   :  { %15085 = vmatpush3.msra.mxu1 %v17759_v7  ;;  %15005 = vmatprep.subr.mxu0 %v22546_v34 }
 0x5fd   :  { %15086 = vmatprep.subr.mxu1 %v22546_v34  ;;  %15006 = vmatpush3.msra.mxu0 %v18017_v8 }
 0x5fe   :  { %15007 = vmatprep.mubr.msk.f32.mxu0 %vm17682_vm0, %v22546_v34  ;;  %15087 = vmatpush3.msra.mxu1 %v17770_v11 }
 0x5ff   :  { %15008 = vmatmul.mubr.f32.vlgmr.msra.gmra.mxu0 %v19266_v41  ;;  %15045 = vmatprep.subr.mxu0 %v22546_v34  ;;  %v22675_v41 = vld [vmem:[#allocation26_spill] sm:$0xff] }
 0x600   :  { %15088 = vmatprep.subr.mxu1 %v22546_v34  ;;  %15046 = vmatpush3.msra.mxu0 %v17806_v23 }
 0x601   :  { %15089 = vmatpush3.msra.mxu1 %v17772_v12  ;;  %15047 = vmatprep.subr.mxu0 %v22546_v34 }
 0x602   :  { %15090 = vmatprep.subr.mxu1 %v22546_v34  ;;  %15048 = vmatpush3.msra.mxu0 %v17809_v24 }
 0x603   :  { %15091 = vmatpush3.msra.mxu1 %v17774_v13  ;;  %15049 = vmatprep.subr.mxu0 %v22546_v34 }
 0x604   :  { %15092 = vmatprep.subr.mxu1 %v22546_v34  ;;  %15050 = vmatpush3.msra.mxu0 %v17812_v25 }
 0x605   :  { %15093 = vmatpush3.msra.mxu1 %v17789_v18  ;;  %15051 = vmatprep.subr.mxu0 %v22546_v34 }
 0x606   :  { %15094 = vmatprep.subr.mxu1 %v22546_v34  ;;  %15052 = vmatpush3.msra.mxu0 %v17821_v28 }
 0x607   :  { %15095 = vmatpush3.msra.mxu1 %v17814_v26  ;;  %15053 = vmatprep.subr.mxu0 %v22546_v34 }
 0x608   :  { %15096 = vmatprep.subr.mxu1 %v22546_v34  ;;  %15054 = vmatpush3.msra.mxu0 %v17826_v30 }
 0x609   :  { %15097 = vmatpush3.msra.mxu1 %v17823_v29  ;;  %15055 = vmatprep.subr.mxu0 %v22546_v34 }
 0x60a   :  { %15098 = vmatprep.subr.mxu1 %v22546_v34  ;;  %15056 = vmatpush3.msra.mxu0 %v17866_v43 }
 0x60b   :  { %15099 = vmatpush3.msra.mxu1 %v17852_v38  ;;  %15057 = vmatprep.subr.mxu0 %v22546_v34 }
 0x60c   :  { %15100 = vmatprep.subr.mxu1 %v22546_v34  ;;  %15058 = vmatpush3.msra.mxu0 %v22574_v10 }
 0x60d   :  { %15101 = vmatpush3.msra.mxu1 %v17882_v48  ;;  %15059 = vmatprep.subr.mxu0 %v22546_v34 }
 0x60e   :  { %15102 = vmatprep.subr.mxu1 %v22546_v34  ;;  %15060 = vmatpush3.msra.mxu0 %v22658_v9 }
 0x60f   :  { %15103 = vmatpush3.msra.mxu1 %v17892_v51  ;;  %15061 = vmatprep.subr.mxu0 %v22546_v34 }
 0x610   :  { %15104 = vmatprep.subr.mxu1 %v22546_v34  ;;  %15062 = vmatpush3.msra.mxu0 %v22659_v54 }
 0x611   :  { %15105 = vmatpush3.msra.mxu1 %v17926_v62  ;;  %15063 = vmatprep.subr.mxu0 %v22546_v34 }
 0x612   :  { %15106 = vmatprep.subr.mxu1 %v22546_v34  ;;  %15064 = vmatpush3.msra.mxu0 %v22660_v36 }
 0x613   :  { %15107 = vmatpush3.msra.mxu1 %v17938_v4  ;;  %15065 = vmatprep.subr.mxu0 %v22546_v34 }
 0x614   :  { %15108 = vmatprep.subr.mxu1 %v22546_v34  ;;  %15066 = vmatpush3.msra.mxu0 %v22661_v0 }
 0x615   :  { %15109 = vmatpush3.msra.mxu1 %v17959_v27  ;;  %15067 = vmatprep.subr.mxu0 %v22546_v34 }
 0x616   :  { %15110 = vmatprep.subr.mxu1 %v22546_v34  ;;  %15068 = vmatpush3.msra.mxu0 %v22662_v49 }
 0x617   :  { %15111 = vmatpush3.msra.mxu1 %v17976_v42  ;;  %15112 = vmatprep.mubr.msk.f32.mxu1 %vm17682_vm0, %v22546_v34 }
 0x618   :  { %15069 = vmatprep.subr.mxu0 %v22546_v34  ;;  %15113 = vmatmul.mubr.f32.vlgmr.msra.gmra.mxu1 %v19262_v63 }
 0x619   :  { %15070 = vmatpush3.msra.mxu0 %v22663_v47  ;;  %15077 = vmatprep.mubr.msk.f32.mxu0 %vm17682_vm0, %v22546_v34 }
 0x61a   :  { %15071 = vmatprep.subr.mxu0 %v22546_v34  ;;  %15150 = vmatprep.subr.mxu1 %v22546_v34 }
 0x61b   :  { %15072 = vmatpush3.msra.mxu0 %v22664_v60  ;;  %15151 = vmatpush3.msra.mxu1 %v22665_v40  ;;  %v208_v60 = vpop.permute.xlu0 %207 }
 0x61c   :  { %15073 = vmatprep.subr.mxu0 %v22546_v34  ;;  %15152 = vmatprep.subr.mxu1 %v22546_v34  ;;  %v259_v49 = vmul.f32 %v19034_v44, %v208_v60  ;;  %v22693_v60 = vld [vmem:[#allocation29_spill] sm:$0xff] }
 0x61d   :  { %15074 = vmatpush3.msra.mxu0 %v22666_v1  ;;  %15153 = vmatpush3.msra.mxu1 %v22667_v61 }
 0x61e   :  { %15075 = vmatprep.subr.mxu0 %v22546_v34  ;;  %15154 = vmatprep.subr.mxu1 %v22546_v34 }
 0x61f   :  { %15076 = vmatpush3.msra.mxu0 %v22668_v56  ;;  %15155 = vmatpush3.msra.mxu1 %v22669_v20  ;;  %v97_v56 = vpop.permute.xlu1 %96 }
 0x620   :  { %15078 = vmatmul.mubr.f32.vlgmr.msra.gmra.mxu0 %v19262_v63  ;;  %15156 = vmatprep.subr.mxu1 %v22546_v34  ;;  %v22678_v63 = vld [vmem:[#allocation32_spill] sm:$0xff]  ;;  %v158_v1 = vmul.f32 %v22653_v33, %v97_v56  ;;  %v22697_v56 = vld [vmem:[#allocation33_spill] sm:$0xff] }
 0x621   :  { %15157 = vmatpush3.msra.mxu1 %v22670_v32  ;;  %15115 = vmatprep.subr.mxu0 %v22546_v34 }
 0x622   :  { %15158 = vmatprep.subr.mxu1 %v22546_v34  ;;  %15116 = vmatpush3.msra.mxu0 %v17755_v5  ;;  %v174_v47 = vadd.f32 %v19028_v35, %v158_v1  ;;  %v22695_v1 = vld [vmem:[#allocation31_spill] sm:$0xff] }
 0x623   :  { %15159 = vmatpush3.msra.mxu1 %v22671_v55  ;;  %15117 = vmatprep.subr.mxu0 %v22546_v34 }
 0x624   :  { %15160 = vmatprep.subr.mxu1 %v22546_v34  ;;  %15118 = vmatpush3.msra.mxu0 %v17757_v6  ;;  %v275_v54 = vadd.f32 %v259_v49, %v174_v47  ;;  %v22691_v49 = vld [vmem:[#allocation25_spill] sm:$0xff]  ;;  %v22692_v47 = vld [vmem:[#allocation27_spill] sm:$0xff] }
 0x625   :  { %15161 = vmatpush3.msra.mxu1 %v22672_v59  ;;  %15119 = vmatprep.subr.mxu0 %v22546_v34 }
 0x626   :  { %15162 = vmatprep.subr.mxu1 %v22546_v34  ;;  %15120 = vmatpush3.msra.mxu0 %v17759_v7 }
 0x627   :  { %15163 = vmatpush3.msra.mxu1 %v22673_v45  ;;  %15121 = vmatprep.subr.mxu0 %v22546_v34 }
 0x628   :  { %15164 = vmatprep.subr.mxu1 %v22546_v34  ;;  %15122 = vmatpush3.msra.mxu0 %v17770_v11 }
 0x629   :  { %15165 = vmatpush3.msra.mxu1 %v22674_v53  ;;  %15123 = vmatprep.subr.mxu0 %v22546_v34 }
 0x62a   :  { %15166 = vmatprep.subr.mxu1 %v22546_v34  ;;  %15124 = vmatpush3.msra.mxu0 %v17772_v12 }
 0x62b   :  { %15167 = vmatpush3.msra.mxu1 %v22675_v41  ;;  %15125 = vmatprep.subr.mxu0 %v22546_v34 }
 0x62c   :  { %15168 = vmatprep.subr.mxu1 %v22546_v34  ;;  %15126 = vmatpush3.msra.mxu0 %v17774_v13 }
 0x62d   :  { %15169 = vmatpush3.msra.mxu1 %v22676_v14  ;;  %15127 = vmatprep.subr.mxu0 %v22546_v34  ;;  %v22679_v14 = vld [vmem:[#allocation34_spill] sm:$0xff] }
 0x62e   :  { %15170 = vmatprep.subr.mxu1 %v22546_v34  ;;  %15128 = vmatpush3.msra.mxu0 %v17789_v18 }
 0x62f   :  { %15171 = vmatpush3.msra.mxu1 %v22677_v3  ;;  %15129 = vmatprep.subr.mxu0 %v22546_v34  ;;  %v22680_v3 = vld [vmem:[#allocation35_spill] sm:$0xff] }
 0x630   :  { %15172 = vmatprep.subr.mxu1 %v22546_v34  ;;  %15130 = vmatpush3.msra.mxu0 %v17814_v26 }
 0x631   :  { %15173 = vmatpush3.msra.mxu1 %v22678_v63  ;;  %15131 = vmatprep.subr.mxu0 %v22546_v34  ;;  %v22681_v63 = vld [vmem:[#allocation36_spill] sm:$0xff] }
 0x632   :  { %15174 = vmatprep.subr.mxu1 %v22546_v34  ;;  %15132 = vmatpush3.msra.mxu0 %v17823_v29 }
 0x633   :  { %15175 = vmatpush3.msra.mxu1 %v22679_v14  ;;  %15133 = vmatprep.subr.mxu0 %v22546_v34  ;;  %v22682_v14 = vld [vmem:[#allocation37_spill] sm:$0xff] }
 0x634   :  { %15176 = vmatprep.subr.mxu1 %v22546_v34  ;;  %15134 = vmatpush3.msra.mxu0 %v17852_v38 }
 0x635   :  { %15177 = vmatpush3.msra.mxu1 %v22680_v3  ;;  %15135 = vmatprep.subr.mxu0 %v22546_v34 }
 0x636   :  { %15178 = vmatprep.subr.mxu1 %v22546_v34  ;;  %15136 = vmatpush3.msra.mxu0 %v17882_v48 }
 0x637   :  { %15179 = vmatpush3.msra.mxu1 %v22681_v63  ;;  %15137 = vmatprep.subr.mxu0 %v22546_v34 }
 0x638   :  { %15180 = vmatprep.subr.mxu1 %v22546_v34  ;;  %15138 = vmatpush3.msra.mxu0 %v17892_v51 }
 0x639   :  { %15181 = vmatpush3.msra.mxu1 %v22682_v14  ;;  %15139 = vmatprep.subr.mxu0 %v22546_v34 }
 0x63a   :  { %15182 = vmatprep.mubr.msk.f32.mxu1 %vm17682_vm0, %v22546_v34  ;;  %15220 = vmatprep.subr.mxu1 %v22546_v34 }
 0x63b   :  { %15140 = vmatpush3.msra.mxu0 %v17926_v62  ;;  %15147 = vmatprep.mubr.msk.f32.mxu0 %vm17682_vm0, %v22546_v34 }
 0x63c   :  { %15141 = vmatprep.subr.mxu0 %v22546_v34 }
 0x63d   :  { %15142 = vmatpush3.msra.mxu0 %v17938_v4 }
 0x63e   :  { %15143 = vmatprep.subr.mxu0 %v22546_v34 }
 0x63f   :  { %15144 = vmatpush3.msra.mxu0 %v17959_v27 }
 0x640   :  { %15145 = vmatprep.subr.mxu0 %v22546_v34 }
 0x641   :  { %15146 = vmatpush3.msra.mxu0 %v17976_v42 }
 0x642   :  { %15185 = vmatprep.subr.mxu0 %v22546_v34 }
 0x696   :  { %v3788_v14 = vpop.f32.mrf.mxu1 }
 0x698   :  { %v14974_v63 = vpop.f32.mrf.mxu1 }
 0x69e   :  { %v3637_v3 = vpop.f32.mrf.mxu0 }
 0x69f   :  { %v3789_v20 = vadd.f32 %v3788_v14, %v3637_v3 }
 0x6a0   :  { %v14939_v41 = vpop.f32.mrf.mxu0 }
 0x6b6   :  { %v3981_v53 = vpop.f32.mrf.mxu1 }
 0x6b8   :  { %v15044_v45 = vpop.f32.mrf.mxu1 }
 0x6bf   :  { %v3892_v59 = vpop.f32.mrf.mxu0 }
 0x6c0   :  { %v3893_v40 = vadd.f32 %v3892_v59, %v3789_v20  ;;  %v22698_v20 = vld [vmem:[#allocation14_spill] sm:$0xff] }
 0x6c1   :  { %v15009_v55 = vpop.f32.mrf.mxu0  ;;  %v22700_v59 = vld [vmem:[#allocation18_spill] sm:$0xff] }
 0x6c2   :  { %v3982_v0 = vadd.f32 %v3981_v53, %v3893_v40  ;;  %v22694_v40 = vld [vmem:[#allocation12_spill] sm:$0xff] }
 0x6c3   :  { %v22701_v53 = vld [vmem:[#allocation20_spill] sm:$0xff] }
 0x6d8   :  { %v4187_v32 = vpop.f32.mrf.mxu1 }
 0x6da   :  { %v15114_v61 = vpop.f32.mrf.mxu1 }
 0x6db   :  { %v22696_v61 = vld [vmem:[#allocation13_spill] sm:$0xff] }
 0x6e0   :  { %v4100_v63 = vpop.f32.mrf.mxu0 }
 0x6e1   :  { %v4101_v36 = vadd.f32 %v4100_v63, %v3982_v0  ;;  %v22690_v0 = vld [vmem:[#allocation23_spill] sm:$0xff]  ;;  %v22702_v63 = vld [vmem:[#allocation22_spill] sm:$0xff] }
 0x6e2   :  { %v15079_v41 = vpop.f32.mrf.mxu0 }
 0x6e3   :  { %v4188_v45 = vadd.f32 %v4187_v32, %v4101_v36  ;;  %v22689_v36 = vld [vmem:[#allocation21_spill] sm:$0xff]  ;;  %v22699_v32 = vld [vmem:[#allocation16_spill] sm:$0xff] }
 0x6e4   :  { %v22703_v41 = vld [vmem:[#allocation24_spill] sm:$0xff] }
 0x6e5   :  { %v4191_v9 = vadd.f32 %v4188_v45, %v275_v54  ;;  %v22688_v54 = vld [vmem:[#allocation19_spill] sm:$0xff]  ;;  %v22704_v45 = vld [vmem:[#allocation26_spill] sm:$0xff] }
 0x6e7   :  { %17575 = vtanh.f32 %v4191_v9  ;;  %v22687_v9 = vld [vmem:[#allocation17_spill] sm:$0xff] }
 0x6f4   :  { %v17576_v55 = vpop.eup %17575 }
 0x6f5   :  { %v19487_v14 = vand.u32 4294901760, %v17576_v55 }
 0x6f7   :  { %22683 = vst [vmem:[#allocation57_spill] sm:$0xff] %v19487_v14  ;;  %15183 = vmatmul.mubr.f32.vlgmr.msra.gmra.mxu1 %v19487_v14  ;;  %v19491_v33 = vsub.f32 %v17576_v55, %v19487_v14  ;;  %v22705_v55 = vld [vmem:[#allocation28_spill] sm:$0xff] }
 0x6f8   :  { %15221 = vmatpush3.msra.mxu1 %v17755_v5  ;;  %15252 = vmatprep.mubr.msk.f32.mxu1 %vm17682_vm0, %v22546_v34 }
 0x6f9   :  { %22684 = vst [vmem:[#allocation58_spill] sm:$0xff] %v19491_v33  ;;  %15222 = vmatprep.subr.mxu1 %v22546_v34  ;;  %v19498_v35 = vand.u32 4294901760, %v19491_v33 }
 0x6fa   :  { %15223 = vmatpush3.msra.mxu1 %v17757_v6 }
 0x6fb   :  { %22685 = vst [vmem:[#allocation59_spill] sm:$0xff] %v19498_v35  ;;  %15224 = vmatprep.subr.mxu1 %v22546_v34  ;;  %v4280_v44 = vsub.f32 %v19491_v33, %v19498_v35 }
 0x6fc   :  { %15225 = vmatpush3.msra.mxu1 %v17759_v7 }
 0x6fd   :  { %15226 = vmatprep.subr.mxu1 %v22546_v34  ;;  %v19506_v3 = vand.u32 4294901760, %v4280_v44  ;;  %v22706_v44 = vld [vmem:[#allocation30_spill] sm:$0xff] }
 0x6fe   :  { %15227 = vmatpush3.msra.mxu1 %v17770_v11 }
 0x6ff   :  { %22686 = vst [vmem:[#allocation60_spill] sm:$0xff] %v19506_v3  ;;  %15228 = vmatprep.subr.mxu1 %v22546_v34  ;;  %15148 = vmatmul.mubr.f32.vlgmr.msra.gmra.mxu0 %v19506_v3  ;;  %v22709_v3 = vld [vmem:[#allocation35_spill] sm:$0xff] }
 0x700   :  { %15186 = vmatpush3.msra.mxu0 %v17784_v16  ;;  %15229 = vmatpush3.msra.mxu1 %v17772_v12 }
 0x701   :  { %15187 = vmatprep.subr.mxu0 %v22546_v34  ;;  %15230 = vmatprep.subr.mxu1 %v22546_v34 }
 0x702   :  { %15188 = vmatpush3.msra.mxu0 %v17787_v17  ;;  %15231 = vmatpush3.msra.mxu1 %v17774_v13 }
 0x703   :  { %15189 = vmatprep.subr.mxu0 %v22546_v34  ;;  %15232 = vmatprep.subr.mxu1 %v22546_v34 }
 0x704   :  { %15190 = vmatpush3.msra.mxu0 %v17792_v19  ;;  %15233 = vmatpush3.msra.mxu1 %v17789_v18 }
 0x705   :  { %15191 = vmatprep.subr.mxu0 %v22546_v34  ;;  %15234 = vmatprep.subr.mxu1 %v22546_v34 }
 0x706   :  { %15192 = vmatpush3.msra.mxu0 %v17799_v21  ;;  %15235 = vmatpush3.msra.mxu1 %v17814_v26 }
 0x707   :  { %15193 = vmatprep.subr.mxu0 %v22546_v34  ;;  %15236 = vmatprep.subr.mxu1 %v22546_v34 }
 0x708   :  { %15194 = vmatpush3.msra.mxu0 %v17802_v22  ;;  %15237 = vmatpush3.msra.mxu1 %v17823_v29 }
 0x709   :  { %15195 = vmatprep.subr.mxu0 %v22546_v34  ;;  %15238 = vmatprep.subr.mxu1 %v22546_v34 }
 0x70a   :  { %15196 = vmatpush3.msra.mxu0 %v17829_v31  ;;  %15239 = vmatpush3.msra.mxu1 %v17852_v38 }
 0x70b   :  { %15197 = vmatprep.subr.mxu0 %v22546_v34  ;;  %15240 = vmatprep.subr.mxu1 %v22546_v34 }
 0x70c   :  { %15198 = vmatpush3.msra.mxu0 %v17849_v37  ;;  %15241 = vmatpush3.msra.mxu1 %v17882_v48 }
 0x70d   :  { %15199 = vmatprep.subr.mxu0 %v22546_v34  ;;  %15242 = vmatprep.subr.mxu1 %v22546_v34 }
 0x70e   :  { %15200 = vmatpush3.msra.mxu0 %v17876_v46  ;;  %15243 = vmatpush3.msra.mxu1 %v17892_v51 }
 0x70f   :  { %15201 = vmatprep.subr.mxu0 %v22546_v34  ;;  %15244 = vmatprep.subr.mxu1 %v22546_v34 }
 0x710   :  { %15202 = vmatpush3.msra.mxu0 %v17888_v50  ;;  %15245 = vmatpush3.msra.mxu1 %v17926_v62 }
 0x711   :  { %15203 = vmatprep.subr.mxu0 %v22546_v34  ;;  %15246 = vmatprep.subr.mxu1 %v22546_v34 }
 0x712   :  { %15204 = vmatpush3.msra.mxu0 %v17913_v58  ;;  %15247 = vmatpush3.msra.mxu1 %v17938_v4 }
 0x713   :  { %15205 = vmatprep.subr.mxu0 %v22546_v34  ;;  %15248 = vmatprep.subr.mxu1 %v22546_v34 }
 0x714   :  { %15206 = vmatpush3.msra.mxu0 %v17932_v2  ;;  %15249 = vmatpush3.msra.mxu1 %v17959_v27 }
 0x715   :  { %15207 = vmatprep.subr.mxu0 %v22546_v34  ;;  %15250 = vmatprep.subr.mxu1 %v22546_v34 }
 0x716   :  { %15208 = vmatpush3.msra.mxu0 %v17953_v15  ;;  %15251 = vmatpush3.msra.mxu1 %v17976_v42 }
 0x717   :  { %15209 = vmatprep.subr.mxu0 %v22546_v34  ;;  %15253 = vmatmul.mubr.f32.vlgmr.msra.gmra.mxu1 %v19498_v35  ;;  %v22708_v35 = vld [vmem:[#allocation34_spill] sm:$0xff] }
 0x718   :  { %15290 = vmatprep.subr.mxu1 %v22546_v34  ;;  %15210 = vmatpush3.msra.mxu0 %v17972_v39 }
 0x719   :  { %15291 = vmatpush3.msra.mxu1 %v17755_v5  ;;  %15211 = vmatprep.subr.mxu0 %v22546_v34 }
 0x71a   :  { %15292 = vmatprep.subr.mxu1 %v22546_v34  ;;  %15212 = vmatpush3.msra.mxu0 %v17988_v52 }
 0x71b   :  { %15293 = vmatpush3.msra.mxu1 %v17757_v6  ;;  %15213 = vmatprep.subr.mxu0 %v22546_v34 }
 0x71c   :  { %15294 = vmatprep.subr.mxu1 %v22546_v34  ;;  %15214 = vmatpush3.msra.mxu0 %v18003_v57 }
 0x71d   :  { %15295 = vmatpush3.msra.mxu1 %v17759_v7  ;;  %15215 = vmatprep.subr.mxu0 %v22546_v34 }
 0x71e   :  { %15296 = vmatprep.subr.mxu1 %v22546_v34  ;;  %15216 = vmatpush3.msra.mxu0 %v18017_v8 }
 0x71f   :  { %15217 = vmatprep.mubr.msk.f32.mxu0 %vm17682_vm0, %v22546_v34  ;;  %15297 = vmatpush3.msra.mxu1 %v17770_v11 }
 0x720   :  { %15218 = vmatmul.mubr.f32.vlgmr.msra.gmra.mxu0 %v19491_v33  ;;  %15255 = vmatprep.subr.mxu0 %v22546_v34  ;;  %v22707_v33 = vld [vmem:[#allocation32_spill] sm:$0xff] }
 0x721   :  { %15298 = vmatprep.subr.mxu1 %v22546_v34  ;;  %15256 = vmatpush3.msra.mxu0 %v17806_v23 }
 0x722   :  { %15299 = vmatpush3.msra.mxu1 %v17772_v12  ;;  %15257 = vmatprep.subr.mxu0 %v22546_v34 }
 0x723   :  { %15300 = vmatprep.subr.mxu1 %v22546_v34  ;;  %15258 = vmatpush3.msra.mxu0 %v17809_v24 }
 0x724   :  { %15301 = vmatpush3.msra.mxu1 %v17774_v13  ;;  %15259 = vmatprep.subr.mxu0 %v22546_v34 }
 0x725   :  { %15302 = vmatprep.subr.mxu1 %v22546_v34  ;;  %15260 = vmatpush3.msra.mxu0 %v17812_v25 }
 0x726   :  { %15303 = vmatpush3.msra.mxu1 %v17789_v18  ;;  %15261 = vmatprep.subr.mxu0 %v22546_v34 }
 0x727   :  { %15304 = vmatprep.subr.mxu1 %v22546_v34  ;;  %15262 = vmatpush3.msra.mxu0 %v17821_v28 }
 0x728   :  { %15305 = vmatpush3.msra.mxu1 %v17814_v26  ;;  %15263 = vmatprep.subr.mxu0 %v22546_v34 }
 0x729   :  { %15306 = vmatprep.subr.mxu1 %v22546_v34  ;;  %15264 = vmatpush3.msra.mxu0 %v17826_v30 }
 0x72a   :  { %15307 = vmatpush3.msra.mxu1 %v17823_v29  ;;  %15265 = vmatprep.subr.mxu0 %v22546_v34 }
 0x72b   :  { %15308 = vmatprep.subr.mxu1 %v22546_v34  ;;  %15266 = vmatpush3.msra.mxu0 %v17866_v43 }
 0x72c   :  { %15309 = vmatpush3.msra.mxu1 %v17852_v38  ;;  %15267 = vmatprep.subr.mxu0 %v22546_v34 }
 0x72d   :  { %15310 = vmatprep.subr.mxu1 %v22546_v34  ;;  %15268 = vmatpush3.msra.mxu0 %v22574_v10 }
 0x72e   :  { %15311 = vmatpush3.msra.mxu1 %v17882_v48  ;;  %15269 = vmatprep.subr.mxu0 %v22546_v34 }
 0x72f   :  { %15312 = vmatprep.subr.mxu1 %v22546_v34  ;;  %15270 = vmatpush3.msra.mxu0 %v22687_v9 }
 0x730   :  { %15313 = vmatpush3.msra.mxu1 %v17892_v51  ;;  %15271 = vmatprep.subr.mxu0 %v22546_v34 }
 0x731   :  { %15314 = vmatprep.subr.mxu1 %v22546_v34  ;;  %15272 = vmatpush3.msra.mxu0 %v22688_v54 }
 0x732   :  { %15315 = vmatpush3.msra.mxu1 %v17926_v62  ;;  %15273 = vmatprep.subr.mxu0 %v22546_v34 }
 0x733   :  { %15316 = vmatprep.subr.mxu1 %v22546_v34  ;;  %15274 = vmatpush3.msra.mxu0 %v22689_v36 }
 0x734   :  { %15317 = vmatpush3.msra.mxu1 %v17938_v4  ;;  %15275 = vmatprep.subr.mxu0 %v22546_v34 }
 0x735   :  { %15318 = vmatprep.subr.mxu1 %v22546_v34  ;;  %15276 = vmatpush3.msra.mxu0 %v22690_v0 }
 0x736   :  { %15319 = vmatpush3.msra.mxu1 %v17959_v27  ;;  %15277 = vmatprep.subr.mxu0 %v22546_v34 }
 0x737   :  { %15320 = vmatprep.subr.mxu1 %v22546_v34  ;;  %15278 = vmatpush3.msra.mxu0 %v22691_v49 }
 0x738   :  { %15321 = vmatpush3.msra.mxu1 %v17976_v42  ;;  %15322 = vmatprep.mubr.msk.f32.mxu1 %vm17682_vm0, %v22546_v34 }
 0x739   :  { %15279 = vmatprep.subr.mxu0 %v22546_v34  ;;  %15323 = vmatmul.mubr.f32.vlgmr.msra.gmra.mxu1 %v19487_v14 }
 0x73a   :  { %15280 = vmatpush3.msra.mxu0 %v22692_v47  ;;  %15287 = vmatprep.mubr.msk.f32.mxu0 %vm17682_vm0, %v22546_v34 }
 0x73b   :  { %15281 = vmatprep.subr.mxu0 %v22546_v34  ;;  %15360 = vmatprep.subr.mxu1 %v22546_v34 }
 0x73c   :  { %15282 = vmatpush3.msra.mxu0 %v22693_v60  ;;  %15361 = vmatpush3.msra.mxu1 %v22694_v40 }
 0x73d   :  { %15283 = vmatprep.subr.mxu0 %v22546_v34  ;;  %15362 = vmatprep.subr.mxu1 %v22546_v34 }
 0x73e   :  { %15284 = vmatpush3.msra.mxu0 %v22695_v1  ;;  %15363 = vmatpush3.msra.mxu1 %v22696_v61  ;;  %v212_v1 = vpop.permute.xlu0 %211 }
 0x73f   :  { %15285 = vmatprep.subr.mxu0 %v22546_v34  ;;  %15364 = vmatprep.subr.mxu1 %v22546_v34 }
 0x740   :  { %15286 = vmatpush3.msra.mxu0 %v22697_v56  ;;  %15365 = vmatpush3.msra.mxu1 %v22698_v20  ;;  %v19712_v20 = vld [vmem:[%s22337_s2] ss:$0 sm:$0xff] }
 0x741   :  { %15288 = vmatmul.mubr.f32.vlgmr.msra.gmra.mxu0 %v19487_v14  ;;  %15366 = vmatprep.subr.mxu1 %v22546_v34  ;;  %v22710_v14 = vld [vmem:[#allocation36_spill] sm:$0xff]  ;;  %22712 = vst [vmem:[#allocation61_spill] sm:$0xff] %v19712_v20 }
 0x742   :  { %15367 = vmatpush3.msra.mxu1 %v22699_v32  ;;  %15325 = vmatprep.subr.mxu0 %v22546_v34 }
 0x743   :  { %15368 = vmatprep.subr.mxu1 %v22546_v34  ;;  %15326 = vmatpush3.msra.mxu0 %v17755_v5 }
 0x744   :  { %15369 = vmatpush3.msra.mxu1 %v22700_v59  ;;  %15327 = vmatprep.subr.mxu0 %v22546_v34  ;;  %v102_v59 = vpop.permute.xlu1 %101 }
 0x745   :  { %15370 = vmatprep.subr.mxu1 %v22546_v34  ;;  %15328 = vmatpush3.msra.mxu0 %v17757_v6  ;;  %v159_v56 = vmul.f32 %v19712_v20, %v102_v59 }
 0x746   :  { %15371 = vmatpush3.msra.mxu1 %v22701_v53  ;;  %15329 = vmatprep.subr.mxu0 %v22546_v34 }
 0x747   :  { %15372 = vmatprep.subr.mxu1 %v22546_v34  ;;  %15330 = vmatpush3.msra.mxu0 %v17759_v7 }
 0x748   :  { %15373 = vmatpush3.msra.mxu1 %v22702_v63  ;;  %15331 = vmatprep.subr.mxu0 %v22546_v34 }
 0x749   :  { %15374 = vmatprep.subr.mxu1 %v22546_v34  ;;  %15332 = vmatpush3.msra.mxu0 %v17770_v11 }
 0x74a   :  { %15375 = vmatpush3.msra.mxu1 %v22703_v41  ;;  %15333 = vmatprep.subr.mxu0 %v22546_v34 }
 0x74b   :  { %15376 = vmatprep.subr.mxu1 %v22546_v34  ;;  %15334 = vmatpush3.msra.mxu0 %v17772_v12 }
 0x74c   :  { %15377 = vmatpush3.msra.mxu1 %v22704_v45  ;;  %15335 = vmatprep.subr.mxu0 %v22546_v34 }
 0x74d   :  { %15378 = vmatprep.subr.mxu1 %v22546_v34  ;;  %15336 = vmatpush3.msra.mxu0 %v17774_v13 }
 0x74e   :  { %15379 = vmatpush3.msra.mxu1 %v22705_v55  ;;  %15337 = vmatprep.subr.mxu0 %v22546_v34 }
 0x74f   :  { %15380 = vmatprep.subr.mxu1 %v22546_v34  ;;  %15338 = vmatpush3.msra.mxu0 %v17789_v18 }
 0x750   :  { %15381 = vmatpush3.msra.mxu1 %v22706_v44  ;;  %15339 = vmatprep.subr.mxu0 %v22546_v34 }
 0x751   :  { %15382 = vmatprep.subr.mxu1 %v22546_v34  ;;  %15340 = vmatpush3.msra.mxu0 %v17814_v26 }
 0x752   :  { %15383 = vmatpush3.msra.mxu1 %v22707_v33  ;;  %15341 = vmatprep.subr.mxu0 %v22546_v34 }
 0x753   :  { %15384 = vmatprep.subr.mxu1 %v22546_v34  ;;  %15342 = vmatpush3.msra.mxu0 %v17823_v29 }
 0x754   :  { %15385 = vmatpush3.msra.mxu1 %v22708_v35  ;;  %15343 = vmatprep.subr.mxu0 %v22546_v34  ;;  %v22711_v35 = vld [vmem:[#allocation37_spill] sm:$0xff] }
 0x755   :  { %15386 = vmatprep.subr.mxu1 %v22546_v34  ;;  %15344 = vmatpush3.msra.mxu0 %v17852_v38 }
 0x756   :  { %15387 = vmatpush3.msra.mxu1 %v22709_v3  ;;  %15345 = vmatprep.subr.mxu0 %v22546_v34 }
 0x757   :  { %15388 = vmatprep.subr.mxu1 %v22546_v34  ;;  %15346 = vmatpush3.msra.mxu0 %v17882_v48 }
 0x758   :  { %15389 = vmatpush3.msra.mxu1 %v22710_v14  ;;  %15347 = vmatprep.subr.mxu0 %v22546_v34 }
 0x759   :  { %15390 = vmatprep.subr.mxu1 %v22546_v34  ;;  %15348 = vmatpush3.msra.mxu0 %v17892_v51 }
 0x75a   :  { %15391 = vmatpush3.msra.mxu1 %v22711_v35  ;;  %15349 = vmatprep.subr.mxu0 %v22546_v34 }
 0x75b   :  { %15392 = vmatprep.mubr.msk.f32.mxu1 %vm17682_vm0, %v22546_v34  ;;  %15430 = vmatprep.subr.mxu1 %v22546_v34 }
 0x75c   :  { %15350 = vmatpush3.msra.mxu0 %v17926_v62  ;;  %15357 = vmatprep.mubr.msk.f32.mxu0 %vm17682_vm0, %v22546_v34 }
 0x75d   :  { %15351 = vmatprep.subr.mxu0 %v22546_v34 }
 0x75e   :  { %15352 = vmatpush3.msra.mxu0 %v17938_v4 }
 0x75f   :  { %15353 = vmatprep.subr.mxu0 %v22546_v34 }
 0x760   :  { %15354 = vmatpush3.msra.mxu0 %v17959_v27 }
 0x761   :  { %15355 = vmatprep.subr.mxu0 %v22546_v34 }
 0x762   :  { %15356 = vmatpush3.msra.mxu0 %v17976_v42 }
 0x763   :  { %15395 = vmatprep.subr.mxu0 %v22546_v34 }
 0x7b7   :  { %v4434_v35 = vpop.f32.mrf.mxu1 }
 0x7b9   :  { %v15184_v14 = vpop.f32.mrf.mxu1 }
 0x7ba   :  { %v19718_v14 = vld [vmem:[%s22339_s4] ss:$0 sm:$0xff] }
 0x7bf   :  { %v4283_v3 = vpop.f32.mrf.mxu0 }
 0x7c0   :  { %v4435_v53 = vadd.f32 %v4434_v35, %v4283_v3  ;;  %v19724_v35 = vld [vmem:[%s22337_s2 + $0x1] ss:$0 sm:$0xff] }
 0x7c1   :  { %v15149_v33 = vpop.f32.mrf.mxu0  ;;  %v260_v3 = vmul.f32 %v19724_v35, %v212_v1 }
 0x7c2   :  { %v175_v33 = vadd.f32 %v19718_v14, %v159_v56 }
 0x7d7   :  { %v4627_v44 = vpop.f32.mrf.mxu1 }
 0x7d9   :  { %v15254_v55 = vpop.f32.mrf.mxu1 }
 0x7e0   :  { %v4538_v45 = vpop.f32.mrf.mxu0 }
 0x7e1   :  { %v4539_v61 = vadd.f32 %v4538_v45, %v4435_v53  ;;  %v276_v53 = vadd.f32 %v260_v3, %v175_v33  ;;  %v22720_v33 = vld [vmem:[#allocation13_spill] sm:$0xff] }
 0x7e2   :  { %v15219_v41 = vpop.f32.mrf.mxu0  ;;  %v22721_v3 = vld [vmem:[#allocation33_spill] sm:$0xff] }
 0x7f9   :  { %v4833_v63 = vpop.f32.mrf.mxu1 }
 0x7fb   :  { %v15324_v32 = vpop.f32.mrf.mxu1 }
 0x7fc   :  { %v4628_v32 = vadd.f32 %v4627_v44, %v4539_v61  ;;  %v22719_v44 = vld [vmem:[#allocation31_spill] sm:$0xff] }
 0x801   :  { %v4746_v41 = vpop.f32.mrf.mxu0 }
 0x802   :  { %v4747_v55 = vadd.f32 %v4746_v41, %v4628_v32  ;;  %v22722_v32 = vld [vmem:[#allocation14_spill] sm:$0xff]  ;;  %v22723_v41 = vld [vmem:[#allocation16_spill] sm:$0xff] }
 0x803   :  { %v15289_v59 = vpop.f32.mrf.mxu0 }
 0x804   :  { %v4834_v45 = vadd.f32 %v4833_v63, %v4747_v55  ;;  %v22718_v63 = vld [vmem:[#allocation12_spill] sm:$0xff]  ;;  %v22724_v55 = vld [vmem:[#allocation18_spill] sm:$0xff] }
 0x805   :  { %v22725_v59 = vld [vmem:[#allocation20_spill] sm:$0xff] }
 0x806   :  { %v4837_v20 = vadd.f32 %v4834_v45, %v276_v53  ;;  %v22726_v53 = vld [vmem:[#allocation22_spill] sm:$0xff]  ;;  %v22727_v45 = vld [vmem:[#allocation24_spill] sm:$0xff] }
 0x808   :  { %17577 = vtanh.f32 %v4837_v20  ;;  %v22717_v20 = vld [vmem:[#allocation29_spill] sm:$0xff] }
 0x815   :  { %v17578_v40 = vpop.eup %17577 }
 0x816   :  { %v19727_v60 = vand.u32 4294901760, %v17578_v40 }
 0x818   :  { %22713 = vst [vmem:[#allocation62_spill] sm:$0xff] %v19727_v60  ;;  %15393 = vmatmul.mubr.f32.vlgmr.msra.gmra.mxu1 %v19727_v60  ;;  %v19731_v56 = vsub.f32 %v17578_v40, %v19727_v60 }
 0x819   :  { %15431 = vmatpush3.msra.mxu1 %v17755_v5  ;;  %15462 = vmatprep.mubr.msk.f32.mxu1 %vm17682_vm0, %v22546_v34 }
 0x81a   :  { %22714 = vst [vmem:[#allocation63_spill] sm:$0xff] %v19731_v56  ;;  %15432 = vmatprep.subr.mxu1 %v22546_v34  ;;  %v19738_v1 = vand.u32 4294901760, %v19731_v56 }
 0x81b   :  { %15433 = vmatpush3.msra.mxu1 %v17757_v6 }
 0x81c   :  { %22715 = vst [vmem:[#allocation64_spill] sm:$0xff] %v19738_v1  ;;  %15434 = vmatprep.subr.mxu1 %v22546_v34  ;;  %v4926_v61 = vsub.f32 %v19731_v56, %v19738_v1 }
 0x81d   :  { %15435 = vmatpush3.msra.mxu1 %v17759_v7 }
 0x81e   :  { %15436 = vmatprep.subr.mxu1 %v22546_v34  ;;  %v19746_v40 = vand.u32 4294901760, %v4926_v61  ;;  %v22728_v61 = vld [vmem:[#allocation26_spill] sm:$0xff] }
 0x81f   :  { %15437 = vmatpush3.msra.mxu1 %v17770_v11 }
 0x820   :  { %22716 = vst [vmem:[#allocation65_spill] sm:$0xff] %v19746_v40  ;;  %15438 = vmatprep.subr.mxu1 %v22546_v34  ;;  %15358 = vmatmul.mubr.f32.vlgmr.msra.gmra.mxu0 %v19746_v40  ;;  %v22731_v40 = vld [vmem:[#allocation32_spill] sm:$0xff] }
 0x821   :  { %15396 = vmatpush3.msra.mxu0 %v17784_v16  ;;  %15439 = vmatpush3.msra.mxu1 %v17772_v12 }
 0x822   :  { %15397 = vmatprep.subr.mxu0 %v22546_v34  ;;  %15440 = vmatprep.subr.mxu1 %v22546_v34 }
 0x823   :  { %15398 = vmatpush3.msra.mxu0 %v17787_v17  ;;  %15441 = vmatpush3.msra.mxu1 %v17774_v13 }
 0x824   :  { %15399 = vmatprep.subr.mxu0 %v22546_v34  ;;  %15442 = vmatprep.subr.mxu1 %v22546_v34 }
 0x825   :  { %15400 = vmatpush3.msra.mxu0 %v17792_v19  ;;  %15443 = vmatpush3.msra.mxu1 %v17789_v18 }
 0x826   :  { %15401 = vmatprep.subr.mxu0 %v22546_v34  ;;  %15444 = vmatprep.subr.mxu1 %v22546_v34 }
 0x827   :  { %15402 = vmatpush3.msra.mxu0 %v17799_v21  ;;  %15445 = vmatpush3.msra.mxu1 %v17814_v26 }
 0x828   :  { %15403 = vmatprep.subr.mxu0 %v22546_v34  ;;  %15446 = vmatprep.subr.mxu1 %v22546_v34 }
 0x829   :  { %15404 = vmatpush3.msra.mxu0 %v17802_v22  ;;  %15447 = vmatpush3.msra.mxu1 %v17823_v29 }
 0x82a   :  { %15405 = vmatprep.subr.mxu0 %v22546_v34  ;;  %15448 = vmatprep.subr.mxu1 %v22546_v34 }
 0x82b   :  { %15406 = vmatpush3.msra.mxu0 %v17829_v31  ;;  %15449 = vmatpush3.msra.mxu1 %v17852_v38 }
 0x82c   :  { %15407 = vmatprep.subr.mxu0 %v22546_v34  ;;  %15450 = vmatprep.subr.mxu1 %v22546_v34 }
 0x82d   :  { %15408 = vmatpush3.msra.mxu0 %v17849_v37  ;;  %15451 = vmatpush3.msra.mxu1 %v17882_v48 }
 0x82e   :  { %15409 = vmatprep.subr.mxu0 %v22546_v34  ;;  %15452 = vmatprep.subr.mxu1 %v22546_v34 }
 0x82f   :  { %15410 = vmatpush3.msra.mxu0 %v17876_v46  ;;  %15453 = vmatpush3.msra.mxu1 %v17892_v51 }
 0x830   :  { %15411 = vmatprep.subr.mxu0 %v22546_v34  ;;  %15454 = vmatprep.subr.mxu1 %v22546_v34 }
 0x831   :  { %15412 = vmatpush3.msra.mxu0 %v17888_v50  ;;  %15455 = vmatpush3.msra.mxu1 %v17926_v62 }
 0x832   :  { %15413 = vmatprep.subr.mxu0 %v22546_v34  ;;  %15456 = vmatprep.subr.mxu1 %v22546_v34 }
 0x833   :  { %15414 = vmatpush3.msra.mxu0 %v17913_v58  ;;  %15457 = vmatpush3.msra.mxu1 %v17938_v4 }
 0x834   :  { %15415 = vmatprep.subr.mxu0 %v22546_v34  ;;  %15458 = vmatprep.subr.mxu1 %v22546_v34 }
 0x835   :  { %15416 = vmatpush3.msra.mxu0 %v17932_v2  ;;  %15459 = vmatpush3.msra.mxu1 %v17959_v27 }
 0x836   :  { %15417 = vmatprep.subr.mxu0 %v22546_v34  ;;  %15460 = vmatprep.subr.mxu1 %v22546_v34 }
 0x837   :  { %15418 = vmatpush3.msra.mxu0 %v17953_v15  ;;  %15461 = vmatpush3.msra.mxu1 %v17976_v42 }
 0x838   :  { %15419 = vmatprep.subr.mxu0 %v22546_v34  ;;  %15463 = vmatmul.mubr.f32.vlgmr.msra.gmra.mxu1 %v19738_v1  ;;  %v22730_v1 = vld [vmem:[#allocation30_spill] sm:$0xff] }
 0x839   :  { %15500 = vmatprep.subr.mxu1 %v22546_v34  ;;  %15420 = vmatpush3.msra.mxu0 %v17972_v39 }
 0x83a   :  { %15501 = vmatpush3.msra.mxu1 %v17755_v5  ;;  %15421 = vmatprep.subr.mxu0 %v22546_v34 }
 0x83b   :  { %15502 = vmatprep.subr.mxu1 %v22546_v34  ;;  %15422 = vmatpush3.msra.mxu0 %v17988_v52 }
 0x83c   :  { %15503 = vmatpush3.msra.mxu1 %v17757_v6  ;;  %15423 = vmatprep.subr.mxu0 %v22546_v34 }
 0x83d   :  { %15504 = vmatprep.subr.mxu1 %v22546_v34  ;;  %15424 = vmatpush3.msra.mxu0 %v18003_v57 }
 0x83e   :  { %15505 = vmatpush3.msra.mxu1 %v17759_v7  ;;  %15425 = vmatprep.subr.mxu0 %v22546_v34 }
 0x83f   :  { %15506 = vmatprep.subr.mxu1 %v22546_v34  ;;  %15426 = vmatpush3.msra.mxu0 %v18017_v8 }
 0x840   :  { %15427 = vmatprep.mubr.msk.f32.mxu0 %vm17682_vm0, %v22546_v34  ;;  %15507 = vmatpush3.msra.mxu1 %v17770_v11 }
 0x841   :  { %15428 = vmatmul.mubr.f32.vlgmr.msra.gmra.mxu0 %v19731_v56  ;;  %15465 = vmatprep.subr.mxu0 %v22546_v34  ;;  %v22729_v56 = vld [vmem:[#allocation28_spill] sm:$0xff] }
 0x842   :  { %15508 = vmatprep.subr.mxu1 %v22546_v34  ;;  %15466 = vmatpush3.msra.mxu0 %v17806_v23 }
 0x843   :  { %15509 = vmatpush3.msra.mxu1 %v17772_v12  ;;  %15467 = vmatprep.subr.mxu0 %v22546_v34 }
 0x844   :  { %15510 = vmatprep.subr.mxu1 %v22546_v34  ;;  %15468 = vmatpush3.msra.mxu0 %v17809_v24 }
 0x845   :  { %15511 = vmatpush3.msra.mxu1 %v17774_v13  ;;  %15469 = vmatprep.subr.mxu0 %v22546_v34 }
 0x846   :  { %15512 = vmatprep.subr.mxu1 %v22546_v34  ;;  %15470 = vmatpush3.msra.mxu0 %v17812_v25 }
 0x847   :  { %15513 = vmatpush3.msra.mxu1 %v17789_v18  ;;  %15471 = vmatprep.subr.mxu0 %v22546_v34 }
 0x848   :  { %15514 = vmatprep.subr.mxu1 %v22546_v34  ;;  %15472 = vmatpush3.msra.mxu0 %v17821_v28 }
 0x849   :  { %15515 = vmatpush3.msra.mxu1 %v17814_v26  ;;  %15473 = vmatprep.subr.mxu0 %v22546_v34 }
 0x84a   :  { %15516 = vmatprep.subr.mxu1 %v22546_v34  ;;  %15474 = vmatpush3.msra.mxu0 %v17826_v30 }
 0x84b   :  { %15517 = vmatpush3.msra.mxu1 %v17823_v29  ;;  %15475 = vmatprep.subr.mxu0 %v22546_v34 }
 0x84c   :  { %15518 = vmatprep.subr.mxu1 %v22546_v34  ;;  %15476 = vmatpush3.msra.mxu0 %v17866_v43 }
 0x84d   :  { %15519 = vmatpush3.msra.mxu1 %v17852_v38  ;;  %15477 = vmatprep.subr.mxu0 %v22546_v34 }
 0x84e   :  { %15520 = vmatprep.subr.mxu1 %v22546_v34  ;;  %15478 = vmatpush3.msra.mxu0 %v22574_v10 }
 0x84f   :  { %15521 = vmatpush3.msra.mxu1 %v17882_v48  ;;  %15479 = vmatprep.subr.mxu0 %v22546_v34 }
 0x850   :  { %15522 = vmatprep.subr.mxu1 %v22546_v34  ;;  %15480 = vmatpush3.msra.mxu0 %v22687_v9 }
 0x851   :  { %15523 = vmatpush3.msra.mxu1 %v17892_v51  ;;  %15481 = vmatprep.subr.mxu0 %v22546_v34 }
 0x852   :  { %15524 = vmatprep.subr.mxu1 %v22546_v34  ;;  %15482 = vmatpush3.msra.mxu0 %v22688_v54 }
 0x853   :  { %15525 = vmatpush3.msra.mxu1 %v17926_v62  ;;  %15483 = vmatprep.subr.mxu0 %v22546_v34 }
 0x854   :  { %15526 = vmatprep.subr.mxu1 %v22546_v34  ;;  %15484 = vmatpush3.msra.mxu0 %v22689_v36 }
 0x855   :  { %15527 = vmatpush3.msra.mxu1 %v17938_v4  ;;  %15485 = vmatprep.subr.mxu0 %v22546_v34 }
 0x856   :  { %15528 = vmatprep.subr.mxu1 %v22546_v34  ;;  %15486 = vmatpush3.msra.mxu0 %v22690_v0 }
 0x857   :  { %15529 = vmatpush3.msra.mxu1 %v17959_v27  ;;  %15487 = vmatprep.subr.mxu0 %v22546_v34 }
 0x858   :  { %15530 = vmatprep.subr.mxu1 %v22546_v34  ;;  %15488 = vmatpush3.msra.mxu0 %v22691_v49 }
 0x859   :  { %15531 = vmatpush3.msra.mxu1 %v17976_v42  ;;  %15532 = vmatprep.mubr.msk.f32.mxu1 %vm17682_vm0, %v22546_v34 }
 0x85a   :  { %15489 = vmatprep.subr.mxu0 %v22546_v34  ;;  %15533 = vmatmul.mubr.f32.vlgmr.msra.gmra.mxu1 %v19727_v60 }
 0x85b   :  { %15490 = vmatpush3.msra.mxu0 %v22692_v47  ;;  %15497 = vmatprep.mubr.msk.f32.mxu0 %vm17682_vm0, %v22546_v34 }
 0x85c   :  { %15491 = vmatprep.subr.mxu0 %v22546_v34  ;;  %15570 = vmatprep.subr.mxu1 %v22546_v34 }
 0x85d   :  { %15492 = vmatpush3.msra.mxu0 %v22717_v20  ;;  %15571 = vmatpush3.msra.mxu1 %v22718_v63  ;;  %v216_v20 = vpop.permute.xlu0 %215 }
 0x85e   :  { %15493 = vmatprep.subr.mxu0 %v22546_v34  ;;  %15572 = vmatprep.subr.mxu1 %v22546_v34  ;;  %v261_v49 = vmul.f32 %v19724_v35, %v216_v20  ;;  %v22744_v20 = vld [vmem:[#allocation23_spill] sm:$0xff] }
 0x85f   :  { %15494 = vmatpush3.msra.mxu0 %v22719_v44  ;;  %15573 = vmatpush3.msra.mxu1 %v22720_v33  ;;  %v22736_v33 = vld [vmem:[#allocation61_spill] sm:$0xff] }
 0x860   :  { %15495 = vmatprep.subr.mxu0 %v22546_v34  ;;  %15574 = vmatprep.subr.mxu1 %v22546_v34 }
 0x861   :  { %15496 = vmatpush3.msra.mxu0 %v22721_v3  ;;  %15575 = vmatpush3.msra.mxu1 %v22722_v32  ;;  %v107_v32 = vpop.permute.xlu1 %106 }
 0x862   :  { %15498 = vmatmul.mubr.f32.vlgmr.msra.gmra.mxu0 %v19727_v60  ;;  %15576 = vmatprep.subr.mxu1 %v22546_v34  ;;  %v22732_v60 = vld [vmem:[#allocation34_spill] sm:$0xff]  ;;  %v160_v44 = vmul.f32 %v22736_v33, %v107_v32  ;;  %v22748_v32 = vld [vmem:[#allocation12_spill] sm:$0xff] }
 0x863   :  { %15577 = vmatpush3.msra.mxu1 %v22723_v41  ;;  %15535 = vmatprep.subr.mxu0 %v22546_v34 }
 0x864   :  { %15578 = vmatprep.subr.mxu1 %v22546_v34  ;;  %15536 = vmatpush3.msra.mxu0 %v17755_v5  ;;  %v176_v47 = vadd.f32 %v19718_v14, %v160_v44  ;;  %v22746_v44 = vld [vmem:[#allocation27_spill] sm:$0xff] }
 0x865   :  { %15579 = vmatpush3.msra.mxu1 %v22724_v55  ;;  %15537 = vmatprep.subr.mxu0 %v22546_v34 }
 0x866   :  { %15580 = vmatprep.subr.mxu1 %v22546_v34  ;;  %15538 = vmatpush3.msra.mxu0 %v17757_v6  ;;  %v277_v54 = vadd.f32 %v261_v49, %v176_v47  ;;  %v22742_v49 = vld [vmem:[#allocation19_spill] sm:$0xff]  ;;  %v22743_v47 = vld [vmem:[#allocation21_spill] sm:$0xff] }
 0x867   :  { %15581 = vmatpush3.msra.mxu1 %v22725_v59  ;;  %15539 = vmatprep.subr.mxu0 %v22546_v34 }
 0x868   :  { %15582 = vmatprep.subr.mxu1 %v22546_v34  ;;  %15540 = vmatpush3.msra.mxu0 %v17759_v7 }
 0x869   :  { %15583 = vmatpush3.msra.mxu1 %v22726_v53  ;;  %15541 = vmatprep.subr.mxu0 %v22546_v34 }
 0x86a   :  { %15584 = vmatprep.subr.mxu1 %v22546_v34  ;;  %15542 = vmatpush3.msra.mxu0 %v17770_v11 }
 0x86b   :  { %15585 = vmatpush3.msra.mxu1 %v22727_v45  ;;  %15543 = vmatprep.subr.mxu0 %v22546_v34 }
 0x86c   :  { %15586 = vmatprep.subr.mxu1 %v22546_v34  ;;  %15544 = vmatpush3.msra.mxu0 %v17772_v12 }
 0x86d   :  { %15587 = vmatpush3.msra.mxu1 %v22728_v61  ;;  %15545 = vmatprep.subr.mxu0 %v22546_v34 }
 0x86e   :  { %15588 = vmatprep.subr.mxu1 %v22546_v34  ;;  %15546 = vmatpush3.msra.mxu0 %v17774_v13 }
 0x86f   :  { %15589 = vmatpush3.msra.mxu1 %v22729_v56  ;;  %15547 = vmatprep.subr.mxu0 %v22546_v34 }
 0x870   :  { %15590 = vmatprep.subr.mxu1 %v22546_v34  ;;  %15548 = vmatpush3.msra.mxu0 %v17789_v18 }
 0x871   :  { %15591 = vmatpush3.msra.mxu1 %v22730_v1  ;;  %15549 = vmatprep.subr.mxu0 %v22546_v34  ;;  %v22733_v1 = vld [vmem:[#allocation35_spill] sm:$0xff] }
 0x872   :  { %15592 = vmatprep.subr.mxu1 %v22546_v34  ;;  %15550 = vmatpush3.msra.mxu0 %v17814_v26 }
 0x873   :  { %15593 = vmatpush3.msra.mxu1 %v22731_v40  ;;  %15551 = vmatprep.subr.mxu0 %v22546_v34  ;;  %v22734_v40 = vld [vmem:[#allocation36_spill] sm:$0xff] }
 0x874   :  { %15594 = vmatprep.subr.mxu1 %v22546_v34  ;;  %15552 = vmatpush3.msra.mxu0 %v17823_v29 }
 0x875   :  { %15595 = vmatpush3.msra.mxu1 %v22732_v60  ;;  %15553 = vmatprep.subr.mxu0 %v22546_v34  ;;  %v22735_v60 = vld [vmem:[#allocation37_spill] sm:$0xff] }
 0x876   :  { %15596 = vmatprep.subr.mxu1 %v22546_v34  ;;  %15554 = vmatpush3.msra.mxu0 %v17852_v38 }
 0x877   :  { %15597 = vmatpush3.msra.mxu1 %v22733_v1  ;;  %15555 = vmatprep.subr.mxu0 %v22546_v34 }
 0x878   :  { %15598 = vmatprep.subr.mxu1 %v22546_v34  ;;  %15556 = vmatpush3.msra.mxu0 %v17882_v48 }
 0x879   :  { %15599 = vmatpush3.msra.mxu1 %v22734_v40  ;;  %15557 = vmatprep.subr.mxu0 %v22546_v34 }
 0x87a   :  { %15600 = vmatprep.subr.mxu1 %v22546_v34  ;;  %15558 = vmatpush3.msra.mxu0 %v17892_v51 }
 0x87b   :  { %15601 = vmatpush3.msra.mxu1 %v22735_v60  ;;  %15559 = vmatprep.subr.mxu0 %v22546_v34 }
 0x87c   :  { %15602 = vmatprep.mubr.msk.f32.mxu1 %vm17682_vm0, %v22546_v34  ;;  %15640 = vmatprep.subr.mxu1 %v22546_v34 }
 0x87d   :  { %15560 = vmatpush3.msra.mxu0 %v17926_v62  ;;  %15567 = vmatprep.mubr.msk.f32.mxu0 %vm17682_vm0, %v22546_v34 }
 0x87e   :  { %15561 = vmatprep.subr.mxu0 %v22546_v34 }
 0x87f   :  { %15562 = vmatpush3.msra.mxu0 %v17938_v4 }
 0x880   :  { %15563 = vmatprep.subr.mxu0 %v22546_v34 }
 0x881   :  { %15564 = vmatpush3.msra.mxu0 %v17959_v27 }
 0x882   :  { %15565 = vmatprep.subr.mxu0 %v22546_v34 }
 0x883   :  { %15566 = vmatpush3.msra.mxu0 %v17976_v42 }
 0x884   :  { %15605 = vmatprep.subr.mxu0 %v22546_v34 }
 0x8d8   :  { %v5080_v60 = vpop.f32.mrf.mxu1 }
 0x8da   :  { %v15394_v40 = vpop.f32.mrf.mxu1 }
 0x8e0   :  { %v4929_v1 = vpop.f32.mrf.mxu0 }
 0x8e1   :  { %v5081_v41 = vadd.f32 %v5080_v60, %v4929_v1 }
 0x8e2   :  { %v15359_v56 = vpop.f32.mrf.mxu0 }
 0x8f8   :  { %v5273_v61 = vpop.f32.mrf.mxu1 }
 0x8fa   :  { %v15464_v45 = vpop.f32.mrf.mxu1 }
 0x901   :  { %v5184_v53 = vpop.f32.mrf.mxu0 }
 0x902   :  { %v5185_v63 = vadd.f32 %v5184_v53, %v5081_v41  ;;  %v22749_v41 = vld [vmem:[#allocation31_spill] sm:$0xff]  ;;  %v22751_v53 = vld [vmem:[#allocation33_spill] sm:$0xff] }
 0x903   :  { %v15429_v59 = vpop.f32.mrf.mxu0 }
 0x904   :  { %v5274_v0 = vadd.f32 %v5273_v61, %v5185_v63  ;;  %v22745_v63 = vld [vmem:[#allocation25_spill] sm:$0xff]  ;;  %v22752_v61 = vld [vmem:[#allocation14_spill] sm:$0xff] }
 0x91a   :  { %v5479_v55 = vpop.f32.mrf.mxu1 }
 0x91c   :  { %v15534_v3 = vpop.f32.mrf.mxu1 }
 0x91d   :  { %v22747_v3 = vld [vmem:[#allocation29_spill] sm:$0xff] }
 0x922   :  { %v5392_v40 = vpop.f32.mrf.mxu0 }
 0x923   :  { %v5393_v36 = vadd.f32 %v5392_v40, %v5274_v0  ;;  %v22753_v40 = vld [vmem:[#allocation16_spill] sm:$0xff] }
 0x924   :  { %v15499_v56 = vpop.f32.mrf.mxu0 }
 0x925   :  { %v5480_v45 = vadd.f32 %v5479_v55, %v5393_v36  ;;  %v22741_v36 = vld [vmem:[#allocation17_spill] sm:$0xff]  ;;  %v22754_v56 = vld [vmem:[#allocation18_spill] sm:$0xff] }
 0x926   :  { %v22750_v55 = vld [vmem:[#allocation13_spill] sm:$0xff] }
 0x927   :  { %v5483_v9 = vadd.f32 %v5480_v45, %v277_v54  ;;  %v22755_v45 = vld [vmem:[#allocation20_spill] sm:$0xff] }
 0x929   :  { %17579 = vtanh.f32 %v5483_v9 }
 0x936   :  { %v17580_v59 = vpop.eup %17579 }
 0x937   :  { %v19952_v60 = vand.u32 4294901760, %v17580_v59 }
 0x939   :  { %22737 = vst [vmem:[#allocation61_spill] sm:$0xff] %v19952_v60  ;;  %15603 = vmatmul.mubr.f32.vlgmr.msra.gmra.mxu1 %v19952_v60  ;;  %v19956_v1 = vsub.f32 %v17580_v59, %v19952_v60  ;;  %v22756_v59 = vld [vmem:[#allocation22_spill] sm:$0xff] }
 0x93a   :  { %15641 = vmatpush3.msra.mxu1 %v17755_v5  ;;  %15672 = vmatprep.mubr.msk.f32.mxu1 %vm17682_vm0, %v22546_v34 }
 0x93b   :  { %22738 = vst [vmem:[#allocation66_spill] sm:$0xff] %v19956_v1  ;;  %15642 = vmatprep.subr.mxu1 %v22546_v34  ;;  %v19963_v0 = vand.u32 4294901760, %v19956_v1 }
 0x93c   :  { %15643 = vmatpush3.msra.mxu1 %v17757_v6 }
 0x93d   :  { %22739 = vst [vmem:[#allocation67_spill] sm:$0xff] %v19963_v0  ;;  %15644 = vmatprep.subr.mxu1 %v22546_v34  ;;  %v5572_v9 = vsub.f32 %v19956_v1, %v19963_v0 }
 0x93e   :  { %15645 = vmatpush3.msra.mxu1 %v17759_v7 }
 0x93f   :  { %15646 = vmatprep.subr.mxu1 %v22546_v34  ;;  %v19971_v54 = vand.u32 4294901760, %v5572_v9  ;;  %v22757_v9 = vld [vmem:[#allocation24_spill] sm:$0xff] }
 0x940   :  { %15647 = vmatpush3.msra.mxu1 %v17770_v11 }
 0x941   :  { %22740 = vst [vmem:[#allocation68_spill] sm:$0xff] %v19971_v54  ;;  %15648 = vmatprep.subr.mxu1 %v22546_v34  ;;  %15568 = vmatmul.mubr.f32.vlgmr.msra.gmra.mxu0 %v19971_v54  ;;  %v22760_v54 = vld [vmem:[#allocation30_spill] sm:$0xff] }
 0x942   :  { %15606 = vmatpush3.msra.mxu0 %v17784_v16  ;;  %15649 = vmatpush3.msra.mxu1 %v17772_v12 }
 0x943   :  { %15607 = vmatprep.subr.mxu0 %v22546_v34  ;;  %15650 = vmatprep.subr.mxu1 %v22546_v34 }
 0x944   :  { %15608 = vmatpush3.msra.mxu0 %v17787_v17  ;;  %15651 = vmatpush3.msra.mxu1 %v17774_v13 }
 0x945   :  { %15609 = vmatprep.subr.mxu0 %v22546_v34  ;;  %15652 = vmatprep.subr.mxu1 %v22546_v34 }
 0x946   :  { %15610 = vmatpush3.msra.mxu0 %v17792_v19  ;;  %15653 = vmatpush3.msra.mxu1 %v17789_v18 }
 0x947   :  { %15611 = vmatprep.subr.mxu0 %v22546_v34  ;;  %15654 = vmatprep.subr.mxu1 %v22546_v34 }
 0x948   :  { %15612 = vmatpush3.msra.mxu0 %v17799_v21  ;;  %15655 = vmatpush3.msra.mxu1 %v17814_v26 }
 0x949   :  { %15613 = vmatprep.subr.mxu0 %v22546_v34  ;;  %15656 = vmatprep.subr.mxu1 %v22546_v34 }
 0x94a   :  { %15614 = vmatpush3.msra.mxu0 %v17802_v22  ;;  %15657 = vmatpush3.msra.mxu1 %v17823_v29 }
 0x94b   :  { %15615 = vmatprep.subr.mxu0 %v22546_v34  ;;  %15658 = vmatprep.subr.mxu1 %v22546_v34 }
 0x94c   :  { %15616 = vmatpush3.msra.mxu0 %v17829_v31  ;;  %15659 = vmatpush3.msra.mxu1 %v17852_v38 }
 0x94d   :  { %15617 = vmatprep.subr.mxu0 %v22546_v34  ;;  %15660 = vmatprep.subr.mxu1 %v22546_v34 }
 0x94e   :  { %15618 = vmatpush3.msra.mxu0 %v17849_v37  ;;  %15661 = vmatpush3.msra.mxu1 %v17882_v48 }
 0x94f   :  { %15619 = vmatprep.subr.mxu0 %v22546_v34  ;;  %15662 = vmatprep.subr.mxu1 %v22546_v34 }
 0x950   :  { %15620 = vmatpush3.msra.mxu0 %v17876_v46  ;;  %15663 = vmatpush3.msra.mxu1 %v17892_v51 }
 0x951   :  { %15621 = vmatprep.subr.mxu0 %v22546_v34  ;;  %15664 = vmatprep.subr.mxu1 %v22546_v34 }
 0x952   :  { %15622 = vmatpush3.msra.mxu0 %v17888_v50  ;;  %15665 = vmatpush3.msra.mxu1 %v17926_v62 }
 0x953   :  { %15623 = vmatprep.subr.mxu0 %v22546_v34  ;;  %15666 = vmatprep.subr.mxu1 %v22546_v34 }
 0x954   :  { %15624 = vmatpush3.msra.mxu0 %v17913_v58  ;;  %15667 = vmatpush3.msra.mxu1 %v17938_v4 }
 0x955   :  { %15625 = vmatprep.subr.mxu0 %v22546_v34  ;;  %15668 = vmatprep.subr.mxu1 %v22546_v34 }
 0x956   :  { %15626 = vmatpush3.msra.mxu0 %v17932_v2  ;;  %15669 = vmatpush3.msra.mxu1 %v17959_v27 }
 0x957   :  { %15627 = vmatprep.subr.mxu0 %v22546_v34  ;;  %15670 = vmatprep.subr.mxu1 %v22546_v34 }
 0x958   :  { %15628 = vmatpush3.msra.mxu0 %v17953_v15  ;;  %15671 = vmatpush3.msra.mxu1 %v17976_v42 }
 0x959   :  { %15629 = vmatprep.subr.mxu0 %v22546_v34  ;;  %15673 = vmatmul.mubr.f32.vlgmr.msra.gmra.mxu1 %v19963_v0  ;;  %v22759_v0 = vld [vmem:[#allocation28_spill] sm:$0xff] }
 0x95a   :  { %15710 = vmatprep.subr.mxu1 %v22546_v34  ;;  %15630 = vmatpush3.msra.mxu0 %v17972_v39 }
 0x95b   :  { %15711 = vmatpush3.msra.mxu1 %v17755_v5  ;;  %15631 = vmatprep.subr.mxu0 %v22546_v34 }
 0x95c   :  { %15712 = vmatprep.subr.mxu1 %v22546_v34  ;;  %15632 = vmatpush3.msra.mxu0 %v17988_v52 }
 0x95d   :  { %15713 = vmatpush3.msra.mxu1 %v17757_v6  ;;  %15633 = vmatprep.subr.mxu0 %v22546_v34 }
 0x95e   :  { %15714 = vmatprep.subr.mxu1 %v22546_v34  ;;  %15634 = vmatpush3.msra.mxu0 %v18003_v57 }
 0x95f   :  { %15715 = vmatpush3.msra.mxu1 %v17759_v7  ;;  %15635 = vmatprep.subr.mxu0 %v22546_v34 }
 0x960   :  { %15716 = vmatprep.subr.mxu1 %v22546_v34  ;;  %15636 = vmatpush3.msra.mxu0 %v18017_v8 }
 0x961   :  { %15637 = vmatprep.mubr.msk.f32.mxu0 %vm17682_vm0, %v22546_v34  ;;  %15717 = vmatpush3.msra.mxu1 %v17770_v11 }
 0x962   :  { %15638 = vmatmul.mubr.f32.vlgmr.msra.gmra.mxu0 %v19956_v1  ;;  %15675 = vmatprep.subr.mxu0 %v22546_v34  ;;  %v22758_v1 = vld [vmem:[#allocation26_spill] sm:$0xff] }
 0x963   :  { %15718 = vmatprep.subr.mxu1 %v22546_v34  ;;  %15676 = vmatpush3.msra.mxu0 %v17806_v23 }
 0x964   :  { %15719 = vmatpush3.msra.mxu1 %v17772_v12  ;;  %15677 = vmatprep.subr.mxu0 %v22546_v34 }
 0x965   :  { %15720 = vmatprep.subr.mxu1 %v22546_v34  ;;  %15678 = vmatpush3.msra.mxu0 %v17809_v24 }
 0x966   :  { %15721 = vmatpush3.msra.mxu1 %v17774_v13  ;;  %15679 = vmatprep.subr.mxu0 %v22546_v34 }
 0x967   :  { %15722 = vmatprep.subr.mxu1 %v22546_v34  ;;  %15680 = vmatpush3.msra.mxu0 %v17812_v25 }
 0x968   :  { %15723 = vmatpush3.msra.mxu1 %v17789_v18  ;;  %15681 = vmatprep.subr.mxu0 %v22546_v34 }
 0x969   :  { %15724 = vmatprep.subr.mxu1 %v22546_v34  ;;  %15682 = vmatpush3.msra.mxu0 %v17821_v28 }
 0x96a   :  { %15725 = vmatpush3.msra.mxu1 %v17814_v26  ;;  %15683 = vmatprep.subr.mxu0 %v22546_v34 }
 0x96b   :  { %15726 = vmatprep.subr.mxu1 %v22546_v34  ;;  %15684 = vmatpush3.msra.mxu0 %v17826_v30 }
 0x96c   :  { %15727 = vmatpush3.msra.mxu1 %v17823_v29  ;;  %15685 = vmatprep.subr.mxu0 %v22546_v34 }
 0x96d   :  { %15728 = vmatprep.subr.mxu1 %v22546_v34  ;;  %15686 = vmatpush3.msra.mxu0 %v17866_v43 }
 0x96e   :  { %15729 = vmatpush3.msra.mxu1 %v17852_v38  ;;  %15687 = vmatprep.subr.mxu0 %v22546_v34 }
 0x96f   :  { %15730 = vmatprep.subr.mxu1 %v22546_v34  ;;  %15688 = vmatpush3.msra.mxu0 %v22574_v10 }
 0x970   :  { %15731 = vmatpush3.msra.mxu1 %v17882_v48  ;;  %15689 = vmatprep.subr.mxu0 %v22546_v34 }
 0x971   :  { %15732 = vmatprep.subr.mxu1 %v22546_v34  ;;  %15690 = vmatpush3.msra.mxu0 %v22741_v36 }
 0x972   :  { %15733 = vmatpush3.msra.mxu1 %v17892_v51  ;;  %15691 = vmatprep.subr.mxu0 %v22546_v34 }
 0x973   :  { %15734 = vmatprep.subr.mxu1 %v22546_v34  ;;  %15692 = vmatpush3.msra.mxu0 %v22742_v49 }
 0x974   :  { %15735 = vmatpush3.msra.mxu1 %v17926_v62  ;;  %15693 = vmatprep.subr.mxu0 %v22546_v34 }
 0x975   :  { %15736 = vmatprep.subr.mxu1 %v22546_v34  ;;  %15694 = vmatpush3.msra.mxu0 %v22743_v47 }
 0x976   :  { %15737 = vmatpush3.msra.mxu1 %v17938_v4  ;;  %15695 = vmatprep.subr.mxu0 %v22546_v34 }
 0x977   :  { %15738 = vmatprep.subr.mxu1 %v22546_v34  ;;  %15696 = vmatpush3.msra.mxu0 %v22744_v20 }
 0x978   :  { %15739 = vmatpush3.msra.mxu1 %v17959_v27  ;;  %15697 = vmatprep.subr.mxu0 %v22546_v34 }
 0x979   :  { %15740 = vmatprep.subr.mxu1 %v22546_v34  ;;  %15698 = vmatpush3.msra.mxu0 %v22745_v63 }
 0x97a   :  { %15741 = vmatpush3.msra.mxu1 %v17976_v42  ;;  %15742 = vmatprep.mubr.msk.f32.mxu1 %vm17682_vm0, %v22546_v34 }
 0x97b   :  { %15699 = vmatprep.subr.mxu0 %v22546_v34  ;;  %15743 = vmatmul.mubr.f32.vlgmr.msra.gmra.mxu1 %v19952_v60 }
 0x97c   :  { %15700 = vmatpush3.msra.mxu0 %v22746_v44  ;;  %15707 = vmatprep.mubr.msk.f32.mxu0 %vm17682_vm0, %v22546_v34 }
 0x97d   :  { %15701 = vmatprep.subr.mxu0 %v22546_v34  ;;  %15780 = vmatprep.subr.mxu1 %v22546_v34 }
 0x97e   :  { %15702 = vmatpush3.msra.mxu0 %v22747_v3  ;;  %15781 = vmatpush3.msra.mxu1 %v22748_v32  ;;  %v220_v3 = vpop.permute.xlu0 %219 }
 0x97f   :  { %15703 = vmatprep.subr.mxu0 %v22546_v34  ;;  %15782 = vmatprep.subr.mxu1 %v22546_v34  ;;  %v262_v63 = vmul.f32 %v19724_v35, %v220_v3  ;;  %v22776_v3 = vld [vmem:[#allocation29_spill] sm:$0xff] }
 0x980   :  { %15704 = vmatpush3.msra.mxu0 %v22749_v41  ;;  %15783 = vmatpush3.msra.mxu1 %v22750_v55 }
 0x981   :  { %15705 = vmatprep.subr.mxu0 %v22546_v34  ;;  %15784 = vmatprep.subr.mxu1 %v22546_v34 }
 0x982   :  { %15706 = vmatpush3.msra.mxu0 %v22751_v53  ;;  %15785 = vmatpush3.msra.mxu1 %v22752_v61  ;;  %v112_v53 = vpop.permute.xlu1 %111 }
 0x983   :  { %15708 = vmatmul.mubr.f32.vlgmr.msra.gmra.mxu0 %v19952_v60  ;;  %15786 = vmatprep.subr.mxu1 %v22546_v34  ;;  %v22761_v60 = vld [vmem:[#allocation32_spill] sm:$0xff]  ;;  %v161_v41 = vmul.f32 %v22736_v33, %v112_v53  ;;  %v22780_v53 = vld [vmem:[#allocation33_spill] sm:$0xff] }
 0x984   :  { %15787 = vmatpush3.msra.mxu1 %v22753_v40  ;;  %15745 = vmatprep.subr.mxu0 %v22546_v34 }
 0x985   :  { %15788 = vmatprep.subr.mxu1 %v22546_v34  ;;  %15746 = vmatpush3.msra.mxu0 %v17755_v5  ;;  %v177_v44 = vadd.f32 %v19718_v14, %v161_v41  ;;  %v22778_v41 = vld [vmem:[#allocation31_spill] sm:$0xff] }
 0x986   :  { %15789 = vmatpush3.msra.mxu1 %v22754_v56  ;;  %15747 = vmatprep.subr.mxu0 %v22546_v34 }
 0x987   :  { %15790 = vmatprep.subr.mxu1 %v22546_v34  ;;  %15748 = vmatpush3.msra.mxu0 %v17757_v6  ;;  %v278_v49 = vadd.f32 %v262_v63, %v177_v44  ;;  %v22774_v63 = vld [vmem:[#allocation25_spill] sm:$0xff]  ;;  %v22775_v44 = vld [vmem:[#allocation27_spill] sm:$0xff] }
 0x988   :  { %15791 = vmatpush3.msra.mxu1 %v22755_v45  ;;  %15749 = vmatprep.subr.mxu0 %v22546_v34 }
 0x989   :  { %15792 = vmatprep.subr.mxu1 %v22546_v34  ;;  %15750 = vmatpush3.msra.mxu0 %v17759_v7 }
 0x98a   :  { %15793 = vmatpush3.msra.mxu1 %v22756_v59  ;;  %15751 = vmatprep.subr.mxu0 %v22546_v34 }
 0x98b   :  { %15794 = vmatprep.subr.mxu1 %v22546_v34  ;;  %15752 = vmatpush3.msra.mxu0 %v17770_v11 }
 0x98c   :  { %15795 = vmatpush3.msra.mxu1 %v22757_v9  ;;  %15753 = vmatprep.subr.mxu0 %v22546_v34 }
 0x98d   :  { %15796 = vmatprep.subr.mxu1 %v22546_v34  ;;  %15754 = vmatpush3.msra.mxu0 %v17772_v12 }
 0x98e   :  { %15797 = vmatpush3.msra.mxu1 %v22758_v1  ;;  %15755 = vmatprep.subr.mxu0 %v22546_v34 }
 0x98f   :  { %15798 = vmatprep.subr.mxu1 %v22546_v34  ;;  %15756 = vmatpush3.msra.mxu0 %v17774_v13 }
 0x990   :  { %15799 = vmatpush3.msra.mxu1 %v22759_v0  ;;  %15757 = vmatprep.subr.mxu0 %v22546_v34  ;;  %v22762_v0 = vld [vmem:[#allocation34_spill] sm:$0xff] }
 0x991   :  { %15800 = vmatprep.subr.mxu1 %v22546_v34  ;;  %15758 = vmatpush3.msra.mxu0 %v17789_v18 }
 0x992   :  { %15801 = vmatpush3.msra.mxu1 %v22760_v54  ;;  %15759 = vmatprep.subr.mxu0 %v22546_v34  ;;  %v22763_v54 = vld [vmem:[#allocation35_spill] sm:$0xff] }
 0x993   :  { %15802 = vmatprep.subr.mxu1 %v22546_v34  ;;  %15760 = vmatpush3.msra.mxu0 %v17814_v26 }
 0x994   :  { %15803 = vmatpush3.msra.mxu1 %v22761_v60  ;;  %15761 = vmatprep.subr.mxu0 %v22546_v34  ;;  %v22764_v60 = vld [vmem:[#allocation36_spill] sm:$0xff] }
 0x995   :  { %15804 = vmatprep.subr.mxu1 %v22546_v34  ;;  %15762 = vmatpush3.msra.mxu0 %v17823_v29 }
 0x996   :  { %15805 = vmatpush3.msra.mxu1 %v22762_v0  ;;  %15763 = vmatprep.subr.mxu0 %v22546_v34  ;;  %v22765_v0 = vld [vmem:[#allocation37_spill] sm:$0xff] }
 0x997   :  { %15806 = vmatprep.subr.mxu1 %v22546_v34  ;;  %15764 = vmatpush3.msra.mxu0 %v17852_v38 }
 0x998   :  { %15807 = vmatpush3.msra.mxu1 %v22763_v54  ;;  %15765 = vmatprep.subr.mxu0 %v22546_v34 }
 0x999   :  { %15808 = vmatprep.subr.mxu1 %v22546_v34  ;;  %15766 = vmatpush3.msra.mxu0 %v17882_v48 }
 0x99a   :  { %15809 = vmatpush3.msra.mxu1 %v22764_v60  ;;  %15767 = vmatprep.subr.mxu0 %v22546_v34 }
 0x99b   :  { %15810 = vmatprep.subr.mxu1 %v22546_v34  ;;  %15768 = vmatpush3.msra.mxu0 %v17892_v51 }
 0x99c   :  { %15811 = vmatpush3.msra.mxu1 %v22765_v0  ;;  %15769 = vmatprep.subr.mxu0 %v22546_v34 }
 0x99d   :  { %15812 = vmatprep.mubr.msk.f32.mxu1 %vm17682_vm0, %v22546_v34  ;;  %15850 = vmatprep.subr.mxu1 %v22546_v34 }
 0x99e   :  { %15770 = vmatpush3.msra.mxu0 %v17926_v62  ;;  %15777 = vmatprep.mubr.msk.f32.mxu0 %vm17682_vm0, %v22546_v34 }
 0x99f   :  { %15771 = vmatprep.subr.mxu0 %v22546_v34 }
 0x9a0   :  { %15772 = vmatpush3.msra.mxu0 %v17938_v4 }
 0x9a1   :  { %15773 = vmatprep.subr.mxu0 %v22546_v34 }
 0x9a2   :  { %15774 = vmatpush3.msra.mxu0 %v17959_v27 }
 0x9a3   :  { %15775 = vmatprep.subr.mxu0 %v22546_v34 }
 0x9a4   :  { %15776 = vmatpush3.msra.mxu0 %v17976_v42 }
 0x9a5   :  { %15815 = vmatprep.subr.mxu0 %v22546_v34 }
 0x9f9   :  { %v5726_v0 = vpop.f32.mrf.mxu1 }
 0x9fb   :  { %v15604_v60 = vpop.f32.mrf.mxu1 }
 0xa01   :  { %v5575_v54 = vpop.f32.mrf.mxu0 }
 0xa02   :  { %v5727_v61 = vadd.f32 %v5726_v0, %v5575_v54 }
 0xa03   :  { %v15569_v1 = vpop.f32.mrf.mxu0 }
 0xa19   :  { %v5919_v9 = vpop.f32.mrf.mxu1 }
 0xa1b   :  { %v15674_v59 = vpop.f32.mrf.mxu1 }
 0xa22   :  { %v5830_v45 = vpop.f32.mrf.mxu0 }
 0xa23   :  { %v5831_v32 = vadd.f32 %v5830_v45, %v5727_v61  ;;  %v22781_v61 = vld [vmem:[#allocation14_spill] sm:$0xff] }
 0xa24   :  { %v15639_v56 = vpop.f32.mrf.mxu0  ;;  %v22783_v45 = vld [vmem:[#allocation18_spill] sm:$0xff] }
 0xa25   :  { %v5920_v20 = vadd.f32 %v5919_v9, %v5831_v32  ;;  %v22777_v32 = vld [vmem:[#allocation12_spill] sm:$0xff] }
 0xa26   :  { %v22784_v9 = vld [vmem:[#allocation20_spill] sm:$0xff] }
 0xa3b   :  { %v6125_v40 = vpop.f32.mrf.mxu1 }
 0xa3d   :  { %v15744_v55 = vpop.f32.mrf.mxu1 }
 0xa3e   :  { %v22779_v55 = vld [vmem:[#allocation13_spill] sm:$0xff] }
 0xa43   :  { %v6038_v60 = vpop.f32.mrf.mxu0 }
 0xa44   :  { %v6039_v47 = vadd.f32 %v6038_v60, %v5920_v20  ;;  %v22773_v20 = vld [vmem:[#allocation23_spill] sm:$0xff]  ;;  %v22785_v60 = vld [vmem:[#allocation22_spill] sm:$0xff] }
 0xa45   :  { %v15709_v1 = vpop.f32.mrf.mxu0 }
 0xa46   :  { %v6126_v59 = vadd.f32 %v6125_v40, %v6039_v47  ;;  %v22772_v47 = vld [vmem:[#allocation21_spill] sm:$0xff]  ;;  %v22782_v40 = vld [vmem:[#allocation16_spill] sm:$0xff] }
 0xa47   :  { %v22786_v1 = vld [vmem:[#allocation24_spill] sm:$0xff] }
 0xa48   :  { %v6129_v36 = vadd.f32 %v6126_v59, %v278_v49  ;;  %v22771_v49 = vld [vmem:[#allocation19_spill] sm:$0xff]  ;;  %v22787_v59 = vld [vmem:[#allocation26_spill] sm:$0xff] }
 0xa4a   :  { %17581 = vtanh.f32 %v6129_v36  ;;  %v22770_v36 = vld [vmem:[#allocation17_spill] sm:$0xff] }
 0xa57   :  { %v17582_v56 = vpop.eup %17581 }
 0xa58   :  { %v20177_v0 = vand.u32 4294901760, %v17582_v56 }
 0xa5a   :  { %22766 = vst [vmem:[#allocation69_spill] sm:$0xff] %v20177_v0  ;;  %15813 = vmatmul.mubr.f32.vlgmr.msra.gmra.mxu1 %v20177_v0  ;;  %v20181_v33 = vsub.f32 %v17582_v56, %v20177_v0  ;;  %v22788_v56 = vld [vmem:[#allocation28_spill] sm:$0xff] }
 0xa5b   :  { %15851 = vmatpush3.msra.mxu1 %v17755_v5  ;;  %15882 = vmatprep.mubr.msk.f32.mxu1 %vm17682_vm0, %v22546_v34 }
 0xa5c   :  { %22767 = vst [vmem:[#allocation70_spill] sm:$0xff] %v20181_v33  ;;  %15852 = vmatprep.subr.mxu1 %v22546_v34  ;;  %v20188_v14 = vand.u32 4294901760, %v20181_v33 }
 0xa5d   :  { %15853 = vmatpush3.msra.mxu1 %v17757_v6 }
 0xa5e   :  { %22768 = vst [vmem:[#allocation71_spill] sm:$0xff] %v20188_v14  ;;  %15854 = vmatprep.subr.mxu1 %v22546_v34  ;;  %v6218_v35 = vsub.f32 %v20181_v33, %v20188_v14 }
 0xa5f   :  { %15855 = vmatpush3.msra.mxu1 %v17759_v7 }
 0xa60   :  { %15856 = vmatprep.subr.mxu1 %v22546_v34  ;;  %v20196_v54 = vand.u32 4294901760, %v6218_v35  ;;  %v22789_v35 = vld [vmem:[#allocation30_spill] sm:$0xff] }
 0xa61   :  { %15857 = vmatpush3.msra.mxu1 %v17770_v11 }
 0xa62   :  { %22769 = vst [vmem:[#allocation72_spill] sm:$0xff] %v20196_v54  ;;  %15858 = vmatprep.subr.mxu1 %v22546_v34  ;;  %15778 = vmatmul.mubr.f32.vlgmr.msra.gmra.mxu0 %v20196_v54  ;;  %v22792_v54 = vld [vmem:[#allocation35_spill] sm:$0xff] }
 0xa63   :  { %15816 = vmatpush3.msra.mxu0 %v17784_v16  ;;  %15859 = vmatpush3.msra.mxu1 %v17772_v12 }
 0xa64   :  { %15817 = vmatprep.subr.mxu0 %v22546_v34  ;;  %15860 = vmatprep.subr.mxu1 %v22546_v34 }
 0xa65   :  { %15818 = vmatpush3.msra.mxu0 %v17787_v17  ;;  %15861 = vmatpush3.msra.mxu1 %v17774_v13 }
 0xa66   :  { %15819 = vmatprep.subr.mxu0 %v22546_v34  ;;  %15862 = vmatprep.subr.mxu1 %v22546_v34 }
 0xa67   :  { %15820 = vmatpush3.msra.mxu0 %v17792_v19  ;;  %15863 = vmatpush3.msra.mxu1 %v17789_v18 }
 0xa68   :  { %15821 = vmatprep.subr.mxu0 %v22546_v34  ;;  %15864 = vmatprep.subr.mxu1 %v22546_v34 }
 0xa69   :  { %15822 = vmatpush3.msra.mxu0 %v17799_v21  ;;  %15865 = vmatpush3.msra.mxu1 %v17814_v26 }
 0xa6a   :  { %15823 = vmatprep.subr.mxu0 %v22546_v34  ;;  %15866 = vmatprep.subr.mxu1 %v22546_v34 }
 0xa6b   :  { %15824 = vmatpush3.msra.mxu0 %v17802_v22  ;;  %15867 = vmatpush3.msra.mxu1 %v17823_v29 }
 0xa6c   :  { %15825 = vmatprep.subr.mxu0 %v22546_v34  ;;  %15868 = vmatprep.subr.mxu1 %v22546_v34 }
 0xa6d   :  { %15826 = vmatpush3.msra.mxu0 %v17829_v31  ;;  %15869 = vmatpush3.msra.mxu1 %v17852_v38 }
 0xa6e   :  { %15827 = vmatprep.subr.mxu0 %v22546_v34  ;;  %15870 = vmatprep.subr.mxu1 %v22546_v34 }
 0xa6f   :  { %15828 = vmatpush3.msra.mxu0 %v17849_v37  ;;  %15871 = vmatpush3.msra.mxu1 %v17882_v48 }
 0xa70   :  { %15829 = vmatprep.subr.mxu0 %v22546_v34  ;;  %15872 = vmatprep.subr.mxu1 %v22546_v34 }
 0xa71   :  { %15830 = vmatpush3.msra.mxu0 %v17876_v46  ;;  %15873 = vmatpush3.msra.mxu1 %v17892_v51 }
 0xa72   :  { %15831 = vmatprep.subr.mxu0 %v22546_v34  ;;  %15874 = vmatprep.subr.mxu1 %v22546_v34 }
 0xa73   :  { %15832 = vmatpush3.msra.mxu0 %v17888_v50  ;;  %15875 = vmatpush3.msra.mxu1 %v17926_v62 }
 0xa74   :  { %15833 = vmatprep.subr.mxu0 %v22546_v34  ;;  %15876 = vmatprep.subr.mxu1 %v22546_v34 }
 0xa75   :  { %15834 = vmatpush3.msra.mxu0 %v17913_v58  ;;  %15877 = vmatpush3.msra.mxu1 %v17938_v4 }
 0xa76   :  { %15835 = vmatprep.subr.mxu0 %v22546_v34  ;;  %15878 = vmatprep.subr.mxu1 %v22546_v34 }
 0xa77   :  { %15836 = vmatpush3.msra.mxu0 %v17932_v2  ;;  %15879 = vmatpush3.msra.mxu1 %v17959_v27 }
 0xa78   :  { %15837 = vmatprep.subr.mxu0 %v22546_v34  ;;  %15880 = vmatprep.subr.mxu1 %v22546_v34 }
 0xa79   :  { %15838 = vmatpush3.msra.mxu0 %v17953_v15  ;;  %15881 = vmatpush3.msra.mxu1 %v17976_v42 }
 0xa7a   :  { %15839 = vmatprep.subr.mxu0 %v22546_v34  ;;  %15883 = vmatmul.mubr.f32.vlgmr.msra.gmra.mxu1 %v20188_v14  ;;  %v22791_v14 = vld [vmem:[#allocation34_spill] sm:$0xff] }
 0xa7b   :  { %15920 = vmatprep.subr.mxu1 %v22546_v34  ;;  %15840 = vmatpush3.msra.mxu0 %v17972_v39 }
 0xa7c   :  { %15921 = vmatpush3.msra.mxu1 %v17755_v5  ;;  %15841 = vmatprep.subr.mxu0 %v22546_v34 }
 0xa7d   :  { %15922 = vmatprep.subr.mxu1 %v22546_v34  ;;  %15842 = vmatpush3.msra.mxu0 %v17988_v52 }
 0xa7e   :  { %15923 = vmatpush3.msra.mxu1 %v17757_v6  ;;  %15843 = vmatprep.subr.mxu0 %v22546_v34 }
 0xa7f   :  { %15924 = vmatprep.subr.mxu1 %v22546_v34  ;;  %15844 = vmatpush3.msra.mxu0 %v18003_v57 }
 0xa80   :  { %15925 = vmatpush3.msra.mxu1 %v17759_v7  ;;  %15845 = vmatprep.subr.mxu0 %v22546_v34 }
 0xa81   :  { %15926 = vmatprep.subr.mxu1 %v22546_v34  ;;  %15846 = vmatpush3.msra.mxu0 %v18017_v8 }
 0xa82   :  { %15847 = vmatprep.mubr.msk.f32.mxu0 %vm17682_vm0, %v22546_v34  ;;  %15927 = vmatpush3.msra.mxu1 %v17770_v11 }
 0xa83   :  { %15848 = vmatmul.mubr.f32.vlgmr.msra.gmra.mxu0 %v20181_v33  ;;  %15885 = vmatprep.subr.mxu0 %v22546_v34  ;;  %v22790_v33 = vld [vmem:[#allocation32_spill] sm:$0xff] }
 0xa84   :  { %15928 = vmatprep.subr.mxu1 %v22546_v34  ;;  %15886 = vmatpush3.msra.mxu0 %v17806_v23 }
 0xa85   :  { %15929 = vmatpush3.msra.mxu1 %v17772_v12  ;;  %15887 = vmatprep.subr.mxu0 %v22546_v34 }
 0xa86   :  { %15930 = vmatprep.subr.mxu1 %v22546_v34  ;;  %15888 = vmatpush3.msra.mxu0 %v17809_v24 }
 0xa87   :  { %15931 = vmatpush3.msra.mxu1 %v17774_v13  ;;  %15889 = vmatprep.subr.mxu0 %v22546_v34 }
 0xa88   :  { %15932 = vmatprep.subr.mxu1 %v22546_v34  ;;  %15890 = vmatpush3.msra.mxu0 %v17812_v25 }
 0xa89   :  { %15933 = vmatpush3.msra.mxu1 %v17789_v18  ;;  %15891 = vmatprep.subr.mxu0 %v22546_v34 }
 0xa8a   :  { %15934 = vmatprep.subr.mxu1 %v22546_v34  ;;  %15892 = vmatpush3.msra.mxu0 %v17821_v28 }
 0xa8b   :  { %15935 = vmatpush3.msra.mxu1 %v17814_v26  ;;  %15893 = vmatprep.subr.mxu0 %v22546_v34 }
 0xa8c   :  { %15936 = vmatprep.subr.mxu1 %v22546_v34  ;;  %15894 = vmatpush3.msra.mxu0 %v17826_v30 }
 0xa8d   :  { %15937 = vmatpush3.msra.mxu1 %v17823_v29  ;;  %15895 = vmatprep.subr.mxu0 %v22546_v34 }
 0xa8e   :  { %15938 = vmatprep.subr.mxu1 %v22546_v34  ;;  %15896 = vmatpush3.msra.mxu0 %v17866_v43 }
 0xa8f   :  { %15939 = vmatpush3.msra.mxu1 %v17852_v38  ;;  %15897 = vmatprep.subr.mxu0 %v22546_v34 }
 0xa90   :  { %15940 = vmatprep.subr.mxu1 %v22546_v34  ;;  %15898 = vmatpush3.msra.mxu0 %v22574_v10 }
 0xa91   :  { %15941 = vmatpush3.msra.mxu1 %v17882_v48  ;;  %15899 = vmatprep.subr.mxu0 %v22546_v34 }
 0xa92   :  { %15942 = vmatprep.subr.mxu1 %v22546_v34  ;;  %15900 = vmatpush3.msra.mxu0 %v22770_v36 }
 0xa93   :  { %15943 = vmatpush3.msra.mxu1 %v17892_v51  ;;  %15901 = vmatprep.subr.mxu0 %v22546_v34 }
 0xa94   :  { %15944 = vmatprep.subr.mxu1 %v22546_v34  ;;  %15902 = vmatpush3.msra.mxu0 %v22771_v49 }
 0xa95   :  { %15945 = vmatpush3.msra.mxu1 %v17926_v62  ;;  %15903 = vmatprep.subr.mxu0 %v22546_v34 }
 0xa96   :  { %15946 = vmatprep.subr.mxu1 %v22546_v34  ;;  %15904 = vmatpush3.msra.mxu0 %v22772_v47 }
 0xa97   :  { %15947 = vmatpush3.msra.mxu1 %v17938_v4  ;;  %15905 = vmatprep.subr.mxu0 %v22546_v34 }
 0xa98   :  { %15948 = vmatprep.subr.mxu1 %v22546_v34  ;;  %15906 = vmatpush3.msra.mxu0 %v22773_v20 }
 0xa99   :  { %15949 = vmatpush3.msra.mxu1 %v17959_v27  ;;  %15907 = vmatprep.subr.mxu0 %v22546_v34 }
 0xa9a   :  { %15950 = vmatprep.subr.mxu1 %v22546_v34  ;;  %15908 = vmatpush3.msra.mxu0 %v22774_v63 }
 0xa9b   :  { %15951 = vmatpush3.msra.mxu1 %v17976_v42  ;;  %15952 = vmatprep.mubr.msk.f32.mxu1 %vm17682_vm0, %v22546_v34 }
 0xa9c   :  { %15909 = vmatprep.subr.mxu0 %v22546_v34  ;;  %15953 = vmatmul.mubr.f32.vlgmr.msra.gmra.mxu1 %v20177_v0 }
 0xa9d   :  { %15910 = vmatpush3.msra.mxu0 %v22775_v44  ;;  %15917 = vmatprep.mubr.msk.f32.mxu0 %vm17682_vm0, %v22546_v34 }
 0xa9e   :  { %15911 = vmatprep.subr.mxu0 %v22546_v34  ;;  %15990 = vmatprep.subr.mxu1 %v22546_v34 }
 0xa9f   :  { %15912 = vmatpush3.msra.mxu0 %v22776_v3  ;;  %15991 = vmatpush3.msra.mxu1 %v22777_v32 }
 0xaa0   :  { %15913 = vmatprep.subr.mxu0 %v22546_v34  ;;  %15992 = vmatprep.subr.mxu1 %v22546_v34 }
 0xaa1   :  { %15914 = vmatpush3.msra.mxu0 %v22778_v41  ;;  %15993 = vmatpush3.msra.mxu1 %v22779_v55  ;;  %v224_v41 = vpop.permute.xlu0 %223 }
 0xaa2   :  { %15915 = vmatprep.subr.mxu0 %v22546_v34  ;;  %15994 = vmatprep.subr.mxu1 %v22546_v34 }
 0xaa3   :  { %15916 = vmatpush3.msra.mxu0 %v22780_v53  ;;  %15995 = vmatpush3.msra.mxu1 %v22781_v61  ;;  %v20402_v61 = vld [vmem:[%s22337_s2] ss:$0 sm:$0xff] }
 0xaa4   :  { %15918 = vmatmul.mubr.f32.vlgmr.msra.gmra.mxu0 %v20177_v0  ;;  %15996 = vmatprep.subr.mxu1 %v22546_v34  ;;  %v22793_v0 = vld [vmem:[#allocation36_spill] sm:$0xff]  ;;  %22795 = vst [vmem:[#allocation73_spill] sm:$0xff] %v20402_v61 }
 0xaa5   :  { %15997 = vmatpush3.msra.mxu1 %v22782_v40  ;;  %15955 = vmatprep.subr.mxu0 %v22546_v34 }
 0xaa6   :  { %15998 = vmatprep.subr.mxu1 %v22546_v34  ;;  %15956 = vmatpush3.msra.mxu0 %v17755_v5 }
 0xaa7   :  { %15999 = vmatpush3.msra.mxu1 %v22783_v45  ;;  %15957 = vmatprep.subr.mxu0 %v22546_v34  ;;  %v117_v45 = vpop.permute.xlu1 %116 }
 0xaa8   :  { %16000 = vmatprep.subr.mxu1 %v22546_v34  ;;  %15958 = vmatpush3.msra.mxu0 %v17757_v6  ;;  %v162_v53 = vmul.f32 %v20402_v61, %v117_v45 }
 0xaa9   :  { %16001 = vmatpush3.msra.mxu1 %v22784_v9  ;;  %15959 = vmatprep.subr.mxu0 %v22546_v34 }
 0xaaa   :  { %16002 = vmatprep.subr.mxu1 %v22546_v34  ;;  %15960 = vmatpush3.msra.mxu0 %v17759_v7 }
 0xaab   :  { %16003 = vmatpush3.msra.mxu1 %v22785_v60  ;;  %15961 = vmatprep.subr.mxu0 %v22546_v34 }
 0xaac   :  { %16004 = vmatprep.subr.mxu1 %v22546_v34  ;;  %15962 = vmatpush3.msra.mxu0 %v17770_v11 }
 0xaad   :  { %16005 = vmatpush3.msra.mxu1 %v22786_v1  ;;  %15963 = vmatprep.subr.mxu0 %v22546_v34 }
 0xaae   :  { %16006 = vmatprep.subr.mxu1 %v22546_v34  ;;  %15964 = vmatpush3.msra.mxu0 %v17772_v12 }
 0xaaf   :  { %16007 = vmatpush3.msra.mxu1 %v22787_v59  ;;  %15965 = vmatprep.subr.mxu0 %v22546_v34 }
 0xab0   :  { %16008 = vmatprep.subr.mxu1 %v22546_v34  ;;  %15966 = vmatpush3.msra.mxu0 %v17774_v13 }
 0xab1   :  { %16009 = vmatpush3.msra.mxu1 %v22788_v56  ;;  %15967 = vmatprep.subr.mxu0 %v22546_v34 }
 0xab2   :  { %16010 = vmatprep.subr.mxu1 %v22546_v34  ;;  %15968 = vmatpush3.msra.mxu0 %v17789_v18 }
 0xab3   :  { %16011 = vmatpush3.msra.mxu1 %v22789_v35  ;;  %15969 = vmatprep.subr.mxu0 %v22546_v34 }
 0xab4   :  { %16012 = vmatprep.subr.mxu1 %v22546_v34  ;;  %15970 = vmatpush3.msra.mxu0 %v17814_v26 }
 0xab5   :  { %16013 = vmatpush3.msra.mxu1 %v22790_v33  ;;  %15971 = vmatprep.subr.mxu0 %v22546_v34 }
 0xab6   :  { %16014 = vmatprep.subr.mxu1 %v22546_v34  ;;  %15972 = vmatpush3.msra.mxu0 %v17823_v29 }
 0xab7   :  { %16015 = vmatpush3.msra.mxu1 %v22791_v14  ;;  %15973 = vmatprep.subr.mxu0 %v22546_v34  ;;  %v22794_v14 = vld [vmem:[#allocation37_spill] sm:$0xff] }
 0xab8   :  { %16016 = vmatprep.subr.mxu1 %v22546_v34  ;;  %15974 = vmatpush3.msra.mxu0 %v17852_v38 }
 0xab9   :  { %16017 = vmatpush3.msra.mxu1 %v22792_v54  ;;  %15975 = vmatprep.subr.mxu0 %v22546_v34 }
 0xaba   :  { %16018 = vmatprep.subr.mxu1 %v22546_v34  ;;  %15976 = vmatpush3.msra.mxu0 %v17882_v48 }
 0xabb   :  { %16019 = vmatpush3.msra.mxu1 %v22793_v0  ;;  %15977 = vmatprep.subr.mxu0 %v22546_v34 }
 0xabc   :  { %16020 = vmatprep.subr.mxu1 %v22546_v34  ;;  %15978 = vmatpush3.msra.mxu0 %v17892_v51 }
 0xabd   :  { %16021 = vmatpush3.msra.mxu1 %v22794_v14  ;;  %15979 = vmatprep.subr.mxu0 %v22546_v34 }
 0xabe   :  { %16022 = vmatprep.mubr.msk.f32.mxu1 %vm17682_vm0, %v22546_v34  ;;  %16060 = vmatprep.subr.mxu1 %v22546_v34 }
 0xabf   :  { %15980 = vmatpush3.msra.mxu0 %v17926_v62  ;;  %15987 = vmatprep.mubr.msk.f32.mxu0 %vm17682_vm0, %v22546_v34 }
 0xac0   :  { %15981 = vmatprep.subr.mxu0 %v22546_v34 }
 0xac1   :  { %15982 = vmatpush3.msra.mxu0 %v17938_v4 }
 0xac2   :  { %15983 = vmatprep.subr.mxu0 %v22546_v34 }
 0xac3   :  { %15984 = vmatpush3.msra.mxu0 %v17959_v27 }
 0xac4   :  { %15985 = vmatprep.subr.mxu0 %v22546_v34 }
 0xac5   :  { %15986 = vmatpush3.msra.mxu0 %v17976_v42 }
 0xac6   :  { %16025 = vmatprep.subr.mxu0 %v22546_v34 }
 0xb1a   :  { %v6372_v14 = vpop.f32.mrf.mxu1 }
 0xb1c   :  { %v15814_v0 = vpop.f32.mrf.mxu1 }
 0xb1d   :  { %v20408_v0 = vld [vmem:[%s22339_s4] ss:$0 sm:$0xff] }
 0xb22   :  { %v6221_v54 = vpop.f32.mrf.mxu0 }
 0xb23   :  { %v6373_v9 = vadd.f32 %v6372_v14, %v6221_v54  ;;  %v20414_v14 = vld [vmem:[%s22337_s2 + $0x1] ss:$0 sm:$0xff] }
 0xb24   :  { %v15779_v33 = vpop.f32.mrf.mxu0  ;;  %v263_v54 = vmul.f32 %v20414_v14, %v224_v41 }
 0xb25   :  { %v178_v33 = vadd.f32 %v20408_v0, %v162_v53 }
 0xb3a   :  { %v6565_v35 = vpop.f32.mrf.mxu1 }
 0xb3c   :  { %v15884_v56 = vpop.f32.mrf.mxu1 }
 0xb43   :  { %v6476_v59 = vpop.f32.mrf.mxu0 }
 0xb44   :  { %v6477_v55 = vadd.f32 %v6476_v59, %v6373_v9  ;;  %v279_v9 = vadd.f32 %v263_v54, %v178_v33  ;;  %v22803_v33 = vld [vmem:[#allocation13_spill] sm:$0xff] }
 0xb45   :  { %v15849_v1 = vpop.f32.mrf.mxu0  ;;  %v22804_v54 = vld [vmem:[#allocation33_spill] sm:$0xff] }
 0xb5c   :  { %v6771_v60 = vpop.f32.mrf.mxu1 }
 0xb5e   :  { %v15954_v40 = vpop.f32.mrf.mxu1 }
 0xb5f   :  { %v6566_v40 = vadd.f32 %v6565_v35, %v6477_v55  ;;  %v22802_v35 = vld [vmem:[#allocation31_spill] sm:$0xff] }
 0xb64   :  { %v6684_v1 = vpop.f32.mrf.mxu0 }
 0xb65   :  { %v6685_v56 = vadd.f32 %v6684_v1, %v6566_v40  ;;  %v22805_v40 = vld [vmem:[#allocation14_spill] sm:$0xff]  ;;  %v22806_v1 = vld [vmem:[#allocation16_spill] sm:$0xff] }
 0xb66   :  { %v15919_v45 = vpop.f32.mrf.mxu0 }
 0xb67   :  { %v6772_v59 = vadd.f32 %v6771_v60, %v6685_v56  ;;  %v22801_v60 = vld [vmem:[#allocation12_spill] sm:$0xff]  ;;  %v22807_v56 = vld [vmem:[#allocation18_spill] sm:$0xff] }
 0xb68   :  { %v22808_v45 = vld [vmem:[#allocation20_spill] sm:$0xff] }
 0xb69   :  { %v6775_v61 = vadd.f32 %v6772_v59, %v279_v9  ;;  %v22809_v9 = vld [vmem:[#allocation22_spill] sm:$0xff]  ;;  %v22810_v59 = vld [vmem:[#allocation24_spill] sm:$0xff] }
 0xb6b   :  { %17583 = vtanh.f32 %v6775_v61  ;;  %v22800_v61 = vld [vmem:[#allocation29_spill] sm:$0xff] }
 0xb78   :  { %v17584_v32 = vpop.eup %17583 }
 0xb79   :  { %v20417_v3 = vand.u32 4294901760, %v17584_v32 }
 0xb7b   :  { %22796 = vst [vmem:[#allocation74_spill] sm:$0xff] %v20417_v3  ;;  %16023 = vmatmul.mubr.f32.vlgmr.msra.gmra.mxu1 %v20417_v3  ;;  %v20421_v53 = vsub.f32 %v17584_v32, %v20417_v3 }
 0xb7c   :  { %16061 = vmatpush3.msra.mxu1 %v17755_v5  ;;  %16092 = vmatprep.mubr.msk.f32.mxu1 %vm17682_vm0, %v22546_v34 }
 0xb7d   :  { %22797 = vst [vmem:[#allocation75_spill] sm:$0xff] %v20421_v53  ;;  %16062 = vmatprep.subr.mxu1 %v22546_v34  ;;  %v20428_v41 = vand.u32 4294901760, %v20421_v53 }
 0xb7e   :  { %16063 = vmatpush3.msra.mxu1 %v17757_v6 }
 0xb7f   :  { %22798 = vst [vmem:[#allocation76_spill] sm:$0xff] %v20428_v41  ;;  %16064 = vmatprep.subr.mxu1 %v22546_v34  ;;  %v6864_v55 = vsub.f32 %v20421_v53, %v20428_v41 }
 0xb80   :  { %16065 = vmatpush3.msra.mxu1 %v17759_v7 }
 0xb81   :  { %16066 = vmatprep.subr.mxu1 %v22546_v34  ;;  %v20436_v32 = vand.u32 4294901760, %v6864_v55  ;;  %v22811_v55 = vld [vmem:[#allocation26_spill] sm:$0xff] }
 0xb82   :  { %16067 = vmatpush3.msra.mxu1 %v17770_v11 }
 0xb83   :  { %22799 = vst [vmem:[#allocation77_spill] sm:$0xff] %v20436_v32  ;;  %16068 = vmatprep.subr.mxu1 %v22546_v34  ;;  %15988 = vmatmul.mubr.f32.vlgmr.msra.gmra.mxu0 %v20436_v32  ;;  %v22814_v32 = vld [vmem:[#allocation32_spill] sm:$0xff] }
 0xb84   :  { %16026 = vmatpush3.msra.mxu0 %v17784_v16  ;;  %16069 = vmatpush3.msra.mxu1 %v17772_v12 }
 0xb85   :  { %16027 = vmatprep.subr.mxu0 %v22546_v34  ;;  %16070 = vmatprep.subr.mxu1 %v22546_v34 }
 0xb86   :  { %16028 = vmatpush3.msra.mxu0 %v17787_v17  ;;  %16071 = vmatpush3.msra.mxu1 %v17774_v13 }
 0xb87   :  { %16029 = vmatprep.subr.mxu0 %v22546_v34  ;;  %16072 = vmatprep.subr.mxu1 %v22546_v34 }
 0xb88   :  { %16030 = vmatpush3.msra.mxu0 %v17792_v19  ;;  %16073 = vmatpush3.msra.mxu1 %v17789_v18 }
 0xb89   :  { %16031 = vmatprep.subr.mxu0 %v22546_v34  ;;  %16074 = vmatprep.subr.mxu1 %v22546_v34 }
 0xb8a   :  { %16032 = vmatpush3.msra.mxu0 %v17799_v21  ;;  %16075 = vmatpush3.msra.mxu1 %v17814_v26 }
 0xb8b   :  { %16033 = vmatprep.subr.mxu0 %v22546_v34  ;;  %16076 = vmatprep.subr.mxu1 %v22546_v34 }
 0xb8c   :  { %16034 = vmatpush3.msra.mxu0 %v17802_v22  ;;  %16077 = vmatpush3.msra.mxu1 %v17823_v29 }
 0xb8d   :  { %16035 = vmatprep.subr.mxu0 %v22546_v34  ;;  %16078 = vmatprep.subr.mxu1 %v22546_v34 }
 0xb8e   :  { %16036 = vmatpush3.msra.mxu0 %v17829_v31  ;;  %16079 = vmatpush3.msra.mxu1 %v17852_v38 }
 0xb8f   :  { %16037 = vmatprep.subr.mxu0 %v22546_v34  ;;  %16080 = vmatprep.subr.mxu1 %v22546_v34 }
 0xb90   :  { %16038 = vmatpush3.msra.mxu0 %v17849_v37  ;;  %16081 = vmatpush3.msra.mxu1 %v17882_v48 }
 0xb91   :  { %16039 = vmatprep.subr.mxu0 %v22546_v34  ;;  %16082 = vmatprep.subr.mxu1 %v22546_v34 }
 0xb92   :  { %16040 = vmatpush3.msra.mxu0 %v17876_v46  ;;  %16083 = vmatpush3.msra.mxu1 %v17892_v51 }
 0xb93   :  { %16041 = vmatprep.subr.mxu0 %v22546_v34  ;;  %16084 = vmatprep.subr.mxu1 %v22546_v34 }
 0xb94   :  { %16042 = vmatpush3.msra.mxu0 %v17888_v50  ;;  %16085 = vmatpush3.msra.mxu1 %v17926_v62 }
 0xb95   :  { %16043 = vmatprep.subr.mxu0 %v22546_v34  ;;  %16086 = vmatprep.subr.mxu1 %v22546_v34 }
 0xb96   :  { %16044 = vmatpush3.msra.mxu0 %v17913_v58  ;;  %16087 = vmatpush3.msra.mxu1 %v17938_v4 }
 0xb97   :  { %16045 = vmatprep.subr.mxu0 %v22546_v34  ;;  %16088 = vmatprep.subr.mxu1 %v22546_v34 }
 0xb98   :  { %16046 = vmatpush3.msra.mxu0 %v17932_v2  ;;  %16089 = vmatpush3.msra.mxu1 %v17959_v27 }
 0xb99   :  { %16047 = vmatprep.subr.mxu0 %v22546_v34  ;;  %16090 = vmatprep.subr.mxu1 %v22546_v34 }
 0xb9a   :  { %16048 = vmatpush3.msra.mxu0 %v17953_v15  ;;  %16091 = vmatpush3.msra.mxu1 %v17976_v42 }
 0xb9b   :  { %16049 = vmatprep.subr.mxu0 %v22546_v34  ;;  %16093 = vmatmul.mubr.f32.vlgmr.msra.gmra.mxu1 %v20428_v41  ;;  %v22813_v41 = vld [vmem:[#allocation30_spill] sm:$0xff] }
 0xb9c   :  { %16130 = vmatprep.subr.mxu1 %v22546_v34  ;;  %16050 = vmatpush3.msra.mxu0 %v17972_v39 }
 0xb9d   :  { %16131 = vmatpush3.msra.mxu1 %v17755_v5  ;;  %16051 = vmatprep.subr.mxu0 %v22546_v34 }
 0xb9e   :  { %16132 = vmatprep.subr.mxu1 %v22546_v34  ;;  %16052 = vmatpush3.msra.mxu0 %v17988_v52 }
 0xb9f   :  { %16133 = vmatpush3.msra.mxu1 %v17757_v6  ;;  %16053 = vmatprep.subr.mxu0 %v22546_v34 }
 0xba0   :  { %16134 = vmatprep.subr.mxu1 %v22546_v34  ;;  %16054 = vmatpush3.msra.mxu0 %v18003_v57 }
 0xba1   :  { %16135 = vmatpush3.msra.mxu1 %v17759_v7  ;;  %16055 = vmatprep.subr.mxu0 %v22546_v34 }
 0xba2   :  { %16136 = vmatprep.subr.mxu1 %v22546_v34  ;;  %16056 = vmatpush3.msra.mxu0 %v18017_v8 }
 0xba3   :  { %16057 = vmatprep.mubr.msk.f32.mxu0 %vm17682_vm0, %v22546_v34  ;;  %16137 = vmatpush3.msra.mxu1 %v17770_v11 }
 0xba4   :  { %16058 = vmatmul.mubr.f32.vlgmr.msra.gmra.mxu0 %v20421_v53  ;;  %16095 = vmatprep.subr.mxu0 %v22546_v34  ;;  %v22812_v53 = vld [vmem:[#allocation28_spill] sm:$0xff] }
 0xba5   :  { %16138 = vmatprep.subr.mxu1 %v22546_v34  ;;  %16096 = vmatpush3.msra.mxu0 %v17806_v23 }
 0xba6   :  { %16139 = vmatpush3.msra.mxu1 %v17772_v12  ;;  %16097 = vmatprep.subr.mxu0 %v22546_v34 }
 0xba7   :  { %16140 = vmatprep.subr.mxu1 %v22546_v34  ;;  %16098 = vmatpush3.msra.mxu0 %v17809_v24 }
 0xba8   :  { %16141 = vmatpush3.msra.mxu1 %v17774_v13  ;;  %16099 = vmatprep.subr.mxu0 %v22546_v34 }
 0xba9   :  { %16142 = vmatprep.subr.mxu1 %v22546_v34  ;;  %16100 = vmatpush3.msra.mxu0 %v17812_v25 }
 0xbaa   :  { %16143 = vmatpush3.msra.mxu1 %v17789_v18  ;;  %16101 = vmatprep.subr.mxu0 %v22546_v34 }
 0xbab   :  { %16144 = vmatprep.subr.mxu1 %v22546_v34  ;;  %16102 = vmatpush3.msra.mxu0 %v17821_v28 }
 0xbac   :  { %16145 = vmatpush3.msra.mxu1 %v17814_v26  ;;  %16103 = vmatprep.subr.mxu0 %v22546_v34 }
 0xbad   :  { %16146 = vmatprep.subr.mxu1 %v22546_v34  ;;  %16104 = vmatpush3.msra.mxu0 %v17826_v30 }
 0xbae   :  { %16147 = vmatpush3.msra.mxu1 %v17823_v29  ;;  %16105 = vmatprep.subr.mxu0 %v22546_v34 }
 0xbaf   :  { %16148 = vmatprep.subr.mxu1 %v22546_v34  ;;  %16106 = vmatpush3.msra.mxu0 %v17866_v43 }
 0xbb0   :  { %16149 = vmatpush3.msra.mxu1 %v17852_v38  ;;  %16107 = vmatprep.subr.mxu0 %v22546_v34 }
 0xbb1   :  { %16150 = vmatprep.subr.mxu1 %v22546_v34  ;;  %16108 = vmatpush3.msra.mxu0 %v22574_v10 }
 0xbb2   :  { %16151 = vmatpush3.msra.mxu1 %v17882_v48  ;;  %16109 = vmatprep.subr.mxu0 %v22546_v34 }
 0xbb3   :  { %16152 = vmatprep.subr.mxu1 %v22546_v34  ;;  %16110 = vmatpush3.msra.mxu0 %v22770_v36 }
 0xbb4   :  { %16153 = vmatpush3.msra.mxu1 %v17892_v51  ;;  %16111 = vmatprep.subr.mxu0 %v22546_v34 }
 0xbb5   :  { %16154 = vmatprep.subr.mxu1 %v22546_v34  ;;  %16112 = vmatpush3.msra.mxu0 %v22771_v49 }
 0xbb6   :  { %16155 = vmatpush3.msra.mxu1 %v17926_v62  ;;  %16113 = vmatprep.subr.mxu0 %v22546_v34 }
 0xbb7   :  { %16156 = vmatprep.subr.mxu1 %v22546_v34  ;;  %16114 = vmatpush3.msra.mxu0 %v22772_v47 }
 0xbb8   :  { %16157 = vmatpush3.msra.mxu1 %v17938_v4  ;;  %16115 = vmatprep.subr.mxu0 %v22546_v34 }
 0xbb9   :  { %16158 = vmatprep.subr.mxu1 %v22546_v34  ;;  %16116 = vmatpush3.msra.mxu0 %v22773_v20 }
 0xbba   :  { %16159 = vmatpush3.msra.mxu1 %v17959_v27  ;;  %16117 = vmatprep.subr.mxu0 %v22546_v34 }
 0xbbb   :  { %16160 = vmatprep.subr.mxu1 %v22546_v34  ;;  %16118 = vmatpush3.msra.mxu0 %v22774_v63 }
 0xbbc   :  { %16161 = vmatpush3.msra.mxu1 %v17976_v42  ;;  %16162 = vmatprep.mubr.msk.f32.mxu1 %vm17682_vm0, %v22546_v34 }
 0xbbd   :  { %16119 = vmatprep.subr.mxu0 %v22546_v34  ;;  %16163 = vmatmul.mubr.f32.vlgmr.msra.gmra.mxu1 %v20417_v3 }
 0xbbe   :  { %16120 = vmatpush3.msra.mxu0 %v22775_v44  ;;  %16127 = vmatprep.mubr.msk.f32.mxu0 %vm17682_vm0, %v22546_v34 }
 0xbbf   :  { %16121 = vmatprep.subr.mxu0 %v22546_v34  ;;  %16200 = vmatprep.subr.mxu1 %v22546_v34 }
 0xbc0   :  { %16122 = vmatpush3.msra.mxu0 %v22800_v61  ;;  %16201 = vmatpush3.msra.mxu1 %v22801_v60  ;;  %v228_v61 = vpop.permute.xlu0 %227 }
 0xbc1   :  { %16123 = vmatprep.subr.mxu0 %v22546_v34  ;;  %16202 = vmatprep.subr.mxu1 %v22546_v34  ;;  %v264_v63 = vmul.f32 %v20414_v14, %v228_v61  ;;  %v22827_v61 = vld [vmem:[#allocation23_spill] sm:$0xff] }
 0xbc2   :  { %16124 = vmatpush3.msra.mxu0 %v22802_v35  ;;  %16203 = vmatpush3.msra.mxu1 %v22803_v33  ;;  %v22819_v33 = vld [vmem:[#allocation73_spill] sm:$0xff] }
 0xbc3   :  { %16125 = vmatprep.subr.mxu0 %v22546_v34  ;;  %16204 = vmatprep.subr.mxu1 %v22546_v34 }
 0xbc4   :  { %16126 = vmatpush3.msra.mxu0 %v22804_v54  ;;  %16205 = vmatpush3.msra.mxu1 %v22805_v40  ;;  %v122_v40 = vpop.permute.xlu1 %121 }
 0xbc5   :  { %16128 = vmatmul.mubr.f32.vlgmr.msra.gmra.mxu0 %v20417_v3  ;;  %16206 = vmatprep.subr.mxu1 %v22546_v34  ;;  %v22815_v3 = vld [vmem:[#allocation34_spill] sm:$0xff]  ;;  %v163_v35 = vmul.f32 %v22819_v33, %v122_v40  ;;  %v22831_v40 = vld [vmem:[#allocation12_spill] sm:$0xff] }
 0xbc6   :  { %16207 = vmatpush3.msra.mxu1 %v22806_v1  ;;  %16165 = vmatprep.subr.mxu0 %v22546_v34 }
 0xbc7   :  { %16208 = vmatprep.subr.mxu1 %v22546_v34  ;;  %16166 = vmatpush3.msra.mxu0 %v17755_v5  ;;  %v179_v44 = vadd.f32 %v20408_v0, %v163_v35  ;;  %v22829_v35 = vld [vmem:[#allocation27_spill] sm:$0xff] }
 0xbc8   :  { %16209 = vmatpush3.msra.mxu1 %v22807_v56  ;;  %16167 = vmatprep.subr.mxu0 %v22546_v34 }
 0xbc9   :  { %16210 = vmatprep.subr.mxu1 %v22546_v34  ;;  %16168 = vmatpush3.msra.mxu0 %v17757_v6  ;;  %v280_v49 = vadd.f32 %v264_v63, %v179_v44  ;;  %v22825_v63 = vld [vmem:[#allocation19_spill] sm:$0xff]  ;;  %v22826_v44 = vld [vmem:[#allocation21_spill] sm:$0xff] }
 0xbca   :  { %16211 = vmatpush3.msra.mxu1 %v22808_v45  ;;  %16169 = vmatprep.subr.mxu0 %v22546_v34 }
 0xbcb   :  { %16212 = vmatprep.subr.mxu1 %v22546_v34  ;;  %16170 = vmatpush3.msra.mxu0 %v17759_v7 }
 0xbcc   :  { %16213 = vmatpush3.msra.mxu1 %v22809_v9  ;;  %16171 = vmatprep.subr.mxu0 %v22546_v34 }
 0xbcd   :  { %16214 = vmatprep.subr.mxu1 %v22546_v34  ;;  %16172 = vmatpush3.msra.mxu0 %v17770_v11 }
 0xbce   :  { %16215 = vmatpush3.msra.mxu1 %v22810_v59  ;;  %16173 = vmatprep.subr.mxu0 %v22546_v34 }
 0xbcf   :  { %16216 = vmatprep.subr.mxu1 %v22546_v34  ;;  %16174 = vmatpush3.msra.mxu0 %v17772_v12 }
 0xbd0   :  { %16217 = vmatpush3.msra.mxu1 %v22811_v55  ;;  %16175 = vmatprep.subr.mxu0 %v22546_v34 }
 0xbd1   :  { %16218 = vmatprep.subr.mxu1 %v22546_v34  ;;  %16176 = vmatpush3.msra.mxu0 %v17774_v13 }
 0xbd2   :  { %16219 = vmatpush3.msra.mxu1 %v22812_v53  ;;  %16177 = vmatprep.subr.mxu0 %v22546_v34 }
 0xbd3   :  { %16220 = vmatprep.subr.mxu1 %v22546_v34  ;;  %16178 = vmatpush3.msra.mxu0 %v17789_v18 }
 0xbd4   :  { %16221 = vmatpush3.msra.mxu1 %v22813_v41  ;;  %16179 = vmatprep.subr.mxu0 %v22546_v34  ;;  %v22816_v41 = vld [vmem:[#allocation35_spill] sm:$0xff] }
 0xbd5   :  { %16222 = vmatprep.subr.mxu1 %v22546_v34  ;;  %16180 = vmatpush3.msra.mxu0 %v17814_v26 }
 0xbd6   :  { %16223 = vmatpush3.msra.mxu1 %v22814_v32  ;;  %16181 = vmatprep.subr.mxu0 %v22546_v34  ;;  %v22817_v32 = vld [vmem:[#allocation36_spill] sm:$0xff] }
 0xbd7   :  { %16224 = vmatprep.subr.mxu1 %v22546_v34  ;;  %16182 = vmatpush3.msra.mxu0 %v17823_v29 }
 0xbd8   :  { %16225 = vmatpush3.msra.mxu1 %v22815_v3  ;;  %16183 = vmatprep.subr.mxu0 %v22546_v34  ;;  %v22818_v3 = vld [vmem:[#allocation37_spill] sm:$0xff] }
 0xbd9   :  { %16226 = vmatprep.subr.mxu1 %v22546_v34  ;;  %16184 = vmatpush3.msra.mxu0 %v17852_v38 }
 0xbda   :  { %16227 = vmatpush3.msra.mxu1 %v22816_v41  ;;  %16185 = vmatprep.subr.mxu0 %v22546_v34 }
 0xbdb   :  { %16228 = vmatprep.subr.mxu1 %v22546_v34  ;;  %16186 = vmatpush3.msra.mxu0 %v17882_v48 }
 0xbdc   :  { %16229 = vmatpush3.msra.mxu1 %v22817_v32  ;;  %16187 = vmatprep.subr.mxu0 %v22546_v34 }
 0xbdd   :  { %16230 = vmatprep.subr.mxu1 %v22546_v34  ;;  %16188 = vmatpush3.msra.mxu0 %v17892_v51 }
 0xbde   :  { %16231 = vmatpush3.msra.mxu1 %v22818_v3  ;;  %16189 = vmatprep.subr.mxu0 %v22546_v34 }
 0xbdf   :  { %16232 = vmatprep.mubr.msk.f32.mxu1 %vm17682_vm0, %v22546_v34  ;;  %16270 = vmatprep.subr.mxu1 %v22546_v34 }
 0xbe0   :  { %16190 = vmatpush3.msra.mxu0 %v17926_v62  ;;  %16197 = vmatprep.mubr.msk.f32.mxu0 %vm17682_vm0, %v22546_v34 }
 0xbe1   :  { %16191 = vmatprep.subr.mxu0 %v22546_v34 }
 0xbe2   :  { %16192 = vmatpush3.msra.mxu0 %v17938_v4 }
 0xbe3   :  { %16193 = vmatprep.subr.mxu0 %v22546_v34 }
 0xbe4   :  { %16194 = vmatpush3.msra.mxu0 %v17959_v27 }
 0xbe5   :  { %16195 = vmatprep.subr.mxu0 %v22546_v34 }
 0xbe6   :  { %16196 = vmatpush3.msra.mxu0 %v17976_v42 }
 0xbe7   :  { %16235 = vmatprep.subr.mxu0 %v22546_v34 }
 0xc3b   :  { %v7018_v3 = vpop.f32.mrf.mxu1 }
 0xc3d   :  { %v16024_v32 = vpop.f32.mrf.mxu1 }
 0xc43   :  { %v6867_v41 = vpop.f32.mrf.mxu0 }
 0xc44   :  { %v7019_v1 = vadd.f32 %v7018_v3, %v6867_v41 }
 0xc45   :  { %v15989_v53 = vpop.f32.mrf.mxu0 }
 0xc5b   :  { %v7211_v55 = vpop.f32.mrf.mxu1 }
 0xc5d   :  { %v16094_v59 = vpop.f32.mrf.mxu1 }
 0xc64   :  { %v7122_v9 = vpop.f32.mrf.mxu0 }
 0xc65   :  { %v7123_v60 = vadd.f32 %v7122_v9, %v7019_v1  ;;  %v22832_v1 = vld [vmem:[#allocation31_spill] sm:$0xff]  ;;  %v22834_v9 = vld [vmem:[#allocation33_spill] sm:$0xff] }
 0xc66   :  { %v16059_v45 = vpop.f32.mrf.mxu0 }
 0xc67   :  { %v7212_v20 = vadd.f32 %v7211_v55, %v7123_v60  ;;  %v22828_v60 = vld [vmem:[#allocation25_spill] sm:$0xff]  ;;  %v22835_v55 = vld [vmem:[#allocation14_spill] sm:$0xff] }
 0xc7d   :  { %v7417_v56 = vpop.f32.mrf.mxu1 }
 0xc7f   :  { %v16164_v54 = vpop.f32.mrf.mxu1 }
 0xc80   :  { %v22830_v54 = vld [vmem:[#allocation29_spill] sm:$0xff] }
 0xc85   :  { %v7330_v32 = vpop.f32.mrf.mxu0 }
 0xc86   :  { %v7331_v47 = vadd.f32 %v7330_v32, %v7212_v20  ;;  %v22836_v32 = vld [vmem:[#allocation16_spill] sm:$0xff] }
 0xc87   :  { %v16129_v53 = vpop.f32.mrf.mxu0 }
 0xc88   :  { %v7418_v59 = vadd.f32 %v7417_v56, %v7331_v47  ;;  %v22824_v47 = vld [vmem:[#allocation17_spill] sm:$0xff]  ;;  %v22837_v53 = vld [vmem:[#allocation18_spill] sm:$0xff] }
 0xc89   :  { %v22833_v56 = vld [vmem:[#allocation13_spill] sm:$0xff] }
 0xc8a   :  { %v7421_v36 = vadd.f32 %v7418_v59, %v280_v49  ;;  %v22838_v59 = vld [vmem:[#allocation20_spill] sm:$0xff] }
 0xc8c   :  { %17585 = vtanh.f32 %v7421_v36 }
 0xc99   :  { %v17586_v45 = vpop.eup %17585 }
 0xc9a   :  { %v20642_v3 = vand.u32 4294901760, %v17586_v45 }
 0xc9c   :  { %22820 = vst [vmem:[#allocation73_spill] sm:$0xff] %v20642_v3  ;;  %16233 = vmatmul.mubr.f32.vlgmr.msra.gmra.mxu1 %v20642_v3  ;;  %v20646_v41 = vsub.f32 %v17586_v45, %v20642_v3  ;;  %v22839_v45 = vld [vmem:[#allocation22_spill] sm:$0xff] }
 0xc9d   :  { %16271 = vmatpush3.msra.mxu1 %v17755_v5  ;;  %16302 = vmatprep.mubr.msk.f32.mxu1 %vm17682_vm0, %v22546_v34 }
 0xc9e   :  { %22821 = vst [vmem:[#allocation78_spill] sm:$0xff] %v20646_v41  ;;  %16272 = vmatprep.subr.mxu1 %v22546_v34  ;;  %v20653_v20 = vand.u32 4294901760, %v20646_v41 }
 0xc9f   :  { %16273 = vmatpush3.msra.mxu1 %v17757_v6 }
 0xca0   :  { %22822 = vst [vmem:[#allocation79_spill] sm:$0xff] %v20653_v20  ;;  %16274 = vmatprep.subr.mxu1 %v22546_v34  ;;  %v7510_v36 = vsub.f32 %v20646_v41, %v20653_v20 }
 0xca1   :  { %16275 = vmatpush3.msra.mxu1 %v17759_v7 }
 0xca2   :  { %16276 = vmatprep.subr.mxu1 %v22546_v34  ;;  %v20661_v49 = vand.u32 4294901760, %v7510_v36  ;;  %v22840_v36 = vld [vmem:[#allocation24_spill] sm:$0xff] }
 0xca3   :  { %16277 = vmatpush3.msra.mxu1 %v17770_v11 }
 0xca4   :  { %22823 = vst [vmem:[#allocation80_spill] sm:$0xff] %v20661_v49  ;;  %16278 = vmatprep.subr.mxu1 %v22546_v34  ;;  %16198 = vmatmul.mubr.f32.vlgmr.msra.gmra.mxu0 %v20661_v49  ;;  %v22843_v49 = vld [vmem:[#allocation30_spill] sm:$0xff] }
 0xca5   :  { %16236 = vmatpush3.msra.mxu0 %v17784_v16  ;;  %16279 = vmatpush3.msra.mxu1 %v17772_v12 }
 0xca6   :  { %16237 = vmatprep.subr.mxu0 %v22546_v34  ;;  %16280 = vmatprep.subr.mxu1 %v22546_v34 }
 0xca7   :  { %16238 = vmatpush3.msra.mxu0 %v17787_v17  ;;  %16281 = vmatpush3.msra.mxu1 %v17774_v13 }
 0xca8   :  { %16239 = vmatprep.subr.mxu0 %v22546_v34  ;;  %16282 = vmatprep.subr.mxu1 %v22546_v34 }
 0xca9   :  { %16240 = vmatpush3.msra.mxu0 %v17792_v19  ;;  %16283 = vmatpush3.msra.mxu1 %v17789_v18 }
 0xcaa   :  { %16241 = vmatprep.subr.mxu0 %v22546_v34  ;;  %16284 = vmatprep.subr.mxu1 %v22546_v34 }
 0xcab   :  { %16242 = vmatpush3.msra.mxu0 %v17799_v21  ;;  %16285 = vmatpush3.msra.mxu1 %v17814_v26 }
 0xcac   :  { %16243 = vmatprep.subr.mxu0 %v22546_v34  ;;  %16286 = vmatprep.subr.mxu1 %v22546_v34 }
 0xcad   :  { %16244 = vmatpush3.msra.mxu0 %v17802_v22  ;;  %16287 = vmatpush3.msra.mxu1 %v17823_v29 }
 0xcae   :  { %16245 = vmatprep.subr.mxu0 %v22546_v34  ;;  %16288 = vmatprep.subr.mxu1 %v22546_v34 }
 0xcaf   :  { %16246 = vmatpush3.msra.mxu0 %v17829_v31  ;;  %16289 = vmatpush3.msra.mxu1 %v17852_v38 }
 0xcb0   :  { %16247 = vmatprep.subr.mxu0 %v22546_v34  ;;  %16290 = vmatprep.subr.mxu1 %v22546_v34 }
 0xcb1   :  { %16248 = vmatpush3.msra.mxu0 %v17849_v37  ;;  %16291 = vmatpush3.msra.mxu1 %v17882_v48 }
 0xcb2   :  { %16249 = vmatprep.subr.mxu0 %v22546_v34  ;;  %16292 = vmatprep.subr.mxu1 %v22546_v34 }
 0xcb3   :  { %16250 = vmatpush3.msra.mxu0 %v17876_v46  ;;  %16293 = vmatpush3.msra.mxu1 %v17892_v51 }
 0xcb4   :  { %16251 = vmatprep.subr.mxu0 %v22546_v34  ;;  %16294 = vmatprep.subr.mxu1 %v22546_v34 }
 0xcb5   :  { %16252 = vmatpush3.msra.mxu0 %v17888_v50  ;;  %16295 = vmatpush3.msra.mxu1 %v17926_v62 }
 0xcb6   :  { %16253 = vmatprep.subr.mxu0 %v22546_v34  ;;  %16296 = vmatprep.subr.mxu1 %v22546_v34 }
 0xcb7   :  { %16254 = vmatpush3.msra.mxu0 %v17913_v58  ;;  %16297 = vmatpush3.msra.mxu1 %v17938_v4 }
 0xcb8   :  { %16255 = vmatprep.subr.mxu0 %v22546_v34  ;;  %16298 = vmatprep.subr.mxu1 %v22546_v34 }
 0xcb9   :  { %16256 = vmatpush3.msra.mxu0 %v17932_v2  ;;  %16299 = vmatpush3.msra.mxu1 %v17959_v27 }
 0xcba   :  { %16257 = vmatprep.subr.mxu0 %v22546_v34  ;;  %16300 = vmatprep.subr.mxu1 %v22546_v34 }
 0xcbb   :  { %16258 = vmatpush3.msra.mxu0 %v17953_v15  ;;  %16301 = vmatpush3.msra.mxu1 %v17976_v42 }
 0xcbc   :  { %16259 = vmatprep.subr.mxu0 %v22546_v34  ;;  %16303 = vmatmul.mubr.f32.vlgmr.msra.gmra.mxu1 %v20653_v20  ;;  %v22842_v20 = vld [vmem:[#allocation28_spill] sm:$0xff] }
 0xcbd   :  { %16340 = vmatprep.subr.mxu1 %v22546_v34  ;;  %16260 = vmatpush3.msra.mxu0 %v17972_v39 }
 0xcbe   :  { %16341 = vmatpush3.msra.mxu1 %v17755_v5  ;;  %16261 = vmatprep.subr.mxu0 %v22546_v34 }
 0xcbf   :  { %16342 = vmatprep.subr.mxu1 %v22546_v34  ;;  %16262 = vmatpush3.msra.mxu0 %v17988_v52 }
 0xcc0   :  { %16343 = vmatpush3.msra.mxu1 %v17757_v6  ;;  %16263 = vmatprep.subr.mxu0 %v22546_v34 }
 0xcc1   :  { %16344 = vmatprep.subr.mxu1 %v22546_v34  ;;  %16264 = vmatpush3.msra.mxu0 %v18003_v57 }
 0xcc2   :  { %16345 = vmatpush3.msra.mxu1 %v17759_v7  ;;  %16265 = vmatprep.subr.mxu0 %v22546_v34 }
 0xcc3   :  { %16346 = vmatprep.subr.mxu1 %v22546_v34  ;;  %16266 = vmatpush3.msra.mxu0 %v18017_v8 }
 0xcc4   :  { %16267 = vmatprep.mubr.msk.f32.mxu0 %vm17682_vm0, %v22546_v34  ;;  %16347 = vmatpush3.msra.mxu1 %v17770_v11 }
 0xcc5   :  { %16268 = vmatmul.mubr.f32.vlgmr.msra.gmra.mxu0 %v20646_v41  ;;  %16305 = vmatprep.subr.mxu0 %v22546_v34  ;;  %v22841_v41 = vld [vmem:[#allocation26_spill] sm:$0xff] }
 0xcc6   :  { %16348 = vmatprep.subr.mxu1 %v22546_v34  ;;  %16306 = vmatpush3.msra.mxu0 %v17806_v23 }
 0xcc7   :  { %16349 = vmatpush3.msra.mxu1 %v17772_v12  ;;  %16307 = vmatprep.subr.mxu0 %v22546_v34 }
 0xcc8   :  { %16350 = vmatprep.subr.mxu1 %v22546_v34  ;;  %16308 = vmatpush3.msra.mxu0 %v17809_v24 }
 0xcc9   :  { %16351 = vmatpush3.msra.mxu1 %v17774_v13  ;;  %16309 = vmatprep.subr.mxu0 %v22546_v34 }
 0xcca   :  { %16352 = vmatprep.subr.mxu1 %v22546_v34  ;;  %16310 = vmatpush3.msra.mxu0 %v17812_v25 }
 0xccb   :  { %16353 = vmatpush3.msra.mxu1 %v17789_v18  ;;  %16311 = vmatprep.subr.mxu0 %v22546_v34 }
 0xccc   :  { %16354 = vmatprep.subr.mxu1 %v22546_v34  ;;  %16312 = vmatpush3.msra.mxu0 %v17821_v28 }
 0xccd   :  { %16355 = vmatpush3.msra.mxu1 %v17814_v26  ;;  %16313 = vmatprep.subr.mxu0 %v22546_v34 }
 0xcce   :  { %16356 = vmatprep.subr.mxu1 %v22546_v34  ;;  %16314 = vmatpush3.msra.mxu0 %v17826_v30 }
 0xccf   :  { %16357 = vmatpush3.msra.mxu1 %v17823_v29  ;;  %16315 = vmatprep.subr.mxu0 %v22546_v34 }
 0xcd0   :  { %16358 = vmatprep.subr.mxu1 %v22546_v34  ;;  %16316 = vmatpush3.msra.mxu0 %v17866_v43 }
 0xcd1   :  { %16359 = vmatpush3.msra.mxu1 %v17852_v38  ;;  %16317 = vmatprep.subr.mxu0 %v22546_v34 }
 0xcd2   :  { %16360 = vmatprep.subr.mxu1 %v22546_v34  ;;  %16318 = vmatpush3.msra.mxu0 %v22574_v10 }
 0xcd3   :  { %16361 = vmatpush3.msra.mxu1 %v17882_v48  ;;  %16319 = vmatprep.subr.mxu0 %v22546_v34 }
 0xcd4   :  { %16362 = vmatprep.subr.mxu1 %v22546_v34  ;;  %16320 = vmatpush3.msra.mxu0 %v22824_v47 }
 0xcd5   :  { %16363 = vmatpush3.msra.mxu1 %v17892_v51  ;;  %16321 = vmatprep.subr.mxu0 %v22546_v34 }
 0xcd6   :  { %16364 = vmatprep.subr.mxu1 %v22546_v34  ;;  %16322 = vmatpush3.msra.mxu0 %v22825_v63 }
 0xcd7   :  { %16365 = vmatpush3.msra.mxu1 %v17926_v62  ;;  %16323 = vmatprep.subr.mxu0 %v22546_v34 }
 0xcd8   :  { %16366 = vmatprep.subr.mxu1 %v22546_v34  ;;  %16324 = vmatpush3.msra.mxu0 %v22826_v44 }
 0xcd9   :  { %16367 = vmatpush3.msra.mxu1 %v17938_v4  ;;  %16325 = vmatprep.subr.mxu0 %v22546_v34 }
 0xcda   :  { %16368 = vmatprep.subr.mxu1 %v22546_v34  ;;  %16326 = vmatpush3.msra.mxu0 %v22827_v61 }
 0xcdb   :  { %16369 = vmatpush3.msra.mxu1 %v17959_v27  ;;  %16327 = vmatprep.subr.mxu0 %v22546_v34 }
 0xcdc   :  { %16370 = vmatprep.subr.mxu1 %v22546_v34  ;;  %16328 = vmatpush3.msra.mxu0 %v22828_v60 }
 0xcdd   :  { %16371 = vmatpush3.msra.mxu1 %v17976_v42  ;;  %16372 = vmatprep.mubr.msk.f32.mxu1 %vm17682_vm0, %v22546_v34 }
 0xcde   :  { %16329 = vmatprep.subr.mxu0 %v22546_v34  ;;  %16373 = vmatmul.mubr.f32.vlgmr.msra.gmra.mxu1 %v20642_v3 }
 0xcdf   :  { %16330 = vmatpush3.msra.mxu0 %v22829_v35  ;;  %16337 = vmatprep.mubr.msk.f32.mxu0 %vm17682_vm0, %v22546_v34 }
 0xce0   :  { %16331 = vmatprep.subr.mxu0 %v22546_v34  ;;  %16410 = vmatprep.subr.mxu1 %v22546_v34 }
 0xce1   :  { %16332 = vmatpush3.msra.mxu0 %v22830_v54  ;;  %16411 = vmatpush3.msra.mxu1 %v22831_v40  ;;  %v232_v54 = vpop.permute.xlu0 %231 }
 0xce2   :  { %16333 = vmatprep.subr.mxu0 %v22546_v34  ;;  %16412 = vmatprep.subr.mxu1 %v22546_v34  ;;  %v265_v60 = vmul.f32 %v20414_v14, %v232_v54  ;;  %v22859_v54 = vld [vmem:[#allocation29_spill] sm:$0xff] }
 0xce3   :  { %16334 = vmatpush3.msra.mxu0 %v22832_v1  ;;  %16413 = vmatpush3.msra.mxu1 %v22833_v56 }
 0xce4   :  { %16335 = vmatprep.subr.mxu0 %v22546_v34  ;;  %16414 = vmatprep.subr.mxu1 %v22546_v34 }
 0xce5   :  { %16336 = vmatpush3.msra.mxu0 %v22834_v9  ;;  %16415 = vmatpush3.msra.mxu1 %v22835_v55  ;;  %v127_v9 = vpop.permute.xlu1 %126 }
 0xce6   :  { %16338 = vmatmul.mubr.f32.vlgmr.msra.gmra.mxu0 %v20642_v3  ;;  %16416 = vmatprep.subr.mxu1 %v22546_v34  ;;  %v22844_v3 = vld [vmem:[#allocation32_spill] sm:$0xff]  ;;  %v164_v1 = vmul.f32 %v22819_v33, %v127_v9  ;;  %v22863_v9 = vld [vmem:[#allocation33_spill] sm:$0xff] }
 0xce7   :  { %16417 = vmatpush3.msra.mxu1 %v22836_v32  ;;  %16375 = vmatprep.subr.mxu0 %v22546_v34 }
 0xce8   :  { %16418 = vmatprep.subr.mxu1 %v22546_v34  ;;  %16376 = vmatpush3.msra.mxu0 %v17755_v5  ;;  %v180_v35 = vadd.f32 %v20408_v0, %v164_v1  ;;  %v22861_v1 = vld [vmem:[#allocation31_spill] sm:$0xff] }
 0xce9   :  { %16419 = vmatpush3.msra.mxu1 %v22837_v53  ;;  %16377 = vmatprep.subr.mxu0 %v22546_v34 }
 0xcea   :  { %16420 = vmatprep.subr.mxu1 %v22546_v34  ;;  %16378 = vmatpush3.msra.mxu0 %v17757_v6  ;;  %v281_v63 = vadd.f32 %v265_v60, %v180_v35  ;;  %v22857_v60 = vld [vmem:[#allocation25_spill] sm:$0xff]  ;;  %v22858_v35 = vld [vmem:[#allocation27_spill] sm:$0xff] }
 0xceb   :  { %16421 = vmatpush3.msra.mxu1 %v22838_v59  ;;  %16379 = vmatprep.subr.mxu0 %v22546_v34 }
 0xcec   :  { %16422 = vmatprep.subr.mxu1 %v22546_v34  ;;  %16380 = vmatpush3.msra.mxu0 %v17759_v7 }
 0xced   :  { %16423 = vmatpush3.msra.mxu1 %v22839_v45  ;;  %16381 = vmatprep.subr.mxu0 %v22546_v34 }
 0xcee   :  { %16424 = vmatprep.subr.mxu1 %v22546_v34  ;;  %16382 = vmatpush3.msra.mxu0 %v17770_v11 }
 0xcef   :  { %16425 = vmatpush3.msra.mxu1 %v22840_v36  ;;  %16383 = vmatprep.subr.mxu0 %v22546_v34 }
 0xcf0   :  { %16426 = vmatprep.subr.mxu1 %v22546_v34  ;;  %16384 = vmatpush3.msra.mxu0 %v17772_v12 }
 0xcf1   :  { %16427 = vmatpush3.msra.mxu1 %v22841_v41  ;;  %16385 = vmatprep.subr.mxu0 %v22546_v34 }
 0xcf2   :  { %16428 = vmatprep.subr.mxu1 %v22546_v34  ;;  %16386 = vmatpush3.msra.mxu0 %v17774_v13 }
 0xcf3   :  { %16429 = vmatpush3.msra.mxu1 %v22842_v20  ;;  %16387 = vmatprep.subr.mxu0 %v22546_v34  ;;  %v22845_v20 = vld [vmem:[#allocation34_spill] sm:$0xff] }
 0xcf4   :  { %16430 = vmatprep.subr.mxu1 %v22546_v34  ;;  %16388 = vmatpush3.msra.mxu0 %v17789_v18 }
 0xcf5   :  { %16431 = vmatpush3.msra.mxu1 %v22843_v49  ;;  %16389 = vmatprep.subr.mxu0 %v22546_v34  ;;  %v22846_v49 = vld [vmem:[#allocation35_spill] sm:$0xff] }
 0xcf6   :  { %16432 = vmatprep.subr.mxu1 %v22546_v34  ;;  %16390 = vmatpush3.msra.mxu0 %v17814_v26 }
 0xcf7   :  { %16433 = vmatpush3.msra.mxu1 %v22844_v3  ;;  %16391 = vmatprep.subr.mxu0 %v22546_v34  ;;  %v22847_v3 = vld [vmem:[#allocation36_spill] sm:$0xff] }
 0xcf8   :  { %16434 = vmatprep.subr.mxu1 %v22546_v34  ;;  %16392 = vmatpush3.msra.mxu0 %v17823_v29 }
 0xcf9   :  { %16435 = vmatpush3.msra.mxu1 %v22845_v20  ;;  %16393 = vmatprep.subr.mxu0 %v22546_v34  ;;  %v22848_v20 = vld [vmem:[#allocation37_spill] sm:$0xff] }
 0xcfa   :  { %16436 = vmatprep.subr.mxu1 %v22546_v34  ;;  %16394 = vmatpush3.msra.mxu0 %v17852_v38 }
 0xcfb   :  { %16437 = vmatpush3.msra.mxu1 %v22846_v49  ;;  %16395 = vmatprep.subr.mxu0 %v22546_v34 }
 0xcfc   :  { %16438 = vmatprep.subr.mxu1 %v22546_v34  ;;  %16396 = vmatpush3.msra.mxu0 %v17882_v48 }
 0xcfd   :  { %16439 = vmatpush3.msra.mxu1 %v22847_v3  ;;  %16397 = vmatprep.subr.mxu0 %v22546_v34 }
 0xcfe   :  { %16440 = vmatprep.subr.mxu1 %v22546_v34  ;;  %16398 = vmatpush3.msra.mxu0 %v17892_v51 }
 0xcff   :  { %16441 = vmatpush3.msra.mxu1 %v22848_v20  ;;  %16399 = vmatprep.subr.mxu0 %v22546_v34 }
 0xd00   :  { %16442 = vmatprep.mubr.msk.f32.mxu1 %vm17682_vm0, %v22546_v34  ;;  %16480 = vmatprep.subr.mxu1 %v22546_v34 }
 0xd01   :  { %16400 = vmatpush3.msra.mxu0 %v17926_v62  ;;  %16407 = vmatprep.mubr.msk.f32.mxu0 %vm17682_vm0, %v22546_v34 }
 0xd02   :  { %16401 = vmatprep.subr.mxu0 %v22546_v34 }
 0xd03   :  { %16402 = vmatpush3.msra.mxu0 %v17938_v4 }
 0xd04   :  { %16403 = vmatprep.subr.mxu0 %v22546_v34 }
 0xd05   :  { %16404 = vmatpush3.msra.mxu0 %v17959_v27 }
 0xd06   :  { %16405 = vmatprep.subr.mxu0 %v22546_v34 }
 0xd07   :  { %16406 = vmatpush3.msra.mxu0 %v17976_v42 }
 0xd08   :  { %16445 = vmatprep.subr.mxu0 %v22546_v34 }
 0xd5c   :  { %v7664_v20 = vpop.f32.mrf.mxu1 }
 0xd5e   :  { %v16234_v3 = vpop.f32.mrf.mxu1 }
 0xd64   :  { %v7513_v49 = vpop.f32.mrf.mxu0 }
 0xd65   :  { %v7665_v55 = vadd.f32 %v7664_v20, %v7513_v49 }
 0xd66   :  { %v16199_v41 = vpop.f32.mrf.mxu0 }
 0xd7c   :  { %v7857_v36 = vpop.f32.mrf.mxu1 }
 0xd7e   :  { %v16304_v45 = vpop.f32.mrf.mxu1 }
 0xd85   :  { %v7768_v59 = vpop.f32.mrf.mxu0 }
 0xd86   :  { %v7769_v40 = vadd.f32 %v7768_v59, %v7665_v55  ;;  %v22864_v55 = vld [vmem:[#allocation14_spill] sm:$0xff] }
 0xd87   :  { %v16269_v53 = vpop.f32.mrf.mxu0  ;;  %v22866_v59 = vld [vmem:[#allocation18_spill] sm:$0xff] }
 0xd88   :  { %v7858_v61 = vadd.f32 %v7857_v36, %v7769_v40  ;;  %v22860_v40 = vld [vmem:[#allocation12_spill] sm:$0xff] }
 0xd89   :  { %v22867_v36 = vld [vmem:[#allocation20_spill] sm:$0xff] }
 0xd9e   :  { %v8063_v32 = vpop.f32.mrf.mxu1 }
 0xda0   :  { %v16374_v56 = vpop.f32.mrf.mxu1 }
 0xda1   :  { %v22862_v56 = vld [vmem:[#allocation13_spill] sm:$0xff] }
 0xda6   :  { %v7976_v3 = vpop.f32.mrf.mxu0 }
 0xda7   :  { %v7977_v44 = vadd.f32 %v7976_v3, %v7858_v61  ;;  %v22856_v61 = vld [vmem:[#allocation23_spill] sm:$0xff]  ;;  %v22868_v3 = vld [vmem:[#allocation22_spill] sm:$0xff] }
 0xda8   :  { %v16339_v41 = vpop.f32.mrf.mxu0 }
 0xda9   :  { %v8064_v45 = vadd.f32 %v8063_v32, %v7977_v44  ;;  %v22855_v44 = vld [vmem:[#allocation21_spill] sm:$0xff]  ;;  %v22865_v32 = vld [vmem:[#allocation16_spill] sm:$0xff] }
 0xdaa   :  { %v22869_v41 = vld [vmem:[#allocation24_spill] sm:$0xff] }
 0xdab   :  { %v8067_v47 = vadd.f32 %v8064_v45, %v281_v63  ;;  %v22854_v63 = vld [vmem:[#allocation19_spill] sm:$0xff]  ;;  %v22870_v45 = vld [vmem:[#allocation26_spill] sm:$0xff] }
 0xdad   :  { %17587 = vtanh.f32 %v8067_v47  ;;  %v22853_v47 = vld [vmem:[#allocation17_spill] sm:$0xff] }
 0xdba   :  { %v17588_v53 = vpop.eup %17587 }
 0xdbb   :  { %v20867_v20 = vand.u32 4294901760, %v17588_v53 }
 0xdbd   :  { %22849 = vst [vmem:[#allocation81_spill] sm:$0xff] %v20867_v20  ;;  %16443 = vmatmul.mubr.f32.vlgmr.msra.gmra.mxu1 %v20867_v20  ;;  %v20871_v33 = vsub.f32 %v17588_v53, %v20867_v20  ;;  %v22871_v53 = vld [vmem:[#allocation28_spill] sm:$0xff] }
 0xdbe   :  { %16481 = vmatpush3.msra.mxu1 %v17755_v5  ;;  %16512 = vmatprep.mubr.msk.f32.mxu1 %vm17682_vm0, %v22546_v34 }
 0xdbf   :  { %22850 = vst [vmem:[#allocation82_spill] sm:$0xff] %v20871_v33  ;;  %16482 = vmatprep.subr.mxu1 %v22546_v34  ;;  %v20878_v0 = vand.u32 4294901760, %v20871_v33 }
 0xdc0   :  { %16483 = vmatpush3.msra.mxu1 %v17757_v6 }
 0xdc1   :  { %22851 = vst [vmem:[#allocation83_spill] sm:$0xff] %v20878_v0  ;;  %16484 = vmatprep.subr.mxu1 %v22546_v34  ;;  %v8156_v14 = vsub.f32 %v20871_v33, %v20878_v0 }
 0xdc2   :  { %16485 = vmatpush3.msra.mxu1 %v17759_v7 }
 0xdc3   :  { %16486 = vmatprep.subr.mxu1 %v22546_v34  ;;  %v20886_v49 = vand.u32 4294901760, %v8156_v14  ;;  %v22872_v14 = vld [vmem:[#allocation30_spill] sm:$0xff] }
 0xdc4   :  { %16487 = vmatpush3.msra.mxu1 %v17770_v11 }
 0xdc5   :  { %22852 = vst [vmem:[#allocation84_spill] sm:$0xff] %v20886_v49  ;;  %16488 = vmatprep.subr.mxu1 %v22546_v34  ;;  %16408 = vmatmul.mubr.f32.vlgmr.msra.gmra.mxu0 %v20886_v49  ;;  %v22875_v49 = vld [vmem:[#allocation35_spill] sm:$0xff] }
 0xdc6   :  { %16446 = vmatpush3.msra.mxu0 %v17784_v16  ;;  %16489 = vmatpush3.msra.mxu1 %v17772_v12 }
 0xdc7   :  { %16447 = vmatprep.subr.mxu0 %v22546_v34  ;;  %16490 = vmatprep.subr.mxu1 %v22546_v34 }
 0xdc8   :  { %16448 = vmatpush3.msra.mxu0 %v17787_v17  ;;  %16491 = vmatpush3.msra.mxu1 %v17774_v13 }
 0xdc9   :  { %16449 = vmatprep.subr.mxu0 %v22546_v34  ;;  %16492 = vmatprep.subr.mxu1 %v22546_v34 }
 0xdca   :  { %16450 = vmatpush3.msra.mxu0 %v17792_v19  ;;  %16493 = vmatpush3.msra.mxu1 %v17789_v18 }
 0xdcb   :  { %16451 = vmatprep.subr.mxu0 %v22546_v34  ;;  %16494 = vmatprep.subr.mxu1 %v22546_v34 }
 0xdcc   :  { %16452 = vmatpush3.msra.mxu0 %v17799_v21  ;;  %16495 = vmatpush3.msra.mxu1 %v17814_v26 }
 0xdcd   :  { %16453 = vmatprep.subr.mxu0 %v22546_v34  ;;  %16496 = vmatprep.subr.mxu1 %v22546_v34 }
 0xdce   :  { %16454 = vmatpush3.msra.mxu0 %v17802_v22  ;;  %16497 = vmatpush3.msra.mxu1 %v17823_v29 }
 0xdcf   :  { %16455 = vmatprep.subr.mxu0 %v22546_v34  ;;  %16498 = vmatprep.subr.mxu1 %v22546_v34 }
 0xdd0   :  { %16456 = vmatpush3.msra.mxu0 %v17829_v31  ;;  %16499 = vmatpush3.msra.mxu1 %v17852_v38 }
 0xdd1   :  { %16457 = vmatprep.subr.mxu0 %v22546_v34  ;;  %16500 = vmatprep.subr.mxu1 %v22546_v34 }
 0xdd2   :  { %16458 = vmatpush3.msra.mxu0 %v17849_v37  ;;  %16501 = vmatpush3.msra.mxu1 %v17882_v48 }
 0xdd3   :  { %16459 = vmatprep.subr.mxu0 %v22546_v34  ;;  %16502 = vmatprep.subr.mxu1 %v22546_v34 }
 0xdd4   :  { %16460 = vmatpush3.msra.mxu0 %v17876_v46  ;;  %16503 = vmatpush3.msra.mxu1 %v17892_v51 }
 0xdd5   :  { %16461 = vmatprep.subr.mxu0 %v22546_v34  ;;  %16504 = vmatprep.subr.mxu1 %v22546_v34 }
 0xdd6   :  { %16462 = vmatpush3.msra.mxu0 %v17888_v50  ;;  %16505 = vmatpush3.msra.mxu1 %v17926_v62 }
 0xdd7   :  { %16463 = vmatprep.subr.mxu0 %v22546_v34  ;;  %16506 = vmatprep.subr.mxu1 %v22546_v34 }
 0xdd8   :  { %16464 = vmatpush3.msra.mxu0 %v17913_v58  ;;  %16507 = vmatpush3.msra.mxu1 %v17938_v4 }
 0xdd9   :  { %16465 = vmatprep.subr.mxu0 %v22546_v34  ;;  %16508 = vmatprep.subr.mxu1 %v22546_v34 }
 0xdda   :  { %16466 = vmatpush3.msra.mxu0 %v17932_v2  ;;  %16509 = vmatpush3.msra.mxu1 %v17959_v27 }
 0xddb   :  { %16467 = vmatprep.subr.mxu0 %v22546_v34  ;;  %16510 = vmatprep.subr.mxu1 %v22546_v34 }
 0xddc   :  { %16468 = vmatpush3.msra.mxu0 %v17953_v15  ;;  %16511 = vmatpush3.msra.mxu1 %v17976_v42 }
 0xddd   :  { %16469 = vmatprep.subr.mxu0 %v22546_v34  ;;  %16513 = vmatmul.mubr.f32.vlgmr.msra.gmra.mxu1 %v20878_v0  ;;  %v22874_v0 = vld [vmem:[#allocation34_spill] sm:$0xff] }
 0xdde   :  { %16550 = vmatprep.subr.mxu1 %v22546_v34  ;;  %16470 = vmatpush3.msra.mxu0 %v17972_v39 }
 0xddf   :  { %16551 = vmatpush3.msra.mxu1 %v17755_v5  ;;  %16471 = vmatprep.subr.mxu0 %v22546_v34 }
 0xde0   :  { %16552 = vmatprep.subr.mxu1 %v22546_v34  ;;  %16472 = vmatpush3.msra.mxu0 %v17988_v52 }
 0xde1   :  { %16553 = vmatpush3.msra.mxu1 %v17757_v6  ;;  %16473 = vmatprep.subr.mxu0 %v22546_v34 }
 0xde2   :  { %16554 = vmatprep.subr.mxu1 %v22546_v34  ;;  %16474 = vmatpush3.msra.mxu0 %v18003_v57 }
 0xde3   :  { %16555 = vmatpush3.msra.mxu1 %v17759_v7  ;;  %16475 = vmatprep.subr.mxu0 %v22546_v34 }
 0xde4   :  { %16556 = vmatprep.subr.mxu1 %v22546_v34  ;;  %16476 = vmatpush3.msra.mxu0 %v18017_v8 }
 0xde5   :  { %16477 = vmatprep.mubr.msk.f32.mxu0 %vm17682_vm0, %v22546_v34  ;;  %16557 = vmatpush3.msra.mxu1 %v17770_v11 }
 0xde6   :  { %16478 = vmatmul.mubr.f32.vlgmr.msra.gmra.mxu0 %v20871_v33  ;;  %16515 = vmatprep.subr.mxu0 %v22546_v34  ;;  %v22873_v33 = vld [vmem:[#allocation32_spill] sm:$0xff] }
 0xde7   :  { %16558 = vmatprep.subr.mxu1 %v22546_v34  ;;  %16516 = vmatpush3.msra.mxu0 %v17806_v23 }
 0xde8   :  { %16559 = vmatpush3.msra.mxu1 %v17772_v12  ;;  %16517 = vmatprep.subr.mxu0 %v22546_v34 }
 0xde9   :  { %16560 = vmatprep.subr.mxu1 %v22546_v34  ;;  %16518 = vmatpush3.msra.mxu0 %v17809_v24 }
 0xdea   :  { %16561 = vmatpush3.msra.mxu1 %v17774_v13  ;;  %16519 = vmatprep.subr.mxu0 %v22546_v34 }
 0xdeb   :  { %16562 = vmatprep.subr.mxu1 %v22546_v34  ;;  %16520 = vmatpush3.msra.mxu0 %v17812_v25 }
 0xdec   :  { %16563 = vmatpush3.msra.mxu1 %v17789_v18  ;;  %16521 = vmatprep.subr.mxu0 %v22546_v34 }
 0xded   :  { %16564 = vmatprep.subr.mxu1 %v22546_v34  ;;  %16522 = vmatpush3.msra.mxu0 %v17821_v28 }
 0xdee   :  { %16565 = vmatpush3.msra.mxu1 %v17814_v26  ;;  %16523 = vmatprep.subr.mxu0 %v22546_v34 }
 0xdef   :  { %16566 = vmatprep.subr.mxu1 %v22546_v34  ;;  %16524 = vmatpush3.msra.mxu0 %v17826_v30 }
 0xdf0   :  { %16567 = vmatpush3.msra.mxu1 %v17823_v29  ;;  %16525 = vmatprep.subr.mxu0 %v22546_v34 }
 0xdf1   :  { %16568 = vmatprep.subr.mxu1 %v22546_v34  ;;  %16526 = vmatpush3.msra.mxu0 %v17866_v43 }
 0xdf2   :  { %16569 = vmatpush3.msra.mxu1 %v17852_v38  ;;  %16527 = vmatprep.subr.mxu0 %v22546_v34 }
 0xdf3   :  { %16570 = vmatprep.subr.mxu1 %v22546_v34  ;;  %16528 = vmatpush3.msra.mxu0 %v22574_v10 }
 0xdf4   :  { %16571 = vmatpush3.msra.mxu1 %v17882_v48  ;;  %16529 = vmatprep.subr.mxu0 %v22546_v34 }
 0xdf5   :  { %16572 = vmatprep.subr.mxu1 %v22546_v34  ;;  %16530 = vmatpush3.msra.mxu0 %v22853_v47 }
 0xdf6   :  { %16573 = vmatpush3.msra.mxu1 %v17892_v51  ;;  %16531 = vmatprep.subr.mxu0 %v22546_v34 }
 0xdf7   :  { %16574 = vmatprep.subr.mxu1 %v22546_v34  ;;  %16532 = vmatpush3.msra.mxu0 %v22854_v63 }
 0xdf8   :  { %16575 = vmatpush3.msra.mxu1 %v17926_v62  ;;  %16533 = vmatprep.subr.mxu0 %v22546_v34 }
 0xdf9   :  { %16576 = vmatprep.subr.mxu1 %v22546_v34  ;;  %16534 = vmatpush3.msra.mxu0 %v22855_v44 }
 0xdfa   :  { %16577 = vmatpush3.msra.mxu1 %v17938_v4  ;;  %16535 = vmatprep.subr.mxu0 %v22546_v34 }
 0xdfb   :  { %16578 = vmatprep.subr.mxu1 %v22546_v34  ;;  %16536 = vmatpush3.msra.mxu0 %v22856_v61 }
 0xdfc   :  { %16579 = vmatpush3.msra.mxu1 %v17959_v27  ;;  %16537 = vmatprep.subr.mxu0 %v22546_v34 }
 0xdfd   :  { %16580 = vmatprep.subr.mxu1 %v22546_v34  ;;  %16538 = vmatpush3.msra.mxu0 %v22857_v60 }
 0xdfe   :  { %16581 = vmatpush3.msra.mxu1 %v17976_v42  ;;  %16582 = vmatprep.mubr.msk.f32.mxu1 %vm17682_vm0, %v22546_v34 }
 0xdff   :  { %16539 = vmatprep.subr.mxu0 %v22546_v34  ;;  %16583 = vmatmul.mubr.f32.vlgmr.msra.gmra.mxu1 %v20867_v20 }
 0xe00   :  { %16540 = vmatpush3.msra.mxu0 %v22858_v35  ;;  %16547 = vmatprep.mubr.msk.f32.mxu0 %vm17682_vm0, %v22546_v34 }
 0xe01   :  { %16541 = vmatprep.subr.mxu0 %v22546_v34  ;;  %16620 = vmatprep.subr.mxu1 %v22546_v34 }
 0xe02   :  { %16542 = vmatpush3.msra.mxu0 %v22859_v54  ;;  %16621 = vmatpush3.msra.mxu1 %v22860_v40 }
 0xe03   :  { %16543 = vmatprep.subr.mxu0 %v22546_v34  ;;  %16622 = vmatprep.subr.mxu1 %v22546_v34 }
 0xe04   :  { %16544 = vmatpush3.msra.mxu0 %v22861_v1  ;;  %16623 = vmatpush3.msra.mxu1 %v22862_v56  ;;  %v236_v1 = vpop.permute.xlu0 %235 }
 0xe05   :  { %16545 = vmatprep.subr.mxu0 %v22546_v34  ;;  %16624 = vmatprep.subr.mxu1 %v22546_v34 }
 0xe06   :  { %16546 = vmatpush3.msra.mxu0 %v22863_v9  ;;  %16625 = vmatpush3.msra.mxu1 %v22864_v55  ;;  %v21092_v55 = vld [vmem:[%s22337_s2] ss:$0 sm:$0xff] }
 0xe07   :  { %16548 = vmatmul.mubr.f32.vlgmr.msra.gmra.mxu0 %v20867_v20  ;;  %16626 = vmatprep.subr.mxu1 %v22546_v34  ;;  %v22876_v20 = vld [vmem:[#allocation36_spill] sm:$0xff]  ;;  %22878 = vst [vmem:[#allocation85_spill] sm:$0xff] %v21092_v55 }
 0xe08   :  { %16627 = vmatpush3.msra.mxu1 %v22865_v32  ;;  %16585 = vmatprep.subr.mxu0 %v22546_v34 }
 0xe09   :  { %16628 = vmatprep.subr.mxu1 %v22546_v34  ;;  %16586 = vmatpush3.msra.mxu0 %v17755_v5 }
 0xe0a   :  { %16629 = vmatpush3.msra.mxu1 %v22866_v59  ;;  %16587 = vmatprep.subr.mxu0 %v22546_v34  ;;  %v132_v59 = vpop.permute.xlu1 %131 }
 0xe0b   :  { %16630 = vmatprep.subr.mxu1 %v22546_v34  ;;  %16588 = vmatpush3.msra.mxu0 %v17757_v6  ;;  %v165_v9 = vmul.f32 %v21092_v55, %v132_v59 }
 0xe0c   :  { %16631 = vmatpush3.msra.mxu1 %v22867_v36  ;;  %16589 = vmatprep.subr.mxu0 %v22546_v34 }
 0xe0d   :  { %16632 = vmatprep.subr.mxu1 %v22546_v34  ;;  %16590 = vmatpush3.msra.mxu0 %v17759_v7 }
 0xe0e   :  { %16633 = vmatpush3.msra.mxu1 %v22868_v3  ;;  %16591 = vmatprep.subr.mxu0 %v22546_v34 }
 0xe0f   :  { %16634 = vmatprep.subr.mxu1 %v22546_v34  ;;  %16592 = vmatpush3.msra.mxu0 %v17770_v11 }
 0xe10   :  { %16635 = vmatpush3.msra.mxu1 %v22869_v41  ;;  %16593 = vmatprep.subr.mxu0 %v22546_v34 }
 0xe11   :  { %16636 = vmatprep.subr.mxu1 %v22546_v34  ;;  %16594 = vmatpush3.msra.mxu0 %v17772_v12 }
 0xe12   :  { %16637 = vmatpush3.msra.mxu1 %v22870_v45  ;;  %16595 = vmatprep.subr.mxu0 %v22546_v34 }
 0xe13   :  { %16638 = vmatprep.subr.mxu1 %v22546_v34  ;;  %16596 = vmatpush3.msra.mxu0 %v17774_v13 }
 0xe14   :  { %16639 = vmatpush3.msra.mxu1 %v22871_v53  ;;  %16597 = vmatprep.subr.mxu0 %v22546_v34 }
 0xe15   :  { %16640 = vmatprep.subr.mxu1 %v22546_v34  ;;  %16598 = vmatpush3.msra.mxu0 %v17789_v18 }
 0xe16   :  { %16641 = vmatpush3.msra.mxu1 %v22872_v14  ;;  %16599 = vmatprep.subr.mxu0 %v22546_v34 }
 0xe17   :  { %16642 = vmatprep.subr.mxu1 %v22546_v34  ;;  %16600 = vmatpush3.msra.mxu0 %v17814_v26 }
 0xe18   :  { %16643 = vmatpush3.msra.mxu1 %v22873_v33  ;;  %16601 = vmatprep.subr.mxu0 %v22546_v34 }
 0xe19   :  { %16644 = vmatprep.subr.mxu1 %v22546_v34  ;;  %16602 = vmatpush3.msra.mxu0 %v17823_v29 }
 0xe1a   :  { %16645 = vmatpush3.msra.mxu1 %v22874_v0  ;;  %16603 = vmatprep.subr.mxu0 %v22546_v34  ;;  %v22877_v0 = vld [vmem:[#allocation37_spill] sm:$0xff] }
 0xe1b   :  { %16646 = vmatprep.subr.mxu1 %v22546_v34  ;;  %16604 = vmatpush3.msra.mxu0 %v17852_v38 }
 0xe1c   :  { %16647 = vmatpush3.msra.mxu1 %v22875_v49  ;;  %16605 = vmatprep.subr.mxu0 %v22546_v34 }
 0xe1d   :  { %16648 = vmatprep.subr.mxu1 %v22546_v34  ;;  %16606 = vmatpush3.msra.mxu0 %v17882_v48 }
 0xe1e   :  { %16649 = vmatpush3.msra.mxu1 %v22876_v20  ;;  %16607 = vmatprep.subr.mxu0 %v22546_v34 }
 0xe1f   :  { %16650 = vmatprep.subr.mxu1 %v22546_v34  ;;  %16608 = vmatpush3.msra.mxu0 %v17892_v51 }
 0xe20   :  { %16651 = vmatpush3.msra.mxu1 %v22877_v0  ;;  %16609 = vmatprep.subr.mxu0 %v22546_v34 }
 0xe21   :  { %16652 = vmatprep.mubr.msk.f32.mxu1 %vm17682_vm0, %v22546_v34  ;;  %16690 = vmatprep.subr.mxu1 %v22546_v34 }
 0xe22   :  { %16610 = vmatpush3.msra.mxu0 %v17926_v62  ;;  %16617 = vmatprep.mubr.msk.f32.mxu0 %vm17682_vm0, %v22546_v34 }
 0xe23   :  { %16611 = vmatprep.subr.mxu0 %v22546_v34 }
 0xe24   :  { %16612 = vmatpush3.msra.mxu0 %v17938_v4 }
 0xe25   :  { %16613 = vmatprep.subr.mxu0 %v22546_v34 }
 0xe26   :  { %16614 = vmatpush3.msra.mxu0 %v17959_v27 }
 0xe27   :  { %16615 = vmatprep.subr.mxu0 %v22546_v34 }
 0xe28   :  { %16616 = vmatpush3.msra.mxu0 %v17976_v42 }
 0xe29   :  { %16655 = vmatprep.subr.mxu0 %v22546_v34 }
 0xe7d   :  { %v8310_v0 = vpop.f32.mrf.mxu1 }
 0xe7f   :  { %v16444_v20 = vpop.f32.mrf.mxu1 }
 0xe80   :  { %v21098_v20 = vld [vmem:[%s22339_s4] ss:$0 sm:$0xff] }
 0xe85   :  { %v8159_v49 = vpop.f32.mrf.mxu0 }
 0xe86   :  { %v8311_v36 = vadd.f32 %v8310_v0, %v8159_v49  ;;  %v21104_v0 = vld [vmem:[%s22337_s2 + $0x1] ss:$0 sm:$0xff] }
 0xe87   :  { %v16409_v33 = vpop.f32.mrf.mxu0  ;;  %v266_v49 = vmul.f32 %v21104_v0, %v236_v1 }
 0xe88   :  { %v181_v33 = vadd.f32 %v21098_v20, %v165_v9 }
 0xe9d   :  { %v8503_v14 = vpop.f32.mrf.mxu1 }
 0xe9f   :  { %v16514_v53 = vpop.f32.mrf.mxu1 }
 0xea6   :  { %v8414_v45 = vpop.f32.mrf.mxu0 }
 0xea7   :  { %v8415_v56 = vadd.f32 %v8414_v45, %v8311_v36  ;;  %v282_v36 = vadd.f32 %v266_v49, %v181_v33  ;;  %v22886_v33 = vld [vmem:[#allocation13_spill] sm:$0xff] }
 0xea8   :  { %v16479_v41 = vpop.f32.mrf.mxu0  ;;  %v22887_v49 = vld [vmem:[#allocation33_spill] sm:$0xff] }
 0xebf   :  { %v8709_v3 = vpop.f32.mrf.mxu1 }
 0xec1   :  { %v16584_v32 = vpop.f32.mrf.mxu1 }
 0xec2   :  { %v8504_v32 = vadd.f32 %v8503_v14, %v8415_v56  ;;  %v22885_v14 = vld [vmem:[#allocation31_spill] sm:$0xff] }
 0xec7   :  { %v8622_v41 = vpop.f32.mrf.mxu0 }
 0xec8   :  { %v8623_v53 = vadd.f32 %v8622_v41, %v8504_v32  ;;  %v22888_v32 = vld [vmem:[#allocation14_spill] sm:$0xff]  ;;  %v22889_v41 = vld [vmem:[#allocation16_spill] sm:$0xff] }
 0xec9   :  { %v16549_v59 = vpop.f32.mrf.mxu0 }
 0xeca   :  { %v8710_v45 = vadd.f32 %v8709_v3, %v8623_v53  ;;  %v22884_v3 = vld [vmem:[#allocation12_spill] sm:$0xff]  ;;  %v22890_v53 = vld [vmem:[#allocation18_spill] sm:$0xff] }
 0xecb   :  { %v22891_v59 = vld [vmem:[#allocation20_spill] sm:$0xff] }
 0xecc   :  { %v8713_v55 = vadd.f32 %v8710_v45, %v282_v36  ;;  %v22892_v36 = vld [vmem:[#allocation22_spill] sm:$0xff]  ;;  %v22893_v45 = vld [vmem:[#allocation24_spill] sm:$0xff] }
 0xece   :  { %17589 = vtanh.f32 %v8713_v55  ;;  %v22883_v55 = vld [vmem:[#allocation29_spill] sm:$0xff] }
 0xedb   :  { %v17590_v40 = vpop.eup %17589 }
 0xedc   :  { %v21107_v54 = vand.u32 4294901760, %v17590_v40 }
 0xede   :  { %22879 = vst [vmem:[#allocation86_spill] sm:$0xff] %v21107_v54  ;;  %16653 = vmatmul.mubr.f32.vlgmr.msra.gmra.mxu1 %v21107_v54  ;;  %v21111_v9 = vsub.f32 %v17590_v40, %v21107_v54 }
 0xedf   :  { %16691 = vmatpush3.msra.mxu1 %v17755_v5  ;;  %16722 = vmatprep.mubr.msk.f32.mxu1 %vm17682_vm0, %v22546_v34 }
 0xee0   :  { %22880 = vst [vmem:[#allocation87_spill] sm:$0xff] %v21111_v9  ;;  %16692 = vmatprep.subr.mxu1 %v22546_v34  ;;  %v21118_v1 = vand.u32 4294901760, %v21111_v9 }
 0xee1   :  { %16693 = vmatpush3.msra.mxu1 %v17757_v6 }
 0xee2   :  { %22881 = vst [vmem:[#allocation88_spill] sm:$0xff] %v21118_v1  ;;  %16694 = vmatprep.subr.mxu1 %v22546_v34  ;;  %v8802_v56 = vsub.f32 %v21111_v9, %v21118_v1 }
 0xee3   :  { %16695 = vmatpush3.msra.mxu1 %v17759_v7 }
 0xee4   :  { %16696 = vmatprep.subr.mxu1 %v22546_v34  ;;  %v21126_v40 = vand.u32 4294901760, %v8802_v56  ;;  %v22894_v56 = vld [vmem:[#allocation26_spill] sm:$0xff] }
 0xee5   :  { %16697 = vmatpush3.msra.mxu1 %v17770_v11 }
 0xee6   :  { %22882 = vst [vmem:[#allocation89_spill] sm:$0xff] %v21126_v40  ;;  %16698 = vmatprep.subr.mxu1 %v22546_v34  ;;  %16618 = vmatmul.mubr.f32.vlgmr.msra.gmra.mxu0 %v21126_v40  ;;  %v22897_v40 = vld [vmem:[#allocation32_spill] sm:$0xff] }
 0xee7   :  { %16656 = vmatpush3.msra.mxu0 %v17784_v16  ;;  %16699 = vmatpush3.msra.mxu1 %v17772_v12 }
 0xee8   :  { %16657 = vmatprep.subr.mxu0 %v22546_v34  ;;  %16700 = vmatprep.subr.mxu1 %v22546_v34 }
 0xee9   :  { %16658 = vmatpush3.msra.mxu0 %v17787_v17  ;;  %16701 = vmatpush3.msra.mxu1 %v17774_v13 }
 0xeea   :  { %16659 = vmatprep.subr.mxu0 %v22546_v34  ;;  %16702 = vmatprep.subr.mxu1 %v22546_v34 }
 0xeeb   :  { %16660 = vmatpush3.msra.mxu0 %v17792_v19  ;;  %16703 = vmatpush3.msra.mxu1 %v17789_v18 }
 0xeec   :  { %16661 = vmatprep.subr.mxu0 %v22546_v34  ;;  %16704 = vmatprep.subr.mxu1 %v22546_v34 }
 0xeed   :  { %16662 = vmatpush3.msra.mxu0 %v17799_v21  ;;  %16705 = vmatpush3.msra.mxu1 %v17814_v26 }
 0xeee   :  { %16663 = vmatprep.subr.mxu0 %v22546_v34  ;;  %16706 = vmatprep.subr.mxu1 %v22546_v34 }
 0xeef   :  { %16664 = vmatpush3.msra.mxu0 %v17802_v22  ;;  %16707 = vmatpush3.msra.mxu1 %v17823_v29 }
 0xef0   :  { %16665 = vmatprep.subr.mxu0 %v22546_v34  ;;  %16708 = vmatprep.subr.mxu1 %v22546_v34 }
 0xef1   :  { %16666 = vmatpush3.msra.mxu0 %v17829_v31  ;;  %16709 = vmatpush3.msra.mxu1 %v17852_v38 }
 0xef2   :  { %16667 = vmatprep.subr.mxu0 %v22546_v34  ;;  %16710 = vmatprep.subr.mxu1 %v22546_v34 }
 0xef3   :  { %16668 = vmatpush3.msra.mxu0 %v17849_v37  ;;  %16711 = vmatpush3.msra.mxu1 %v17882_v48 }
 0xef4   :  { %16669 = vmatprep.subr.mxu0 %v22546_v34  ;;  %16712 = vmatprep.subr.mxu1 %v22546_v34 }
 0xef5   :  { %16670 = vmatpush3.msra.mxu0 %v17876_v46  ;;  %16713 = vmatpush3.msra.mxu1 %v17892_v51 }
 0xef6   :  { %16671 = vmatprep.subr.mxu0 %v22546_v34  ;;  %16714 = vmatprep.subr.mxu1 %v22546_v34 }
 0xef7   :  { %16672 = vmatpush3.msra.mxu0 %v17888_v50  ;;  %16715 = vmatpush3.msra.mxu1 %v17926_v62 }
 0xef8   :  { %16673 = vmatprep.subr.mxu0 %v22546_v34  ;;  %16716 = vmatprep.subr.mxu1 %v22546_v34 }
 0xef9   :  { %16674 = vmatpush3.msra.mxu0 %v17913_v58  ;;  %16717 = vmatpush3.msra.mxu1 %v17938_v4 }
 0xefa   :  { %16675 = vmatprep.subr.mxu0 %v22546_v34  ;;  %16718 = vmatprep.subr.mxu1 %v22546_v34 }
 0xefb   :  { %16676 = vmatpush3.msra.mxu0 %v17932_v2  ;;  %16719 = vmatpush3.msra.mxu1 %v17959_v27 }
 0xefc   :  { %16677 = vmatprep.subr.mxu0 %v22546_v34  ;;  %16720 = vmatprep.subr.mxu1 %v22546_v34 }
 0xefd   :  { %16678 = vmatpush3.msra.mxu0 %v17953_v15  ;;  %16721 = vmatpush3.msra.mxu1 %v17976_v42 }
 0xefe   :  { %16679 = vmatprep.subr.mxu0 %v22546_v34  ;;  %16723 = vmatmul.mubr.f32.vlgmr.msra.gmra.mxu1 %v21118_v1  ;;  %v22896_v1 = vld [vmem:[#allocation30_spill] sm:$0xff] }
 0xeff   :  { %16760 = vmatprep.subr.mxu1 %v22546_v34  ;;  %16680 = vmatpush3.msra.mxu0 %v17972_v39 }
 0xf00   :  { %16761 = vmatpush3.msra.mxu1 %v17755_v5  ;;  %16681 = vmatprep.subr.mxu0 %v22546_v34 }
 0xf01   :  { %16762 = vmatprep.subr.mxu1 %v22546_v34  ;;  %16682 = vmatpush3.msra.mxu0 %v17988_v52 }
 0xf02   :  { %16763 = vmatpush3.msra.mxu1 %v17757_v6  ;;  %16683 = vmatprep.subr.mxu0 %v22546_v34 }
 0xf03   :  { %16764 = vmatprep.subr.mxu1 %v22546_v34  ;;  %16684 = vmatpush3.msra.mxu0 %v18003_v57 }
 0xf04   :  { %16765 = vmatpush3.msra.mxu1 %v17759_v7  ;;  %16685 = vmatprep.subr.mxu0 %v22546_v34 }
 0xf05   :  { %16766 = vmatprep.subr.mxu1 %v22546_v34  ;;  %16686 = vmatpush3.msra.mxu0 %v18017_v8 }
 0xf06   :  { %16687 = vmatprep.mubr.msk.f32.mxu0 %vm17682_vm0, %v22546_v34  ;;  %16767 = vmatpush3.msra.mxu1 %v17770_v11 }
 0xf07   :  { %16688 = vmatmul.mubr.f32.vlgmr.msra.gmra.mxu0 %v21111_v9  ;;  %16725 = vmatprep.subr.mxu0 %v22546_v34  ;;  %v22895_v9 = vld [vmem:[#allocation28_spill] sm:$0xff] }
 0xf08   :  { %16768 = vmatprep.subr.mxu1 %v22546_v34  ;;  %16726 = vmatpush3.msra.mxu0 %v17806_v23 }
 0xf09   :  { %16769 = vmatpush3.msra.mxu1 %v17772_v12  ;;  %16727 = vmatprep.subr.mxu0 %v22546_v34 }
 0xf0a   :  { %16770 = vmatprep.subr.mxu1 %v22546_v34  ;;  %16728 = vmatpush3.msra.mxu0 %v17809_v24 }
 0xf0b   :  { %16771 = vmatpush3.msra.mxu1 %v17774_v13  ;;  %16729 = vmatprep.subr.mxu0 %v22546_v34 }
 0xf0c   :  { %16772 = vmatprep.subr.mxu1 %v22546_v34  ;;  %16730 = vmatpush3.msra.mxu0 %v17812_v25 }
 0xf0d   :  { %16773 = vmatpush3.msra.mxu1 %v17789_v18  ;;  %16731 = vmatprep.subr.mxu0 %v22546_v34 }
 0xf0e   :  { %16774 = vmatprep.subr.mxu1 %v22546_v34  ;;  %16732 = vmatpush3.msra.mxu0 %v17821_v28 }
 0xf0f   :  { %16775 = vmatpush3.msra.mxu1 %v17814_v26  ;;  %16733 = vmatprep.subr.mxu0 %v22546_v34 }
 0xf10   :  { %16776 = vmatprep.subr.mxu1 %v22546_v34  ;;  %16734 = vmatpush3.msra.mxu0 %v17826_v30 }
 0xf11   :  { %16777 = vmatpush3.msra.mxu1 %v17823_v29  ;;  %16735 = vmatprep.subr.mxu0 %v22546_v34 }
 0xf12   :  { %16778 = vmatprep.subr.mxu1 %v22546_v34  ;;  %16736 = vmatpush3.msra.mxu0 %v17866_v43 }
 0xf13   :  { %16779 = vmatpush3.msra.mxu1 %v17852_v38  ;;  %16737 = vmatprep.subr.mxu0 %v22546_v34 }
 0xf14   :  { %16780 = vmatprep.subr.mxu1 %v22546_v34  ;;  %16738 = vmatpush3.msra.mxu0 %v22574_v10 }
 0xf15   :  { %16781 = vmatpush3.msra.mxu1 %v17882_v48  ;;  %16739 = vmatprep.subr.mxu0 %v22546_v34 }
 0xf16   :  { %16782 = vmatprep.subr.mxu1 %v22546_v34  ;;  %16740 = vmatpush3.msra.mxu0 %v22853_v47 }
 0xf17   :  { %16783 = vmatpush3.msra.mxu1 %v17892_v51  ;;  %16741 = vmatprep.subr.mxu0 %v22546_v34 }
 0xf18   :  { %16784 = vmatprep.subr.mxu1 %v22546_v34  ;;  %16742 = vmatpush3.msra.mxu0 %v22854_v63 }
 0xf19   :  { %16785 = vmatpush3.msra.mxu1 %v17926_v62  ;;  %16743 = vmatprep.subr.mxu0 %v22546_v34 }
 0xf1a   :  { %16786 = vmatprep.subr.mxu1 %v22546_v34  ;;  %16744 = vmatpush3.msra.mxu0 %v22855_v44 }
 0xf1b   :  { %16787 = vmatpush3.msra.mxu1 %v17938_v4  ;;  %16745 = vmatprep.subr.mxu0 %v22546_v34 }
 0xf1c   :  { %16788 = vmatprep.subr.mxu1 %v22546_v34  ;;  %16746 = vmatpush3.msra.mxu0 %v22856_v61 }
 0xf1d   :  { %16789 = vmatpush3.msra.mxu1 %v17959_v27  ;;  %16747 = vmatprep.subr.mxu0 %v22546_v34 }
 0xf1e   :  { %16790 = vmatprep.subr.mxu1 %v22546_v34  ;;  %16748 = vmatpush3.msra.mxu0 %v22857_v60 }
 0xf1f   :  { %16791 = vmatpush3.msra.mxu1 %v17976_v42  ;;  %16792 = vmatprep.mubr.msk.f32.mxu1 %vm17682_vm0, %v22546_v34 }
 0xf20   :  { %16749 = vmatprep.subr.mxu0 %v22546_v34  ;;  %16793 = vmatmul.mubr.f32.vlgmr.msra.gmra.mxu1 %v21107_v54 }
 0xf21   :  { %16750 = vmatpush3.msra.mxu0 %v22858_v35  ;;  %16757 = vmatprep.mubr.msk.f32.mxu0 %vm17682_vm0, %v22546_v34 }
 0xf22   :  { %16751 = vmatprep.subr.mxu0 %v22546_v34  ;;  %16830 = vmatprep.subr.mxu1 %v22546_v34 }
 0xf23   :  { %16752 = vmatpush3.msra.mxu0 %v22883_v55  ;;  %16831 = vmatpush3.msra.mxu1 %v22884_v3  ;;  %v240_v55 = vpop.permute.xlu0 %239 }
 0xf24   :  { %16753 = vmatprep.subr.mxu0 %v22546_v34  ;;  %16832 = vmatprep.subr.mxu1 %v22546_v34  ;;  %v267_v60 = vmul.f32 %v21104_v0, %v240_v55  ;;  %v22910_v55 = vld [vmem:[#allocation23_spill] sm:$0xff] }
 0xf25   :  { %16754 = vmatpush3.msra.mxu0 %v22885_v14  ;;  %16833 = vmatpush3.msra.mxu1 %v22886_v33  ;;  %v22902_v33 = vld [vmem:[#allocation85_spill] sm:$0xff] }
 0xf26   :  { %16755 = vmatprep.subr.mxu0 %v22546_v34  ;;  %16834 = vmatprep.subr.mxu1 %v22546_v34 }
 0xf27   :  { %16756 = vmatpush3.msra.mxu0 %v22887_v49  ;;  %16835 = vmatpush3.msra.mxu1 %v22888_v32  ;;  %v137_v32 = vpop.permute.xlu1 %136 }
 0xf28   :  { %16758 = vmatmul.mubr.f32.vlgmr.msra.gmra.mxu0 %v21107_v54  ;;  %16836 = vmatprep.subr.mxu1 %v22546_v34  ;;  %v22898_v54 = vld [vmem:[#allocation34_spill] sm:$0xff]  ;;  %v166_v14 = vmul.f32 %v22902_v33, %v137_v32  ;;  %v22914_v32 = vld [vmem:[#allocation12_spill] sm:$0xff] }
 0xf29   :  { %16837 = vmatpush3.msra.mxu1 %v22889_v41  ;;  %16795 = vmatprep.subr.mxu0 %v22546_v34 }
 0xf2a   :  { %16838 = vmatprep.subr.mxu1 %v22546_v34  ;;  %16796 = vmatpush3.msra.mxu0 %v17755_v5  ;;  %v182_v35 = vadd.f32 %v21098_v20, %v166_v14  ;;  %v22912_v14 = vld [vmem:[#allocation27_spill] sm:$0xff] }
 0xf2b   :  { %16839 = vmatpush3.msra.mxu1 %v22890_v53  ;;  %16797 = vmatprep.subr.mxu0 %v22546_v34 }
 0xf2c   :  { %16840 = vmatprep.subr.mxu1 %v22546_v34  ;;  %16798 = vmatpush3.msra.mxu0 %v17757_v6  ;;  %v283_v63 = vadd.f32 %v267_v60, %v182_v35  ;;  %v22908_v60 = vld [vmem:[#allocation19_spill] sm:$0xff]  ;;  %v22909_v35 = vld [vmem:[#allocation21_spill] sm:$0xff] }
 0xf2d   :  { %16841 = vmatpush3.msra.mxu1 %v22891_v59  ;;  %16799 = vmatprep.subr.mxu0 %v22546_v34 }
 0xf2e   :  { %16842 = vmatprep.subr.mxu1 %v22546_v34  ;;  %16800 = vmatpush3.msra.mxu0 %v17759_v7 }
 0xf2f   :  { %16843 = vmatpush3.msra.mxu1 %v22892_v36  ;;  %16801 = vmatprep.subr.mxu0 %v22546_v34 }
 0xf30   :  { %16844 = vmatprep.subr.mxu1 %v22546_v34  ;;  %16802 = vmatpush3.msra.mxu0 %v17770_v11 }
 0xf31   :  { %16845 = vmatpush3.msra.mxu1 %v22893_v45  ;;  %16803 = vmatprep.subr.mxu0 %v22546_v34 }
 0xf32   :  { %16846 = vmatprep.subr.mxu1 %v22546_v34  ;;  %16804 = vmatpush3.msra.mxu0 %v17772_v12 }
 0xf33   :  { %16847 = vmatpush3.msra.mxu1 %v22894_v56  ;;  %16805 = vmatprep.subr.mxu0 %v22546_v34 }
 0xf34   :  { %16848 = vmatprep.subr.mxu1 %v22546_v34  ;;  %16806 = vmatpush3.msra.mxu0 %v17774_v13 }
 0xf35   :  { %16849 = vmatpush3.msra.mxu1 %v22895_v9  ;;  %16807 = vmatprep.subr.mxu0 %v22546_v34 }
 0xf36   :  { %16850 = vmatprep.subr.mxu1 %v22546_v34  ;;  %16808 = vmatpush3.msra.mxu0 %v17789_v18 }
 0xf37   :  { %16851 = vmatpush3.msra.mxu1 %v22896_v1  ;;  %16809 = vmatprep.subr.mxu0 %v22546_v34  ;;  %v22899_v1 = vld [vmem:[#allocation35_spill] sm:$0xff] }
 0xf38   :  { %16852 = vmatprep.subr.mxu1 %v22546_v34  ;;  %16810 = vmatpush3.msra.mxu0 %v17814_v26 }
 0xf39   :  { %16853 = vmatpush3.msra.mxu1 %v22897_v40  ;;  %16811 = vmatprep.subr.mxu0 %v22546_v34  ;;  %v22900_v40 = vld [vmem:[#allocation36_spill] sm:$0xff] }
 0xf3a   :  { %16854 = vmatprep.subr.mxu1 %v22546_v34  ;;  %16812 = vmatpush3.msra.mxu0 %v17823_v29 }
 0xf3b   :  { %16855 = vmatpush3.msra.mxu1 %v22898_v54  ;;  %16813 = vmatprep.subr.mxu0 %v22546_v34  ;;  %v22901_v54 = vld [vmem:[#allocation37_spill] sm:$0xff] }
 0xf3c   :  { %16856 = vmatprep.subr.mxu1 %v22546_v34  ;;  %16814 = vmatpush3.msra.mxu0 %v17852_v38 }
 0xf3d   :  { %16857 = vmatpush3.msra.mxu1 %v22899_v1  ;;  %16815 = vmatprep.subr.mxu0 %v22546_v34 }
 0xf3e   :  { %16858 = vmatprep.subr.mxu1 %v22546_v34  ;;  %16816 = vmatpush3.msra.mxu0 %v17882_v48 }
 0xf3f   :  { %16859 = vmatpush3.msra.mxu1 %v22900_v40  ;;  %16817 = vmatprep.subr.mxu0 %v22546_v34 }
 0xf40   :  { %16860 = vmatprep.subr.mxu1 %v22546_v34  ;;  %16818 = vmatpush3.msra.mxu0 %v17892_v51 }
 0xf41   :  { %16861 = vmatpush3.msra.mxu1 %v22901_v54  ;;  %16819 = vmatprep.subr.mxu0 %v22546_v34 }
 0xf42   :  { %16862 = vmatprep.mubr.msk.f32.mxu1 %vm17682_vm0, %v22546_v34  ;;  %16900 = vmatprep.subr.mxu1 %v22546_v34 }
 0xf43   :  { %16820 = vmatpush3.msra.mxu0 %v17926_v62  ;;  %16827 = vmatprep.mubr.msk.f32.mxu0 %vm17682_vm0, %v22546_v34 }
 0xf44   :  { %16821 = vmatprep.subr.mxu0 %v22546_v34 }
 0xf45   :  { %16822 = vmatpush3.msra.mxu0 %v17938_v4 }
 0xf46   :  { %16823 = vmatprep.subr.mxu0 %v22546_v34 }
 0xf47   :  { %16824 = vmatpush3.msra.mxu0 %v17959_v27 }
 0xf48   :  { %16825 = vmatprep.subr.mxu0 %v22546_v34 }
 0xf49   :  { %16826 = vmatpush3.msra.mxu0 %v17976_v42 }
 0xf4a   :  { %16865 = vmatprep.subr.mxu0 %v22546_v34 }
 0xf9e   :  { %v8956_v54 = vpop.f32.mrf.mxu1 }
 0xfa0   :  { %v16654_v40 = vpop.f32.mrf.mxu1 }
 0xfa6   :  { %v8805_v1 = vpop.f32.mrf.mxu0 }
 0xfa7   :  { %v8957_v41 = vadd.f32 %v8956_v54, %v8805_v1 }
 0xfa8   :  { %v16619_v9 = vpop.f32.mrf.mxu0 }
 0xfbe   :  { %v9149_v56 = vpop.f32.mrf.mxu1 }
 0xfc0   :  { %v16724_v45 = vpop.f32.mrf.mxu1 }
 0xfc7   :  { %v9060_v36 = vpop.f32.mrf.mxu0 }
 0xfc8   :  { %v9061_v3 = vadd.f32 %v9060_v36, %v8957_v41  ;;  %v22915_v41 = vld [vmem:[#allocation31_spill] sm:$0xff]  ;;  %v22917_v36 = vld [vmem:[#allocation33_spill] sm:$0xff] }
 0xfc9   :  { %v16689_v59 = vpop.f32.mrf.mxu0 }
 0xfca   :  { %v9150_v61 = vadd.f32 %v9149_v56, %v9061_v3  ;;  %v22911_v3 = vld [vmem:[#allocation25_spill] sm:$0xff]  ;;  %v22918_v56 = vld [vmem:[#allocation14_spill] sm:$0xff] }
 0xfe0   :  { %v9355_v53 = vpop.f32.mrf.mxu1 }
 0xfe2   :  { %v16794_v49 = vpop.f32.mrf.mxu1 }
 0xfe3   :  { %v22913_v49 = vld [vmem:[#allocation29_spill] sm:$0xff] }
 0xfe8   :  { %v9268_v40 = vpop.f32.mrf.mxu0 }
 0xfe9   :  { %v9269_v44 = vadd.f32 %v9268_v40, %v9150_v61  ;;  %v22919_v40 = vld [vmem:[#allocation16_spill] sm:$0xff] }
 0xfea   :  { %v16759_v9 = vpop.f32.mrf.mxu0 }
 0xfeb   :  { %v9356_v45 = vadd.f32 %v9355_v53, %v9269_v44  ;;  %v22907_v44 = vld [vmem:[#allocation17_spill] sm:$0xff]  ;;  %v22920_v9 = vld [vmem:[#allocation18_spill] sm:$0xff] }
 0xfec   :  { %v22916_v53 = vld [vmem:[#allocation13_spill] sm:$0xff] }
 0xfed   :  { %v9359_v47 = vadd.f32 %v9356_v45, %v283_v63  ;;  %v22921_v45 = vld [vmem:[#allocation20_spill] sm:$0xff] }
 0xfef   :  { %17591 = vtanh.f32 %v9359_v47 }
 0xffc   :  { %v17592_v59 = vpop.eup %17591 }
 0xffd   :  { %v21332_v54 = vand.u32 4294901760, %v17592_v59 }
 0xfff   :  { %22903 = vst [vmem:[#allocation85_spill] sm:$0xff] %v21332_v54  ;;  %16863 = vmatmul.mubr.f32.vlgmr.msra.gmra.mxu1 %v21332_v54  ;;  %v21336_v1 = vsub.f32 %v17592_v59, %v21332_v54  ;;  %v22922_v59 = vld [vmem:[#allocation22_spill] sm:$0xff] }
0x1000   :  { %16901 = vmatpush3.msra.mxu1 %v17755_v5  ;;  %16932 = vmatprep.mubr.msk.f32.mxu1 %vm17682_vm0, %v22546_v34 }
0x1001   :  { %22904 = vst [vmem:[#allocation90_spill] sm:$0xff] %v21336_v1  ;;  %16902 = vmatprep.subr.mxu1 %v22546_v34  ;;  %v21343_v61 = vand.u32 4294901760, %v21336_v1 }
0x1002   :  { %16903 = vmatpush3.msra.mxu1 %v17757_v6 }
0x1003   :  { %22905 = vst [vmem:[#allocation91_spill] sm:$0xff] %v21343_v61  ;;  %16904 = vmatprep.subr.mxu1 %v22546_v34  ;;  %v9448_v47 = vsub.f32 %v21336_v1, %v21343_v61 }
0x1004   :  { %16905 = vmatpush3.msra.mxu1 %v17759_v7 }
0x1005   :  { %16906 = vmatprep.subr.mxu1 %v22546_v34  ;;  %v21351_v63 = vand.u32 4294901760, %v9448_v47  ;;  %v22923_v47 = vld [vmem:[#allocation24_spill] sm:$0xff] }
0x1006   :  { %16907 = vmatpush3.msra.mxu1 %v17770_v11 }
0x1007   :  { %22906 = vst [vmem:[#allocation92_spill] sm:$0xff] %v21351_v63  ;;  %16908 = vmatprep.subr.mxu1 %v22546_v34  ;;  %16828 = vmatmul.mubr.f32.vlgmr.msra.gmra.mxu0 %v21351_v63  ;;  %v142_v63 = vpop.permute.xlu1 %141 }
0x1008   :  { %16866 = vmatpush3.msra.mxu0 %v17784_v16  ;;  %16909 = vmatpush3.msra.mxu1 %v17772_v12 }
0x1009   :  { %16867 = vmatprep.subr.mxu0 %v22546_v34  ;;  %16910 = vmatprep.subr.mxu1 %v22546_v34 }
0x100a   :  { %16868 = vmatpush3.msra.mxu0 %v17787_v17  ;;  %16911 = vmatpush3.msra.mxu1 %v17774_v13 }
0x100b   :  { %16869 = vmatprep.subr.mxu0 %v22546_v34  ;;  %16912 = vmatprep.subr.mxu1 %v22546_v34 }
0x100c   :  { %16870 = vmatpush3.msra.mxu0 %v17792_v19  ;;  %16913 = vmatpush3.msra.mxu1 %v17789_v18 }
0x100d   :  { %16871 = vmatprep.subr.mxu0 %v22546_v34  ;;  %16914 = vmatprep.subr.mxu1 %v22546_v34 }
0x100e   :  { %16872 = vmatpush3.msra.mxu0 %v17799_v21  ;;  %16915 = vmatpush3.msra.mxu1 %v17814_v26 }
0x100f   :  { %16873 = vmatprep.subr.mxu0 %v22546_v34  ;;  %16916 = vmatprep.subr.mxu1 %v22546_v34 }
0x1010   :  { %16874 = vmatpush3.msra.mxu0 %v17802_v22  ;;  %16917 = vmatpush3.msra.mxu1 %v17823_v29 }
0x1011   :  { %16875 = vmatprep.subr.mxu0 %v22546_v34  ;;  %16918 = vmatprep.subr.mxu1 %v22546_v34 }
0x1012   :  { %16876 = vmatpush3.msra.mxu0 %v17829_v31  ;;  %16919 = vmatpush3.msra.mxu1 %v17852_v38 }
0x1013   :  { %16877 = vmatprep.subr.mxu0 %v22546_v34  ;;  %16920 = vmatprep.subr.mxu1 %v22546_v34 }
0x1014   :  { %16878 = vmatpush3.msra.mxu0 %v17849_v37  ;;  %16921 = vmatpush3.msra.mxu1 %v17882_v48 }
0x1015   :  { %16879 = vmatprep.subr.mxu0 %v22546_v34  ;;  %16922 = vmatprep.subr.mxu1 %v22546_v34 }
0x1016   :  { %16880 = vmatpush3.msra.mxu0 %v17876_v46  ;;  %16923 = vmatpush3.msra.mxu1 %v17892_v51 }
0x1017   :  { %16881 = vmatprep.subr.mxu0 %v22546_v34  ;;  %16924 = vmatprep.subr.mxu1 %v22546_v34 }
0x1018   :  { %16882 = vmatpush3.msra.mxu0 %v17888_v50  ;;  %16925 = vmatpush3.msra.mxu1 %v17926_v62 }
0x1019   :  { %16883 = vmatprep.subr.mxu0 %v22546_v34  ;;  %16926 = vmatprep.subr.mxu1 %v22546_v34 }
0x101a   :  { %16884 = vmatpush3.msra.mxu0 %v17913_v58  ;;  %16927 = vmatpush3.msra.mxu1 %v17938_v4 }
0x101b   :  { %16885 = vmatprep.subr.mxu0 %v22546_v34  ;;  %16928 = vmatprep.subr.mxu1 %v22546_v34 }
0x101c   :  { %16886 = vmatpush3.msra.mxu0 %v17932_v2  ;;  %16929 = vmatpush3.msra.mxu1 %v17959_v27 }
0x101d   :  { %16887 = vmatprep.subr.mxu0 %v22546_v34  ;;  %16930 = vmatprep.subr.mxu1 %v22546_v34 }
0x101e   :  { %16888 = vmatpush3.msra.mxu0 %v17953_v15  ;;  %16931 = vmatpush3.msra.mxu1 %v17976_v42 }
0x101f   :  { %16889 = vmatprep.subr.mxu0 %v22546_v34  ;;  %16933 = vmatmul.mubr.f32.vlgmr.msra.gmra.mxu1 %v21343_v61 }
0x1020   :  { %16970 = vmatprep.subr.mxu1 %v22546_v34  ;;  %16890 = vmatpush3.msra.mxu0 %v17972_v39 }
0x1021   :  { %16971 = vmatpush3.msra.mxu1 %v17755_v5  ;;  %16891 = vmatprep.subr.mxu0 %v22546_v34 }
0x1022   :  { %16972 = vmatprep.subr.mxu1 %v22546_v34  ;;  %16892 = vmatpush3.msra.mxu0 %v17988_v52 }
0x1023   :  { %16973 = vmatpush3.msra.mxu1 %v17757_v6  ;;  %16893 = vmatprep.subr.mxu0 %v22546_v34 }
0x1024   :  { %16974 = vmatprep.subr.mxu1 %v22546_v34  ;;  %16894 = vmatpush3.msra.mxu0 %v18003_v57 }
0x1025   :  { %16975 = vmatpush3.msra.mxu1 %v17759_v7  ;;  %16895 = vmatprep.subr.mxu0 %v22546_v34 }
0x1026   :  { %16976 = vmatprep.subr.mxu1 %v22546_v34  ;;  %16896 = vmatpush3.msra.mxu0 %v18017_v8 }
0x1027   :  { %16897 = vmatprep.mubr.msk.f32.mxu0 %vm17682_vm0, %v22546_v34  ;;  %16977 = vmatpush3.msra.mxu1 %v17770_v11 }
0x1028   :  { %16898 = vmatmul.mubr.f32.vlgmr.msra.gmra.mxu0 %v21336_v1  ;;  %16935 = vmatprep.subr.mxu0 %v22546_v34 }
0x1029   :  { %16978 = vmatprep.subr.mxu1 %v22546_v34  ;;  %16936 = vmatpush3.msra.mxu0 %v17806_v23 }
0x102a   :  { %16979 = vmatpush3.msra.mxu1 %v17772_v12  ;;  %16937 = vmatprep.subr.mxu0 %v22546_v34 }
0x102b   :  { %16980 = vmatprep.subr.mxu1 %v22546_v34  ;;  %16938 = vmatpush3.msra.mxu0 %v17809_v24 }
0x102c   :  { %16981 = vmatpush3.msra.mxu1 %v17774_v13  ;;  %16939 = vmatprep.subr.mxu0 %v22546_v34 }
0x102d   :  { %16982 = vmatprep.subr.mxu1 %v22546_v34  ;;  %16940 = vmatpush3.msra.mxu0 %v17812_v25 }
0x102e   :  { %16983 = vmatpush3.msra.mxu1 %v17789_v18  ;;  %16941 = vmatprep.subr.mxu0 %v22546_v34 }
0x102f   :  { %16984 = vmatprep.subr.mxu1 %v22546_v34  ;;  %16942 = vmatpush3.msra.mxu0 %v17821_v28 }
0x1030   :  { %16985 = vmatpush3.msra.mxu1 %v17814_v26  ;;  %16943 = vmatprep.subr.mxu0 %v22546_v34 }
0x1031   :  { %16986 = vmatprep.subr.mxu1 %v22546_v34  ;;  %16944 = vmatpush3.msra.mxu0 %v17826_v30 }
0x1032   :  { %16987 = vmatpush3.msra.mxu1 %v17823_v29  ;;  %16945 = vmatprep.subr.mxu0 %v22546_v34 }
0x1033   :  { %16988 = vmatprep.subr.mxu1 %v22546_v34  ;;  %16946 = vmatpush3.msra.mxu0 %v17866_v43 }
0x1034   :  { %16989 = vmatpush3.msra.mxu1 %v17852_v38  ;;  %16947 = vmatprep.subr.mxu0 %v22546_v34 }
0x1035   :  { %16990 = vmatprep.subr.mxu1 %v22546_v34  ;;  %16948 = vmatpush3.msra.mxu0 %v22574_v10 }
0x1036   :  { %16991 = vmatpush3.msra.mxu1 %v17882_v48  ;;  %16949 = vmatprep.subr.mxu0 %v22546_v34 }
0x1037   :  { %16992 = vmatprep.subr.mxu1 %v22546_v34  ;;  %16950 = vmatpush3.msra.mxu0 %v22907_v44 }
0x1038   :  { %16993 = vmatpush3.msra.mxu1 %v17892_v51  ;;  %16951 = vmatprep.subr.mxu0 %v22546_v34 }
0x1039   :  { %16994 = vmatprep.subr.mxu1 %v22546_v34  ;;  %16952 = vmatpush3.msra.mxu0 %v22908_v60 }
0x103a   :  { %16995 = vmatpush3.msra.mxu1 %v17926_v62  ;;  %16953 = vmatprep.subr.mxu0 %v22546_v34 }
0x103b   :  { %16996 = vmatprep.subr.mxu1 %v22546_v34  ;;  %16954 = vmatpush3.msra.mxu0 %v22909_v35 }
0x103c   :  { %16997 = vmatpush3.msra.mxu1 %v17938_v4  ;;  %16955 = vmatprep.subr.mxu0 %v22546_v34 }
0x103d   :  { %16998 = vmatprep.subr.mxu1 %v22546_v34  ;;  %16956 = vmatpush3.msra.mxu0 %v22910_v55 }
0x103e   :  { %16999 = vmatpush3.msra.mxu1 %v17959_v27  ;;  %16957 = vmatprep.subr.mxu0 %v22546_v34 }
0x103f   :  { %17000 = vmatprep.subr.mxu1 %v22546_v34  ;;  %16958 = vmatpush3.msra.mxu0 %v22911_v3 }
0x1040   :  { %17001 = vmatpush3.msra.mxu1 %v17976_v42  ;;  %17002 = vmatprep.mubr.msk.f32.mxu1 %vm17682_vm0, %v22546_v34 }
0x1041   :  { %16959 = vmatprep.subr.mxu0 %v22546_v34  ;;  %17003 = vmatmul.mubr.f32.vlgmr.msra.gmra.mxu1 %v21332_v54 }
0x1042   :  { %16960 = vmatpush3.msra.mxu0 %v22912_v14  ;;  %16967 = vmatprep.mubr.msk.f32.mxu0 %vm17682_vm0, %v22546_v34 }
0x1043   :  { %16961 = vmatprep.subr.mxu0 %v22546_v34  ;;  %17040 = vmatprep.subr.mxu1 %v22546_v34 }
0x1044   :  { %16962 = vmatpush3.msra.mxu0 %v22913_v49  ;;  %17041 = vmatpush3.msra.mxu1 %v22914_v32  ;;  %v22924_v32 = vld [vmem:[#allocation26_spill] sm:$0xff]  ;;  %v244_v49 = vpop.permute.xlu0 %243 }
0x1045   :  { %16963 = vmatprep.subr.mxu0 %v22546_v34  ;;  %17042 = vmatprep.subr.mxu1 %v22546_v34  ;;  %v268_v3 = vmul.f32 %v21104_v0, %v244_v49  ;;  %v22939_v49 = vld [vmem:[#allocation39_spill] sm:$0xff] }
0x1046   :  { %16964 = vmatpush3.msra.mxu0 %v22915_v41  ;;  %17043 = vmatpush3.msra.mxu1 %v22916_v53  ;;  %v22925_v53 = vld [vmem:[#allocation28_spill] sm:$0xff] }
0x1047   :  { %16965 = vmatprep.subr.mxu0 %v22546_v34  ;;  %17044 = vmatprep.subr.mxu1 %v22546_v34 }
0x1048   :  { %16966 = vmatpush3.msra.mxu0 %v22917_v36  ;;  %17045 = vmatpush3.msra.mxu1 %v22918_v56  ;;  %v22926_v56 = vld [vmem:[#allocation30_spill] sm:$0xff]  ;;  %v167_v36 = vmul.f32 %v22902_v33, %v142_v63 }
0x1049   :  { %16968 = vmatmul.mubr.f32.vlgmr.msra.gmra.mxu0 %v21332_v54  ;;  %17046 = vmatprep.subr.mxu1 %v22546_v34 }
0x104a   :  { %17047 = vmatpush3.msra.mxu1 %v22919_v40  ;;  %17005 = vmatprep.subr.mxu0 %v22546_v34  ;;  %v22927_v40 = vld [vmem:[#allocation32_spill] sm:$0xff]  ;;  %v183_v14 = vadd.f32 %v21098_v20, %v167_v36 }
0x104b   :  { %17048 = vmatprep.subr.mxu1 %v22546_v34  ;;  %17006 = vmatpush3.msra.mxu0 %v17755_v5 }
0x104c   :  { %17049 = vmatpush3.msra.mxu1 %v22920_v9  ;;  %17007 = vmatprep.subr.mxu0 %v22546_v34  ;;  %v22928_v9 = vld [vmem:[#allocation34_spill] sm:$0xff]  ;;  %v284_v60 = vadd.f32 %v268_v3, %v183_v14 }
0x104d   :  { %17050 = vmatprep.subr.mxu1 %v22546_v34  ;;  %17008 = vmatpush3.msra.mxu0 %v17757_v6 }
0x104e   :  { %17051 = vmatpush3.msra.mxu1 %v22921_v45  ;;  %17009 = vmatprep.subr.mxu0 %v22546_v34  ;;  %v22929_v45 = vld [vmem:[#allocation35_spill] sm:$0xff] }
0x104f   :  { %17052 = vmatprep.subr.mxu1 %v22546_v34  ;;  %17010 = vmatpush3.msra.mxu0 %v17759_v7 }
0x1050   :  { %17053 = vmatpush3.msra.mxu1 %v22922_v59  ;;  %17011 = vmatprep.subr.mxu0 %v22546_v34  ;;  %v22930_v59 = vld [vmem:[#allocation36_spill] sm:$0xff] }
0x1051   :  { %17054 = vmatprep.subr.mxu1 %v22546_v34  ;;  %17012 = vmatpush3.msra.mxu0 %v17770_v11 }
0x1052   :  { %17055 = vmatpush3.msra.mxu1 %v22923_v47  ;;  %17013 = vmatprep.subr.mxu0 %v22546_v34  ;;  %v22931_v47 = vld [vmem:[#allocation37_spill] sm:$0xff] }
0x1053   :  { %17056 = vmatprep.subr.mxu1 %v22546_v34  ;;  %17014 = vmatpush3.msra.mxu0 %v17772_v12 }
0x1054   :  { %17057 = vmatpush3.msra.mxu1 %v22924_v32  ;;  %17015 = vmatprep.subr.mxu0 %v22546_v34 }
0x1055   :  { %17058 = vmatprep.subr.mxu1 %v22546_v34  ;;  %17016 = vmatpush3.msra.mxu0 %v17774_v13 }
0x1056   :  { %17059 = vmatpush3.msra.mxu1 %v22925_v53  ;;  %17017 = vmatprep.subr.mxu0 %v22546_v34 }
0x1057   :  { %17060 = vmatprep.subr.mxu1 %v22546_v34  ;;  %17018 = vmatpush3.msra.mxu0 %v17789_v18 }
0x1058   :  { %17061 = vmatpush3.msra.mxu1 %v22926_v56  ;;  %17019 = vmatprep.subr.mxu0 %v22546_v34 }
0x1059   :  { %17062 = vmatprep.subr.mxu1 %v22546_v34  ;;  %17020 = vmatpush3.msra.mxu0 %v17814_v26 }
0x105a   :  { %17063 = vmatpush3.msra.mxu1 %v22927_v40  ;;  %17021 = vmatprep.subr.mxu0 %v22546_v34 }
0x105b   :  { %17064 = vmatprep.subr.mxu1 %v22546_v34  ;;  %17022 = vmatpush3.msra.mxu0 %v17823_v29 }
0x105c   :  { %17065 = vmatpush3.msra.mxu1 %v22928_v9  ;;  %17023 = vmatprep.subr.mxu0 %v22546_v34 }
0x105d   :  { %17066 = vmatprep.subr.mxu1 %v22546_v34  ;;  %17024 = vmatpush3.msra.mxu0 %v17852_v38 }
0x105e   :  { %17067 = vmatpush3.msra.mxu1 %v22929_v45  ;;  %17025 = vmatprep.subr.mxu0 %v22546_v34 }
0x105f   :  { %17068 = vmatprep.subr.mxu1 %v22546_v34  ;;  %17026 = vmatpush3.msra.mxu0 %v17882_v48 }
0x1060   :  { %17069 = vmatpush3.msra.mxu1 %v22930_v59  ;;  %17027 = vmatprep.subr.mxu0 %v22546_v34 }
0x1061   :  { %17070 = vmatprep.subr.mxu1 %v22546_v34  ;;  %17028 = vmatpush3.msra.mxu0 %v17892_v51 }
0x1062   :  { %17071 = vmatpush3.msra.mxu1 %v22931_v47  ;;  %17029 = vmatprep.subr.mxu0 %v22546_v34 }
0x1063   :  { %17072 = vmatprep.mubr.msk.f32.mxu1 %vm17682_vm0, %v22546_v34  ;;  %17110 = vmatprep.subr.mxu1 %v22546_v34 }
0x1064   :  { %17030 = vmatpush3.msra.mxu0 %v17926_v62  ;;  %17037 = vmatprep.mubr.msk.f32.mxu0 %vm17682_vm0, %v22546_v34 }
0x1065   :  { %17031 = vmatprep.subr.mxu0 %v22546_v34 }
0x1066   :  { %17032 = vmatpush3.msra.mxu0 %v17938_v4 }
0x1067   :  { %17033 = vmatprep.subr.mxu0 %v22546_v34 }
0x1068   :  { %17034 = vmatpush3.msra.mxu0 %v17959_v27 }
0x1069   :  { %17035 = vmatprep.subr.mxu0 %v22546_v34 }
0x106a   :  { %17036 = vmatpush3.msra.mxu0 %v17976_v42 }
0x106b   :  { %17075 = vmatprep.subr.mxu0 %v22546_v34 }
0x10bf   :  { %v9602_v32 = vpop.f32.mrf.mxu1 }
0x10c1   :  { %v16864_v53 = vpop.f32.mrf.mxu1 }
0x10c7   :  { %v9451_v56 = vpop.f32.mrf.mxu0 }
0x10c8   :  { %v9603_v61 = vadd.f32 %v9602_v32, %v9451_v56  ;;  %v10674_v56 = vld [vmem:[#allocation3 + $0x20] sm:$0xff] }
0x10c9   :  { %v16829_v40 = vpop.f32.mrf.mxu0 }
0x10df   :  { %v9795_v9 = vpop.f32.mrf.mxu1 }
0x10e1   :  { %v16934_v45 = vpop.f32.mrf.mxu1 }
0x10e8   :  { %v9706_v59 = vpop.f32.mrf.mxu0 }
0x10e9   :  { %v9707_v41 = vadd.f32 %v9706_v59, %v9603_v61 }
0x10ea   :  { %v16899_v47 = vpop.f32.mrf.mxu0 }
0x10eb   :  { %v9796_v55 = vadd.f32 %v9795_v9, %v9707_v41 }
0x1101   :  { %v10001_v1 = vpop.f32.mrf.mxu1 }
0x1103   :  { %v17004_v54 = vpop.f32.mrf.mxu1 }
0x1109   :  { %v9914_v53 = vpop.f32.mrf.mxu0 }
0x110a   :  { %v9915_v35 = vadd.f32 %v9914_v53, %v9796_v55  ;;  %v22938_v55 = vld [vmem:[#allocation27_spill] sm:$0xff] }
0x110b   :  { %v16969_v40 = vpop.f32.mrf.mxu0 }
0x110c   :  { %v10002_v45 = vadd.f32 %v10001_v1, %v9915_v35  ;;  %v10675_v35 = vld [vmem:[#allocation3 + $0x28] sm:$0xff]  ;;  %v22940_v40 = vld [vmem:[#allocation29_spill] sm:$0xff] }
0x110d   :  { %v21780_v53 = vand.u32 4294901760, %v10675_v35 }
0x110e   :  { %v10005_v44 = vadd.f32 %v10002_v45, %v284_v60 }
0x1110   :  { %17593 = vtanh.f32 %v10005_v44 }
0x111d   :  { %v17594_v47 = vpop.eup %17593 }
0x111e   :  { %v21557_v32 = vand.u32 4294901760, %v17594_v47 }
0x1120   :  { %22932 = vst [vmem:[#allocation12_spill] sm:$0xff] %v21557_v32  ;;  %17073 = vmatmul.mubr.f32.vlgmr.msra.gmra.mxu1 %v21557_v32  ;;  %v21561_v33 = vsub.f32 %v17594_v47, %v21557_v32  ;;  %v10673_v47 = vld [vmem:[#allocation3 + $0x18] sm:$0xff] }
0x1121   :  { %17111 = vmatpush3.msra.mxu1 %v17755_v5  ;;  %17142 = vmatprep.mubr.msk.f32.mxu1 %vm17682_vm0, %v22546_v34 }
0x1122   :  { %17112 = vmatprep.subr.mxu1 %v22546_v34  ;;  %v21568_v20 = vand.u32 4294901760, %v21561_v33 }
0x1123   :  { %17113 = vmatpush3.msra.mxu1 %v17757_v6 }
0x1124   :  { %17114 = vmatprep.subr.mxu1 %v22546_v34  ;;  %v10094_v0 = vsub.f32 %v21561_v33, %v21568_v20 }
0x1125   :  { %17115 = vmatpush3.msra.mxu1 %v17759_v7 }
0x1126   :  { %17116 = vmatprep.subr.mxu1 %v22546_v34  ;;  %v21576_v54 = vand.u32 4294901760, %v10094_v0 }
0x1127   :  { %17117 = vmatpush3.msra.mxu1 %v17770_v11 }
0x1128   :  { %17118 = vmatprep.subr.mxu1 %v22546_v34  ;;  %17038 = vmatmul.mubr.f32.vlgmr.msra.gmra.mxu0 %v21576_v54 }
0x1129   :  { %17076 = vmatpush3.msra.mxu0 %v17784_v16  ;;  %17119 = vmatpush3.msra.mxu1 %v17772_v12 }
0x112a   :  { %17077 = vmatprep.subr.mxu0 %v22546_v34  ;;  %17120 = vmatprep.subr.mxu1 %v22546_v34 }
0x112b   :  { %17078 = vmatpush3.msra.mxu0 %v17787_v17  ;;  %17121 = vmatpush3.msra.mxu1 %v17774_v13 }
0x112c   :  { %17079 = vmatprep.subr.mxu0 %v22546_v34  ;;  %17122 = vmatprep.subr.mxu1 %v22546_v34 }
0x112d   :  { %17080 = vmatpush3.msra.mxu0 %v17792_v19  ;;  %17123 = vmatpush3.msra.mxu1 %v17789_v18 }
0x112e   :  { %17081 = vmatprep.subr.mxu0 %v22546_v34  ;;  %17124 = vmatprep.subr.mxu1 %v22546_v34 }
0x112f   :  { %17082 = vmatpush3.msra.mxu0 %v17799_v21  ;;  %17125 = vmatpush3.msra.mxu1 %v17814_v26  ;;  %v10681_v21 = vld [vmem:[#allocation3 + $0x58] sm:$0xff] }
0x1130   :  { %17083 = vmatprep.subr.mxu0 %v22546_v34  ;;  %17126 = vmatprep.subr.mxu1 %v22546_v34 }
0x1131   :  { %17084 = vmatpush3.msra.mxu0 %v17802_v22  ;;  %17127 = vmatpush3.msra.mxu1 %v17823_v29 }
0x1132   :  { %17085 = vmatprep.subr.mxu0 %v22546_v34  ;;  %17128 = vmatprep.subr.mxu1 %v22546_v34 }
0x1133   :  { %17086 = vmatpush3.msra.mxu0 %v17829_v31  ;;  %17129 = vmatpush3.msra.mxu1 %v17852_v38  ;;  %v22934_v31 = vld [vmem:[#allocation19_spill] sm:$0xff] }
0x1134   :  { %17087 = vmatprep.subr.mxu0 %v22546_v34  ;;  %17130 = vmatprep.subr.mxu1 %v22546_v34 }
0x1135   :  { %17088 = vmatpush3.msra.mxu0 %v17849_v37  ;;  %17131 = vmatpush3.msra.mxu1 %v17882_v48 }
0x1136   :  { %17089 = vmatprep.subr.mxu0 %v22546_v34  ;;  %17132 = vmatprep.subr.mxu1 %v22546_v34 }
0x1137   :  { %17090 = vmatpush3.msra.mxu0 %v17876_v46  ;;  %17133 = vmatpush3.msra.mxu1 %v17892_v51  ;;  %v10678_v46 = vld [vmem:[#allocation3 + $0x40] sm:$0xff] }
0x1138   :  { %17091 = vmatprep.subr.mxu0 %v22546_v34  ;;  %17134 = vmatprep.subr.mxu1 %v22546_v34 }
0x1139   :  { %17092 = vmatpush3.msra.mxu0 %v17888_v50  ;;  %17135 = vmatpush3.msra.mxu1 %v17926_v62 }
0x113a   :  { %17093 = vmatprep.subr.mxu0 %v22546_v34  ;;  %17136 = vmatprep.subr.mxu1 %v22546_v34 }
0x113b   :  { %17094 = vmatpush3.msra.mxu0 %v17913_v58  ;;  %17137 = vmatpush3.msra.mxu1 %v17938_v4 }
0x113c   :  { %17095 = vmatprep.subr.mxu0 %v22546_v34  ;;  %17138 = vmatprep.subr.mxu1 %v22546_v34 }
0x113d   :  { %17096 = vmatpush3.msra.mxu0 %v17932_v2  ;;  %17139 = vmatpush3.msra.mxu1 %v17959_v27  ;;  %v22936_v2 = vld [vmem:[#allocation23_spill] sm:$0xff] }
0x113e   :  { %17097 = vmatprep.subr.mxu0 %v22546_v34  ;;  %17140 = vmatprep.subr.mxu1 %v22546_v34 }
0x113f   :  { %17098 = vmatpush3.msra.mxu0 %v17953_v15  ;;  %17141 = vmatpush3.msra.mxu1 %v17976_v42  ;;  %v10677_v15 = vld [vmem:[#allocation3 + $0x38] sm:$0xff] }
0x1140   :  { %17099 = vmatprep.subr.mxu0 %v22546_v34  ;;  %17143 = vmatmul.mubr.f32.vlgmr.msra.gmra.mxu1 %v21568_v20  ;;  %v21757_v44 = vand.u32 4294901760, %v10677_v15 }
0x1141   :  { %17180 = vmatprep.subr.mxu1 %v22546_v34  ;;  %17100 = vmatpush3.msra.mxu0 %v17972_v39 }
0x1142   :  { %17181 = vmatpush3.msra.mxu1 %v17755_v5  ;;  %17101 = vmatprep.subr.mxu0 %v22546_v34  ;;  %v10685_v5 = vld [vmem:[#allocation3 + $0x78] sm:$0xff]  ;;  %v21778_v59 = vsub.f32 %v10677_v15, %v21757_v44 }
0x1143   :  { %17182 = vmatprep.subr.mxu1 %v22546_v34  ;;  %17102 = vmatpush3.msra.mxu0 %v17988_v52 }
0x1144   :  { %17183 = vmatpush3.msra.mxu1 %v17757_v6  ;;  %17103 = vmatprep.subr.mxu0 %v22546_v34  ;;  %v10684_v6 = vld [vmem:[#allocation3 + $0x70] sm:$0xff] }
0x1145   :  { %17184 = vmatprep.subr.mxu1 %v22546_v34  ;;  %17104 = vmatpush3.msra.mxu0 %v18003_v57  ;;  %v22937_v57 = vld [vmem:[#allocation25_spill] sm:$0xff] }
0x1146   :  { %17185 = vmatpush3.msra.mxu1 %v17759_v7  ;;  %17105 = vmatprep.subr.mxu0 %v22546_v34  ;;  %v21660_v7 = vand.u32 4294901760, %v10685_v5 }
0x1147   :  { %17186 = vmatprep.subr.mxu1 %v22546_v34  ;;  %17106 = vmatpush3.msra.mxu0 %v18017_v8  ;;  %v21735_v8 = vand.u32 4294901760, %v10678_v46 }
0x1148   :  { %17107 = vmatprep.mubr.msk.f32.mxu0 %vm17682_vm0, %v22546_v34  ;;  %17187 = vmatpush3.msra.mxu1 %v17770_v11  ;;  %v10683_v11 = vld [vmem:[#allocation3 + $0x68] sm:$0xff]  ;;  %v21673_v16 = vsub.f32 %v10685_v5, %v21660_v7 }
0x1149   :  { %17108 = vmatmul.mubr.f32.vlgmr.msra.gmra.mxu0 %v21561_v33  ;;  %17145 = vmatprep.subr.mxu0 %v22546_v34  ;;  %v21675_v17 = vand.u32 4294901760, %v10683_v11  ;;  %v21762_v60 = vsub.f32 %v10678_v46, %v21735_v8 }
0x114a   :  { %17188 = vmatprep.subr.mxu1 %v22546_v34  ;;  %17146 = vmatpush3.msra.mxu0 %v17806_v23  ;;  %v21691_v22 = vand.u32 4294901760, %v21673_v16 }
0x114b   :  { %17189 = vmatpush3.msra.mxu1 %v17772_v12  ;;  %17147 = vmatprep.subr.mxu0 %v22546_v34  ;;  %v21666_v12 = vand.u32 4294901760, %v10684_v6  ;;  %v21694_v23 = vsub.f32 %v10683_v11, %v21675_v17  ;;  %v21784_v45 = vand.u32 4294901760, %v21762_v60  ;;  %v22941_v11 = vld [vmem:[#allocation31_spill] sm:$0xff] }
0x114c   :  { %17190 = vmatprep.subr.mxu1 %v22546_v34  ;;  %17148 = vmatpush3.msra.mxu0 %v17809_v24  ;;  %v22933_v24 = vld [vmem:[#allocation17_spill] sm:$0xff]  ;;  %v10938_v37 = vsub.f32 %v21673_v16, %v21691_v22 }
0x114d   :  { %17191 = vmatpush3.msra.mxu1 %v17774_v13  ;;  %17149 = vmatprep.subr.mxu0 %v22546_v34  ;;  %v10682_v13 = vld [vmem:[#allocation3 + $0x60] sm:$0xff]  ;;  %v10987_v46 = vsub.f32 %v21762_v60, %v21784_v45 }
0x114e   :  { %17192 = vmatprep.subr.mxu1 %v22546_v34  ;;  %17150 = vmatpush3.msra.mxu0 %v17812_v25  ;;  %v21684_v19 = vand.u32 4294901760, %v10682_v13  ;;  %v21698_v25 = vand.u32 4294901760, %v10681_v21 }
0x114f   :  { %17193 = vmatpush3.msra.mxu1 %v17789_v18  ;;  %17151 = vmatprep.subr.mxu0 %v22546_v34  ;;  %v21682_v18 = vsub.f32 %v10684_v6, %v21666_v12  ;;  %v21792_v6 = vand.u32 4294901760, %v10674_v56 }
0x1150   :  { %17194 = vmatprep.subr.mxu1 %v22546_v34  ;;  %17152 = vmatpush3.msra.mxu0 %v17821_v28  ;;  %v21722_v50 = vsub.f32 %v10681_v21, %v21698_v25 }
0x1151   :  { %17195 = vmatpush3.msra.mxu1 %v17814_v26  ;;  %17153 = vmatprep.subr.mxu0 %v22546_v34  ;;  %v10680_v26 = vld [vmem:[#allocation3 + $0x50] sm:$0xff]  ;;  %v21703_v28 = vand.u32 4294901760, %v21682_v18  ;;  %v21816_v15 = vsub.f32 %v10674_v56, %v21792_v6 }
0x1152   :  { %17196 = vmatprep.subr.mxu1 %v22546_v34  ;;  %17154 = vmatpush3.msra.mxu0 %v17826_v30  ;;  %v10679_v30 = vld [vmem:[#allocation3 + $0x48] sm:$0xff] }
0x1153   :  { %17197 = vmatpush3.msra.mxu1 %v17823_v29  ;;  %17155 = vmatprep.subr.mxu0 %v22546_v34  ;;  %v21706_v29 = vsub.f32 %v10682_v13, %v21684_v19  ;;  %v10945_v58 = vsub.f32 %v21682_v18, %v21703_v28 }
0x1154   :  { %17198 = vmatprep.subr.mxu1 %v22546_v34  ;;  %17156 = vmatpush3.msra.mxu0 %v17866_v43  ;;  %v21717_v43 = vand.u32 4294901760, %v10680_v26 }
0x1155   :  { %17199 = vmatpush3.msra.mxu1 %v17852_v38  ;;  %17157 = vmatprep.subr.mxu0 %v22546_v34  ;;  %v21715_v38 = vand.u32 4294901760, %v21694_v23  ;;  %v10946_v61 = vand.u32 4294901760, %v10945_v58 }
0x1156   :  { %17200 = vmatprep.subr.mxu1 %v22546_v34  ;;  %17158 = vmatpush3.msra.mxu0 %v22574_v10  ;;  %v21742_v52 = vsub.f32 %v10680_v26, %v21717_v43  ;;  %v21747_v10 = vand.u32 4294901760, %v21722_v50  ;;  %v21799_v26 = vand.u32 4294901760, %v21778_v59 }
0x1157   :  { %17201 = vmatpush3.msra.mxu1 %v17882_v48  ;;  %17159 = vmatprep.subr.mxu0 %v22546_v34  ;;  %v22935_v48 = vld [vmem:[#allocation21_spill] sm:$0xff]  ;;  %v10952_v39 = vsub.f32 %v21694_v23, %v21715_v38 }
0x1158   :  { %17202 = vmatprep.subr.mxu1 %v22546_v34  ;;  %17160 = vmatpush3.msra.mxu0 %v22933_v24  ;;  %v21766_v3 = vand.u32 4294901760, %v21742_v52  ;;  %v10966_v41 = vsub.f32 %v21722_v50, %v21747_v10  ;;  %v10672_v24 = vld [vmem:[#allocation3 + $0x10] sm:$0xff] }
0x1159   :  { %17203 = vmatpush3.msra.mxu1 %v17892_v51  ;;  %17161 = vmatprep.subr.mxu0 %v22546_v34  ;;  %v21724_v51 = vand.u32 4294901760, %v10679_v30 }
0x115a   :  { %17204 = vmatprep.subr.mxu1 %v22546_v34  ;;  %17162 = vmatpush3.msra.mxu0 %v22934_v31  ;;  %v10973_v0 = vsub.f32 %v21742_v52, %v21766_v3  ;;  %v10967_v13 = vand.u32 4294901760, %v10966_v41  ;;  %v21804_v31 = vand.u32 4294901760, %v10673_v47  ;;  %v21838_v41 = vand.u32 4294901760, %v21816_v15 }
0x115b   :  { %17205 = vmatpush3.msra.mxu1 %v17926_v62  ;;  %17163 = vmatprep.subr.mxu0 %v22546_v34  ;;  %v21731_v62 = vand.u32 4294901760, %v21706_v29  ;;  %v21750_v1 = vsub.f32 %v10679_v30, %v21724_v51  ;;  %v21802_v30 = vsub.f32 %v10675_v35, %v21780_v53 }
0x115c   :  { %17206 = vmatprep.subr.mxu1 %v22546_v34  ;;  %17164 = vmatpush3.msra.mxu0 %v22935_v48  ;;  %v10671_v48 = vld [vmem:[#allocation3 + $0x8] sm:$0xff]  ;;  %v10974_v58 = vand.u32 4294901760, %v10973_v0 }
0x115d   :  { %17207 = vmatpush3.msra.mxu1 %v17938_v4  ;;  %17165 = vmatprep.subr.mxu0 %v22546_v34  ;;  %v10939_v4 = vand.u32 4294901760, %v10938_v37  ;;  %v10959_v63 = vsub.f32 %v21706_v29, %v21731_v62  ;;  %v21774_v36 = vand.u32 4294901760, %v21750_v1  ;;  %v22942_v37 = vld [vmem:[#allocation33_spill] sm:$0xff]  ;;  %v21831_v35 = vand.u32 4294901760, %v10671_v48 }
0x115e   :  { %17208 = vmatprep.subr.mxu1 %v22546_v34  ;;  %17166 = vmatpush3.msra.mxu0 %v22936_v2 }
0x115f   :  { %17209 = vmatpush3.msra.mxu1 %v17959_v27  ;;  %17167 = vmatprep.subr.mxu0 %v22546_v34  ;;  %v10676_v27 = vld [vmem:[#allocation3 + $0x30] sm:$0xff]  ;;  %v10960_v9 = vand.u32 4294901760, %v10959_v63  ;;  %v10980_v21 = vsub.f32 %v21750_v1, %v21774_v36  ;;  %v21829_v63 = vsub.f32 %v10673_v47, %v21804_v31 }
0x1160   :  { %17210 = vmatprep.subr.mxu1 %v22546_v34  ;;  %17168 = vmatpush3.msra.mxu0 %v22937_v57  ;;  %v21768_v14 = vand.u32 4294901760, %v10676_v27  ;;  %v22943_v57 = vld [vmem:[#allocation42_spill] sm:$0xff] }
0x1161   :  { %17211 = vmatpush3.msra.mxu1 %v17976_v42  ;;  %17212 = vmatprep.mubr.msk.f32.mxu1 %vm17682_vm0, %v22546_v34  ;;  %v10953_v42 = vand.u32 4294901760, %v10952_v39  ;;  %v10670_v39 = vld [vmem:[#allocation3] sm:$0xff]  ;;  %v21850_v0 = vand.u32 4294901760, %v21829_v63 }
0x1162   :  { %17169 = vmatprep.subr.mxu0 %v22546_v34  ;;  %17213 = vmatmul.mubr.f32.vlgmr.msra.gmra.mxu1 %v21557_v32  ;;  %v21790_v5 = vsub.f32 %v10676_v27, %v21768_v14  ;;  %v10994_v27 = vsub.f32 %v21778_v59, %v21799_v26 }
0x1163   :  { %17271 = vmatprep.subr.mxu1 %v10939_v4  ;;  %17170 = vmatpush3.msra.mxu0 %v22938_v55  ;;  %v10988_v55 = vand.u32 4294901760, %v10987_v46 }
0x1164   :  { %17272 = vmatpush3.msra.mxu1 %v10939_v4  ;;  %17303 = vmatprep.mubr.f32.mxu1 %v22939_v49  ;;  %v21813_v2 = vand.u32 4294901760, %v21790_v5  ;;  %v21818_v4 = vand.u32 4294901760, %v10672_v24 }
0x1165   :  { %17171 = vmatprep.subr.mxu0 %v22546_v34  ;;  %17273 = vmatprep.subr.mxu1 %v10946_v61 }
0x1166   :  { %17172 = vmatpush3.msra.mxu0 %v22940_v40  ;;  %17274 = vmatpush3.msra.mxu1 %v10946_v61  ;;  %v21826_v61 = vand.u32 4294901760, %v21802_v30  ;;  %v21841_v56 = vsub.f32 %v10672_v24, %v21818_v4  ;;  %v10995_v40 = vand.u32 4294901760, %v10994_v27 }
0x1167   :  { %17173 = vmatprep.subr.mxu0 %v22546_v34  ;;  %17275 = vmatprep.subr.mxu1 %v10953_v42 }
0x1168   :  { %17174 = vmatpush3.msra.mxu0 %v22941_v11  ;;  %17276 = vmatpush3.msra.mxu1 %v10953_v42  ;;  %v11001_v42 = vsub.f32 %v21790_v5, %v21813_v2  ;;  %v11008_v47 = vsub.f32 %v21802_v30, %v21826_v61  ;;  %v21853_v11 = vsub.f32 %v10671_v48, %v21831_v35  ;;  %v21860_v24 = vand.u32 4294901760, %v21841_v56 }
0x1169   :  { %17175 = vmatprep.subr.mxu0 %v22546_v34  ;;  %17277 = vmatprep.subr.mxu1 %v10960_v9  ;;  %v11022_v48 = vsub.f32 %v21829_v63, %v21850_v0 }
0x116a   :  { %17176 = vmatpush3.msra.mxu0 %v22942_v37  ;;  %17177 = vmatprep.mubr.msk.f32.mxu0 %vm17682_vm0, %v22546_v34  ;;  %v10981_v34 = vand.u32 4294901760, %v10980_v21  ;;  %v11015_v21 = vsub.f32 %v21816_v15, %v21838_v41  ;;  %v11009_v46 = vand.u32 4294901760, %v11008_v47 }
0x116b   :  { %17278 = vmatpush3.msra.mxu1 %v10960_v9  ;;  %17178 = vmatmul.mubr.f32.vlgmr.msra.gmra.mxu0 %v21557_v32  ;;  %v21843_v9 = vand.u32 4294901760, %v10670_v39  ;;  %v11023_v27 = vand.u32 4294901760, %v11022_v48  ;;  %v22946_v48 = vld [vmem:[#allocation50_spill] sm:$0xff] }
0x116c   :  { %17215 = vmatprep.subr.mxu0 %v21660_v7  ;;  %17279 = vmatprep.subr.mxu1 %v10967_v13 }
0x116d   :  { %17216 = vmatpush3.msra.mxu0 %v21660_v7  ;;  %17247 = vmatprep.mubr.f32.mxu0 %v22943_v57  ;;  %v21863_v37 = vsub.f32 %v10670_v39, %v21843_v9  ;;  %v11029_v39 = vsub.f32 %v21841_v56, %v21860_v24 }
0x116e   :  { %17280 = vmatpush3.msra.mxu1 %v10967_v13  ;;  %17217 = vmatprep.subr.mxu0 %v21666_v12  ;;  %v11002_v13 = vand.u32 4294901760, %v11001_v42 }
0x116f   :  { %17281 = vmatprep.subr.mxu1 %v10974_v58  ;;  %17218 = vmatpush3.msra.mxu0 %v21666_v12  ;;  %v21877_v57 = vand.u32 4294901760, %v21863_v37  ;;  %v11030_v42 = vand.u32 4294901760, %v11029_v39  ;;  %v22948_v39 = vld [vmem:[#allocation45_spill] sm:$0xff] }
0x1170   :  { %17282 = vmatpush3.msra.mxu1 %v10974_v58  ;;  %17219 = vmatprep.subr.mxu0 %v21675_v17  ;;  %v21870_v58 = vand.u32 4294901760, %v21853_v11 }
0x1171   :  { %17283 = vmatprep.subr.mxu1 %v10981_v34  ;;  %17220 = vmatpush3.msra.mxu0 %v21675_v17 }
0x1172   :  { %17284 = vmatpush3.msra.mxu1 %v10981_v34  ;;  %17221 = vmatprep.subr.mxu0 %v21684_v19  ;;  %v11016_v34 = vand.u32 4294901760, %v11015_v21  ;;  %v22944_v21 = vld [vmem:[#allocation38_spill] sm:$0xff] }
0x1173   :  { %17285 = vmatprep.subr.mxu1 %v10988_v55  ;;  %17222 = vmatpush3.msra.mxu0 %v21684_v19 }
0x1174   :  { %17286 = vmatpush3.msra.mxu1 %v10988_v55  ;;  %17223 = vmatprep.subr.mxu0 %v21698_v25  ;;  %v11036_v55 = vsub.f32 %v21853_v11, %v21870_v58 }
0x1175   :  { %17287 = vmatprep.subr.mxu1 %v10995_v40  ;;  %17224 = vmatpush3.msra.mxu0 %v21698_v25 }
0x1176   :  { %17288 = vmatpush3.msra.mxu1 %v10995_v40  ;;  %17225 = vmatprep.subr.mxu0 %v21717_v43  ;;  %v11043_v40 = vsub.f32 %v21863_v37, %v21877_v57  ;;  %v11037_v47 = vand.u32 4294901760, %v11036_v55  ;;  %v22950_v55 = vld [vmem:[#allocation48_spill] sm:$0xff] }
0x1177   :  { %17289 = vmatprep.subr.mxu1 %v11002_v13  ;;  %17226 = vmatpush3.msra.mxu0 %v21717_v43 }
0x1178   :  { %17290 = vmatpush3.msra.mxu1 %v11002_v13  ;;  %17227 = vmatprep.subr.mxu0 %v21724_v51  ;;  %v11044_v13 = vand.u32 4294901760, %v11043_v40  ;;  %v22952_v40 = vld [vmem:[#allocation53_spill] sm:$0xff] }
0x1179   :  { %17291 = vmatprep.subr.mxu1 %v11009_v46  ;;  %17228 = vmatpush3.msra.mxu0 %v21724_v51 }
0x117a   :  { %17292 = vmatpush3.msra.mxu1 %v11009_v46  ;;  %17229 = vmatprep.subr.mxu0 %v21735_v8  ;;  %v22945_v46 = vld [vmem:[#allocation15_spill] sm:$0xff] }
0x117b   :  { %17293 = vmatprep.subr.mxu1 %v11016_v34  ;;  %17230 = vmatpush3.msra.mxu0 %v21735_v8 }
0x117c   :  { %17294 = vmatpush3.msra.mxu1 %v11016_v34  ;;  %17231 = vmatprep.subr.mxu0 %v21757_v44  ;;  %v22947_v34 = vld [vmem:[#allocation49_spill] sm:$0xff] }
0x117d   :  { %17295 = vmatprep.subr.mxu1 %v11023_v27  ;;  %17232 = vmatpush3.msra.mxu0 %v21757_v44 }
0x117e   :  { %17296 = vmatpush3.msra.mxu1 %v11023_v27  ;;  %17233 = vmatprep.subr.mxu0 %v21768_v14  ;;  %v22949_v27 = vld [vmem:[#allocation57_spill] sm:$0xff] }
0x117f   :  { %17297 = vmatprep.subr.mxu1 %v11030_v42  ;;  %17234 = vmatpush3.msra.mxu0 %v21768_v14 }
0x1180   :  { %17298 = vmatpush3.msra.mxu1 %v11030_v42  ;;  %17235 = vmatprep.subr.mxu0 %v21780_v53  ;;  %v22951_v42 = vld [vmem:[#allocation62_spill] sm:$0xff] }
0x1181   :  { %17299 = vmatprep.subr.mxu1 %v11037_v47  ;;  %17236 = vmatpush3.msra.mxu0 %v21780_v53 }
0x1182   :  { %17300 = vmatpush3.msra.mxu1 %v11037_v47  ;;  %17237 = vmatprep.subr.mxu0 %v21792_v6  ;;  %v22953_v47 = vld [vmem:[#allocation61_spill] sm:$0xff] }
0x1183   :  { %17301 = vmatprep.subr.mxu1 %v11044_v13  ;;  %17238 = vmatpush3.msra.mxu0 %v21792_v6 }
0x1184   :  { %17302 = vmatpush3.msra.mxu1 %v11044_v13  ;;  %17239 = vmatprep.subr.mxu0 %v21804_v31  ;;  %v22954_v13 = vld [vmem:[#allocation56_spill] sm:$0xff] }
0x1185   :  { %17304 = vmatmul.mubr.f32.vlgmr.msra.gmra.mxu1 %v22944_v21  ;;  %17240 = vmatpush3.msra.mxu0 %v21804_v31 }
0x1186   :  { %17306 = vmatprep.mubr.f32.mxu1 %v22945_v46  ;;  %17241 = vmatprep.subr.mxu0 %v21818_v4 }
0x1187   :  { %17242 = vmatpush3.msra.mxu0 %v21818_v4  ;;  %17383 = vmatprep.subr.mxu1 %v21660_v7 }
0x1188   :  { %17243 = vmatprep.subr.mxu0 %v21831_v35  ;;  %17384 = vmatpush3.msra.mxu1 %v21660_v7 }
0x1189   :  { %17307 = vmatmul.mubr.f32.gmra.mxu1 %v22946_v48  ;;  %17244 = vmatpush3.msra.mxu0 %v21831_v35 }
0x118a   :  { %17309 = vmatprep.mubr.f32.mxu1 %v22947_v34  ;;  %17245 = vmatprep.subr.mxu0 %v21843_v9 }
0x118b   :  { %17246 = vmatpush3.msra.mxu0 %v21843_v9  ;;  %17385 = vmatprep.subr.mxu1 %v21666_v12 }
0x118c   :  { %17248 = vmatmul.mubr.f32.vlgmr.msra.gmra.mxu0 %v22948_v39  ;;  %17386 = vmatpush3.msra.mxu1 %v21666_v12  ;;  %v22955_v39 = vld [vmem:[#allocation69_spill] sm:$0xff] }
0x118d   :  { %17310 = vmatmul.mubr.f32.gmra.mxu1 %v22949_v27  ;;  %17250 = vmatprep.mubr.f32.mxu0 %v22950_v55  ;;  %v22956_v55 = vld [vmem:[#allocation60_spill] sm:$0xff]  ;;  %v22959_v27 = vld [vmem:[#allocation73_spill] sm:$0xff] }
0x118e   :  { %17312 = vmatprep.mubr.f32.mxu1 %v22951_v42  ;;  %17387 = vmatprep.subr.mxu1 %v21675_v17  ;;  %v22957_v42 = vld [vmem:[#allocation74_spill] sm:$0xff] }
0x118f   :  { %17388 = vmatpush3.msra.mxu1 %v21675_v17  ;;  %17327 = vmatprep.subr.mxu0 %v21673_v16 }
0x1190   :  { %17251 = vmatmul.mubr.f32.gmra.mxu0 %v22952_v40  ;;  %17389 = vmatprep.subr.mxu1 %v21684_v19  ;;  %v22958_v40 = vld [vmem:[#allocation65_spill] sm:$0xff] }
0x1191   :  { %17313 = vmatmul.mubr.f32.gmra.mxu1 %v22953_v47  ;;  %17253 = vmatprep.mubr.f32.mxu0 %v22954_v13  ;;  %v22960_v13 = vld [vmem:[#allocation68_spill] sm:$0xff] }
0x1192   :  { %17315 = vmatprep.mubr.f32.mxu1 %v22955_v39  ;;  %17390 = vmatpush3.msra.mxu1 %v21684_v19  ;;  %v22963_v39 = vld [vmem:[#allocation86_spill] sm:$0xff] }
0x1193   :  { %17328 = vmatpush3.msra.mxu0 %v21673_v16  ;;  %17391 = vmatprep.subr.mxu1 %v21698_v25  ;;  %v22961_v16 = vld [vmem:[#allocation81_spill] sm:$0xff] }
0x1194   :  { %17254 = vmatmul.mubr.f32.gmra.mxu0 %v22956_v55  ;;  %17329 = vmatprep.subr.mxu0 %v21682_v18  ;;  %v22962_v55 = vld [vmem:[#allocation72_spill] sm:$0xff] }
0x1195   :  { %17316 = vmatmul.mubr.f32.gmra.mxu1 %v22957_v42  ;;  %17256 = vmatprep.mubr.f32.mxu0 %v22958_v40  ;;  %v22964_v40 = vld [vmem:[#allocation77_spill] sm:$0xff] }
0x1196   :  { %17318 = vmatprep.mubr.f32.mxu1 %v22959_v27  ;;  %17392 = vmatpush3.msra.mxu1 %v21698_v25 }
0x1197   :  { %17330 = vmatpush3.msra.mxu0 %v21682_v18  ;;  %17393 = vmatprep.subr.mxu1 %v21717_v43  ;;  %v22965_v18 = vld [vmem:[#allocation85_spill] sm:$0xff] }
0x1198   :  { %17257 = vmatmul.mubr.f32.gmra.mxu0 %v22960_v13  ;;  %17331 = vmatprep.subr.mxu0 %v21694_v23  ;;  %v22966_v13 = vld [vmem:[#allocation80_spill] sm:$0xff] }
0x1199   :  { %17319 = vmatmul.mubr.f32.gmra.mxu1 %v22961_v16  ;;  %17259 = vmatprep.mubr.f32.mxu0 %v22962_v55  ;;  %v22967_v55 = vld [vmem:[#allocation84_spill] sm:$0xff] }
0x119a   :  { %17321 = vmatprep.mubr.f32.mxu1 %v22963_v39  ;;  %17394 = vmatpush3.msra.mxu1 %v21717_v43 }
0x119b   :  { %17332 = vmatpush3.msra.mxu0 %v21694_v23  ;;  %17395 = vmatprep.subr.mxu1 %v21724_v51  ;;  %v22968_v23 = vld [vmem:[#allocation89_spill] sm:$0xff] }
0x119c   :  { %17260 = vmatmul.mubr.f32.gmra.mxu0 %v22964_v40  ;;  %17333 = vmatprep.subr.mxu0 %v21706_v29  ;;  %v22969_v40 = vld [vmem:[#allocation92_spill] sm:$0xff] }
0x119d   :  { %17322 = vmatmul.mubr.f32.gmra.mxu1 %v22965_v18  ;;  %17262 = vmatprep.mubr.f32.mxu0 %v22966_v13 }
0x119e   :  { %17324 = vmatprep.mubr.f32.mxu1 %v21557_v32  ;;  %17396 = vmatpush3.msra.mxu1 %v21724_v51 }
0x119f   :  { %17334 = vmatpush3.msra.mxu0 %v21706_v29  ;;  %17397 = vmatprep.subr.mxu1 %v21735_v8 }
0x11a0   :  { %17263 = vmatmul.mubr.f32.gmra.mxu0 %v22967_v55  ;;  %17335 = vmatprep.subr.mxu0 %v21722_v50  ;;  %v248_v55 = vpop.permute.xlu0 %247 }
0x11a1   :  { %17265 = vmatprep.mubr.f32.mxu0 %v22968_v23  ;;  %17398 = vmatpush3.msra.mxu1 %v21735_v8  ;;  %v17610_v23 = vld [vmem:[%s22339_s4] ss:$0 sm:$0xff] }
0x11a2   :  { %17336 = vmatpush3.msra.mxu0 %v21722_v50  ;;  %17399 = vmatprep.subr.mxu1 %v21757_v44 }
0x11a3   :  { %17337 = vmatprep.subr.mxu0 %v21742_v52  ;;  %17400 = vmatpush3.msra.mxu1 %v21757_v44 }
0x11a4   :  { %17266 = vmatmul.mubr.f32.gmra.mxu0 %v22969_v40  ;;  %17401 = vmatprep.subr.mxu1 %v21768_v14 }
0x11a5   :  { %17268 = vmatprep.mubr.f32.mxu0 %v21576_v54  ;;  %17338 = vmatpush3.msra.mxu0 %v21742_v52 }
0x11a6   :  { %17339 = vmatprep.subr.mxu0 %v21750_v1  ;;  %17402 = vmatpush3.msra.mxu1 %v21768_v14 }
0x11a7   :  { %17340 = vmatpush3.msra.mxu0 %v21750_v1  ;;  %17403 = vmatprep.subr.mxu1 %v21780_v53 }
0x11a8   :  { %17341 = vmatprep.subr.mxu0 %v21762_v60  ;;  %17404 = vmatpush3.msra.mxu1 %v21780_v53 }
0x11a9   :  { %17342 = vmatpush3.msra.mxu0 %v21762_v60  ;;  %17405 = vmatprep.subr.mxu1 %v21792_v6 }
0x11aa   :  { %17343 = vmatprep.subr.mxu0 %v21778_v59  ;;  %17406 = vmatpush3.msra.mxu1 %v21792_v6 }
0x11ab   :  { %17344 = vmatpush3.msra.mxu0 %v21778_v59  ;;  %17407 = vmatprep.subr.mxu1 %v21804_v31 }
0x11ac   :  { %17345 = vmatprep.subr.mxu0 %v21790_v5  ;;  %17408 = vmatpush3.msra.mxu1 %v21804_v31 }
0x11ad   :  { %17346 = vmatpush3.msra.mxu0 %v21790_v5  ;;  %17409 = vmatprep.subr.mxu1 %v21818_v4 }
0x11ae   :  { %17347 = vmatprep.subr.mxu0 %v21802_v30  ;;  %17410 = vmatpush3.msra.mxu1 %v21818_v4 }
0x11af   :  { %17348 = vmatpush3.msra.mxu0 %v21802_v30  ;;  %17411 = vmatprep.subr.mxu1 %v21831_v35 }
0x11b0   :  { %17349 = vmatprep.subr.mxu0 %v21816_v15  ;;  %17412 = vmatpush3.msra.mxu1 %v21831_v35 }
0x11b1   :  { %17350 = vmatpush3.msra.mxu0 %v21816_v15  ;;  %17413 = vmatprep.subr.mxu1 %v21843_v9  ;;  %v147_v15 = vpop.permute.xlu1 %146 }
0x11b2   :  { %17351 = vmatprep.subr.mxu0 %v21829_v63  ;;  %17414 = vmatpush3.msra.mxu1 %v21843_v9 }
0x11b3   :  { %17352 = vmatpush3.msra.mxu0 %v21829_v63  ;;  %17495 = vmatprep.subr.mxu1 %v21660_v7 }
0x11b4   :  { %17353 = vmatprep.subr.mxu0 %v21841_v56 }
0x11b5   :  { %17354 = vmatpush3.msra.mxu0 %v21841_v56 }
0x11b6   :  { %17355 = vmatprep.subr.mxu0 %v21853_v11 }
0x11b7   :  { %17356 = vmatpush3.msra.mxu0 %v21853_v11  ;;  %v17609_v11 = vld [vmem:[%s22337_s2] ss:$0 sm:$0xff] }
0x11b8   :  { %17357 = vmatprep.subr.mxu0 %v21863_v37  ;;  %v168_v13 = vmul.f32 %v17609_v11, %v147_v15  ;;  %v22970_v11 = vld [vmem:[#allocation41_spill] sm:$0xff] }
0x11b9   :  { %17358 = vmatpush3.msra.mxu0 %v21863_v37 }
0x11ba   :  { %17439 = vmatprep.subr.mxu0 %v21691_v22  ;;  %v184_v40 = vadd.f32 %v17610_v23, %v168_v13  ;;  %v22971_v13 = vld [vmem:[#allocation44_spill] sm:$0xff]  ;;  %v22975_v23 = vld [vmem:[#allocation55_spill] sm:$0xff] }
0x11e0   :  { %v10248_v54 = vpop.f32.mrf.mxu1 }
0x11e2   :  { %v17074_v29 = vpop.f32.mrf.mxu1 }
0x11e3   :  { %v17611_v29 = vld [vmem:[%s22337_s2 + $0x1] ss:$0 sm:$0xff]  ;;  %s17685_s2 = smov [#allocation7]  }
0x11e4   :  { %s12014_s4 = sshll.u32 %s17685_s2, 4  ;;  %s12015_s4 = int_to_ptr.vmem [resolvable:$true] %s12014_s4 }
0x11e5   :  { %s17632_s21 = scalar_lea.vmem %s12015_s4, 128  ;;  %p17637_p6 = scmp.lt.s32.totalorder %s12015_s4, %s12015_s4 }
0x11e6   :  { %p17633_p5 = scmp.ne.s32.totalorder %s12015_s4, %s17632_s21  ;;  %p17638_p7 = scmp.lt.s32.totalorder %s17632_s21, %s17632_s21 }
0x11e8   :  { %v10097_v50 = vpop.f32.mrf.mxu0  ;;  %p17639_p8 = por %p17638_p7, %p17637_p6 }
0x11e9   :  { %v10249_v63 = vadd.f32 %v10248_v54, %v10097_v50 }
0x11ea   :  { %v17039_v52 = vpop.f32.mrf.mxu0  ;;  %p17640_p9 = pnand %p17639_p8, %p17633_p5 }
0x11eb   :  { %v269_v52 = vmul.f32 %v17611_v29, %v248_v55  ;;  %v22974_v55 = vld [vmem:[#allocation40_spill] sm:$0xff] }
0x11ec   :  { %v22979_v29 = vld [vmem:[#allocation64_spill] sm:$0xff] }
0x1200   :  { %v10441_v1 = vpop.f32.mrf.mxu1 }
0x1202   :  { %v17144_v60 = vpop.f32.mrf.mxu1 }
0x1209   :  { %v10352_v59 = vpop.f32.mrf.mxu0 }
0x120a   :  { %v10353_v37 = vadd.f32 %v10352_v59, %v10249_v63 }
0x120b   :  { %v17109_v5 = vpop.f32.mrf.mxu0 }
0x120c   :  { %v10442_v60 = vadd.f32 %v10441_v1, %v10353_v37  ;;  %v22973_v37 = vld [vmem:[#allocation52_spill] sm:$0xff] }
0x1222   :  { %v10647_v30 = vpop.f32.mrf.mxu1 }
0x1224   :  { %v17214_v56 = vpop.f32.mrf.mxu1 }
0x1225   :  { %v285_v56 = vadd.f32 %v269_v52, %v184_v40  ;;  %v22977_v40 = vld [vmem:[#allocation59_spill] sm:$0xff] }
0x1226   :  { %v22983_v52 = vld [vmem:[#allocation71_spill] sm:$0xff] }
0x122b   :  { %v10560_v54 = vpop.f32.mrf.mxu0 }
0x122c   :  { %v10561_v50 = vadd.f32 %v10560_v54, %v10442_v60 }
0x122d   :  { %v17179_v5 = vpop.f32.mrf.mxu0 }
0x122e   :  { %v10648_v32 = vadd.f32 %v10647_v30, %v10561_v50 }
0x1230   :  { %v10651_v18 = vadd.f32 %v10648_v32, %v285_v56 }
0x1232   :  { %17595 = vtanh.f32 %v10651_v18  ;;  %v22972_v18 = vld [vmem:[#allocation47_spill] sm:$0xff] }
0x123f   :  { %v17596_v59 = vpop.eup %17595 }
0x1240   :  { %11995 = vst [vmem:[#allocation7] sm:$0xff] %v17596_v59  ;;  %v22006_v15 = vand.u32 4294901760, %v17596_v59 }
0x1242   :  { %17325 = vmatmul.mubr.f32.gmra.mxu1 %v22006_v15  ;;  %v22010_v63 = vsub.f32 %v17596_v59, %v22006_v15 }
0x1243   :  { %17415 = vmatprep.mubr.f32.mxu1 %v22970_v11 }
0x1244   :  { %v10926_v1 = vand.u32 4294901760, %v22010_v63 }
0x1246   :  { %17416 = vmatmul.mubr.f32.vlgmr.msra.gmra.mxu1 %v22971_v13  ;;  %v10927_v32 = vsub.f32 %v22010_v63, %v10926_v1 }
0x1247   :  { %17418 = vmatprep.mubr.f32.mxu1 %v22972_v18  ;;  %17496 = vmatpush3.msra.mxu1 %v21660_v7  ;;  %v22976_v7 = vld [vmem:[#allocation43_spill] sm:$0xff] }
0x1248   :  { %17497 = vmatprep.subr.mxu1 %v21666_v12  ;;  %v10928_v30 = vand.u32 4294901760, %v10927_v32 }
0x1249   :  { %17498 = vmatpush3.msra.mxu1 %v21666_v12  ;;  %v22978_v12 = vld [vmem:[#allocation46_spill] sm:$0xff] }
0x124a   :  { %17269 = vmatmul.mubr.f32.gmra.mxu0 %v10928_v30  ;;  %17419 = vmatmul.mubr.f32.gmra.mxu1 %v22973_v37 }
0x124b   :  { %17499 = vmatprep.subr.mxu1 %v21675_v17  ;;  %17359 = vmatprep.mubr.f32.mxu0 %v22974_v55 }
0x124c   :  { %17421 = vmatprep.mubr.f32.mxu1 %v22975_v23  ;;  %17500 = vmatpush3.msra.mxu1 %v21675_v17  ;;  %v22980_v17 = vld [vmem:[#allocation51_spill] sm:$0xff] }
0x124d   :  { %17501 = vmatprep.subr.mxu1 %v21684_v19 }
0x124e   :  { %17502 = vmatpush3.msra.mxu1 %v21684_v19  ;;  %17360 = vmatmul.mubr.f32.vlgmr.msra.gmra.mxu0 %v22976_v7  ;;  %v22981_v19 = vld [vmem:[#allocation67_spill] sm:$0xff] }
0x124f   :  { %17422 = vmatmul.mubr.f32.gmra.mxu1 %v22977_v40  ;;  %17440 = vmatpush3.msra.mxu0 %v21691_v22  ;;  %v22982_v22 = vld [vmem:[#allocation54_spill] sm:$0xff] }
0x1250   :  { %17503 = vmatprep.subr.mxu1 %v21698_v25  ;;  %17362 = vmatprep.mubr.f32.mxu0 %v22978_v12 }
0x1251   :  { %17424 = vmatprep.mubr.f32.mxu1 %v22979_v29  ;;  %17441 = vmatprep.subr.mxu0 %v21703_v28 }
0x1252   :  { %17504 = vmatpush3.msra.mxu1 %v21698_v25  ;;  %17442 = vmatpush3.msra.mxu0 %v21703_v28  ;;  %v22984_v25 = vld [vmem:[#allocation58_spill] sm:$0xff]  ;;  %v22985_v28 = vld [vmem:[#allocation76_spill] sm:$0xff] }
0x1253   :  { %17505 = vmatprep.subr.mxu1 %v21717_v43  ;;  %17443 = vmatprep.subr.mxu0 %v21715_v38 }
0x1254   :  { %17506 = vmatpush3.msra.mxu1 %v21717_v43  ;;  %17363 = vmatmul.mubr.f32.gmra.mxu0 %v22980_v17  ;;  %v22987_v43 = vld [vmem:[#allocation79_spill] sm:$0xff] }
0x1255   :  { %17425 = vmatmul.mubr.f32.gmra.mxu1 %v22981_v19  ;;  %17444 = vmatpush3.msra.mxu0 %v21715_v38  ;;  %v22986_v38 = vld [vmem:[#allocation63_spill] sm:$0xff] }
0x1256   :  { %17507 = vmatprep.subr.mxu1 %v21724_v51  ;;  %17365 = vmatprep.mubr.f32.mxu0 %v22982_v22 }
0x1257   :  { %17427 = vmatprep.mubr.f32.mxu1 %v22983_v52  ;;  %17445 = vmatprep.subr.mxu0 %v21731_v62 }
0x1258   :  { %17508 = vmatpush3.msra.mxu1 %v21724_v51  ;;  %17446 = vmatpush3.msra.mxu0 %v21731_v62  ;;  %v22988_v51 = vld [vmem:[#allocation66_spill] sm:$0xff]  ;;  %v22989_v62 = vld [vmem:[#allocation83_spill] sm:$0xff] }
0x1259   :  { %17509 = vmatprep.subr.mxu1 %v21735_v8  ;;  %17447 = vmatprep.subr.mxu0 %v21747_v10 }
0x125a   :  { %17510 = vmatpush3.msra.mxu1 %v21735_v8  ;;  %17366 = vmatmul.mubr.f32.gmra.mxu0 %v22984_v25  ;;  %v22990_v8 = vld [vmem:[#allocation70_spill] sm:$0xff] }
0x125b   :  { %17428 = vmatmul.mubr.f32.gmra.mxu1 %v22985_v28  ;;  %17448 = vmatpush3.msra.mxu0 %v21747_v10  ;;  %v22991_v10 = vld [vmem:[#allocation88_spill] sm:$0xff] }
0x125c   :  { %17511 = vmatprep.subr.mxu1 %v21757_v44  ;;  %17368 = vmatprep.mubr.f32.mxu0 %v22986_v38 }
0x125d   :  { %17430 = vmatprep.mubr.f32.mxu1 %v22987_v43  ;;  %17449 = vmatprep.subr.mxu0 %v21766_v3 }
0x125e   :  { %17512 = vmatpush3.msra.mxu1 %v21757_v44  ;;  %17450 = vmatpush3.msra.mxu0 %v21766_v3  ;;  %v22992_v44 = vld [vmem:[#allocation75_spill] sm:$0xff] }
0x125f   :  { %17513 = vmatprep.subr.mxu1 %v21768_v14  ;;  %17451 = vmatprep.subr.mxu0 %v21774_v36  ;;  %v22993_v3 = vld [vmem:[#allocation91_spill] sm:$0xff] }
0x1260   :  { %17514 = vmatpush3.msra.mxu1 %v21768_v14  ;;  %17369 = vmatmul.mubr.f32.gmra.mxu0 %v22988_v51  ;;  %v22994_v14 = vld [vmem:[#allocation78_spill] sm:$0xff] }
0x1261   :  { %17431 = vmatmul.mubr.f32.gmra.mxu1 %v22989_v62  ;;  %17452 = vmatpush3.msra.mxu0 %v21774_v36  ;;  %v22995_v36 = vld [vmem:[#allocation82_spill] sm:$0xff] }
0x1262   :  { %17515 = vmatprep.subr.mxu1 %v21780_v53  ;;  %17371 = vmatprep.mubr.f32.mxu0 %v22990_v8 }
0x1263   :  { %17433 = vmatprep.mubr.f32.mxu1 %v22991_v10  ;;  %17453 = vmatprep.subr.mxu0 %v21784_v45 }
0x1264   :  { %17516 = vmatpush3.msra.mxu1 %v21780_v53  ;;  %17454 = vmatpush3.msra.mxu0 %v21784_v45  ;;  %v22997_v53 = vld [vmem:[#allocation90_spill] sm:$0xff] }
0x1265   :  { %17517 = vmatprep.subr.mxu1 %v21792_v6  ;;  %17455 = vmatprep.subr.mxu0 %v21799_v26  ;;  %v22999_v45 = vld [vmem:[#allocation62_spill] sm:$0xff] }
0x1266   :  { %17518 = vmatpush3.msra.mxu1 %v21792_v6  ;;  %17372 = vmatmul.mubr.f32.gmra.mxu0 %v22992_v44  ;;  %v23000_v6 = vld [vmem:[#allocation69_spill] sm:$0xff] }
0x1267   :  { %17434 = vmatmul.mubr.f32.gmra.mxu1 %v22993_v3  ;;  %17456 = vmatpush3.msra.mxu0 %v21799_v26  ;;  %v23002_v26 = vld [vmem:[#allocation12_spill] sm:$0xff] }
0x1268   :  { %17519 = vmatprep.subr.mxu1 %v21804_v31  ;;  %17374 = vmatprep.mubr.f32.mxu0 %v22994_v14 }
0x1269   :  { %17436 = vmatprep.mubr.f32.mxu1 %v21568_v20  ;;  %17457 = vmatprep.subr.mxu0 %v21813_v2  ;;  %v22996_v20 = vld [vmem:[#allocation87_spill] sm:$0xff] }
0x126a   :  { %17520 = vmatpush3.msra.mxu1 %v21804_v31  ;;  %17458 = vmatpush3.msra.mxu0 %v21813_v2  ;;  %v22143_v31 = vpop.f32.mrf.mxu1 }
0x126b   :  { %17521 = vmatprep.subr.mxu1 %v21818_v4  ;;  %17459 = vmatprep.subr.mxu0 %v21826_v61 }
0x126c   :  { %17522 = vmatpush3.msra.mxu1 %v21818_v4  ;;  %17375 = vmatmul.mubr.f32.gmra.mxu0 %v22995_v36  ;;  %v22145_v2 = vpop.f32.mrf.mxu1 }
0x126d   :  { %17437 = vmatmul.mubr.f32.gmra.mxu1 %v10926_v1  ;;  %17460 = vmatpush3.msra.mxu0 %v21826_v61  ;;  %v22149_v61 = vpop.f32.mrf.mxu0 }
0x126e   :  { %17523 = vmatprep.subr.mxu1 %v21831_v35  ;;  %17377 = vmatprep.mubr.f32.mxu0 %v22996_v20  ;;  %v22147_v4 = vpop.f32.mrf.mxu1 }
0x126f   :  { %17461 = vmatprep.subr.mxu0 %v21838_v41  ;;  %17524 = vmatpush3.msra.mxu1 %v21831_v35 }
0x1270   :  { %17527 = vmatprep.mubr.f32.mxu1 %v22939_v49  ;;  %17462 = vmatpush3.msra.mxu0 %v21838_v41  ;;  %v22151_v35 = vpop.f32.mrf.mxu1  ;;  %v22153_v41 = vpop.f32.mrf.mxu0 }
0x1271   :  { %17525 = vmatprep.subr.mxu1 %v21843_v9  ;;  %17463 = vmatprep.subr.mxu0 %v21850_v0 }
0x1272   :  { %17526 = vmatpush3.msra.mxu1 %v21843_v9  ;;  %17378 = vmatmul.mubr.f32.gmra.mxu0 %v22997_v53  ;;  %v22155_v9 = vpop.f32.mrf.mxu1 }
0x1273   :  { %17464 = vmatpush3.msra.mxu0 %v21850_v0  ;;  %17528 = vmatmul.mubr.f32.vlgmr.msra.gmra.mxu1 %v22944_v21  ;;  %v22157_v0 = vpop.f32.mrf.mxu0 }
0x1274   :  { %17380 = vmatprep.mubr.f32.mxu0 %v21561_v33  ;;  %17465 = vmatprep.subr.mxu0 %v21860_v24  ;;  %v22998_v33 = vld [vmem:[#allocation57_spill] sm:$0xff] }
0x1275   :  { %17530 = vmatprep.mubr.f32.mxu1 %v22945_v46  ;;  %17466 = vmatpush3.msra.mxu0 %v21860_v24  ;;  %v22159_v24 = vpop.f32.mrf.mxu1 }
0x1276   :  { %17467 = vmatprep.subr.mxu0 %v21870_v58  ;;  %17381 = vmatmul.mubr.f32.gmra.mxu0 %v22010_v63 }
0x1277   :  { %17468 = vmatpush3.msra.mxu0 %v21870_v58  ;;  %17531 = vmatmul.mubr.f32.gmra.mxu1 %v22946_v48  ;;  %v22161_v58 = vpop.f32.mrf.mxu0 }
0x1278   :  { %17469 = vmatprep.subr.mxu0 %v21877_v57  ;;  %17471 = vmatprep.mubr.f32.mxu0 %v22939_v49  ;;  %v23001_v49 = vld [vmem:[#allocation85_spill] sm:$0xff] }
0x1279   :  { %17533 = vmatprep.mubr.f32.mxu1 %v22947_v34  ;;  %17470 = vmatpush3.msra.mxu0 %v21877_v57 }
0x127a   :  { %17472 = vmatmul.mubr.f32.vlgmr.msra.gmra.mxu0 %v22944_v21 }
0x127b   :  { %17534 = vmatmul.mubr.f32.gmra.mxu1 %v22998_v33  ;;  %17474 = vmatprep.mubr.f32.mxu0 %v22945_v46 }
0x127c   :  { %17536 = vmatprep.mubr.f32.mxu1 %v22999_v45 }
0x127e   :  { %17475 = vmatmul.mubr.f32.gmra.mxu0 %v22946_v48 }
0x127f   :  { %17537 = vmatmul.mubr.f32.gmra.mxu1 %v22953_v47  ;;  %17477 = vmatprep.mubr.f32.mxu0 %v22947_v34 }
0x1280   :  { %17539 = vmatprep.mubr.f32.mxu1 %v23000_v6 }
0x1282   :  { %17478 = vmatmul.mubr.f32.gmra.mxu0 %v22998_v33 }
0x1283   :  { %17540 = vmatmul.mubr.f32.gmra.mxu1 %v22957_v42  ;;  %17480 = vmatprep.mubr.f32.mxu0 %v22999_v45 }
0x1284   :  { %17542 = vmatprep.mubr.f32.mxu1 %v22959_v27 }
0x1286   :  { %17481 = vmatmul.mubr.f32.gmra.mxu0 %v22953_v47 }
0x1287   :  { %17543 = vmatmul.mubr.f32.gmra.mxu1 %v22961_v16  ;;  %17483 = vmatprep.mubr.f32.mxu0 %v23000_v6 }
0x1288   :  { %17545 = vmatprep.mubr.f32.mxu1 %v22963_v39 }
0x128a   :  { %17484 = vmatmul.mubr.f32.gmra.mxu0 %v22957_v42 }
0x128b   :  { %17546 = vmatmul.mubr.f32.gmra.mxu1 %v23001_v49  ;;  %17486 = vmatprep.mubr.f32.mxu0 %v22959_v27 }
0x128c   :  { %17548 = vmatprep.mubr.f32.mxu1 %v23002_v26 }
0x128e   :  { %17487 = vmatmul.mubr.f32.gmra.mxu0 %v22961_v16 }
0x128f   :  { %17549 = vmatmul.mubr.f32.gmra.mxu1 %v22006_v15  ;;  %17489 = vmatprep.mubr.f32.mxu0 %v22963_v39 }
0x1292   :  { %17490 = vmatmul.mubr.f32.gmra.mxu0 %v23001_v49 }
0x1293   :  { %17492 = vmatprep.mubr.f32.mxu0 %v23002_v26 }
0x1296   :  { %17493 = vmatmul.mubr.f32.gmra.mxu0 %v22006_v15 }
0x1297   :  { %17643 = shalt.err (!%p17640_p9)
}
0x1298   :  { %12017 = dma.vmem_to_hbm [thread:$0]  %s12015_s4, 128, %s22343_s8, [#allocation8]   ;;  %v22166_v57 = vpop.f32.mrf.mxu1  ;;  %v17255_v21 = vpop.f32.mrf.mxu0  ;;  %v22241_v36 = vld [vmem:[%s22341_s6] ss:$0 sm:$0xff] }
0x1299   :  { %v10791_v45 = vadd.f32 %v22149_v61, %v22241_v36  ;;  %v10781_v49 = vadd.f32 %v22241_v36, %v22153_v41  ;;  %v10831_v41 = vadd.f32 %v17255_v21, %v22241_v36  ;;  %s17686_s6 = smov [#allocation6]  }
0x129a   :  { %v22168_v46 = vpop.f32.mrf.mxu1  ;;  %v22170_v48 = vpop.f32.mrf.mxu0  ;;  %s12001_s24 = sshll.u32 %s17686_s6, 4  ;;  %s12002_s24 = int_to_ptr.vmem [resolvable:$true] %s12001_s24 }
0x129b   :  { %v11082_v61 = vadd.f32 %v22145_v2, %v10781_v49  ;;  %v11112_v21 = vadd.f32 %v22155_v9, %v10831_v41  ;;  %s17652_s25 = scalar_lea.vmem %s12002_s24, 2048  ;;  %p17657_p11 = scmp.lt.s32.totalorder %s12002_s24, %s12002_s24 }
0x129c   :  { %v22172_v34 = vpop.f32.mrf.mxu1  ;;  %v22174_v27 = vpop.f32.mrf.mxu0  ;;  %p17653_p10 = scmp.ne.s32.totalorder %s12002_s24, %s17652_s25  ;;  %p17658_p12 = scmp.lt.s32.totalorder %s17652_s25, %s17652_s25 }
0x129d   :  { %v10851_v2 = vadd.f32 %v22174_v27, %v22241_v36 }
0x129e   :  { %v22176_v42 = vpop.f32.mrf.mxu1  ;;  %v22178_v47 = vpop.f32.mrf.mxu0  ;;  %p17659_p13 = por %p17658_p12, %p17657_p11 }
0x129f   :  { %v11124_v9 = vadd.f32 %v22166_v57, %v10851_v2 }
0x12a0   :  { %v22180_v39 = vpop.f32.mrf.mxu1  ;;  %v22182_v16 = vpop.f32.mrf.mxu0  ;;  %p17660_p0 = pnand %p17659_p13, %p17653_p10 }
0x12a1   :  { %v10871_v27 = vadd.f32 %v22182_v16, %v22241_v36 }
0x12a2   :  { %v22184_v60 = vpop.f32.mrf.mxu1  ;;  %v22186_v54 = vpop.f32.mrf.mxu0 }
0x12a4   :  { %v22188_v50 = vpop.f32.mrf.mxu1  ;;  %v22190_v5 = vpop.f32.mrf.mxu0 }
0x12a6   :  { %v22192_v56 = vpop.f32.mrf.mxu1  ;;  %v22194_v59 = vpop.f32.mrf.mxu0 }
0x12a7   :  { %23003 = vst [vmem:[#allocation13_spill] sm:$0xff] %v22192_v56 }
0x12a8   :  { %v22198_v63 = vpop.f32.mrf.mxu0 }
0x12aa   :  { %v22202_v13 = vpop.f32.mrf.mxu0 }
0x1302   :  { %v22196_v15 = vpop.f32.mrf.mxu1 }
0x1303   :  { %23004 = vst [vmem:[#allocation14_spill] sm:$0xff] %v22196_v15 }
0x1304   :  { %v22200_v11 = vpop.f32.mrf.mxu1 }
0x1305   :  { %23005 = vst [vmem:[#allocation16_spill] sm:$0xff] %v22200_v11 }
0x1306   :  { %v17417_v1 = vpop.f32.mrf.mxu1 }
0x1308   :  { %v11469_v32 = vpop.f32.mrf.mxu1 }
0x130a   :  { %v22204_v18 = vpop.f32.mrf.mxu0  ;;  %v22206_v30 = vpop.f32.mrf.mxu1 }
0x130c   :  { %v22208_v37 = vpop.f32.mrf.mxu0  ;;  %v22210_v55 = vpop.f32.mrf.mxu1 }
0x130e   :  { %v17361_v23 = vpop.f32.mrf.mxu0 }
0x130f   :  { %v22212_v7 = vpop.f32.mrf.mxu1 }
0x1310   :  { %v11275_v40 = vpop.f32.mrf.mxu0 }
0x1311   :  { %v22214_v12 = vpop.f32.mrf.mxu1 }
0x1314   :  { %v17364_v29 = vpop.f32.mrf.mxu0 }
0x1315   :  { %v22216_v17 = vpop.f32.mrf.mxu1 }
0x1316   :  { %v11289_v19 = vpop.f32.mrf.mxu0 }
0x1317   :  { %v22218_v22 = vpop.f32.mrf.mxu1 }
0x131a   :  { %v17367_v52 = vpop.f32.mrf.mxu0 }
0x131b   :  { %v22220_v25 = vpop.f32.mrf.mxu1 }
0x131c   :  { %v11303_v28 = vpop.f32.mrf.mxu0 }
0x131d   :  { %v22222_v38 = vpop.f32.mrf.mxu1 }
0x1320   :  { %v17370_v43 = vpop.f32.mrf.mxu0 }
0x1321   :  { %v22224_v51 = vpop.f32.mrf.mxu1 }
0x1322   :  { %23006 = vst [vmem:[#allocation18_spill] sm:$0xff] %v22224_v51  ;;  %v22226_v62 = vpop.f32.mrf.mxu0 }
0x1323   :  { %v22228_v8 = vpop.f32.mrf.mxu1 }
0x1324   :  { %23007 = vst [vmem:[#allocation20_spill] sm:$0xff] %v22228_v8 }
0x1326   :  { %v22230_v10 = vpop.f32.mrf.mxu0 }
0x1327   :  { %v22232_v44 = vpop.f32.mrf.mxu1 }
0x1328   :  { %23008 = vst [vmem:[#allocation22_spill] sm:$0xff] %v22232_v44  ;;  %v22234_v3 = vpop.f32.mrf.mxu0  ;;  %v11088_v44 = vadd.f32 %v22143_v31, %v10791_v45  ;;  %v10821_v31 = vadd.f32 %v22241_v36, %v22170_v48  ;;  %v10841_v48 = vadd.f32 %v22241_v36, %v22178_v47 }
0x1329   :  { %v22236_v14 = vpop.f32.mrf.mxu1 }
0x132a   :  { %23009 = vst [vmem:[#allocation24_spill] sm:$0xff] %v22236_v14  ;;  %v10811_v14 = vadd.f32 %v22157_v0, %v22241_v36  ;;  %v11283_v15 = vadd.f32 %v17361_v23, %v11088_v44 }
0x132c   :  { %v22243_v20 = vpop.f32.mrf.mxu0  ;;  %v11100_v56 = vadd.f32 %v22147_v4, %v10811_v14  ;;  %v11478_v44 = vadd.f32 %v17417_v1, %v11283_v15 }
0x132d   :  { %v22245_v53 = vpop.f32.mrf.mxu1 }
0x132e   :  { %23010 = vst [vmem:[#allocation26_spill] sm:$0xff] %v22245_v53  ;;  %v22247_v33 = vpop.f32.mrf.mxu0  ;;  %v10801_v53 = vadd.f32 %v22241_v36, %v22161_v58 }
0x132f   :  { %v22251_v6 = vpop.f32.mrf.mxu1 }
0x1330   :  { %23011 = vst [vmem:[#allocation28_spill] sm:$0xff] %v22251_v6  ;;  %v11094_v58 = vadd.f32 %v22151_v35, %v10801_v53 }
0x1332   :  { %v22255_v26 = vpop.f32.mrf.mxu0 }
0x1333   :  { %23012 = vst [vmem:[#allocation30_spill] sm:$0xff] %v22255_v26  ;;  %v17529_v11 = vpop.f32.mrf.mxu1  ;;  %v11276_v26 = vadd.f32 %v11275_v40, %v11082_v61  ;;  %v11106_v61 = vadd.f32 %v22159_v24, %v10821_v31 }
0x1334   :  { %v22260_v8 = vpop.f32.mrf.mxu0 }
0x1335   :  { %23013 = vst [vmem:[#allocation32_spill] sm:$0xff] %v22260_v8  ;;  %v11885_v6 = vpop.f32.mrf.mxu1  ;;  %v11297_v8 = vadd.f32 %v17364_v29, %v11100_v56  ;;  %v11470_v14 = vadd.f32 %v11469_v32, %v11276_v26  ;;  %v11311_v29 = vadd.f32 %v17367_v52, %v11112_v21  ;;  %v11304_v41 = vadd.f32 %v11303_v28, %v11106_v61 }
0x1336   :  { %v22265_v51 = vpop.f32.mrf.mxu0  ;;  %v11118_v52 = vadd.f32 %v22168_v46, %v10841_v48  ;;  %v10891_v28 = vadd.f32 %v22190_v5, %v22241_v36 }
0x1337   :  { %23014 = vst [vmem:[#allocation34_spill] sm:$0xff] %v22265_v51  ;;  %v17532_v0 = vpop.f32.mrf.mxu1  ;;  %v11290_v51 = vadd.f32 %v11289_v19, %v11094_v58  ;;  %v11494_v1 = vadd.f32 %v22206_v30, %v11297_v8  ;;  %v11325_v30 = vadd.f32 %v17370_v43, %v11124_v9  ;;  %v11510_v57 = vadd.f32 %v22212_v7, %v11311_v29 }
0x1338   :  { %v22271_v45 = vpop.f32.mrf.mxu0  ;;  %v11502_v43 = vadd.f32 %v22214_v12, %v11304_v41 }
0x1339   :  { %v11897_v23 = vpop.f32.mrf.mxu1  ;;  %v11486_v24 = vadd.f32 %v22210_v55, %v11290_v51  ;;  %v11318_v55 = vadd.f32 %v22226_v62, %v11118_v52  ;;  %v11526_v62 = vadd.f32 %v22216_v17, %v11325_v30 }
0x133a   :  { %v17473_v49 = vpop.f32.mrf.mxu0 }
0x133b   :  { %v11715_v40 = vadd.f32 %v17473_v49, %v11478_v44  ;;  %v17535_v4 = vpop.f32.mrf.mxu1 }
0x133c   :  { %v11708_v56 = vpop.f32.mrf.mxu0  ;;  %v23019_v52 = vld [vmem:[#allocation32_spill] sm:$0xff] }
0x133d   :  { %v11892_v35 = vadd.f32 %v17529_v11, %v11715_v40  ;;  %v11709_v53 = vadd.f32 %v11708_v56, %v11470_v14  ;;  %v11909_v15 = vpop.f32.mrf.mxu1  ;;  %v10861_v11 = vadd.f32 %v22241_v36, %v22186_v54  ;;  %v11148_v40 = vadd.f32 %v22180_v39, %v10891_v28 }
0x133e   :  { %v17476_v19 = vpop.f32.mrf.mxu0 }
0x133f   :  { %11980 = vst [vmem:[#allocation6 + $0x8] sm:$0xff] %v11892_v35  ;;  %v11886_v32 = vadd.f32 %v11885_v6, %v11709_v53  ;;  %v11727_v26 = vadd.f32 %v17476_v19, %v11494_v1  ;;  %v17538_v47 = vpop.f32.mrf.mxu1  ;;  %v11136_v6 = vadd.f32 %v22172_v34, %v10871_v27  ;;  %v11130_v2 = vadd.f32 %v22176_v42, %v10861_v11  ;;  %v23015_v27 = vld [vmem:[#allocation13_spill] sm:$0xff]  ;;  %v23016_v19 = vld [vmem:[#allocation30_spill] sm:$0xff] }
0x1340   :  { %v11720_v31 = vpop.f32.mrf.mxu0  ;;  %v11353_v56 = vadd.f32 %v22243_v20, %v11148_v40  ;;  %v10921_v20 = vadd.f32 %v22241_v36, %v22208_v37  ;;  %v23020_v37 = vld [vmem:[#allocation20_spill] sm:$0xff] }
0x1341   :  { %11979 = vst [vmem:[#allocation6] sm:$0xff] %v11886_v32  ;;  %v11904_v8 = vadd.f32 %v17532_v0, %v11727_v26  ;;  %v11721_v16 = vadd.f32 %v11720_v31, %v11486_v24  ;;  %v11921_v58 = vpop.f32.mrf.mxu1  ;;  %v10881_v0 = vadd.f32 %v22241_v36, %v22194_v59  ;;  %v11339_v49 = vadd.f32 %v22230_v10, %v11136_v6  ;;  %v23017_v32 = vld [vmem:[#allocation18_spill] sm:$0xff] }
0x1342   :  { %v17479_v44 = vpop.f32.mrf.mxu0  ;;  %v11332_v14 = vadd.f32 %v22234_v3, %v11130_v2  ;;  %v11518_v10 = vadd.f32 %v22218_v22, %v11318_v55  ;;  %v10931_v3 = vadd.f32 %v22204_v18, %v22241_v36  ;;  %v11558_v26 = vadd.f32 %v23017_v32, %v11353_v56  ;;  %v23023_v55 = vld [vmem:[#allocation22_spill] sm:$0xff] }
0x1343   :  { %11982 = vst [vmem:[#allocation6 + $0x18] sm:$0xff] %v11904_v8  ;;  %v11898_v54 = vadd.f32 %v11897_v23, %v11721_v16  ;;  %v11739_v51 = vadd.f32 %v17479_v44, %v11510_v57  ;;  %v17541_v46 = vpop.f32.mrf.mxu1  ;;  %v10911_v23 = vadd.f32 %v22198_v63, %v22241_v36  ;;  %v11142_v61 = vadd.f32 %v22184_v60, %v10881_v0  ;;  %v23021_v8 = vld [vmem:[#allocation16_spill] sm:$0xff]  ;;  %v23022_v57 = vld [vmem:[#allocation34_spill] sm:$0xff] }
0x1344   :  { %v11732_v7 = vpop.f32.mrf.mxu0  ;;  %v11542_v29 = vadd.f32 %v22220_v25, %v11339_v49  ;;  %v11534_v1 = vadd.f32 %v22222_v38, %v11332_v14  ;;  %v11166_v16 = vadd.f32 %v23021_v8, %v10921_v20 }
0x1345   :  { %11981 = vst [vmem:[#allocation6 + $0x10] sm:$0xff] %v11898_v54  ;;  %v11916_v5 = vadd.f32 %v17535_v4, %v11739_v51  ;;  %v11733_v34 = vadd.f32 %v11732_v7, %v11502_v43  ;;  %v11933_v21 = vpop.f32.mrf.mxu1  ;;  %v10901_v4 = vadd.f32 %v22241_v36, %v22202_v13  ;;  %v11160_v35 = vadd.f32 %v22188_v50, %v10911_v23  ;;  %v23024_v7 = vld [vmem:[#allocation24_spill] sm:$0xff] }
0x1346   :  { %v17482_v12 = vpop.f32.mrf.mxu0  ;;  %v11374_v43 = vadd.f32 %v22271_v45, %v11166_v16 }
0x1347   :  { %11984 = vst [vmem:[#allocation6 + $0x28] sm:$0xff] %v11916_v5  ;;  %v11910_v59 = vadd.f32 %v11909_v15, %v11733_v34  ;;  %v11751_v42 = vadd.f32 %v17482_v12, %v11526_v62  ;;  %v17544_v48 = vpop.f32.mrf.mxu1  ;;  %v11346_v15 = vadd.f32 %v22247_v33, %v11142_v61  ;;  %v11154_v9 = vadd.f32 %v23015_v27, %v10901_v4  ;;  %v23025_v62 = vld [vmem:[#allocation26_spill] sm:$0xff] }
0x1348   :  { %v11744_v17 = vpop.f32.mrf.mxu0  ;;  %v11367_v41 = vadd.f32 %v23016_v19, %v11160_v35 }
0x1349   :  { %11983 = vst [vmem:[#allocation6 + $0x20] sm:$0xff] %v11910_v59  ;;  %v11928_v63 = vadd.f32 %v17538_v47, %v11751_v42  ;;  %v11745_v39 = vadd.f32 %v11744_v17, %v11518_v10  ;;  %v11945_v53 = vpop.f32.mrf.mxu1  ;;  %v23018_v47 = vld [vmem:[#allocation14_spill] sm:$0xff]  ;;  %v11360_v31 = vadd.f32 %v23019_v52, %v11154_v9  ;;  %v11550_v36 = vadd.f32 %v23020_v37, %v11346_v15  ;;  %v23026_v42 = vld [vmem:[#allocation28_spill] sm:$0xff] }
0x134a   :  { %v17485_v22 = vpop.f32.mrf.mxu0  ;;  %v11172_v33 = vadd.f32 %v23018_v47, %v10931_v3  ;;  %v11574_v54 = vadd.f32 %v23023_v55, %v11367_v41 }
0x134b   :  { %11986 = vst [vmem:[#allocation6 + $0x38] sm:$0xff] %v11928_v63  ;;  %v11922_v13 = vadd.f32 %v11921_v58, %v11745_v39  ;;  %v11763_v60 = vadd.f32 %v17485_v22, %v11542_v29  ;;  %v17547_v24 = vpop.f32.mrf.mxu1  ;;  %v11566_v49 = vadd.f32 %v23024_v7, %v11360_v31 }
0x134c   :  { %v11756_v25 = vpop.f32.mrf.mxu0  ;;  %v11381_v28 = vadd.f32 %v23022_v57, %v11172_v33 }
0x134d   :  { %11985 = vst [vmem:[#allocation6 + $0x30] sm:$0xff] %v11922_v13  ;;  %v11940_v18 = vadd.f32 %v17541_v46, %v11763_v60  ;;  %v11757_v50 = vadd.f32 %v11756_v25, %v11534_v1  ;;  %v11957_v51 = vpop.f32.mrf.mxu1 }
0x134e   :  { %v17488_v11 = vpop.f32.mrf.mxu0  ;;  %v11590_v23 = vadd.f32 %v23025_v62, %v11381_v28 }
0x134f   :  { %11988 = vst [vmem:[#allocation6 + $0x48] sm:$0xff] %v11940_v18  ;;  %v11934_v38 = vadd.f32 %v11933_v21, %v11757_v50  ;;  %v11775_v30 = vadd.f32 %v17488_v11, %v11558_v26  ;;  %v17550_v40 = vpop.f32.mrf.mxu1 }
0x1350   :  { %v11768_v58 = vpop.f32.mrf.mxu0 }
0x1351   :  { %11987 = vst [vmem:[#allocation6 + $0x40] sm:$0xff] %v11934_v38  ;;  %v11952_v6 = vadd.f32 %v17544_v48, %v11775_v30  ;;  %v11769_v44 = vadd.f32 %v11768_v58, %v11550_v36  ;;  %v11582_v48 = vadd.f32 %v23026_v42, %v11374_v43  ;;  %v11969_v61 = vpop.f32.mrf.mxu1 }
0x1352   :  { %v17491_v46 = vpop.f32.mrf.mxu0 }
0x1353   :  { %11990 = vst [vmem:[#allocation6 + $0x58] sm:$0xff] %v11952_v6  ;;  %v11946_v0 = vadd.f32 %v11945_v53, %v11769_v44  ;;  %v11787_v2 = vadd.f32 %v17491_v46, %v11574_v54 }
0x1354   :  { %v11780_v5 = vpop.f32.mrf.mxu0 }
0x1355   :  { %11989 = vst [vmem:[#allocation6 + $0x50] sm:$0xff] %v11946_v0  ;;  %v11964_v34 = vadd.f32 %v17547_v24, %v11787_v2  ;;  %v11781_v21 = vadd.f32 %v11780_v5, %v11566_v49 }
0x1356   :  { %v17494_v12 = vpop.f32.mrf.mxu0 }
0x1357   :  { %11992 = vst [vmem:[#allocation6 + $0x68] sm:$0xff] %v11964_v34  ;;  %v11958_v14 = vadd.f32 %v11957_v51, %v11781_v21  ;;  %v11799_v59 = vadd.f32 %v17494_v12, %v11590_v23 }
0x1358   :  { %v11792_v10 = vpop.f32.mrf.mxu0 }
0x1359   :  { %11991 = vst [vmem:[#allocation6 + $0x60] sm:$0xff] %v11958_v14  ;;  %v11976_v45 = vadd.f32 %v17550_v40, %v11799_v59  ;;  %v11793_v4 = vadd.f32 %v11792_v10, %v11582_v48 }
0x135b   :  { %11994 = vst [vmem:[#allocation6 + $0x78] sm:$0xff] %v11976_v45  ;;  %v11970_v17 = vadd.f32 %v11969_v61, %v11793_v4 }
0x135d   :  { %11993 = vst [vmem:[#allocation6 + $0x70] sm:$0xff] %v11970_v17 }
0x135e   :  { %17663 = shalt.err (!%p17660_p0)
}
0x135f   :  { %12007 = dma.vmem_to_hbm [thread:$0]  %s12002_s24, 2048, %s22342_s7, [#allocation5], %s17679_s30, %s17679_s30, %s17680_s9  }
0x1360   :  { %17674 = dma.done.wait [#allocation5], 2048  }
0x1361   :  { %17675 = vsyncadd [#allocation5], 4294965248 }
0x1362   :  { %17676 = dma.done.wait [#allocation8], 128  }
0x1363   :  { %17677 = vsyncadd [#allocation8], 4294967168 }
0x1364   :  { %12024 = vsyncpa [#allocation4], 1 }
0x1365   :  { %12025 = vsyncpa [#allocation5], 1 }
0x1366   :  { %12026 = vsyncpa [#allocation8], 1 }

</bundles_post_ra>
